<compile_context>
chip_gen: v7x
topology: tpu7x:2x2x1
jax: 0.10.0
libtpu: 0.0.40
codegen_flags: <defaults>
</compile_context>

<pallas_src>
import functools

import jax
import jax.numpy as jnp
from jax.experimental import pallas as pl
from jax.experimental.pallas import tpu as pltpu

_VMEM_LIMIT = 48 * 1024 * 1024


def _round_up(x, m):
    return (x + m - 1) // m * m


def _largest_divisor(n, cap):
    d = max(1, min(n, cap))
    while n % d:
        d -= 1
    return d


# ----------------------------------------------------------------------------
# Pallas kernel 1: fused matmul * scale + shift [+ ReLU]   (conv / deconv / fc)
# ----------------------------------------------------------------------------
def _matmul_bn_act_kernel(x_ref, w_ref, scale_ref, shift_ref, o_ref, acc_ref,
                          *, apply_relu):
    @pl.when(pl.program_id(2) == 0)
    def _():
        acc_ref[...] = jnp.zeros_like(acc_ref)

    acc_ref[...] += jnp.dot(x_ref[...], w_ref[...],
                            preferred_element_type=jnp.float32)

    @pl.when(pl.program_id(2) == pl.num_programs(2) - 1)
    def _():
        y = acc_ref[...] * scale_ref[...] + shift_ref[...]
        if apply_relu:
            y = jnp.maximum(y, 0.0)
        o_ref[...] = y.astype(o_ref.dtype)


def fused_matmul_bn_act(x, w, scale, shift, *, relu, out_dtype=jnp.bfloat16):
    """act((x @ w) * scale + shift).  x:[M,K]  w:[K,N]  scale,shift:[N]."""
    M, K = x.shape
    Kw, N = w.shape
    assert K == Kw

    # ---- N tiling (full block when it fits -> no padding / slicing) ----
    if N <= 512:
        Np, tn = N, N
    else:
        Np = _round_up(N, 128)
        tn = 128 * _largest_divisor(Np // 128, 8)          # <= 1024, divides Np

    # ---- K tiling (single full block up to 4608; exact divisor above) ----
    if K > 4608:
        Kp = _round_up(K, 128)
        tk = 128 * _largest_divisor(Kp // 128, 28)         # <= 3584, divides Kp
    elif K < 128:
        Kp, tk = 128, 128
    else:
        Kp, tk = K, K

    # ---- M tiling (bf16 LHS tile <= 8 MiB, f32 acc <= 4 MiB, cap 4096) ----
    tm_cap = max(8, min(4096,
                        (8 * 1024 * 1024) // (2 * tk),
                        (4 * 1024 * 1024) // (4 * tn)))
    if M < 8:
        Mp, tm = 8, 8
    elif M <= tm_cap:
        Mp, tm = M, M
    else:
        Mp = _round_up(M, 8)
        tm = 8 * _largest_divisor(Mp // 8, max(1, tm_cap // 8))

    xp = x.astype(jnp.bfloat16)
    wp = w.astype(jnp.bfloat16)
    if Mp != M or Kp != K:
        xp = jnp.pad(xp, ((0, Mp - M), (0, Kp - K)))
    if Kp != K or Np != N:
        wp = jnp.pad(wp, ((0, Kp - K), (0, Np - N)))
    sp = (scale if Np == N else jnp.pad(scale, (0, Np - N))).reshape(1, Np)
    bp = (shift if Np == N else jnp.pad(shift, (0, Np - N))).reshape(1, Np)
    sp = sp.astype(jnp.float32)
    bp = bp.astype(jnp.float32)

    out = pl.pallas_call(
        functools.partial(_matmul_bn_act_kernel, apply_relu=relu),
        out_shape=jax.ShapeDtypeStruct((Mp, Np), out_dtype),
        grid_spec=pltpu.PrefetchScalarGridSpec(
            num_scalar_prefetch=0,
            grid=(Mp // tm, Np // tn, Kp // tk),
            in_specs=[
                pl.BlockSpec((tm, tk), lambda i, j, k: (i, k)),
                pl.BlockSpec((tk, tn), lambda i, j, k: (k, j)),
                pl.BlockSpec((1, tn), lambda i, j, k: (0, j)),
                pl.BlockSpec((1, tn), lambda i, j, k: (0, j)),
            ],
            out_specs=pl.BlockSpec((tm, tn), lambda i, j, k: (i, j)),
            scratch_shapes=[pltpu.VMEM((tm, tn), jnp.float32)],
        ),
        compiler_params=pltpu.CompilerParams(
            dimension_semantics=("parallel", "parallel", "arbitrary"),
            vmem_limit_bytes=_VMEM_LIMIT),
    )(xp, wp, sp, bp)
    if Mp != M or Np != N:
        out = out[:M, :N]
    return out


# ----------------------------------------------------------------------------
# Glue: im2col (zero pad + shifted slices), NHWC, patch order = (kh, kw, cin)
# ----------------------------------------------------------------------------
def _im2col(x_nhwc, ksize, padding):
    N, H, W, C = x_nhwc.shape
    xp = jnp.pad(x_nhwc, ((0, 0), (padding, padding), (padding, padding), (0, 0)))
    Ho = H + 2 * padding - ksize + 1
    Wo = W + 2 * padding - ksize + 1
    cols = []
    for kh in range(ksize):
        for kw in range(ksize):
            cols.append(xp[:, kh:kh + Ho, kw:kw + Wo, :])
    patches = cols[0] if len(cols) == 1 else jnp.concatenate(cols, axis=-1)
    return patches.reshape(N * Ho * Wo, ksize * ksize * C), (N, Ho, Wo)


@functools.partial(jax.jit, static_argnames=("k", "pad", "relu", "out_dtype"))
def conv_bn_act(x, wmat, scale, shift, *, k, pad, relu, out_dtype=jnp.bfloat16):
    patches, (N, Ho, Wo) = _im2col(x, k, pad)
    y = fused_matmul_bn_act(patches, wmat, scale, shift,
                            relu=relu, out_dtype=out_dtype)
    return y.reshape(N, Ho, Wo, wmat.shape[1])


@functools.partial(jax.jit, static_argnames=("relu",))
def dense_bn_act(x2d, wmat, scale, shift, *, relu):
    return fused_matmul_bn_act(x2d, wmat, scale, shift,
                               relu=relu, out_dtype=jnp.bfloat16)


# ----------------------------------------------------------------------------
# Pallas kernel 2: 2x2/stride-2 max pooling with PyTorch-style flat indices.
# Row-blocked; the four window positions are pre-split (XLA glue).
# ----------------------------------------------------------------------------
def _maxpool_kernel(x00_ref, x01_ref, x10_ref, x11_ref, out_ref, idx_ref, *, w_in):
    i = pl.program_id(1)
    th, wo, c = out_ref.shape[1], out_ref.shape[2], out_ref.shape[3]
    row = jax.lax.broadcasted_iota(jnp.int32, (th, wo, c), 0) + i * th
    col = jax.lax.broadcasted_iota(jnp.int32, (th, wo, c), 1)
    r0 = (2 * row) * w_in + 2 * col
    r1 = (2 * row + 1) * w_in + 2 * col
    cands = (
        (x00_ref[0], r0),
        (x01_ref[0], r0 + 1),
        (x10_ref[0], r1),
        (x11_ref[0], r1 + 1),
    )
    best, best_idx = cands[0]
    for val, vidx in cands[1:]:
        take = val > best                      # first max wins ties
        best = jnp.where(take, val, best)
        best_idx = jnp.where(take, vidx, best_idx)
    out_ref[0] = best
    idx_ref[0] = best_idx


def _pool_row_tile(h, cap=64):
    t = min(h, cap)
    while h % t:
        t -= 1
    return t


@jax.jit
def maxpool2x2(x):
    N, H, W, C = x.shape
    Ho, Wo = H // 2, W // 2
    x00 = x[:, 0::2, 0::2, :]
    x01 = x[:, 0::2, 1::2, :]
    x10 = x[:, 1::2, 0::2, :]
    x11 = x[:, 1::2, 1::2, :]
    th = _pool_row_tile(Ho)
    spec = pl.BlockSpec((1, th, Wo, C), lambda n, i: (n, i, 0, 0))
    out, idx = pl.pallas_call(
        functools.partial(_maxpool_kernel, w_in=W),
        out_shape=(jax.ShapeDtypeStruct((N, Ho, Wo, C), x.dtype),
                   jax.ShapeDtypeStruct((N, Ho, Wo, C), jnp.int32)),
        grid=(N, Ho // th),
        in_specs=[spec, spec, spec, spec],
        out_specs=(spec, spec),
        compiler_params=pltpu.CompilerParams(
            dimension_semantics=("parallel", "parallel"),
            vmem_limit_bytes=_VMEM_LIMIT),
    )(x00, x01, x10, x11)
    return out, idx


# ----------------------------------------------------------------------------
# Pallas kernel 3: 2x2/stride-2 max unpooling.  Row-blocked masked scatter;
# the kernel emits the four (dh, dw) planes, interleaving is XLA glue.
# ----------------------------------------------------------------------------
def _maxunpool_kernel(x_ref, idx_ref, y00, y01, y10, y11, *, w_out):
    i = pl.program_id(1)
    th, wi, c = x_ref.shape[1], x_ref.shape[2], x_ref.shape[3]
    row = jax.lax.broadcasted_iota(jnp.int32, (th, wi, c), 0) + i * th
    col = jax.lax.broadcasted_iota(jnp.int32, (th, wi, c), 1)
    x = x_ref[0]
    idx = idx_ref[0]
    r0 = (2 * row) * w_out + 2 * col
    r1 = (2 * row + 1) * w_out + 2 * col
    zero = jnp.zeros_like(x)
    y00[0] = jnp.where(idx == r0, x, zero)
    y01[0] = jnp.where(idx == r0 + 1, x, zero)
    y10[0] = jnp.where(idx == r1, x, zero)
    y11[0] = jnp.where(idx == r1 + 1, x, zero)


@jax.jit
def maxunpool2x2(x, idx):
    N, H, W, C = x.shape
    th = _pool_row_tile(H)
    spec = pl.BlockSpec((1, th, W, C), lambda n, i: (n, i, 0, 0))
    shp = jax.ShapeDtypeStruct((N, H, W, C), x.dtype)
    y00, y01, y10, y11 = pl.pallas_call(
        functools.partial(_maxunpool_kernel, w_out=2 * W),
        out_shape=(shp, shp, shp, shp),
        grid=(N, H // th),
        in_specs=[spec, spec],
        out_specs=(spec, spec, spec, spec),
        compiler_params=pltpu.CompilerParams(
            dimension_semantics=("parallel", "parallel"),
            vmem_limit_bytes=_VMEM_LIMIT),
    )(x, idx)
    top = jnp.stack([y00, y01], axis=3)      # (N, H, W, 2, C)
    bot = jnp.stack([y10, y11], axis=3)      # (N, H, W, 2, C)
    full = jnp.stack([top, bot], axis=2)     # (N, H, 2, W, 2, C)
    return full.reshape(N, 2 * H, 2 * W, C)


# ----------------------------------------------------------------------------
# Deterministic parameter construction (shapes follow DeconvNet.__init__).
# BN (eval) + conv bias are folded into per-channel scale/shift; weights bf16.
# ----------------------------------------------------------------------------
def _bn_fold(key, cout, bias):
    kg, kb, km, kv = jax.random.split(key, 4)
    gamma = 1.0 + 0.1 * jax.random.normal(kg, (cout,), jnp.float32)
    beta = 0.05 * jax.random.normal(kb, (cout,), jnp.float32)
    mean = 0.05 * jax.random.normal(km, (cout,), jnp.float32)
    var = 0.9 + 0.2 * jax.random.uniform(kv, (cout,), jnp.float32)
    s = gamma * jax.lax.rsqrt(var + 1e-5)
    return s, (bias - mean) * s + beta


def init_cbr(key, cin, cout, k=3):
    kw, kb, kbn = jax.random.split(key, 3)
    fan = cin * k * k
    w = jax.random.normal(kw, (cout, cin, k, k), jnp.float32) * (2.0 / fan) ** 0.5
    b = 0.05 * jax.random.normal(kb, (cout,), jnp.float32)
    scale, shift = _bn_fold(kbn, cout, b)
    wmat = jnp.transpose(w, (2, 3, 1, 0)).reshape(k * k * cin, cout)
    return {'wmat': wmat.astype(jnp.bfloat16), 'scale': scale, 'shift': shift}


def init_dcb(key, cin, cout, k=3):
    # ConvTranspose2d weight is (cin, cout, k, k); stride-1 transpose conv ==
    # regular conv with flipped kernel, swapped channels, padding k-1-pad.
    kw, kb, kbn = jax.random.split(key, 3)
    fan = cin * k * k
    w_ct = jax.random.normal(kw, (cin, cout, k, k), jnp.float32) * (2.0 / fan) ** 0.5
    b = 0.05 * jax.random.normal(kb, (cout,), jnp.float32)
    scale, shift = _bn_fold(kbn, cout, b)
    wmat = jnp.transpose(jnp.flip(w_ct, (2, 3)), (2, 3, 0, 1)).reshape(k * k * cin, cout)
    return {'wmat': wmat.astype(jnp.bfloat16), 'scale': scale, 'shift': shift}


def init_fc6_deconv(key, cin=4096, cout=512, k=7):
    # ConvTranspose2d(4096, 512, 7, 1, 0) applied to a 1x1 map:
    # out[kh, kw, co] = sum_ci x[ci] * w_ct[ci, co, kh, kw]  ==  x @ W2
    kw, kb, kbn = jax.random.split(key, 3)
    fan = cin * k * k
    w_ct = jax.random.normal(kw, (cin, cout, k, k), jnp.float32) * (2.0 / fan) ** 0.5
    b = 0.05 * jax.random.normal(kb, (cout,), jnp.float32)
    scale, shift = _bn_fold(kbn, cout, b)
    wmat = jnp.transpose(w_ct, (0, 2, 3, 1)).reshape(cin, k * k * cout)
    return {'wmat': wmat.astype(jnp.bfloat16),
            'scale': jnp.tile(scale, k * k),
            'shift': jnp.tile(shift, k * k)}


def init_plain_conv(key, cin, cout, k=1):
    kw, kb = jax.random.split(key)
    fan = cin * k * k
    w = jax.random.normal(kw, (cout, cin, k, k), jnp.float32) * (1.0 / fan) ** 0.5
    b = 0.05 * jax.random.normal(kb, (cout,), jnp.float32)
    wmat = jnp.transpose(w, (2, 3, 1, 0)).reshape(k * k * cin, cout)
    return {'wmat': wmat.astype(jnp.bfloat16),
            'scale': jnp.ones((cout,), jnp.float32), 'shift': b}


def make_params(key, num_classes=21):
    cbr_defs = [
        ('conv1_1', 3, 64, 3), ('conv1_2', 64, 64, 3),
        ('conv2_1', 64, 128, 3), ('conv2_2', 128, 128, 3),
        ('conv3_1', 128, 256, 3), ('conv3_2', 256, 256, 3), ('conv3_3', 256, 256, 3),
        ('conv4_1', 256, 512, 3), ('conv4_2', 512, 512, 3), ('conv4_3', 512, 512, 3),
        ('conv5_1', 512, 512, 3), ('conv5_2', 512, 512, 3), ('conv5_3', 512, 512, 3),
        ('fc6', 512, 4096, 7), ('fc7', 4096, 4096, 1),
    ]
    dcb_defs = [
        ('deconv5_1', 512, 512, 3), ('deconv5_2', 512, 512, 3), ('deconv5_3', 512, 512, 3),
        ('deconv4_1', 512, 512, 3), ('deconv4_2', 512, 512, 3), ('deconv4_3', 512, 256, 3),
        ('deconv3_1', 256, 256, 3), ('deconv3_2', 256, 256, 3), ('deconv3_3', 256, 128, 3),
        ('deconv2_1', 128, 128, 3), ('deconv2_2', 128, 64, 3),
        ('deconv1_1', 64, 64, 3), ('deconv1_2', 64, 64, 3),
    ]
    keys = jax.random.split(key, len(cbr_defs) + len(dcb_defs) + 2)
    P = {}
    ki = 0
    for (name, cin, cout, k) in cbr_defs:
        P[name] = init_cbr(keys[ki], cin, cout, k); ki += 1
    for (name, cin, cout, k) in dcb_defs:
        P[name] = init_dcb(keys[ki], cin, cout, k); ki += 1
    P['fc6_deconv'] = init_fc6_deconv(keys[ki]); ki += 1
    P['score_fr'] = init_plain_conv(keys[ki], 64, num_classes, 1)
    return P


# ----------------------------------------------------------------------------
# Forward pass (matches DeconvNet.forward, inference mode)
# ----------------------------------------------------------------------------
def deconvnet_forward(x_nchw, P):
    h = jnp.transpose(x_nchw, (0, 2, 3, 1)).astype(jnp.bfloat16)   # NCHW -> NHWC

    def c3(t, name):                         # 3x3 conv / stride-1 deconv + BN + ReLU
        p = P[name]
        return conv_bn_act(t, p['wmat'], p['scale'], p['shift'],
                           k=3, pad=1, relu=True)

    h = c3(h, 'conv1_1'); h = c3(h, 'conv1_2'); h, idx1 = maxpool2x2(h)
    h = c3(h, 'conv2_1'); h = c3(h, 'conv2_2'); h, idx2 = maxpool2x2(h)
    h = c3(h, 'conv3_1'); h = c3(h, 'conv3_2'); h = c3(h, 'conv3_3'); h, idx3 = maxpool2x2(h)
    h = c3(h, 'conv4_1'); h = c3(h, 'conv4_2'); h = c3(h, 'conv4_3'); h, idx4 = maxpool2x2(h)
    h = c3(h, 'conv5_1'); h = c3(h, 'conv5_2'); h = c3(h, 'conv5_3'); h, idx5 = maxpool2x2(h)

    # fc6: 7x7 VALID conv on the 7x7x512 map == a single fused GEMV.
    n, hh, ww, cc = h.shape
    assert (hh, ww) == (7, 7)
    p = P['fc6']
    h = dense_bn_act(h.reshape(n, hh * ww * cc), p['wmat'], p['scale'], p['shift'],
                     relu=True)
    # drop6: Dropout2d is identity at inference time.
    p = P['fc7']
    h = dense_bn_act(h, p['wmat'], p['scale'], p['shift'], relu=True)
    # drop7: Dropout2d is identity at inference time.
    p = P['fc6_deconv']   # ConvTranspose2d(4096,512,7,1,0) on the 1x1 map == GEMV
    h = dense_bn_act(h, p['wmat'], p['scale'], p['shift'], relu=True)
    h = h.reshape(n, 7, 7, 512)

    h = maxunpool2x2(h, idx5)
    h = c3(h, 'deconv5_1'); h = c3(h, 'deconv5_2'); h = c3(h, 'deconv5_3')
    h = maxunpool2x2(h, idx4)
    h = c3(h, 'deconv4_1'); h = c3(h, 'deconv4_2'); h = c3(h, 'deconv4_3')
    h = maxunpool2x2(h, idx3)
    h = c3(h, 'deconv3_1'); h = c3(h, 'deconv3_2'); h = c3(h, 'deconv3_3')
    h = maxunpool2x2(h, idx2)
    h = c3(h, 'deconv2_1'); h = c3(h, 'deconv2_2')
    h = maxunpool2x2(h, idx1)
    h = c3(h, 'deconv1_1'); h = c3(h, 'deconv1_2')

    p = P['score_fr']
    h = conv_bn_act(h, p['wmat'], p['scale'], p['shift'],
                    k=1, pad=0, relu=False, out_dtype=jnp.float32)
    return jnp.transpose(h, (0, 3, 1, 2))                           # NHWC -> NCHW


if __name__ == "__main__":
    key = jax.random.PRNGKey(0)
    kp, kx = jax.random.split(key)
    num_classes = 21
    params = make_params(kp, num_classes=num_classes)

    # 224x224 is the smallest spatial size the architecture admits:
    # fc6 is a 7x7 VALID conv applied after five 2x2/stride-2 pools.
    x = jax.random.normal(kx, (1, 3, 224, 224), jnp.float32)

    out = deconvnet_forward(x, params)
    out = jax.block_until_ready(out)

    assert out.shape == (1, num_classes, 224, 224), out.shape
    assert out.dtype == jnp.float32
    assert bool(jnp.all(jnp.isfinite(out)))
    print("KERNEL_OK")
</pallas_src>

<mosaic_0001>
module attributes {stable_mosaic.version = 11 : i64} {
  func.func @_matmul_bn_act_kernel(%arg0: i32, %arg1: i32, %arg2: i32, %arg3: memref<3584x128xbf16, #tpu.memory_space<vmem>>, %arg4: memref<128x64xbf16, #tpu.memory_space<vmem>>, %arg5: memref<1x64xf32, #tpu.memory_space<vmem>>, %arg6: memref<1x64xf32, #tpu.memory_space<vmem>>, %arg7: memref<3584x64xbf16, #tpu.memory_space<vmem>>, %arg8: memref<3584x64xf32, #tpu.memory_space<vmem>>) attributes {dimension_semantics = [#tpu.dimension_semantics<parallel>, #tpu.dimension_semantics<parallel>, #tpu.dimension_semantics<arbitrary>], iteration_bounds = array<i64: 14, 1, 1>, scalar_prefetch = 0 : i64, scratch_operands = 1 : i64, tpu.core_type = #tpu.core_type<tc>, window_params = [{transform_indices = @transform_0, window_bounds = array<i64: 3584, 128>}, {transform_indices = @transform_1, window_bounds = array<i64: 128, 64>}, {transform_indices = @transform_2, window_bounds = array<i64: 1, 64>}, {transform_indices = @transform_3, window_bounds = array<i64: 1, 64>}, {transform_indices = @transform_4, window_bounds = array<i64: 3584, 64>}]} {
    %c0_i32 = arith.constant 0 : i32
    %0 = arith.cmpi eq, %arg2, %c0_i32 : i32
    %1 = arith.extui %0 : i1 to i32
    %c0_i32_0 = arith.constant 0 : i32
    %2 = arith.cmpi ne, %1, %c0_i32_0 : i32
    scf.if %2 {
      %cst_10 = arith.constant 0.000000e+00 : f32
      %12 = vector.broadcast %cst_10 : f32 to vector<3584x64xf32>
      %c0_11 = arith.constant 0 : index
      %c0_12 = arith.constant 0 : index
      %13 = vector.load %arg8[%c0_11, %c0_12] : memref<3584x64xf32, #tpu.memory_space<vmem>>, vector<3584x64xf32>
      tpu.vector_store %arg8[%c0_11, %c0_12], %12 {strides = array<i32>} : memref<3584x64xf32, #tpu.memory_space<vmem>>, vector<3584x64xf32>,
    } else {
    }
    %c0 = arith.constant 0 : index
    %c0_1 = arith.constant 0 : index
    %3 = vector.load %arg8[%c0, %c0_1] : memref<3584x64xf32, #tpu.memory_space<vmem>>, vector<3584x64xf32>
    %c0_2 = arith.constant 0 : index
    %c0_3 = arith.constant 0 : index
    %4 = vector.load %arg3[%c0_2, %c0_3] : memref<3584x128xbf16, #tpu.memory_space<vmem>>, vector<3584x128xbf16>
    %c0_4 = arith.constant 0 : index
    %c0_5 = arith.constant 0 : index
    %5 = vector.load %arg4[%c0_4, %c0_5] : memref<128x64xbf16, #tpu.memory_space<vmem>>, vector<128x64xbf16>
    %cst = arith.constant dense<0.000000e+00> : vector<3584x64xf32>
    %6 = tpu.matmul %4, %5, %cst {dimension_numbers = #tpu.dot_dimension_numbers<[1], [0], [0], [1], [0, 0, 1, 1], [], []>} : vector<3584x128xbf16>, vector<128x64xbf16>, vector<3584x64xf32> -> vector<3584x64xf32>
    %7 = arith.addf %3, %6 : vector<3584x64xf32>
    %c0_6 = arith.constant 0 : index
    %c0_7 = arith.constant 0 : index
    %8 = vector.load %arg8[%c0_6, %c0_7] : memref<3584x64xf32, #tpu.memory_space<vmem>>, vector<3584x64xf32>
    tpu.vector_store %arg8[%c0_6, %c0_7], %7 {strides = array<i32>} : memref<3584x64xf32, #tpu.memory_space<vmem>>, vector<3584x64xf32>,
    %c0_i32_8 = arith.constant 0 : i32
    %9 = arith.cmpi eq, %arg2, %c0_i32_8 : i32
    %10 = arith.extui %9 : i1 to i32
    %c0_i32_9 = arith.constant 0 : i32
    %11 = arith.cmpi ne, %10, %c0_i32_9 : i32
    scf.if %11 {
      %c0_10 = arith.constant 0 : index
      %c0_11 = arith.constant 0 : index
      %12 = vector.load %arg8[%c0_10, %c0_11] : memref<3584x64xf32, #tpu.memory_space<vmem>>, vector<3584x64xf32>
      %c0_12 = arith.constant 0 : index
      %c0_13 = arith.constant 0 : index
      %13 = vector.load %arg5[%c0_12, %c0_13] : memref<1x64xf32, #tpu.memory_space<vmem>>, vector<1x64xf32>
      %14 = vector.broadcast %13 : vector<1x64xf32> to vector<3584x64xf32>
      %15 = arith.mulf %12, %14 : vector<3584x64xf32>
      %c0_14 = arith.constant 0 : index
      %c0_15 = arith.constant 0 : index
      %16 = vector.load %arg6[%c0_14, %c0_15] : memref<1x64xf32, #tpu.memory_space<vmem>>, vector<1x64xf32>
      %17 = vector.broadcast %16 : vector<1x64xf32> to vector<3584x64xf32>
      %18 = arith.addf %15, %17 : vector<3584x64xf32>
      %cst_16 = arith.constant 0.000000e+00 : f32
      %19 = vector.broadcast %cst_16 : f32 to vector<3584x64xf32>
      %20 = arith.maximumf %18, %19 : vector<3584x64xf32>
      %21 = arith.truncf %20 : vector<3584x64xf32> to vector<3584x64xbf16>
      %c0_17 = arith.constant 0 : index
      %c0_18 = arith.constant 0 : index
      %22 = vector.load %arg7[%c0_17, %c0_18] : memref<3584x64xbf16, #tpu.memory_space<vmem>>, vector<3584x64xbf16>
      tpu.vector_store %arg7[%c0_17, %c0_18], %21 {strides = array<i32>} : memref<3584x64xbf16, #tpu.memory_space<vmem>>, vector<3584x64xbf16>,
    } else {
    }
    return
  }
  func.func @transform_0(%arg0: i32, %arg1: i32, %arg2: i32) -> (i32, i32) {
    %c0_i32 = arith.constant 0 : i32
    return %arg0, %arg2 : i32, i32
  }
  func.func @transform_1(%arg0: i32, %arg1: i32, %arg2: i32) -> (i32, i32) {
    %c0_i32 = arith.constant 0 : i32
    return %arg2, %arg1 : i32, i32
  }
  func.func @transform_2(%arg0: i32, %arg1: i32, %arg2: i32) -> (i32, i32) {
    %c0_i32 = arith.constant 0 : i32
    %c0_i32_0 = arith.constant 0 : i32
    return %c0_i32, %arg1 : i32, i32
  }
  func.func @transform_3(%arg0: i32, %arg1: i32, %arg2: i32) -> (i32, i32) {
    %c0_i32 = arith.constant 0 : i32
    %c0_i32_0 = arith.constant 0 : i32
    return %c0_i32, %arg1 : i32, i32
  }
  func.func @transform_4(%arg0: i32, %arg1: i32, %arg2: i32) -> (i32, i32) {
    %c0_i32 = arith.constant 0 : i32
    return %arg0, %arg1 : i32, i32
  }
}

</mosaic_0001>

<bundles_post_ra>
// kernel: conv_bn_act.1
= control target key start
LH: loop header
LB: loop body
LE: loop exit
PB: predicated region body
PF: predicated region fallthrough
CT: control target
= control target key end

     0   :  { %9 = vsyncpa [#allocation4], 0  ;;  %s17064_s0 = inlined_call_operand.vmem [shape: bf16[50176,128], index: 0, kind: input, shape index: {}]   ;;  %s17065_s1 = inlined_call_operand.vmem [shape: bf16[128,64], index: 1, kind: input, shape index: {}]   ;;  %s17066_s2 = inlined_call_operand.vmem [shape: f32[1,64], index: 2, kind: input, shape index: {}]   ;;  %s17067_s3 = inlined_call_operand.vmem [shape: f32[1,64], index: 3, kind: input, shape index: {}]   ;;  %s17068_s4 = inlined_call_operand.hbm [shape: bf16[50176,64], index: 4, kind: output, shape index: {}]  }
   0x1   :  { %11 = vsyncpa [#allocation4 + $0x1], 0  ;;  %s12228_s15 = smov 0   ;;  %s12230_s16 = smov 0  }
   0x2   :  { %s12232_s17 = smov 0   ;;  %s12234_s18 = smov 0  }
   0x3   :  { %s12236_s19 = smov 0   ;;  %s12238_s20 = smov 0  }
   0x4 LB: > { %s9957_s21 = sadd.s32 4294967295, %s12197_s20   ;;  %s9958_s22 = sadd.s32 4294967294, %s12197_s20   ;;  %s12197_s20 = sphi %s12238_s20, %s17_s20   ;;  %s12193_s19 = sphi %s12236_s19, %s17471_s19   ;;  %s12189_s18 = sphi %s12234_s18, %s17470_s18   ;;  %s12185_s17 = sphi %s12232_s17, %s17469_s17   ;;  %s12181_s16 = sphi %s12230_s16, %s17468_s16   ;;  %s12177_s15 = sphi %s12228_s15, %s17467_s15  }
   0x5   : > { %s36_s23 = sadd.s32 1, %s12193_s19  ;;  %s153_s24 = sadd.s32 1, %s12185_s17 }
   0x6   : > { %p38_p0 = scmp.ge.s32.totalorder %s36_s23, 14  ;;  %p163_p1 = scmp.ne.s32.totalorder %s12185_s17, %s12181_s16 }
   0x7   : > { %p164_p2 = scmp.eq.s32.totalorder %s9957_s21, 13  ;;  %p169_p3 = scmp.ne.s32.totalorder %s12181_s16, %s12177_s15 }
   0x8   : > { %s17473_s23 = smov (%p38_p0, %s36_s23), 0  ;;  %p170_p5 = scmp.eq.s32.totalorder %s9958_s22, 13 }
   0x9   : > { %p12268_p4 = por %p164_p2, %p163_p1  ;;  %s148_s26 = ssub.s32 %s12193_s19, %s17473_s23 }
   0xa   : > { %p9964_p6 = scmp.ge.s32.totalorder %s12197_s20, 1  ;;  %p151_p7 = scmp.eq.s32.totalorder %s148_s26, 0 }
   0xb   : > { %p12275_p8 = por %p170_p5, %p169_p3  ;;  %p224_p9 = scmp.lt.s32.totalorder %s12197_s20, 15 }
   0xc   : > { %s12281_s28 = scalar_select %p151_p7, %s12185_s17, %s153_s24  }
   0xd   : > { %p225_p10 = pnand %p9964_p6, %p224_p9 }
   0xf   : > { %228 = sbr.rel (%p225_p10) target bundleno = 1009 (0x3f1), region = 36 }
  0x16   : > { %v11871_v0 = vld [vmem:[%s17065_s1] sm:$0xff]   ;;  %s267_s5 = smul.u32 448, %s12189_s18  ;;  %v11872_v1 = vld [vmem:[%s17065_s1 + $0x8] sm:$0xff]   ;;  %v11873_v2 = vld [vmem:[%s17065_s1 + $0x10] sm:$0xff]   ;;  %vm297_vm0 = vcmask 523264   ;;  %v12199_v54 = vmov 0.0  }
  0x17   : > { %11332 = vmatprep.subr.bf16.mxu0 %v11871_v0  ;;  %11796 = vmatprep.subr.bf16.mxu1 %v11871_v0  ;;  %v11874_v3 = vld [vmem:[%s17065_s1 + $0x18] sm:$0xff]   ;;  %v11875_v6 = vld [vmem:[%s17065_s1 + $0x20] sm:$0xff]   ;;  %v11876_v7 = vld [vmem:[%s17065_s1 + $0x28] sm:$0xff]   ;;  %300 = vst.msk [vmem:[#allocation2 + $0x10] sm:$0xff] %vm297_vm0, %v12199_v54  ;;  %s264_s12 = sand.u32 1, %s12181_s16   ;;  %vm9373_vm1 = vcmask 519168  }
  0x18   : > { %p268_p11 = scmp.lt.s32.totalorder %s267_s5, 6271  ;;  %11333 = vmatpush3.bf16.msra.mxu0 %v11871_v0  ;;  %11804 = vmatpush3.bf16.msra.mxu1 %v11871_v0  ;;  %v11877_v8 = vld [vmem:[%s17065_s1 + $0x30] sm:$0xff]   ;;  %v11878_v9 = vld [vmem:[%s17065_s1 + $0x38] sm:$0xff]   ;;  %298 = vst.msk [vmem:[#allocation2] sm:$0xff] %vm297_vm0, %v12199_v54  ;;  %299 = vst.msk [vmem:[#allocation2 + $0x8] sm:$0xff] %vm297_vm0, %v12199_v54  ;;  %s13364_s13 = smul.u32 1792, %s264_s12 }
  0x19   : > { %11334 = vmatprep.subr.bf16.mxu0 %v11872_v1  ;;  %11797 = vmatprep.subr.bf16.mxu1 %v11872_v1  ;;  %301 = vst.msk [vmem:[#allocation2 + $0x18] sm:$0xff] %vm297_vm0, %v12199_v54  ;;  %302 = vst.msk [vmem:[#allocation2 + $0x20] sm:$0xff] %vm297_vm0, %v12199_v54  ;;  %s11099_s30 = smul.u32 28672, %s12189_s18  ;;  %s17018_s8 = scalar_lea.sflag [#allocation4], %s264_s12 }
  0x1a   : > { %s17475_s5 = smov (!%p268_p11, %s267_s5), 6271  ;;  %303 = vst.msk [vmem:[#allocation2 + $0x28] sm:$0xff] %vm297_vm0, %v12199_v54  ;;  %304 = vst.msk [vmem:[#allocation2 + $0x30] sm:$0xff] %vm297_vm0, %v12199_v54  ;;  %s13402_s14 = scalar_lea.vmem [#allocation3], %s13364_s13 }
  0x1b   : > { %s9965_s10 = sshll.u32 %s17475_s5, 2  ;;  %305 = vst.msk [vmem:[#allocation2 + $0x38] sm:$0xff] %vm297_vm0, %v12199_v54  ;;  %306 = vst.msk [vmem:[#allocation2 + $0x40] sm:$0xff] %vm297_vm0, %v12199_v54  ;;  %s9837_s5 = sshll.u32 %s13402_s14, 4  ;;  %s17002_s5 = int_to_ptr.vmem [resolvable:$true] %s9837_s5 }
  0x1c   : > { %11335 = vmatpush3.bf16.msra.mxu0 %v11872_v1  ;;  %11805 = vmatpush3.bf16.msra.mxu1 %v11872_v1  ;;  %s12299_s21 = scalar_lea.vmem %s17064_s0, %s9965_s10  ;;  %307 = vst.msk [vmem:[#allocation2 + $0x48] sm:$0xff] %vm297_vm0, %v12199_v54  ;;  %308 = vst.msk [vmem:[#allocation2 + $0x50] sm:$0xff] %vm297_vm0, %v12199_v54  ;;  %s17000_s7 = scalar_lea.hbm %s17068_s4, %s11099_s30 }
  0x1d   : > { %11336 = vmatprep.subr.bf16.mxu0 %v11873_v2  ;;  %11798 = vmatprep.subr.bf16.mxu1 %v11873_v2  ;;  %v11879_v4 = vld [vmem:[%s12299_s21] sm:$0xff]   ;;  %v11881_v10 = vld [vmem:[%s12299_s21 + $0x8] sm:$0xff]   ;;  %v11883_v12 = vld [vmem:[%s12299_s21 + $0x10] sm:$0xff]   ;;  %309 = vst.msk [vmem:[#allocation2 + $0x58] sm:$0xff] %vm297_vm0, %v12199_v54  ;;  %s12119_s9 = scalar_lea.vmem %s17002_s5, 28672  ;;  %s12200_s10 = smov [#allocation3]  }
  0x1e   : > { %v11880_v5 = vld [vmem:[%s12299_s21 + $0x380] sm:$0xff]   ;;  %11348 = vmatprep.mubr.bf16.mxu0 %v11879_v4  ;;  %v11882_v11 = vld [vmem:[%s12299_s21 + $0x388] sm:$0xff]   ;;  %v11884_v13 = vld [vmem:[%s12299_s21 + $0x390] sm:$0xff]   ;;  %310 = vst.msk [vmem:[#allocation2 + $0x60] sm:$0xff] %vm297_vm0, %v12199_v54  ;;  %p12120_p12 = scmp.ne.s32.totalorder %s17002_s5, %s12119_s9  ;;  %s12123_s11 = sshll.u32 %s12200_s10, 4  ;;  %s12124_s11 = int_to_ptr.vmem [resolvable:$false] %s12123_s11 }
  0x1f   : > { %11572 = vmatprep.mubr.bf16.mxu1 %v11880_v5  ;;  %v11885_v14 = vld [vmem:[%s12299_s21 + $0x18] sm:$0xff]   ;;  %v11887_v16 = vld [vmem:[%s12299_s21 + $0x20] sm:$0xff]   ;;  %v11889_v18 = vld [vmem:[%s12299_s21 + $0x28] sm:$0xff]   ;;  %311 = vst.msk [vmem:[#allocation2 + $0x68] sm:$0xff] %vm297_vm0, %v12199_v54  ;;  %p12126_p1 = scmp.lt.s32.totalorder %s17002_s5, %s12124_s11 }
  0x20   : > { %11337 = vmatpush3.bf16.msra.mxu0 %v11873_v2  ;;  %11806 = vmatpush3.bf16.msra.mxu1 %v11873_v2  ;;  %v11886_v15 = vld [vmem:[%s12299_s21 + $0x398] sm:$0xff]   ;;  %v11888_v17 = vld [vmem:[%s12299_s21 + $0x3a0] sm:$0xff]   ;;  %v11890_v19 = vld [vmem:[%s12299_s21 + $0x3a8] sm:$0xff]   ;;  %312 = vst.msk [vmem:[#allocation2 + $0x70] sm:$0xff] %vm297_vm0, %v12199_v54  ;;  %p12121_p13 = pnand %p12120_p12, %p12268_p4 }
  0x21   : > { %11338 = vmatprep.subr.bf16.mxu0 %v11874_v3  ;;  %11799 = vmatprep.subr.bf16.mxu1 %v11874_v3  ;;  %v11891_v20 = vld [vmem:[%s12299_s21 + $0x30] sm:$0xff]   ;;  %v11893_v22 = vld [vmem:[%s12299_s21 + $0x38] sm:$0xff]   ;;  %v11895_v24 = vld [vmem:[%s12299_s21 + $0x40] sm:$0xff]   ;;  %313 = vst.msk [vmem:[#allocation2 + $0x78] sm:$0xff] %vm297_vm0, %v12199_v54 }
  0x22   : > { %v11892_v21 = vld [vmem:[%s12299_s21 + $0x3b0] sm:$0xff]   ;;  %v11894_v23 = vld [vmem:[%s12299_s21 + $0x3b8] sm:$0xff]   ;;  %v11896_v25 = vld [vmem:[%s12299_s21 + $0x3c0] sm:$0xff]   ;;  %314 = vst.msk [vmem:[#allocation2 + $0x80] sm:$0xff] %vm297_vm0, %v12199_v54  ;;  %p12122_p0 = pneg %p12121_p13 }
  0x23   : > { %v11897_v26 = vld [vmem:[%s12299_s21 + $0x48] sm:$0xff]   ;;  %v11899_v28 = vld [vmem:[%s12299_s21 + $0x50] sm:$0xff]   ;;  %v11901_v30 = vld [vmem:[%s12299_s21 + $0x58] sm:$0xff]   ;;  %315 = vst.msk [vmem:[#allocation2 + $0x88] sm:$0xff] %vm297_vm0, %v12199_v54 }
  0x24   : > { %11339 = vmatpush3.bf16.msra.mxu0 %v11874_v3  ;;  %11807 = vmatpush3.bf16.msra.mxu1 %v11874_v3  ;;  %v11898_v27 = vld [vmem:[%s12299_s21 + $0x3c8] sm:$0xff]   ;;  %v11900_v29 = vld [vmem:[%s12299_s21 + $0x3d0] sm:$0xff]   ;;  %v11902_v31 = vld [vmem:[%s12299_s21 + $0x3d8] sm:$0xff]   ;;  %316 = vst.msk [vmem:[#allocation2 + $0x90] sm:$0xff] %vm297_vm0, %v12199_v54 }
  0x25   : > { %11340 = vmatprep.subr.bf16.mxu0 %v11875_v6  ;;  %11800 = vmatprep.subr.bf16.mxu1 %v11875_v6  ;;  %v11903_v32 = vld [vmem:[%s12299_s21 + $0x60] sm:$0xff]   ;;  %v11905_v34 = vld [vmem:[%s12299_s21 + $0x68] sm:$0xff]   ;;  %v11907_v36 = vld [vmem:[%s12299_s21 + $0x70] sm:$0xff]   ;;  %317 = vst.msk [vmem:[#allocation2 + $0x98] sm:$0xff] %vm297_vm0, %v12199_v54 }
  0x26   : > { %v11904_v33 = vld [vmem:[%s12299_s21 + $0x3e0] sm:$0xff]   ;;  %v11906_v35 = vld [vmem:[%s12299_s21 + $0x3e8] sm:$0xff]   ;;  %v11908_v37 = vld [vmem:[%s12299_s21 + $0x3f0] sm:$0xff]   ;;  %318 = vst.msk [vmem:[#allocation2 + $0xa0] sm:$0xff] %vm297_vm0, %v12199_v54 }
  0x27   : > { %v11909_v38 = vld [vmem:[%s12299_s21 + $0x78] sm:$0xff]   ;;  %v11911_v40 = vld [vmem:[%s12299_s21 + $0x80] sm:$0xff]   ;;  %v11913_v42 = vld [vmem:[%s12299_s21 + $0x88] sm:$0xff]   ;;  %319 = vst.msk [vmem:[#allocation2 + $0xa8] sm:$0xff] %vm297_vm0, %v12199_v54 }
  0x28   : > { %11341 = vmatpush3.bf16.msra.mxu0 %v11875_v6  ;;  %11808 = vmatpush3.bf16.msra.mxu1 %v11875_v6  ;;  %v11910_v39 = vld [vmem:[%s12299_s21 + $0x3f8] sm:$0xff]   ;;  %v11912_v41 = vld [vmem:[%s12299_s21 + $0x400] sm:$0xff]   ;;  %v11914_v43 = vld [vmem:[%s12299_s21 + $0x408] sm:$0xff]   ;;  %320 = vst.msk [vmem:[#allocation2 + $0xb0] sm:$0xff] %vm297_vm0, %v12199_v54 }
  0x29   : > { %11342 = vmatprep.subr.bf16.mxu0 %v11876_v7  ;;  %11801 = vmatprep.subr.bf16.mxu1 %v11876_v7  ;;  %v11915_v44 = vld [vmem:[%s12299_s21 + $0x90] sm:$0xff]   ;;  %v11917_v46 = vld [vmem:[%s12299_s21 + $0x98] sm:$0xff]   ;;  %v11919_v48 = vld [vmem:[%s12299_s21 + $0xa0] sm:$0xff]   ;;  %321 = vst.msk [vmem:[#allocation2 + $0xb8] sm:$0xff] %vm297_vm0, %v12199_v54 }
  0x2a   : > { %v11916_v45 = vld [vmem:[%s12299_s21 + $0x410] sm:$0xff]   ;;  %v11918_v47 = vld [vmem:[%s12299_s21 + $0x418] sm:$0xff]   ;;  %v11920_v49 = vld [vmem:[%s12299_s21 + $0x420] sm:$0xff]   ;;  %322 = vst.msk [vmem:[#allocation2 + $0xc0] sm:$0xff] %vm297_vm0, %v12199_v54 }
  0x2b   : > { %v12356_v50 = vld [vmem:[%s12299_s21 + $0xa8] sm:$0xff]   ;;  %v12362_v52 = vld [vmem:[%s12299_s21 + $0xb0] sm:$0xff]   ;;  %323 = vst.msk [vmem:[#allocation2 + $0xc8] sm:$0xff] %vm297_vm0, %v12199_v54  ;;  %324 = vst.msk [vmem:[#allocation2 + $0xd0] sm:$0xff] %vm297_vm0, %v12199_v54 }
  0x2c   : > { %11343 = vmatpush3.bf16.msra.mxu0 %v11876_v7  ;;  %11809 = vmatpush3.bf16.msra.mxu1 %v11876_v7  ;;  %v12359_v51 = vld [vmem:[%s12299_s21 + $0x428] sm:$0xff]   ;;  %v12365_v53 = vld [vmem:[%s12299_s21 + $0x430] sm:$0xff]   ;;  %325 = vst.msk [vmem:[#allocation2 + $0xd8] sm:$0xff] %vm297_vm0, %v12199_v54  ;;  %326 = vst.msk [vmem:[#allocation2 + $0xe0] sm:$0xff] %vm297_vm0, %v12199_v54 }
  0x2d   : > { %11344 = vmatprep.subr.bf16.mxu0 %v11877_v8  ;;  %11802 = vmatprep.subr.bf16.mxu1 %v11877_v8  ;;  %327 = vst.msk [vmem:[#allocation2 + $0xe8] sm:$0xff] %vm297_vm0, %v12199_v54  ;;  %328 = vst.msk [vmem:[#allocation2 + $0xf0] sm:$0xff] %vm297_vm0, %v12199_v54  ;;  %v11925_v55 = vld [vmem:[%s12299_s21 + $0xb8] sm:$0xff]   ;;  %v11927_v57 = vld [vmem:[%s12299_s21 + $0xc0] sm:$0xff]  }
  0x2e   : > { %329 = vst.msk [vmem:[#allocation2 + $0xf8] sm:$0xff] %vm297_vm0, %v12199_v54  ;;  %330 = vst.msk [vmem:[#allocation2 + $0x100] sm:$0xff] %vm297_vm0, %v12199_v54  ;;  %v11926_v56 = vld [vmem:[%s12299_s21 + $0x438] sm:$0xff]   ;;  %v11928_v58 = vld [vmem:[%s12299_s21 + $0x440] sm:$0xff]  }
  0x2f   : > { %331 = vst.msk [vmem:[#allocation2 + $0x108] sm:$0xff] %vm297_vm0, %v12199_v54  ;;  %332 = vst.msk [vmem:[#allocation2 + $0x110] sm:$0xff] %vm297_vm0, %v12199_v54  ;;  %v11929_v59 = vld [vmem:[%s12299_s21 + $0xc8] sm:$0xff]   ;;  %v11931_v61 = vld [vmem:[%s12299_s21 + $0xd0] sm:$0xff]  }
  0x30   : > { %11345 = vmatpush3.bf16.msra.mxu0 %v11877_v8  ;;  %11810 = vmatpush3.bf16.msra.mxu1 %v11877_v8  ;;  %333 = vst.msk [vmem:[#allocation2 + $0x118] sm:$0xff] %vm297_vm0, %v12199_v54  ;;  %334 = vst.msk [vmem:[#allocation2 + $0x120] sm:$0xff] %vm297_vm0, %v12199_v54  ;;  %v11930_v60 = vld [vmem:[%s12299_s21 + $0x448] sm:$0xff]   ;;  %v11932_v62 = vld [vmem:[%s12299_s21 + $0x450] sm:$0xff]  }
  0x31   : > { %11346 = vmatprep.subr.bf16.mxu0 %v11878_v9  ;;  %11803 = vmatprep.subr.bf16.mxu1 %v11878_v9  ;;  %335 = vst.msk [vmem:[#allocation2 + $0x128] sm:$0xff] %vm297_vm0, %v12199_v54  ;;  %336 = vst.msk [vmem:[#allocation2 + $0x130] sm:$0xff] %vm297_vm0, %v12199_v54  ;;  %v11933_v63 = vld [vmem:[%s12299_s21 + $0xd8] sm:$0xff]   ;;  %v11935_v1 = vld [vmem:[%s12299_s21 + $0xe0] sm:$0xff]  }
  0x32   : > { %337 = vst.msk [vmem:[#allocation2 + $0x138] sm:$0xff] %vm297_vm0, %v12199_v54  ;;  %338 = vst.msk [vmem:[#allocation2 + $0x140] sm:$0xff] %vm297_vm0, %v12199_v54  ;;  %v11934_v0 = vld [vmem:[%s12299_s21 + $0x458] sm:$0xff]   ;;  %v11936_v2 = vld [vmem:[%s12299_s21 + $0x460] sm:$0xff]  }
  0x33   : > { %339 = vst.msk [vmem:[#allocation2 + $0x148] sm:$0xff] %vm297_vm0, %v12199_v54  ;;  %340 = vst.msk [vmem:[#allocation2 + $0x150] sm:$0xff] %vm297_vm0, %v12199_v54  ;;  %v11937_v3 = vld [vmem:[%s12299_s21 + $0xe8] sm:$0xff]   ;;  %v11939_v5 = vld [vmem:[%s12299_s21 + $0xf0] sm:$0xff]  }
  0x34   : > { %11347 = vmatpush3.bf16.msra.mxu0 %v11878_v9  ;;  %11811 = vmatpush3.bf16.msra.mxu1 %v11878_v9  ;;  %341 = vst.msk [vmem:[#allocation2 + $0x158] sm:$0xff] %vm297_vm0, %v12199_v54  ;;  %342 = vst.msk [vmem:[#allocation2 + $0x160] sm:$0xff] %vm297_vm0, %v12199_v54  ;;  %v11938_v4 = vld [vmem:[%s12299_s21 + $0x468] sm:$0xff]   ;;  %v11940_v6 = vld [vmem:[%s12299_s21 + $0x470] sm:$0xff]  }
  0x35   : > { %343 = vst.msk [vmem:[#allocation2 + $0x168] sm:$0xff] %vm297_vm0, %v12199_v54  ;;  %344 = vst.msk [vmem:[#allocation2 + $0x170] sm:$0xff] %vm297_vm0, %v12199_v54  ;;  %v11941_v7 = vld [vmem:[%s12299_s21 + $0xf8] sm:$0xff]   ;;  %v11943_v9 = vld [vmem:[%s12299_s21 + $0x100] sm:$0xff]  }
  0x36   : > { %345 = vst.msk [vmem:[#allocation2 + $0x178] sm:$0xff] %vm297_vm0, %v12199_v54  ;;  %346 = vst.msk [vmem:[#allocation2 + $0x180] sm:$0xff] %vm297_vm0, %v12199_v54  ;;  %v11942_v8 = vld [vmem:[%s12299_s21 + $0x478] sm:$0xff]  }
  0x37   : > { %11349 = vmatmul.mubr.bf16.vlgmr.msra.gmra.mrb[0].mxu0 %v11881_v10  ;;  %11573 = vmatmul.mubr.bf16.vlgmr.msra.gmra.mrb[0].mxu1 %v11882_v11  ;;  %347 = vst.msk [vmem:[#allocation2 + $0x188] sm:$0xff] %vm297_vm0, %v12199_v54  ;;  %348 = vst.msk [vmem:[#allocation2 + $0x190] sm:$0xff] %vm297_vm0, %v12199_v54  ;;  %v11944_v10 = vld [vmem:[%s12299_s21 + $0x480] sm:$0xff]   ;;  %v11945_v11 = vld [vmem:[%s12299_s21 + $0x108] sm:$0xff]  }
  0x38   : > { %11352 = vmatprep.mubr.bf16.mxu0 %v11883_v12  ;;  %11576 = vmatprep.mubr.bf16.mxu1 %v11884_v13  ;;  %349 = vst.msk [vmem:[#allocation2 + $0x198] sm:$0xff] %vm297_vm0, %v12199_v54  ;;  %350 = vst.msk [vmem:[#allocation2 + $0x1a0] sm:$0xff] %vm297_vm0, %v12199_v54  ;;  %v11946_v12 = vld [vmem:[%s12299_s21 + $0x488] sm:$0xff]   ;;  %v11947_v13 = vld [vmem:[%s12299_s21 + $0x110] sm:$0xff]  }
  0x39   : > { %351 = vst.msk [vmem:[#allocation2 + $0x1a8] sm:$0xff] %vm297_vm0, %v12199_v54  ;;  %352 = vst.msk [vmem:[#allocation2 + $0x1b0] sm:$0xff] %vm297_vm0, %v12199_v54 }
  0x3a   : > { %353 = vst.msk [vmem:[#allocation2 + $0x1b8] sm:$0xff] %vm297_vm0, %v12199_v54  ;;  %354 = vst.msk [vmem:[#allocation2 + $0x1c0] sm:$0xff] %vm297_vm0, %v12199_v54 }
  0x3b   : > { %355 = vst.msk [vmem:[#allocation2 + $0x1c8] sm:$0xff] %vm297_vm0, %v12199_v54  ;;  %356 = vst.msk [vmem:[#allocation2 + $0x1d0] sm:$0xff] %vm297_vm0, %v12199_v54 }
  0x3c   : > { %357 = vst.msk [vmem:[#allocation2 + $0x1d8] sm:$0xff] %vm297_vm0, %v12199_v54  ;;  %358 = vst.msk [vmem:[#allocation2 + $0x1e0] sm:$0xff] %vm297_vm0, %v12199_v54 }
  0x3d   : > { %359 = vst.msk [vmem:[#allocation2 + $0x1e8] sm:$0xff] %vm297_vm0, %v12199_v54  ;;  %360 = vst.msk [vmem:[#allocation2 + $0x1f0] sm:$0xff] %vm297_vm0, %v12199_v54 }
  0x3e   : > { %361 = vst.msk [vmem:[#allocation2 + $0x1f8] sm:$0xff] %vm297_vm0, %v12199_v54  ;;  %362 = vst.msk [vmem:[#allocation2 + $0x200] sm:$0xff] %vm297_vm0, %v12199_v54 }
  0x3f   : > { %11353 = vmatmul.mubr.bf16.gmra.mrb[4].mxu0 %v11885_v14  ;;  %11577 = vmatmul.mubr.bf16.gmra.mrb[4].mxu1 %v11886_v15  ;;  %363 = vst.msk [vmem:[#allocation2 + $0x208] sm:$0xff] %vm297_vm0, %v12199_v54  ;;  %364 = vst.msk [vmem:[#allocation2 + $0x210] sm:$0xff] %vm297_vm0, %v12199_v54  ;;  %v11948_v14 = vld [vmem:[%s12299_s21 + $0x490] sm:$0xff]   ;;  %v11949_v15 = vld [vmem:[%s12299_s21 + $0x118] sm:$0xff]  }
  0x40   : > { %11356 = vmatprep.mubr.bf16.mxu0 %v11887_v16  ;;  %11580 = vmatprep.mubr.bf16.mxu1 %v11888_v17  ;;  %365 = vst.msk [vmem:[#allocation2 + $0x218] sm:$0xff] %vm297_vm0, %v12199_v54  ;;  %366 = vst.msk [vmem:[#allocation2 + $0x220] sm:$0xff] %vm297_vm0, %v12199_v54  ;;  %v11950_v16 = vld [vmem:[%s12299_s21 + $0x498] sm:$0xff]   ;;  %v11951_v17 = vld [vmem:[%s12299_s21 + $0x120] sm:$0xff]  }
  0x41   : > { %367 = vst.msk [vmem:[#allocation2 + $0x228] sm:$0xff] %vm297_vm0, %v12199_v54  ;;  %368 = vst.msk [vmem:[#allocation2 + $0x230] sm:$0xff] %vm297_vm0, %v12199_v54 }
  0x42   : > { %369 = vst.msk [vmem:[#allocation2 + $0x238] sm:$0xff] %vm297_vm0, %v12199_v54  ;;  %370 = vst.msk [vmem:[#allocation2 + $0x240] sm:$0xff] %vm297_vm0, %v12199_v54 }
  0x43   : > { %371 = vst.msk [vmem:[#allocation2 + $0x248] sm:$0xff] %vm297_vm0, %v12199_v54  ;;  %372 = vst.msk [vmem:[#allocation2 + $0x250] sm:$0xff] %vm297_vm0, %v12199_v54 }
  0x44   : > { %373 = vst.msk [vmem:[#allocation2 + $0x258] sm:$0xff] %vm297_vm0, %v12199_v54  ;;  %374 = vst.msk [vmem:[#allocation2 + $0x260] sm:$0xff] %vm297_vm0, %v12199_v54 }
  0x45   : > { %375 = vst.msk [vmem:[#allocation2 + $0x268] sm:$0xff] %vm297_vm0, %v12199_v54  ;;  %376 = vst.msk [vmem:[#allocation2 + $0x270] sm:$0xff] %vm297_vm0, %v12199_v54 }
  0x46   : > { %377 = vst.msk [vmem:[#allocation2 + $0x278] sm:$0xff] %vm297_vm0, %v12199_v54  ;;  %378 = vst.msk [vmem:[#allocation2 + $0x280] sm:$0xff] %vm297_vm0, %v12199_v54 }
  0x47   : > { %11357 = vmatmul.mubr.bf16.gmra.mrb[8].mxu0 %v11889_v18  ;;  %11581 = vmatmul.mubr.bf16.gmra.mrb[8].mxu1 %v11890_v19  ;;  %379 = vst.msk [vmem:[#allocation2 + $0x288] sm:$0xff] %vm297_vm0, %v12199_v54  ;;  %380 = vst.msk [vmem:[#allocation2 + $0x290] sm:$0xff] %vm297_vm0, %v12199_v54  ;;  %v11952_v18 = vld [vmem:[%s12299_s21 + $0x4a0] sm:$0xff]   ;;  %v11953_v19 = vld [vmem:[%s12299_s21 + $0x128] sm:$0xff]  }
  0x48   : > { %11360 = vmatprep.mubr.bf16.mxu0 %v11891_v20  ;;  %11584 = vmatprep.mubr.bf16.mxu1 %v11892_v21  ;;  %381 = vst.msk [vmem:[#allocation2 + $0x298] sm:$0xff] %vm297_vm0, %v12199_v54  ;;  %382 = vst.msk [vmem:[#allocation2 + $0x2a0] sm:$0xff] %vm297_vm0, %v12199_v54  ;;  %v11954_v20 = vld [vmem:[%s12299_s21 + $0x4a8] sm:$0xff]   ;;  %v11955_v21 = vld [vmem:[%s12299_s21 + $0x130] sm:$0xff]  }
  0x49   : > { %383 = vst.msk [vmem:[#allocation2 + $0x2a8] sm:$0xff] %vm297_vm0, %v12199_v54  ;;  %384 = vst.msk [vmem:[#allocation2 + $0x2b0] sm:$0xff] %vm297_vm0, %v12199_v54 }
  0x4a   : > { %385 = vst.msk [vmem:[#allocation2 + $0x2b8] sm:$0xff] %vm297_vm0, %v12199_v54  ;;  %386 = vst.msk [vmem:[#allocation2 + $0x2c0] sm:$0xff] %vm297_vm0, %v12199_v54 }
  0x4b   : > { %387 = vst.msk [vmem:[#allocation2 + $0x2c8] sm:$0xff] %vm297_vm0, %v12199_v54  ;;  %388 = vst.msk [vmem:[#allocation2 + $0x2d0] sm:$0xff] %vm297_vm0, %v12199_v54 }
  0x4c   : > { %389 = vst.msk [vmem:[#allocation2 + $0x2d8] sm:$0xff] %vm297_vm0, %v12199_v54  ;;  %390 = vst.msk [vmem:[#allocation2 + $0x2e0] sm:$0xff] %vm297_vm0, %v12199_v54 }
  0x4d   : > { %391 = vst.msk [vmem:[#allocation2 + $0x2e8] sm:$0xff] %vm297_vm0, %v12199_v54  ;;  %392 = vst.msk [vmem:[#allocation2 + $0x2f0] sm:$0xff] %vm297_vm0, %v12199_v54 }
  0x4e   : > { %393 = vst.msk [vmem:[#allocation2 + $0x2f8] sm:$0xff] %vm297_vm0, %v12199_v54  ;;  %394 = vst.msk [vmem:[#allocation2 + $0x300] sm:$0xff] %vm297_vm0, %v12199_v54 }
  0x4f   : > { %11361 = vmatmul.mubr.bf16.gmra.mrb[12].mxu0 %v11893_v22  ;;  %11585 = vmatmul.mubr.bf16.gmra.mrb[12].mxu1 %v11894_v23  ;;  %395 = vst.msk [vmem:[#allocation2 + $0x308] sm:$0xff] %vm297_vm0, %v12199_v54  ;;  %396 = vst.msk [vmem:[#allocation2 + $0x310] sm:$0xff] %vm297_vm0, %v12199_v54  ;;  %v11956_v22 = vld [vmem:[%s12299_s21 + $0x4b0] sm:$0xff]   ;;  %v11957_v23 = vld [vmem:[%s12299_s21 + $0x138] sm:$0xff]  }
  0x50   : > { %11364 = vmatprep.mubr.bf16.mxu0 %v11895_v24  ;;  %11588 = vmatprep.mubr.bf16.mxu1 %v11896_v25  ;;  %397 = vst.msk [vmem:[#allocation2 + $0x318] sm:$0xff] %vm297_vm0, %v12199_v54  ;;  %398 = vst.msk [vmem:[#allocation2 + $0x320] sm:$0xff] %vm297_vm0, %v12199_v54  ;;  %v11958_v24 = vld [vmem:[%s12299_s21 + $0x4b8] sm:$0xff]   ;;  %v11959_v25 = vld [vmem:[%s12299_s21 + $0x140] sm:$0xff]  }
  0x51   : > { %399 = vst.msk [vmem:[#allocation2 + $0x328] sm:$0xff] %vm297_vm0, %v12199_v54  ;;  %400 = vst.msk [vmem:[#allocation2 + $0x330] sm:$0xff] %vm297_vm0, %v12199_v54 }
  0x52   : > { %401 = vst.msk [vmem:[#allocation2 + $0x338] sm:$0xff] %vm297_vm0, %v12199_v54  ;;  %402 = vst.msk [vmem:[#allocation2 + $0x340] sm:$0xff] %vm297_vm0, %v12199_v54 }
  0x53   : > { %403 = vst.msk [vmem:[#allocation2 + $0x348] sm:$0xff] %vm297_vm0, %v12199_v54  ;;  %404 = vst.msk [vmem:[#allocation2 + $0x350] sm:$0xff] %vm297_vm0, %v12199_v54 }
  0x54   : > { %405 = vst.msk [vmem:[#allocation2 + $0x358] sm:$0xff] %vm297_vm0, %v12199_v54  ;;  %406 = vst.msk [vmem:[#allocation2 + $0x360] sm:$0xff] %vm297_vm0, %v12199_v54 }
  0x55   : > { %407 = vst.msk [vmem:[#allocation2 + $0x368] sm:$0xff] %vm297_vm0, %v12199_v54  ;;  %408 = vst.msk [vmem:[#allocation2 + $0x370] sm:$0xff] %vm297_vm0, %v12199_v54 }
  0x56   : > { %409 = vst.msk [vmem:[#allocation2 + $0x378] sm:$0xff] %vm297_vm0, %v12199_v54  ;;  %410 = vst.msk [vmem:[#allocation2 + $0x380] sm:$0xff] %vm297_vm0, %v12199_v54 }
  0x57   : > { %11365 = vmatmul.mubr.bf16.gmra.mrb[16].mxu0 %v11897_v26  ;;  %11589 = vmatmul.mubr.bf16.gmra.mrb[16].mxu1 %v11898_v27  ;;  %411 = vst.msk [vmem:[#allocation2 + $0x388] sm:$0xff] %vm297_vm0, %v12199_v54  ;;  %412 = vst.msk [vmem:[#allocation2 + $0x390] sm:$0xff] %vm297_vm0, %v12199_v54  ;;  %v11960_v26 = vld [vmem:[%s12299_s21 + $0x4c0] sm:$0xff]   ;;  %v11961_v27 = vld [vmem:[%s12299_s21 + $0x148] sm:$0xff]  }
  0x58   : > { %11368 = vmatprep.mubr.bf16.mxu0 %v11899_v28  ;;  %11592 = vmatprep.mubr.bf16.mxu1 %v11900_v29  ;;  %413 = vst.msk [vmem:[#allocation2 + $0x398] sm:$0xff] %vm297_vm0, %v12199_v54  ;;  %414 = vst.msk [vmem:[#allocation2 + $0x3a0] sm:$0xff] %vm297_vm0, %v12199_v54  ;;  %v11962_v28 = vld [vmem:[%s12299_s21 + $0x4c8] sm:$0xff]   ;;  %v11963_v29 = vld [vmem:[%s12299_s21 + $0x150] sm:$0xff]  }
  0x59   : > { %415 = vst.msk [vmem:[#allocation2 + $0x3a8] sm:$0xff] %vm297_vm0, %v12199_v54  ;;  %416 = vst.msk [vmem:[#allocation2 + $0x3b0] sm:$0xff] %vm297_vm0, %v12199_v54 }
  0x5a   : > { %417 = vst.msk [vmem:[#allocation2 + $0x3b8] sm:$0xff] %vm297_vm0, %v12199_v54  ;;  %418 = vst.msk [vmem:[#allocation2 + $0x3c0] sm:$0xff] %vm297_vm0, %v12199_v54 }
  0x5b   : > { %419 = vst.msk [vmem:[#allocation2 + $0x3c8] sm:$0xff] %vm297_vm0, %v12199_v54  ;;  %420 = vst.msk [vmem:[#allocation2 + $0x3d0] sm:$0xff] %vm297_vm0, %v12199_v54 }
  0x5c   : > { %421 = vst.msk [vmem:[#allocation2 + $0x3d8] sm:$0xff] %vm297_vm0, %v12199_v54  ;;  %422 = vst.msk [vmem:[#allocation2 + $0x3e0] sm:$0xff] %vm297_vm0, %v12199_v54 }
  0x5d   : > { %423 = vst.msk [vmem:[#allocation2 + $0x3e8] sm:$0xff] %vm297_vm0, %v12199_v54  ;;  %424 = vst.msk [vmem:[#allocation2 + $0x3f0] sm:$0xff] %vm297_vm0, %v12199_v54 }
  0x5e   : > { %425 = vst.msk [vmem:[#allocation2 + $0x3f8] sm:$0xff] %vm297_vm0, %v12199_v54  ;;  %426 = vst.msk [vmem:[#allocation2 + $0x400] sm:$0xff] %vm297_vm0, %v12199_v54 }
  0x5f   : > { %11369 = vmatmul.mubr.bf16.gmra.mrb[20].mxu0 %v11901_v30  ;;  %11593 = vmatmul.mubr.bf16.gmra.mrb[20].mxu1 %v11902_v31  ;;  %427 = vst.msk [vmem:[#allocation2 + $0x408] sm:$0xff] %vm297_vm0, %v12199_v54  ;;  %428 = vst.msk [vmem:[#allocation2 + $0x410] sm:$0xff] %vm297_vm0, %v12199_v54  ;;  %v11964_v30 = vld [vmem:[%s12299_s21 + $0x4d0] sm:$0xff]   ;;  %v11965_v31 = vld [vmem:[%s12299_s21 + $0x158] sm:$0xff]  }
  0x60   : > { %11372 = vmatprep.mubr.bf16.mxu0 %v11903_v32  ;;  %11596 = vmatprep.mubr.bf16.mxu1 %v11904_v33  ;;  %429 = vst.msk [vmem:[#allocation2 + $0x418] sm:$0xff] %vm297_vm0, %v12199_v54  ;;  %430 = vst.msk [vmem:[#allocation2 + $0x420] sm:$0xff] %vm297_vm0, %v12199_v54  ;;  %v11966_v32 = vld [vmem:[%s12299_s21 + $0x4d8] sm:$0xff]   ;;  %v11967_v33 = vld [vmem:[%s12299_s21 + $0x160] sm:$0xff]  }
  0x61   : > { %431 = vst.msk [vmem:[#allocation2 + $0x428] sm:$0xff] %vm297_vm0, %v12199_v54  ;;  %432 = vst.msk [vmem:[#allocation2 + $0x430] sm:$0xff] %vm297_vm0, %v12199_v54 }
  0x62   : > { %433 = vst.msk [vmem:[#allocation2 + $0x438] sm:$0xff] %vm297_vm0, %v12199_v54  ;;  %434 = vst.msk [vmem:[#allocation2 + $0x440] sm:$0xff] %vm297_vm0, %v12199_v54 }
  0x63   : > { %435 = vst.msk [vmem:[#allocation2 + $0x448] sm:$0xff] %vm297_vm0, %v12199_v54  ;;  %436 = vst.msk [vmem:[#allocation2 + $0x450] sm:$0xff] %vm297_vm0, %v12199_v54 }
  0x64   : > { %437 = vst.msk [vmem:[#allocation2 + $0x458] sm:$0xff] %vm297_vm0, %v12199_v54  ;;  %438 = vst.msk [vmem:[#allocation2 + $0x460] sm:$0xff] %vm297_vm0, %v12199_v54 }
  0x65   : > { %439 = vst.msk [vmem:[#allocation2 + $0x468] sm:$0xff] %vm297_vm0, %v12199_v54  ;;  %440 = vst.msk [vmem:[#allocation2 + $0x470] sm:$0xff] %vm297_vm0, %v12199_v54 }
  0x66   : > { %441 = vst.msk [vmem:[#allocation2 + $0x478] sm:$0xff] %vm297_vm0, %v12199_v54  ;;  %442 = vst.msk [vmem:[#allocation2 + $0x480] sm:$0xff] %vm297_vm0, %v12199_v54 }
  0x67   : > { %11373 = vmatmul.mubr.bf16.gmra.mrb[24].mxu0 %v11905_v34  ;;  %11597 = vmatmul.mubr.bf16.gmra.mrb[24].mxu1 %v11906_v35  ;;  %443 = vst.msk [vmem:[#allocation2 + $0x488] sm:$0xff] %vm297_vm0, %v12199_v54  ;;  %444 = vst.msk [vmem:[#allocation2 + $0x490] sm:$0xff] %vm297_vm0, %v12199_v54  ;;  %v11968_v34 = vld [vmem:[%s12299_s21 + $0x4e0] sm:$0xff]   ;;  %v11969_v35 = vld [vmem:[%s12299_s21 + $0x168] sm:$0xff]  }
  0x68   : > { %11376 = vmatprep.mubr.bf16.mxu0 %v11907_v36  ;;  %11600 = vmatprep.mubr.bf16.mxu1 %v11908_v37  ;;  %445 = vst.msk [vmem:[#allocation2 + $0x498] sm:$0xff] %vm297_vm0, %v12199_v54  ;;  %446 = vst.msk [vmem:[#allocation2 + $0x4a0] sm:$0xff] %vm297_vm0, %v12199_v54  ;;  %v11970_v36 = vld [vmem:[%s12299_s21 + $0x4e8] sm:$0xff]   ;;  %v11971_v37 = vld [vmem:[%s12299_s21 + $0x170] sm:$0xff]  }
  0x69   : > { %447 = vst.msk [vmem:[#allocation2 + $0x4a8] sm:$0xff] %vm297_vm0, %v12199_v54  ;;  %448 = vst.msk [vmem:[#allocation2 + $0x4b0] sm:$0xff] %vm297_vm0, %v12199_v54 }
  0x6a   : > { %449 = vst.msk [vmem:[#allocation2 + $0x4b8] sm:$0xff] %vm297_vm0, %v12199_v54  ;;  %450 = vst.msk [vmem:[#allocation2 + $0x4c0] sm:$0xff] %vm297_vm0, %v12199_v54 }
  0x6b   : > { %451 = vst.msk [vmem:[#allocation2 + $0x4c8] sm:$0xff] %vm297_vm0, %v12199_v54  ;;  %452 = vst.msk [vmem:[#allocation2 + $0x4d0] sm:$0xff] %vm297_vm0, %v12199_v54 }
  0x6c   : > { %453 = vst.msk [vmem:[#allocation2 + $0x4d8] sm:$0xff] %vm297_vm0, %v12199_v54  ;;  %454 = vst.msk [vmem:[#allocation2 + $0x4e0] sm:$0xff] %vm297_vm0, %v12199_v54 }
  0x6d   : > { %455 = vst.msk [vmem:[#allocation2 + $0x4e8] sm:$0xff] %vm297_vm0, %v12199_v54  ;;  %456 = vst.msk [vmem:[#allocation2 + $0x4f0] sm:$0xff] %vm297_vm0, %v12199_v54 }
  0x6e   : > { %457 = vst.msk [vmem:[#allocation2 + $0x4f8] sm:$0xff] %vm297_vm0, %v12199_v54  ;;  %458 = vst.msk [vmem:[#allocation2 + $0x500] sm:$0xff] %vm297_vm0, %v12199_v54 }
  0x6f   : > { %11377 = vmatmul.mubr.bf16.gmra.mrb[28].mxu0 %v11909_v38  ;;  %11601 = vmatmul.mubr.bf16.gmra.mrb[28].mxu1 %v11910_v39  ;;  %459 = vst.msk [vmem:[#allocation2 + $0x508] sm:$0xff] %vm297_vm0, %v12199_v54  ;;  %460 = vst.msk [vmem:[#allocation2 + $0x510] sm:$0xff] %vm297_vm0, %v12199_v54  ;;  %v11972_v38 = vld [vmem:[%s12299_s21 + $0x4f0] sm:$0xff]   ;;  %v11973_v39 = vld [vmem:[%s12299_s21 + $0x178] sm:$0xff]  }
  0x70   : > { %11380 = vmatprep.mubr.bf16.mxu0 %v11911_v40  ;;  %11604 = vmatprep.mubr.bf16.mxu1 %v11912_v41  ;;  %461 = vst.msk [vmem:[#allocation2 + $0x518] sm:$0xff] %vm297_vm0, %v12199_v54  ;;  %462 = vst.msk [vmem:[#allocation2 + $0x520] sm:$0xff] %vm297_vm0, %v12199_v54  ;;  %v11974_v40 = vld [vmem:[%s12299_s21 + $0x4f8] sm:$0xff]   ;;  %v11975_v41 = vld [vmem:[%s12299_s21 + $0x180] sm:$0xff]  }
  0x71   : > { %463 = vst.msk [vmem:[#allocation2 + $0x528] sm:$0xff] %vm297_vm0, %v12199_v54  ;;  %464 = vst.msk [vmem:[#allocation2 + $0x530] sm:$0xff] %vm297_vm0, %v12199_v54 }
  0x72   : > { %465 = vst.msk [vmem:[#allocation2 + $0x538] sm:$0xff] %vm297_vm0, %v12199_v54  ;;  %466 = vst.msk [vmem:[#allocation2 + $0x540] sm:$0xff] %vm297_vm0, %v12199_v54 }
  0x73   : > { %467 = vst.msk [vmem:[#allocation2 + $0x548] sm:$0xff] %vm297_vm0, %v12199_v54  ;;  %468 = vst.msk [vmem:[#allocation2 + $0x550] sm:$0xff] %vm297_vm0, %v12199_v54 }
  0x74   : > { %469 = vst.msk [vmem:[#allocation2 + $0x558] sm:$0xff] %vm297_vm0, %v12199_v54  ;;  %470 = vst.msk [vmem:[#allocation2 + $0x560] sm:$0xff] %vm297_vm0, %v12199_v54 }
  0x75   : > { %471 = vst.msk [vmem:[#allocation2 + $0x568] sm:$0xff] %vm297_vm0, %v12199_v54  ;;  %472 = vst.msk [vmem:[#allocation2 + $0x570] sm:$0xff] %vm297_vm0, %v12199_v54 }
  0x76   : > { %473 = vst.msk [vmem:[#allocation2 + $0x578] sm:$0xff] %vm297_vm0, %v12199_v54  ;;  %474 = vst.msk [vmem:[#allocation2 + $0x580] sm:$0xff] %vm297_vm0, %v12199_v54 }
  0x77   : > { %11381 = vmatmul.mubr.bf16.gmra.mrb[32].mxu0 %v11913_v42  ;;  %11605 = vmatmul.mubr.bf16.gmra.mrb[32].mxu1 %v11914_v43  ;;  %475 = vst.msk [vmem:[#allocation2 + $0x588] sm:$0xff] %vm297_vm0, %v12199_v54  ;;  %476 = vst.msk [vmem:[#allocation2 + $0x590] sm:$0xff] %vm297_vm0, %v12199_v54  ;;  %v11976_v42 = vld [vmem:[%s12299_s21 + $0x500] sm:$0xff]   ;;  %v11977_v43 = vld [vmem:[%s12299_s21 + $0x188] sm:$0xff]  }
  0x78   : > { %11384 = vmatprep.mubr.bf16.mxu0 %v11915_v44  ;;  %11608 = vmatprep.mubr.bf16.mxu1 %v11916_v45  ;;  %477 = vst.msk [vmem:[#allocation2 + $0x598] sm:$0xff] %vm297_vm0, %v12199_v54  ;;  %478 = vst.msk [vmem:[#allocation2 + $0x5a0] sm:$0xff] %vm297_vm0, %v12199_v54  ;;  %v11978_v44 = vld [vmem:[%s12299_s21 + $0x508] sm:$0xff]   ;;  %v11979_v45 = vld [vmem:[%s12299_s21 + $0x190] sm:$0xff]  }
  0x79   : > { %479 = vst.msk [vmem:[#allocation2 + $0x5a8] sm:$0xff] %vm297_vm0, %v12199_v54  ;;  %480 = vst.msk [vmem:[#allocation2 + $0x5b0] sm:$0xff] %vm297_vm0, %v12199_v54 }
  0x7a   : > { %481 = vst.msk [vmem:[#allocation2 + $0x5b8] sm:$0xff] %vm297_vm0, %v12199_v54  ;;  %482 = vst.msk [vmem:[#allocation2 + $0x5c0] sm:$0xff] %vm297_vm0, %v12199_v54 }
  0x7b   : > { %483 = vst.msk [vmem:[#allocation2 + $0x5c8] sm:$0xff] %vm297_vm0, %v12199_v54  ;;  %484 = vst.msk [vmem:[#allocation2 + $0x5d0] sm:$0xff] %vm297_vm0, %v12199_v54 }
  0x7c   : > { %485 = vst.msk [vmem:[#allocation2 + $0x5d8] sm:$0xff] %vm297_vm0, %v12199_v54  ;;  %486 = vst.msk [vmem:[#allocation2 + $0x5e0] sm:$0xff] %vm297_vm0, %v12199_v54 }
  0x7d   : > { %487 = vst.msk [vmem:[#allocation2 + $0x5e8] sm:$0xff] %vm297_vm0, %v12199_v54  ;;  %488 = vst.msk [vmem:[#allocation2 + $0x5f0] sm:$0xff] %vm297_vm0, %v12199_v54 }
  0x7e   : > { %489 = vst.msk [vmem:[#allocation2 + $0x5f8] sm:$0xff] %vm297_vm0, %v12199_v54  ;;  %490 = vst.msk [vmem:[#allocation2 + $0x600] sm:$0xff] %vm297_vm0, %v12199_v54 }
  0x7f   : > { %11385 = vmatmul.mubr.bf16.gmra.mrb[36].mxu0 %v11917_v46  ;;  %11609 = vmatmul.mubr.bf16.gmra.mrb[36].mxu1 %v11918_v47  ;;  %491 = vst.msk [vmem:[#allocation2 + $0x608] sm:$0xff] %vm297_vm0, %v12199_v54  ;;  %492 = vst.msk [vmem:[#allocation2 + $0x610] sm:$0xff] %vm297_vm0, %v12199_v54  ;;  %v11980_v46 = vld [vmem:[%s12299_s21 + $0x510] sm:$0xff]   ;;  %v11981_v47 = vld [vmem:[%s12299_s21 + $0x198] sm:$0xff]  }
  0x80   : > { %11388 = vmatprep.mubr.bf16.mxu0 %v11919_v48  ;;  %11612 = vmatprep.mubr.bf16.mxu1 %v11920_v49  ;;  %493 = vst.msk [vmem:[#allocation2 + $0x618] sm:$0xff] %vm297_vm0, %v12199_v54  ;;  %494 = vst.msk [vmem:[#allocation2 + $0x620] sm:$0xff] %vm297_vm0, %v12199_v54  ;;  %v11982_v48 = vld [vmem:[%s12299_s21 + $0x518] sm:$0xff]   ;;  %v11983_v49 = vld [vmem:[%s12299_s21 + $0x1a0] sm:$0xff]  }
  0x81   : > { %495 = vst.msk [vmem:[#allocation2 + $0x628] sm:$0xff] %vm297_vm0, %v12199_v54  ;;  %496 = vst.msk [vmem:[#allocation2 + $0x630] sm:$0xff] %vm297_vm0, %v12199_v54 }
  0x82   : > { %497 = vst.msk [vmem:[#allocation2 + $0x638] sm:$0xff] %vm297_vm0, %v12199_v54  ;;  %498 = vst.msk [vmem:[#allocation2 + $0x640] sm:$0xff] %vm297_vm0, %v12199_v54 }
  0x83   : > { %499 = vst.msk [vmem:[#allocation2 + $0x648] sm:$0xff] %vm297_vm0, %v12199_v54  ;;  %500 = vst.msk [vmem:[#allocation2 + $0x650] sm:$0xff] %vm297_vm0, %v12199_v54 }
  0x84   : > { %501 = vst.msk [vmem:[#allocation2 + $0x658] sm:$0xff] %vm297_vm0, %v12199_v54  ;;  %502 = vst.msk [vmem:[#allocation2 + $0x660] sm:$0xff] %vm297_vm0, %v12199_v54 }
  0x85   : > { %503 = vst.msk [vmem:[#allocation2 + $0x668] sm:$0xff] %vm297_vm0, %v12199_v54  ;;  %504 = vst.msk [vmem:[#allocation2 + $0x670] sm:$0xff] %vm297_vm0, %v12199_v54 }
  0x86   : > { %505 = vst.msk [vmem:[#allocation2 + $0x678] sm:$0xff] %vm297_vm0, %v12199_v54  ;;  %506 = vst.msk [vmem:[#allocation2 + $0x680] sm:$0xff] %vm297_vm0, %v12199_v54 }
  0x87   : > { %507 = vst.msk [vmem:[#allocation2 + $0x688] sm:$0xff] %vm297_vm0, %v12199_v54  ;;  %508 = vst.msk [vmem:[#allocation2 + $0x690] sm:$0xff] %vm297_vm0, %v12199_v54  ;;  %11389 = vmatmul.mubr.bf16.gmra.mrb[40].mxu0 %v12356_v50  ;;  %11613 = vmatmul.mubr.bf16.gmra.mrb[40].mxu1 %v12359_v51  ;;  %v11984_v50 = vld [vmem:[%s12299_s21 + $0x520] sm:$0xff]   ;;  %v11985_v51 = vld [vmem:[%s12299_s21 + $0x1a8] sm:$0xff]  }
  0x88   : > { %509 = vst.msk [vmem:[#allocation2 + $0x698] sm:$0xff] %vm297_vm0, %v12199_v54  ;;  %510 = vst.msk [vmem:[#allocation2 + $0x6a0] sm:$0xff] %vm297_vm0, %v12199_v54  ;;  %11392 = vmatprep.mubr.bf16.mxu0 %v12362_v52  ;;  %11616 = vmatprep.mubr.bf16.mxu1 %v12365_v53  ;;  %v11986_v52 = vld [vmem:[%s12299_s21 + $0x528] sm:$0xff]   ;;  %v11987_v53 = vld [vmem:[%s12299_s21 + $0x1b0] sm:$0xff]  }
  0x89   : > { %511 = vst.msk [vmem:[#allocation2 + $0x6a8] sm:$0xff] %vm297_vm0, %v12199_v54  ;;  %512 = vst.msk [vmem:[#allocation2 + $0x6b0] sm:$0xff] %vm297_vm0, %v12199_v54 }
  0x8a   : > { %513 = vst.msk [vmem:[#allocation2 + $0x6b8] sm:$0xff] %vm297_vm0, %v12199_v54  ;;  %514 = vst.msk [vmem:[#allocation2 + $0x6c0] sm:$0xff] %vm297_vm0, %v12199_v54 }
  0x8b   : > { %515 = vst.msk [vmem:[#allocation2 + $0x6c8] sm:$0xff] %vm297_vm0, %v12199_v54  ;;  %516 = vst.msk [vmem:[#allocation2 + $0x6d0] sm:$0xff] %vm297_vm0, %v12199_v54 }
  0x8c   : > { %517 = vst.msk [vmem:[#allocation2 + $0x6d8] sm:$0xff] %vm297_vm0, %v12199_v54  ;;  %518 = vst.msk [vmem:[#allocation2 + $0x6e0] sm:$0xff] %vm297_vm0, %v12199_v54 }
  0x8d   : > { %519 = vst.msk [vmem:[#allocation2 + $0x6e8] sm:$0xff] %vm297_vm0, %v12199_v54  ;;  %520 = vst.msk [vmem:[#allocation2 + $0x6f0] sm:$0xff] %vm297_vm0, %v12199_v54 }
  0x8e   : > { %521 = vst.msk [vmem:[#allocation2 + $0x6f8] sm:$0xff] %vm297_vm0, %v12199_v54  ;;  %522 = vst.msk [vmem:[#allocation2 + $0x700] sm:$0xff] %vm297_vm0, %v12199_v54 }
  0x8f   : > { %523 = vst.msk [vmem:[#allocation2 + $0x708] sm:$0xff] %vm297_vm0, %v12199_v54  ;;  %524 = vst.msk [vmem:[#allocation2 + $0x710] sm:$0xff] %vm297_vm0, %v12199_v54  ;;  %11393 = vmatmul.mubr.bf16.gmra.mrb[44].mxu0 %v11925_v55  ;;  %11617 = vmatmul.mubr.bf16.gmra.mrb[44].mxu1 %v11926_v56  ;;  %v748_v55 = vld [vmem:[#allocation2 + $0x10] sm:$0xff] }
  0x90   : > { %525 = vst.msk [vmem:[#allocation2 + $0x718] sm:$0xff] %vm297_vm0, %v12199_v54  ;;  %526 = vst.msk [vmem:[#allocation2 + $0x720] sm:$0xff] %vm297_vm0, %v12199_v54  ;;  %11396 = vmatprep.mubr.bf16.mxu0 %v11927_v57  ;;  %11620 = vmatprep.mubr.bf16.mxu1 %v11928_v58  ;;  %v746_v57 = vld [vmem:[#allocation2] sm:$0xff] }
  0x91   : > { %527 = vst.msk [vmem:[#allocation2 + $0x728] sm:$0xff] %vm297_vm0, %v12199_v54  ;;  %528 = vst.msk [vmem:[#allocation2 + $0x730] sm:$0xff] %vm297_vm0, %v12199_v54 }
  0x92   : > { %529 = vst.msk [vmem:[#allocation2 + $0x738] sm:$0xff] %vm297_vm0, %v12199_v54  ;;  %530 = vst.msk [vmem:[#allocation2 + $0x740] sm:$0xff] %vm297_vm0, %v12199_v54 }
  0x93   : > { %531 = vst.msk [vmem:[#allocation2 + $0x748] sm:$0xff] %vm297_vm0, %v12199_v54  ;;  %532 = vst.msk [vmem:[#allocation2 + $0x750] sm:$0xff] %vm297_vm0, %v12199_v54 }
  0x94   : > { %533 = vst.msk [vmem:[#allocation2 + $0x758] sm:$0xff] %vm297_vm0, %v12199_v54  ;;  %534 = vst.msk [vmem:[#allocation2 + $0x760] sm:$0xff] %vm297_vm0, %v12199_v54 }
  0x95   : > { %535 = vst.msk [vmem:[#allocation2 + $0x768] sm:$0xff] %vm297_vm0, %v12199_v54  ;;  %536 = vst.msk [vmem:[#allocation2 + $0x770] sm:$0xff] %vm297_vm0, %v12199_v54  ;;  %v970_v58 = vld [vmem:[#allocation2 + $0x700] sm:$0xff] }
  0x96   : > { %537 = vst.msk [vmem:[#allocation2 + $0x778] sm:$0xff] %vm297_vm0, %v12199_v54  ;;  %538 = vst.msk [vmem:[#allocation2 + $0x780] sm:$0xff] %vm297_vm0, %v12199_v54  ;;  %v972_v56 = vld [vmem:[#allocation2 + $0x710] sm:$0xff] }
  0x97   : > { %539 = vst.msk [vmem:[#allocation2 + $0x788] sm:$0xff] %vm297_vm0, %v12199_v54  ;;  %540 = vst.msk [vmem:[#allocation2 + $0x790] sm:$0xff] %vm297_vm0, %v12199_v54  ;;  %11397 = vmatmul.mubr.bf16.gmra.mrb[48].mxu0 %v11929_v59  ;;  %11621 = vmatmul.mubr.bf16.gmra.mrb[48].mxu1 %v11930_v60 }
  0x98   : > { %541 = vst.msk [vmem:[#allocation2 + $0x798] sm:$0xff] %vm297_vm0, %v12199_v54  ;;  %542 = vst.msk [vmem:[#allocation2 + $0x7a0] sm:$0xff] %vm297_vm0, %v12199_v54  ;;  %11400 = vmatprep.mubr.bf16.mxu0 %v11931_v61  ;;  %11624 = vmatprep.mubr.bf16.mxu1 %v11932_v62  ;;  %v749_v61 = vld [vmem:[#allocation2 + $0x18] sm:$0xff] }
  0x99   : > { %543 = vst.msk [vmem:[#allocation2 + $0x7a8] sm:$0xff] %vm297_vm0, %v12199_v54  ;;  %544 = vst.msk [vmem:[#allocation2 + $0x7b0] sm:$0xff] %vm297_vm0, %v12199_v54  ;;  %v973_v62 = vld [vmem:[#allocation2 + $0x718] sm:$0xff] }
  0x9a   : > { %545 = vst.msk [vmem:[#allocation2 + $0x7b8] sm:$0xff] %vm297_vm0, %v12199_v54  ;;  %546 = vst.msk [vmem:[#allocation2 + $0x7c0] sm:$0xff] %vm297_vm0, %v12199_v54 }
  0x9b   : > { %547 = vst.msk [vmem:[#allocation2 + $0x7c8] sm:$0xff] %vm297_vm0, %v12199_v54  ;;  %548 = vst.msk [vmem:[#allocation2 + $0x7d0] sm:$0xff] %vm297_vm0, %v12199_v54 }
  0x9c   : > { %549 = vst.msk [vmem:[#allocation2 + $0x7d8] sm:$0xff] %vm297_vm0, %v12199_v54  ;;  %550 = vst.msk [vmem:[#allocation2 + $0x7e0] sm:$0xff] %vm297_vm0, %v12199_v54 }
  0x9d   : > { %551 = vst.msk [vmem:[#allocation2 + $0x7e8] sm:$0xff] %vm297_vm0, %v12199_v54  ;;  %552 = vst.msk [vmem:[#allocation2 + $0x7f0] sm:$0xff] %vm297_vm0, %v12199_v54 }
  0x9e   : > { %553 = vst.msk [vmem:[#allocation2 + $0x7f8] sm:$0xff] %vm297_vm0, %v12199_v54  ;;  %554 = vst.msk [vmem:[#allocation2 + $0x800] sm:$0xff] %vm297_vm0, %v12199_v54 }
  0x9f   : > { %555 = vst.msk [vmem:[#allocation2 + $0x808] sm:$0xff] %vm297_vm0, %v12199_v54  ;;  %556 = vst.msk [vmem:[#allocation2 + $0x810] sm:$0xff] %vm297_vm0, %v12199_v54  ;;  %11401 = vmatmul.mubr.bf16.gmra.mrb[52].mxu0 %v11933_v63  ;;  %11625 = vmatmul.mubr.bf16.gmra.mrb[52].mxu1 %v11934_v0  ;;  %v747_v63 = vld [vmem:[#allocation2 + $0x8] sm:$0xff] }
  0xa0   : > { %557 = vst.msk [vmem:[#allocation2 + $0x818] sm:$0xff] %vm297_vm0, %v12199_v54  ;;  %558 = vst.msk [vmem:[#allocation2 + $0x820] sm:$0xff] %vm297_vm0, %v12199_v54  ;;  %11404 = vmatprep.mubr.bf16.mxu0 %v11935_v1  ;;  %11628 = vmatprep.mubr.bf16.mxu1 %v11936_v2 }
  0xa1   : > { %559 = vst.msk [vmem:[#allocation2 + $0x828] sm:$0xff] %vm297_vm0, %v12199_v54  ;;  %560 = vst.msk [vmem:[#allocation2 + $0x830] sm:$0xff] %vm297_vm0, %v12199_v54 }
  0xa2   : > { %561 = vst.msk [vmem:[#allocation2 + $0x838] sm:$0xff] %vm297_vm0, %v12199_v54  ;;  %562 = vst.msk [vmem:[#allocation2 + $0x840] sm:$0xff] %vm297_vm0, %v12199_v54 }
  0xa3   : > { %563 = vst.msk [vmem:[#allocation2 + $0x848] sm:$0xff] %vm297_vm0, %v12199_v54  ;;  %564 = vst.msk [vmem:[#allocation2 + $0x850] sm:$0xff] %vm297_vm0, %v12199_v54 }
  0xa4   : > { %565 = vst.msk [vmem:[#allocation2 + $0x858] sm:$0xff] %vm297_vm0, %v12199_v54  ;;  %566 = vst.msk [vmem:[#allocation2 + $0x860] sm:$0xff] %vm297_vm0, %v12199_v54 }
  0xa5   : > { %567 = vst.msk [vmem:[#allocation2 + $0x868] sm:$0xff] %vm297_vm0, %v12199_v54  ;;  %568 = vst.msk [vmem:[#allocation2 + $0x870] sm:$0xff] %vm297_vm0, %v12199_v54 }
  0xa6   : > { %569 = vst.msk [vmem:[#allocation2 + $0x878] sm:$0xff] %vm297_vm0, %v12199_v54  ;;  %570 = vst.msk [vmem:[#allocation2 + $0x880] sm:$0xff] %vm297_vm0, %v12199_v54 }
  0xa7   : > { %571 = vst.msk [vmem:[#allocation2 + $0x888] sm:$0xff] %vm297_vm0, %v12199_v54  ;;  %572 = vst.msk [vmem:[#allocation2 + $0x890] sm:$0xff] %vm297_vm0, %v12199_v54  ;;  %11405 = vmatmul.mubr.bf16.gmra.mrb[56].mxu0 %v11937_v3  ;;  %11629 = vmatmul.mubr.bf16.gmra.mrb[56].mxu1 %v11938_v4  ;;  %v971_v4 = vld [vmem:[#allocation2 + $0x708] sm:$0xff] }
  0xa8   : > { %573 = vst.msk [vmem:[#allocation2 + $0x898] sm:$0xff] %vm297_vm0, %v12199_v54  ;;  %574 = vst.msk [vmem:[#allocation2 + $0x8a0] sm:$0xff] %vm297_vm0, %v12199_v54  ;;  %11408 = vmatprep.mubr.bf16.mxu0 %v11939_v5  ;;  %11632 = vmatprep.mubr.bf16.mxu1 %v11940_v6  ;;  %v11989_v5 = vld [vmem:[%s12299_s21 + $0x1b8] sm:$0xff]  }
  0xa9   : > { %575 = vst.msk [vmem:[#allocation2 + $0x8a8] sm:$0xff] %vm297_vm0, %v12199_v54  ;;  %576 = vst.msk [vmem:[#allocation2 + $0x8b0] sm:$0xff] %vm297_vm0, %v12199_v54  ;;  %v11990_v6 = vld [vmem:[%s12299_s21 + $0x538] sm:$0xff]  }
  0xaa   : > { %577 = vst.msk [vmem:[#allocation2 + $0x8b8] sm:$0xff] %vm297_vm0, %v12199_v54  ;;  %578 = vst.msk [vmem:[#allocation2 + $0x8c0] sm:$0xff] %vm297_vm0, %v12199_v54 }
  0xab   : > { %579 = vst.msk [vmem:[#allocation2 + $0x8c8] sm:$0xff] %vm297_vm0, %v12199_v54  ;;  %580 = vst.msk [vmem:[#allocation2 + $0x8d0] sm:$0xff] %vm297_vm0, %v12199_v54 }
  0xac   : > { %581 = vst.msk [vmem:[#allocation2 + $0x8d8] sm:$0xff] %vm297_vm0, %v12199_v54  ;;  %582 = vst.msk [vmem:[#allocation2 + $0x8e0] sm:$0xff] %vm297_vm0, %v12199_v54 }
  0xad   : > { %583 = vst.msk [vmem:[#allocation2 + $0x8e8] sm:$0xff] %vm297_vm0, %v12199_v54  ;;  %584 = vst.msk [vmem:[#allocation2 + $0x8f0] sm:$0xff] %vm297_vm0, %v12199_v54 }
  0xae   : > { %585 = vst.msk [vmem:[#allocation2 + $0x8f8] sm:$0xff] %vm297_vm0, %v12199_v54  ;;  %586 = vst.msk [vmem:[#allocation2 + $0x900] sm:$0xff] %vm297_vm0, %v12199_v54 }
  0xaf   : > { %587 = vst.msk [vmem:[#allocation2 + $0x908] sm:$0xff] %vm297_vm0, %v12199_v54  ;;  %588 = vst.msk [vmem:[#allocation2 + $0x910] sm:$0xff] %vm297_vm0, %v12199_v54  ;;  %11409 = vmatmul.mubr.bf16.gmra.mrb[60].mxu0 %v11941_v7  ;;  %11633 = vmatmul.mubr.bf16.gmra.mrb[60].mxu1 %v11942_v8 }
  0xb0   : > { %589 = vst.msk [vmem:[#allocation2 + $0x918] sm:$0xff] %vm297_vm0, %v12199_v54  ;;  %590 = vst.msk [vmem:[#allocation2 + $0x920] sm:$0xff] %vm297_vm0, %v12199_v54  ;;  %11412 = vmatprep.mubr.bf16.mxu0 %v11943_v9  ;;  %11636 = vmatprep.mubr.bf16.mxu1 %v11944_v10 }
  0xb1   : > { %591 = vst.msk [vmem:[#allocation2 + $0x928] sm:$0xff] %vm297_vm0, %v12199_v54  ;;  %592 = vst.msk [vmem:[#allocation2 + $0x930] sm:$0xff] %vm297_vm0, %v12199_v54 }
  0xb2   : > { %593 = vst.msk [vmem:[#allocation2 + $0x938] sm:$0xff] %vm297_vm0, %v12199_v54  ;;  %594 = vst.msk [vmem:[#allocation2 + $0x940] sm:$0xff] %vm297_vm0, %v12199_v54 }
  0xb3   : > { %595 = vst.msk [vmem:[#allocation2 + $0x948] sm:$0xff] %vm297_vm0, %v12199_v54  ;;  %596 = vst.msk [vmem:[#allocation2 + $0x950] sm:$0xff] %vm297_vm0, %v12199_v54 }
  0xb4   : > { %597 = vst.msk [vmem:[#allocation2 + $0x958] sm:$0xff] %vm297_vm0, %v12199_v54  ;;  %598 = vst.msk [vmem:[#allocation2 + $0x960] sm:$0xff] %vm297_vm0, %v12199_v54 }
  0xb5   : > { %599 = vst.msk [vmem:[#allocation2 + $0x968] sm:$0xff] %vm297_vm0, %v12199_v54  ;;  %600 = vst.msk [vmem:[#allocation2 + $0x970] sm:$0xff] %vm297_vm0, %v12199_v54 }
  0xb6   : > { %601 = vst.msk [vmem:[#allocation2 + $0x978] sm:$0xff] %vm297_vm0, %v12199_v54  ;;  %602 = vst.msk [vmem:[#allocation2 + $0x980] sm:$0xff] %vm297_vm0, %v12199_v54 }
  0xb7   : > { %603 = vst.msk [vmem:[#allocation2 + $0x988] sm:$0xff] %vm297_vm0, %v12199_v54  ;;  %604 = vst.msk [vmem:[#allocation2 + $0x990] sm:$0xff] %vm297_vm0, %v12199_v54  ;;  %11413 = vmatmul.mubr.bf16.gmra.mrb[64].mxu0 %v11945_v11  ;;  %11637 = vmatmul.mubr.bf16.gmra.mrb[64].mxu1 %v11946_v12  ;;  %v11991_v11 = vld [vmem:[%s12299_s21 + $0x1c0] sm:$0xff]  }
  0xb8   : > { %605 = vst.msk [vmem:[#allocation2 + $0x998] sm:$0xff] %vm297_vm0, %v12199_v54  ;;  %606 = vst.msk [vmem:[#allocation2 + $0x9a0] sm:$0xff] %vm297_vm0, %v12199_v54  ;;  %11416 = vmatprep.mubr.bf16.mxu0 %v11947_v13  ;;  %11640 = vmatprep.mubr.bf16.mxu1 %v11948_v14  ;;  %v11992_v12 = vld [vmem:[%s12299_s21 + $0x540] sm:$0xff]  }
  0xb9   : > { %607 = vst.msk [vmem:[#allocation2 + $0x9a8] sm:$0xff] %vm297_vm0, %v12199_v54  ;;  %608 = vst.msk [vmem:[#allocation2 + $0x9b0] sm:$0xff] %vm297_vm0, %v12199_v54 }
  0xba   : > { %609 = vst.msk [vmem:[#allocation2 + $0x9b8] sm:$0xff] %vm297_vm0, %v12199_v54  ;;  %610 = vst.msk [vmem:[#allocation2 + $0x9c0] sm:$0xff] %vm297_vm0, %v12199_v54 }
  0xbb   : > { %611 = vst.msk [vmem:[#allocation2 + $0x9c8] sm:$0xff] %vm297_vm0, %v12199_v54  ;;  %612 = vst.msk [vmem:[#allocation2 + $0x9d0] sm:$0xff] %vm297_vm0, %v12199_v54 }
  0xbc   : > { %613 = vst.msk [vmem:[#allocation2 + $0x9d8] sm:$0xff] %vm297_vm0, %v12199_v54  ;;  %614 = vst.msk [vmem:[#allocation2 + $0x9e0] sm:$0xff] %vm297_vm0, %v12199_v54 }
  0xbd   : > { %615 = vst.msk [vmem:[#allocation2 + $0x9e8] sm:$0xff] %vm297_vm0, %v12199_v54  ;;  %616 = vst.msk [vmem:[#allocation2 + $0x9f0] sm:$0xff] %vm297_vm0, %v12199_v54 }
  0xbe   : > { %617 = vst.msk [vmem:[#allocation2 + $0x9f8] sm:$0xff] %vm297_vm0, %v12199_v54  ;;  %618 = vst.msk [vmem:[#allocation2 + $0xa00] sm:$0xff] %vm297_vm0, %v12199_v54 }
  0xbf   : > { %619 = vst.msk [vmem:[#allocation2 + $0xa08] sm:$0xff] %vm297_vm0, %v12199_v54  ;;  %620 = vst.msk [vmem:[#allocation2 + $0xa10] sm:$0xff] %vm297_vm0, %v12199_v54  ;;  %11417 = vmatmul.mubr.bf16.gmra.mrb[68].mxu0 %v11949_v15  ;;  %11641 = vmatmul.mubr.bf16.gmra.mrb[68].mxu1 %v11950_v16 }
  0xc0   : > { %621 = vst.msk [vmem:[#allocation2 + $0xa18] sm:$0xff] %vm297_vm0, %v12199_v54  ;;  %622 = vst.msk [vmem:[#allocation2 + $0xa20] sm:$0xff] %vm297_vm0, %v12199_v54  ;;  %11420 = vmatprep.mubr.bf16.mxu0 %v11951_v17  ;;  %11644 = vmatprep.mubr.bf16.mxu1 %v11952_v18 }
  0xc1   : > { %623 = vst.msk [vmem:[#allocation2 + $0xa28] sm:$0xff] %vm297_vm0, %v12199_v54  ;;  %624 = vst.msk [vmem:[#allocation2 + $0xa30] sm:$0xff] %vm297_vm0, %v12199_v54 }
  0xc2   : > { %625 = vst.msk [vmem:[#allocation2 + $0xa38] sm:$0xff] %vm297_vm0, %v12199_v54  ;;  %626 = vst.msk [vmem:[#allocation2 + $0xa40] sm:$0xff] %vm297_vm0, %v12199_v54 }
  0xc3   : > { %627 = vst.msk [vmem:[#allocation2 + $0xa48] sm:$0xff] %vm297_vm0, %v12199_v54  ;;  %628 = vst.msk [vmem:[#allocation2 + $0xa50] sm:$0xff] %vm297_vm0, %v12199_v54 }
  0xc4   : > { %629 = vst.msk [vmem:[#allocation2 + $0xa58] sm:$0xff] %vm297_vm0, %v12199_v54  ;;  %630 = vst.msk [vmem:[#allocation2 + $0xa60] sm:$0xff] %vm297_vm0, %v12199_v54 }
  0xc5   : > { %631 = vst.msk [vmem:[#allocation2 + $0xa68] sm:$0xff] %vm297_vm0, %v12199_v54  ;;  %632 = vst.msk [vmem:[#allocation2 + $0xa70] sm:$0xff] %vm297_vm0, %v12199_v54 }
  0xc6   : > { %633 = vst.msk [vmem:[#allocation2 + $0xa78] sm:$0xff] %vm297_vm0, %v12199_v54  ;;  %634 = vst.msk [vmem:[#allocation2 + $0xa80] sm:$0xff] %vm297_vm0, %v12199_v54 }
  0xc7   : > { %635 = vst.msk [vmem:[#allocation2 + $0xa88] sm:$0xff] %vm297_vm0, %v12199_v54  ;;  %636 = vst.msk [vmem:[#allocation2 + $0xa90] sm:$0xff] %vm297_vm0, %v12199_v54  ;;  %11421 = vmatmul.mubr.bf16.gmra.mrb[72].mxu0 %v11953_v19  ;;  %11645 = vmatmul.mubr.bf16.gmra.mrb[72].mxu1 %v11954_v20  ;;  %v752_v19 = vld [vmem:[#allocation2 + $0x30] sm:$0xff] }
  0xc8   : > { %637 = vst.msk [vmem:[#allocation2 + $0xa98] sm:$0xff] %vm297_vm0, %v12199_v54  ;;  %638 = vst.msk [vmem:[#allocation2 + $0xaa0] sm:$0xff] %vm297_vm0, %v12199_v54  ;;  %11424 = vmatprep.mubr.bf16.mxu0 %v11955_v21  ;;  %11648 = vmatprep.mubr.bf16.mxu1 %v11956_v22  ;;  %v976_v20 = vld [vmem:[#allocation2 + $0x730] sm:$0xff]  ;;  %v750_v21 = vld [vmem:[#allocation2 + $0x20] sm:$0xff] }
  0xc9   : > { %639 = vst.msk [vmem:[#allocation2 + $0xaa8] sm:$0xff] %vm297_vm0, %v12199_v54  ;;  %640 = vst.msk [vmem:[#allocation2 + $0xab0] sm:$0xff] %vm297_vm0, %v12199_v54  ;;  %v13346_v22 = vld [vmem:[%s17066_s2] ss:$0 sm:$0xff] }
  0xca   : > { %641 = vst.msk [vmem:[#allocation2 + $0xab8] sm:$0xff] %vm297_vm0, %v12199_v54  ;;  %642 = vst.msk [vmem:[#allocation2 + $0xac0] sm:$0xff] %vm297_vm0, %v12199_v54 }
  0xcb   : > { %643 = vst.msk [vmem:[#allocation2 + $0xac8] sm:$0xff] %vm297_vm0, %v12199_v54  ;;  %644 = vst.msk [vmem:[#allocation2 + $0xad0] sm:$0xff] %vm297_vm0, %v12199_v54 }
  0xcc   : > { %645 = vst.msk [vmem:[#allocation2 + $0xad8] sm:$0xff] %vm297_vm0, %v12199_v54  ;;  %646 = vst.msk [vmem:[#allocation2 + $0xae0] sm:$0xff] %vm297_vm0, %v12199_v54 }
  0xcd   : > { %647 = vst.msk [vmem:[#allocation2 + $0xae8] sm:$0xff] %vm297_vm0, %v12199_v54  ;;  %648 = vst.msk [vmem:[#allocation2 + $0xaf0] sm:$0xff] %vm297_vm0, %v12199_v54 }
  0xce   : > { %649 = vst.msk [vmem:[#allocation2 + $0xaf8] sm:$0xff] %vm297_vm0, %v12199_v54  ;;  %650 = vst.msk [vmem:[#allocation2 + $0xb00] sm:$0xff] %vm297_vm0, %v12199_v54 }
  0xcf   : > { %651 = vst.msk [vmem:[#allocation2 + $0xb08] sm:$0xff] %vm297_vm0, %v12199_v54  ;;  %652 = vst.msk [vmem:[#allocation2 + $0xb10] sm:$0xff] %vm297_vm0, %v12199_v54  ;;  %11425 = vmatmul.mubr.bf16.gmra.mrb[76].mxu0 %v11957_v23  ;;  %11649 = vmatmul.mubr.bf16.gmra.mrb[76].mxu1 %v11958_v24  ;;  %v974_v23 = vld [vmem:[#allocation2 + $0x720] sm:$0xff]  ;;  %v753_v24 = vld [vmem:[#allocation2 + $0x38] sm:$0xff] }
  0xd0   : > { %653 = vst.msk [vmem:[#allocation2 + $0xb18] sm:$0xff] %vm297_vm0, %v12199_v54  ;;  %654 = vst.msk [vmem:[#allocation2 + $0xb20] sm:$0xff] %vm297_vm0, %v12199_v54  ;;  %11428 = vmatprep.mubr.bf16.mxu0 %v11959_v25  ;;  %11652 = vmatprep.mubr.bf16.mxu1 %v11960_v26  ;;  %v13351_v25 = vld [vmem:[%s17067_s3] ss:$0 sm:$0xff] }
  0xd1   : > { %655 = vst.msk [vmem:[#allocation2 + $0xb28] sm:$0xff] %vm297_vm0, %v12199_v54  ;;  %656 = vst.msk [vmem:[#allocation2 + $0xb30] sm:$0xff] %vm297_vm0, %v12199_v54 }
  0xd2   : > { %657 = vst.msk [vmem:[#allocation2 + $0xb38] sm:$0xff] %vm297_vm0, %v12199_v54  ;;  %658 = vst.msk [vmem:[#allocation2 + $0xb40] sm:$0xff] %vm297_vm0, %v12199_v54 }
  0xd3   : > { %659 = vst.msk [vmem:[#allocation2 + $0xb48] sm:$0xff] %vm297_vm0, %v12199_v54  ;;  %660 = vst.msk [vmem:[#allocation2 + $0xb50] sm:$0xff] %vm297_vm0, %v12199_v54 }
  0xd4   : > { %661 = vst.msk [vmem:[#allocation2 + $0xb58] sm:$0xff] %vm297_vm0, %v12199_v54  ;;  %662 = vst.msk [vmem:[#allocation2 + $0xb60] sm:$0xff] %vm297_vm0, %v12199_v54 }
  0xd5   : > { %663 = vst.msk [vmem:[#allocation2 + $0xb68] sm:$0xff] %vm297_vm0, %v12199_v54  ;;  %664 = vst.msk [vmem:[#allocation2 + $0xb70] sm:$0xff] %vm297_vm0, %v12199_v54 }
  0xd6   : > { %665 = vst.msk [vmem:[#allocation2 + $0xb78] sm:$0xff] %vm297_vm0, %v12199_v54  ;;  %666 = vst.msk [vmem:[#allocation2 + $0xb80] sm:$0xff] %vm297_vm0, %v12199_v54 }
  0xd7   : > { %667 = vst.msk [vmem:[#allocation2 + $0xb88] sm:$0xff] %vm297_vm0, %v12199_v54  ;;  %668 = vst.msk [vmem:[#allocation2 + $0xb90] sm:$0xff] %vm297_vm0, %v12199_v54  ;;  %11429 = vmatmul.mubr.bf16.gmra.mrb[80].mxu0 %v11961_v27  ;;  %11653 = vmatmul.mubr.bf16.gmra.mrb[80].mxu1 %v11962_v28  ;;  %v977_v28 = vld [vmem:[#allocation2 + $0x738] sm:$0xff] }
  0xd8   : > { %669 = vst.msk [vmem:[#allocation2 + $0xb98] sm:$0xff] %vm297_vm0, %v12199_v54  ;;  %670 = vst.msk [vmem:[#allocation2 + $0xba0] sm:$0xff] %vm297_vm0, %v12199_v54  ;;  %11432 = vmatprep.mubr.bf16.mxu0 %v11963_v29  ;;  %11656 = vmatprep.mubr.bf16.mxu1 %v11964_v30  ;;  %v751_v29 = vld [vmem:[#allocation2 + $0x28] sm:$0xff] }
  0xd9   : > { %671 = vst.msk [vmem:[#allocation2 + $0xba8] sm:$0xff] %vm297_vm0, %v12199_v54  ;;  %672 = vst.msk [vmem:[#allocation2 + $0xbb0] sm:$0xff] %vm297_vm0, %v12199_v54 }
  0xda   : > { %673 = vst.msk [vmem:[#allocation2 + $0xbb8] sm:$0xff] %vm297_vm0, %v12199_v54  ;;  %674 = vst.msk [vmem:[#allocation2 + $0xbc0] sm:$0xff] %vm297_vm0, %v12199_v54 }
  0xdb   : > { %675 = vst.msk [vmem:[#allocation2 + $0xbc8] sm:$0xff] %vm297_vm0, %v12199_v54  ;;  %676 = vst.msk [vmem:[#allocation2 + $0xbd0] sm:$0xff] %vm297_vm0, %v12199_v54 }
  0xdc   : > { %677 = vst.msk [vmem:[#allocation2 + $0xbd8] sm:$0xff] %vm297_vm0, %v12199_v54  ;;  %678 = vst.msk [vmem:[#allocation2 + $0xbe0] sm:$0xff] %vm297_vm0, %v12199_v54 }
  0xdd   : > { %679 = vst.msk [vmem:[#allocation2 + $0xbe8] sm:$0xff] %vm297_vm0, %v12199_v54  ;;  %680 = vst.msk [vmem:[#allocation2 + $0xbf0] sm:$0xff] %vm297_vm0, %v12199_v54 }
  0xde   : > { %681 = vst.msk [vmem:[#allocation2 + $0xbf8] sm:$0xff] %vm297_vm0, %v12199_v54  ;;  %682 = vst.msk [vmem:[#allocation2 + $0xc00] sm:$0xff] %vm297_vm0, %v12199_v54 }
  0xdf   : > { %683 = vst.msk [vmem:[#allocation2 + $0xc08] sm:$0xff] %vm297_vm0, %v12199_v54  ;;  %684 = vst.msk [vmem:[#allocation2 + $0xc10] sm:$0xff] %vm297_vm0, %v12199_v54  ;;  %11433 = vmatmul.mubr.bf16.gmra.mrb[84].mxu0 %v11965_v31  ;;  %11657 = vmatmul.mubr.bf16.gmra.mrb[84].mxu1 %v11966_v32 }
  0xe0   : > { %685 = vst.msk [vmem:[#allocation2 + $0xc18] sm:$0xff] %vm297_vm0, %v12199_v54  ;;  %686 = vst.msk [vmem:[#allocation2 + $0xc20] sm:$0xff] %vm297_vm0, %v12199_v54  ;;  %11436 = vmatprep.mubr.bf16.mxu0 %v11967_v33  ;;  %11660 = vmatprep.mubr.bf16.mxu1 %v11968_v34  ;;  %v975_v34 = vld [vmem:[#allocation2 + $0x728] sm:$0xff] }
  0xe1   : > { %687 = vst.msk [vmem:[#allocation2 + $0xc28] sm:$0xff] %vm297_vm0, %v12199_v54  ;;  %688 = vst.msk [vmem:[#allocation2 + $0xc30] sm:$0xff] %vm297_vm0, %v12199_v54 }
  0xe2   : > { %689 = vst.msk [vmem:[#allocation2 + $0xc38] sm:$0xff] %vm297_vm0, %v12199_v54  ;;  %690 = vst.msk [vmem:[#allocation2 + $0xc40] sm:$0xff] %vm297_vm0, %v12199_v54 }
  0xe3   : > { %691 = vst.msk [vmem:[#allocation2 + $0xc48] sm:$0xff] %vm297_vm0, %v12199_v54  ;;  %692 = vst.msk [vmem:[#allocation2 + $0xc50] sm:$0xff] %vm297_vm0, %v12199_v54 }
  0xe4   : > { %693 = vst.msk [vmem:[#allocation2 + $0xc58] sm:$0xff] %vm297_vm0, %v12199_v54  ;;  %694 = vst.msk [vmem:[#allocation2 + $0xc60] sm:$0xff] %vm297_vm0, %v12199_v54 }
  0xe5   : > { %695 = vst.msk [vmem:[#allocation2 + $0xc68] sm:$0xff] %vm297_vm0, %v12199_v54  ;;  %696 = vst.msk [vmem:[#allocation2 + $0xc70] sm:$0xff] %vm297_vm0, %v12199_v54 }
  0xe6   : > { %697 = vst.msk [vmem:[#allocation2 + $0xc78] sm:$0xff] %vm297_vm0, %v12199_v54  ;;  %698 = vst.msk [vmem:[#allocation2 + $0xc80] sm:$0xff] %vm297_vm0, %v12199_v54 }
  0xe7   : > { %699 = vst.msk [vmem:[#allocation2 + $0xc88] sm:$0xff] %vm297_vm0, %v12199_v54  ;;  %700 = vst.msk [vmem:[#allocation2 + $0xc90] sm:$0xff] %vm297_vm0, %v12199_v54  ;;  %11437 = vmatmul.mubr.bf16.gmra.mrb[88].mxu0 %v11969_v35  ;;  %11661 = vmatmul.mubr.bf16.gmra.mrb[88].mxu1 %v11970_v36  ;;  %v11993_v35 = vld [vmem:[%s12299_s21 + $0x1c8] sm:$0xff]  }
  0xe8   : > { %701 = vst.msk [vmem:[#allocation2 + $0xc98] sm:$0xff] %vm297_vm0, %v12199_v54  ;;  %702 = vst.msk [vmem:[#allocation2 + $0xca0] sm:$0xff] %vm297_vm0, %v12199_v54  ;;  %11440 = vmatprep.mubr.bf16.mxu0 %v11971_v37  ;;  %11664 = vmatprep.mubr.bf16.mxu1 %v11972_v38  ;;  %v11994_v36 = vld [vmem:[%s12299_s21 + $0x548] sm:$0xff]  }
  0xe9   : > { %703 = vst.msk [vmem:[#allocation2 + $0xca8] sm:$0xff] %vm297_vm0, %v12199_v54  ;;  %704 = vst.msk [vmem:[#allocation2 + $0xcb0] sm:$0xff] %vm297_vm0, %v12199_v54 }
  0xea   : > { %705 = vst.msk [vmem:[#allocation2 + $0xcb8] sm:$0xff] %vm297_vm0, %v12199_v54  ;;  %706 = vst.msk [vmem:[#allocation2 + $0xcc0] sm:$0xff] %vm297_vm0, %v12199_v54 }
  0xeb   : > { %707 = vst.msk [vmem:[#allocation2 + $0xcc8] sm:$0xff] %vm297_vm0, %v12199_v54  ;;  %708 = vst.msk [vmem:[#allocation2 + $0xcd0] sm:$0xff] %vm297_vm0, %v12199_v54 }
  0xec   : > { %709 = vst.msk [vmem:[#allocation2 + $0xcd8] sm:$0xff] %vm297_vm0, %v12199_v54  ;;  %710 = vst.msk [vmem:[#allocation2 + $0xce0] sm:$0xff] %vm297_vm0, %v12199_v54 }
  0xed   : > { %711 = vst.msk [vmem:[#allocation2 + $0xce8] sm:$0xff] %vm297_vm0, %v12199_v54  ;;  %712 = vst.msk [vmem:[#allocation2 + $0xcf0] sm:$0xff] %vm297_vm0, %v12199_v54 }
  0xee   : > { %713 = vst.msk [vmem:[#allocation2 + $0xcf8] sm:$0xff] %vm297_vm0, %v12199_v54  ;;  %714 = vst.msk [vmem:[#allocation2 + $0xd00] sm:$0xff] %vm297_vm0, %v12199_v54 }
  0xef   : > { %715 = vst.msk [vmem:[#allocation2 + $0xd08] sm:$0xff] %vm297_vm0, %v12199_v54  ;;  %716 = vst.msk [vmem:[#allocation2 + $0xd10] sm:$0xff] %vm297_vm0, %v12199_v54  ;;  %11441 = vmatmul.mubr.bf16.gmra.mrb[92].mxu0 %v11973_v39  ;;  %11665 = vmatmul.mubr.bf16.gmra.mrb[92].mxu1 %v11974_v40 }
  0xf0   : > { %717 = vst.msk [vmem:[#allocation2 + $0xd18] sm:$0xff] %vm297_vm0, %v12199_v54  ;;  %718 = vst.msk [vmem:[#allocation2 + $0xd20] sm:$0xff] %vm297_vm0, %v12199_v54  ;;  %11444 = vmatprep.mubr.bf16.mxu0 %v11975_v41  ;;  %11668 = vmatprep.mubr.bf16.mxu1 %v11976_v42 }
  0xf1   : > { %719 = vst.msk [vmem:[#allocation2 + $0xd28] sm:$0xff] %vm297_vm0, %v12199_v54  ;;  %720 = vst.msk [vmem:[#allocation2 + $0xd30] sm:$0xff] %vm297_vm0, %v12199_v54 }
  0xf2   : > { %721 = vst.msk [vmem:[#allocation2 + $0xd38] sm:$0xff] %vm297_vm0, %v12199_v54  ;;  %722 = vst.msk [vmem:[#allocation2 + $0xd40] sm:$0xff] %vm297_vm0, %v12199_v54 }
  0xf3   : > { %723 = vst.msk [vmem:[#allocation2 + $0xd48] sm:$0xff] %vm297_vm0, %v12199_v54  ;;  %724 = vst.msk [vmem:[#allocation2 + $0xd50] sm:$0xff] %vm297_vm0, %v12199_v54 }
  0xf4   : > { %725 = vst.msk [vmem:[#allocation2 + $0xd58] sm:$0xff] %vm297_vm0, %v12199_v54  ;;  %726 = vst.msk [vmem:[#allocation2 + $0xd60] sm:$0xff] %vm297_vm0, %v12199_v54 }
  0xf5   : > { %727 = vst.msk [vmem:[#allocation2 + $0xd68] sm:$0xff] %vm297_vm0, %v12199_v54  ;;  %728 = vst.msk [vmem:[#allocation2 + $0xd70] sm:$0xff] %vm297_vm0, %v12199_v54 }
  0xf6   : > { %729 = vst.msk [vmem:[#allocation2 + $0xd78] sm:$0xff] %vm297_vm0, %v12199_v54  ;;  %730 = vst.msk [vmem:[#allocation2 + $0xd80] sm:$0xff] %vm297_vm0, %v12199_v54 }
  0xf7   : > { %731 = vst.msk [vmem:[#allocation2 + $0xd88] sm:$0xff] %vm297_vm0, %v12199_v54  ;;  %732 = vst.msk [vmem:[#allocation2 + $0xd90] sm:$0xff] %vm297_vm0, %v12199_v54  ;;  %11445 = vmatmul.mubr.bf16.gmra.mrb[96].mxu0 %v11977_v43  ;;  %11669 = vmatmul.mubr.bf16.gmra.mrb[96].mxu1 %v11978_v44  ;;  %v11995_v43 = vld [vmem:[%s12299_s21 + $0x1d0] sm:$0xff]  }
  0xf8   : > { %733 = vst.msk [vmem:[#allocation2 + $0xd98] sm:$0xff] %vm297_vm0, %v12199_v54  ;;  %734 = vst.msk [vmem:[#allocation2 + $0xda0] sm:$0xff] %vm297_vm0, %v12199_v54  ;;  %11448 = vmatprep.mubr.bf16.mxu0 %v11979_v45  ;;  %11672 = vmatprep.mubr.bf16.mxu1 %v11980_v46 }
  0xf9   : > { %735 = vst.msk [vmem:[#allocation2 + $0xda8] sm:$0xff] %vm297_vm0, %v12199_v54  ;;  %736 = vst.msk [vmem:[#allocation2 + $0xdb0] sm:$0xff] %vm297_vm0, %v12199_v54 }
  0xfa   : > { %737 = vst.msk [vmem:[#allocation2 + $0xdb8] sm:$0xff] %vm297_vm0, %v12199_v54  ;;  %738 = vst.msk [vmem:[#allocation2 + $0xdc0] sm:$0xff] %vm297_vm0, %v12199_v54 }
  0xfb   : > { %739 = vst.msk [vmem:[#allocation2 + $0xdc8] sm:$0xff] %vm297_vm0, %v12199_v54  ;;  %740 = vst.msk [vmem:[#allocation2 + $0xdd0] sm:$0xff] %vm297_vm0, %v12199_v54 }
  0xfc   : > { %741 = vst.msk [vmem:[#allocation2 + $0xdd8] sm:$0xff] %vm297_vm0, %v12199_v54  ;;  %742 = vst.msk [vmem:[#allocation2 + $0xde0] sm:$0xff] %vm297_vm0, %v12199_v54 }
  0xfd   : > { %743 = vst.msk [vmem:[#allocation2 + $0xde8] sm:$0xff] %vm297_vm0, %v12199_v54  ;;  %744 = vst.msk [vmem:[#allocation2 + $0xdf0] sm:$0xff] %vm297_vm0, %v12199_v54 }
  0xfe   : > { %745 = vst.msk [vmem:[#allocation2 + $0xdf8] sm:$0xff] %vm297_vm0, %v12199_v54  ;;  %v11988_v54 = vld [vmem:[%s12299_s21 + $0x530] sm:$0xff]  }
  0xff   : > { %11449 = vmatmul.mubr.bf16.gmra.mrb[100].mxu0 %v11981_v47  ;;  %11673 = vmatmul.mubr.bf16.gmra.mrb[100].mxu1 %v11982_v48 }
 0x100   : > { %11452 = vmatprep.mubr.bf16.mxu0 %v11983_v49  ;;  %11676 = vmatprep.mubr.bf16.mxu1 %v11984_v50 }
 0x107   : > { %11453 = vmatmul.mubr.bf16.gmra.mrb[104].mxu0 %v11985_v51  ;;  %11677 = vmatmul.mubr.bf16.gmra.mrb[104].mxu1 %v11986_v52  ;;  %v11996_v52 = vld [vmem:[%s12299_s21 + $0x550] sm:$0xff]  }
 0x108   : > { %11456 = vmatprep.mubr.bf16.mxu0 %v11987_v53  ;;  %11680 = vmatprep.mubr.bf16.mxu1 %v11988_v54 }
 0x10a   : > { %v11350_v59 = vpop.f32.mrb[0].mxu0  ;;  %v11574_v60 = vpop.f32.mrb[0].mxu1 }
 0x10b   : > { %v4877_v0 = vadd.f32 %v11350_v59, %v748_v55  ;;  %v5101_v1 = vadd.f32 %v11574_v60, %v972_v56  ;;  %v3084_v2 = vpop.f32.mrb[1].mxu0  ;;  %v3980_v3 = vpop.f32.mrb[1].mxu1 }
 0x10c   : > { %v4875_v7 = vadd.f32 %v3084_v2, %v746_v57  ;;  %v5099_v8 = vadd.f32 %v3980_v3, %v970_v58  ;;  %v11351_v9 = vpop.f32.mrb[2].mxu0  ;;  %v11575_v10 = vpop.f32.mrb[2].mxu1 }
 0x10d   : > { %5326 = vst.msk [vmem:[#allocation2 + $0x10] sm:$0xff] %vm297_vm0, %v4877_v0  ;;  %5550 = vst.msk [vmem:[#allocation2 + $0x710] sm:$0xff] %vm297_vm0, %v5101_v1  ;;  %v4878_v13 = vadd.f32 %v11351_v9, %v749_v61  ;;  %v5102_v14 = vadd.f32 %v11575_v10, %v973_v62  ;;  %v3087_v15 = vpop.f32.mrb[3].mxu0  ;;  %v3983_v16 = vpop.f32.mrb[3].mxu1 }
 0x10e   : > { %5324 = vst.msk [vmem:[#allocation2] sm:$0xff] %vm297_vm0, %v4875_v7  ;;  %5548 = vst.msk [vmem:[#allocation2 + $0x700] sm:$0xff] %vm297_vm0, %v5099_v8  ;;  %v4876_v17 = vadd.f32 %v3087_v15, %v747_v63  ;;  %v5100_v18 = vadd.f32 %v3983_v16, %v971_v4  ;;  %v11997_v15 = vld [vmem:[%s12299_s21 + $0x1d8] sm:$0xff]  }
 0x10f   : > { %5327 = vst.msk [vmem:[#allocation2 + $0x18] sm:$0xff] %vm297_vm0, %v4878_v13  ;;  %5551 = vst.msk [vmem:[#allocation2 + $0x718] sm:$0xff] %vm297_vm0, %v5102_v14  ;;  %11457 = vmatmul.mubr.bf16.gmra.mrb[108].mxu0 %v11989_v5  ;;  %11681 = vmatmul.mubr.bf16.gmra.mrb[108].mxu1 %v11990_v6 }
 0x110   : > { %5325 = vst.msk [vmem:[#allocation2 + $0x8] sm:$0xff] %vm297_vm0, %v4876_v17  ;;  %5549 = vst.msk [vmem:[#allocation2 + $0x708] sm:$0xff] %vm297_vm0, %v5100_v18  ;;  %11460 = vmatprep.mubr.bf16.mxu0 %v11991_v11  ;;  %11684 = vmatprep.mubr.bf16.mxu1 %v11992_v12 }
 0x112   : > { %v11354_v26 = vpop.f32.mrb[4].mxu0  ;;  %v11578_v27 = vpop.f32.mrb[4].mxu1 }
 0x113   : > { %v4881_v30 = vadd.f32 %v11354_v26, %v752_v19  ;;  %v5105_v31 = vadd.f32 %v11578_v27, %v976_v20  ;;  %v3100_v32 = vpop.f32.mrb[5].mxu0  ;;  %v3996_v33 = vpop.f32.mrb[5].mxu1 }
 0x114   : > { %v5777_v37 = vld [vmem:[#allocation2 + $0x10] sm:$0xff]  ;;  %v4879_v39 = vadd.f32 %v3100_v32, %v750_v21  ;;  %v5103_v40 = vadd.f32 %v3996_v33, %v974_v23  ;;  %v11355_v41 = vpop.f32.mrb[6].mxu0  ;;  %v11579_v42 = vpop.f32.mrb[6].mxu1  ;;  %v11998_v23 = vld [vmem:[%s12299_s21 + $0x558] sm:$0xff]  }
 0x115   : > { %v6001_v38 = vld [vmem:[#allocation2 + $0x710] sm:$0xff]  ;;  %v6232_v44 = vmul.f32 %v13346_v22, %v5777_v37  ;;  %v5775_v46 = vld [vmem:[#allocation2] sm:$0xff]  ;;  %5330 = vst.msk [vmem:[#allocation2 + $0x30] sm:$0xff] %vm297_vm0, %v4881_v30  ;;  %5554 = vst.msk [vmem:[#allocation2 + $0x730] sm:$0xff] %vm297_vm0, %v5105_v31  ;;  %v4882_v48 = vadd.f32 %v11355_v41, %v753_v24  ;;  %v5106_v49 = vadd.f32 %v11579_v42, %v977_v28  ;;  %v3103_v50 = vpop.f32.mrb[7].mxu0  ;;  %v3999_v51 = vpop.f32.mrb[7].mxu1 }
 0x116   : > { %v6456_v45 = vmul.f32 %v13346_v22, %v6001_v38  ;;  %v5999_v47 = vld [vmem:[#allocation2 + $0x700] sm:$0xff]  ;;  %v6230_v53 = vmul.f32 %v13346_v22, %v5775_v46  ;;  %v5778_v55 = vld [vmem:[#allocation2 + $0x18] sm:$0xff]  ;;  %5328 = vst.msk [vmem:[#allocation2 + $0x20] sm:$0xff] %vm297_vm0, %v4879_v39  ;;  %5552 = vst.msk [vmem:[#allocation2 + $0x720] sm:$0xff] %vm297_vm0, %v5103_v40  ;;  %v4880_v57 = vadd.f32 %v3103_v50, %v751_v29 }
 0x117   : > { %v6454_v54 = vmul.f32 %v13346_v22, %v5999_v47  ;;  %v6002_v56 = vld [vmem:[#allocation2 + $0x718] sm:$0xff]  ;;  %v5104_v58 = vadd.f32 %v3999_v51, %v975_v34  ;;  %v6687_v59 = vadd.f32 %v13351_v25, %v6232_v44  ;;  %v6233_v61 = vmul.f32 %v13346_v22, %v5778_v55  ;;  %v5776_v63 = vld [vmem:[#allocation2 + $0x8] sm:$0xff]  ;;  %5331 = vst.msk [vmem:[#allocation2 + $0x38] sm:$0xff] %vm297_vm0, %v4882_v48  ;;  %v11999_v24 = vld [vmem:[%s12299_s21 + $0x1e0] sm:$0xff]  }
 0x118   : > { %v6911_v60 = vadd.f32 %v13351_v25, %v6456_v45  ;;  %v6457_v62 = vmul.f32 %v13346_v22, %v6002_v56  ;;  %v6000_v0 = vld [vmem:[#allocation2 + $0x708] sm:$0xff]  ;;  %5555 = vst.msk [vmem:[#allocation2 + $0x738] sm:$0xff] %vm297_vm0, %v5106_v49  ;;  %11461 = vmatmul.mubr.bf16.gmra.mrb[112].mxu0 %v11993_v35  ;;  %v6685_v1 = vadd.f32 %v13351_v25, %v6230_v53  ;;  %5329 = vst.msk [vmem:[#allocation2 + $0x28] sm:$0xff] %vm297_vm0, %v4880_v57  ;;  %v12000_v42 = vld [vmem:[%s12299_s21 + $0x560] sm:$0xff]  }
 0x119   : > { %v6909_v2 = vadd.f32 %v13351_v25, %v6454_v54  ;;  %v6231_v3 = vmul.f32 %v13346_v22, %v5776_v63  ;;  %v6455_v4 = vmul.f32 %v13346_v22, %v6000_v0  ;;  %5553 = vst.msk [vmem:[#allocation2 + $0x728] sm:$0xff] %vm297_vm0, %v5104_v58  ;;  %11685 = vmatmul.mubr.bf16.gmra.mrb[112].mxu1 %v11994_v36  ;;  %v7135_v5 = vmax.f32 %v6687_v59, 0.0  ;;  %v756_v59 = vld [vmem:[#allocation2 + $0x50] sm:$0xff] }
 0x11a   : > { %v7359_v6 = vmax.f32 %v6911_v60, 0.0  ;;  %v6688_v7 = vadd.f32 %v13351_v25, %v6233_v61  ;;  %v6912_v8 = vadd.f32 %v13351_v25, %v6457_v62  ;;  %11464 = vmatprep.mubr.bf16.mxu0 %v11995_v43  ;;  %11688 = vmatprep.mubr.bf16.mxu1 %v11996_v52  ;;  %v7133_v9 = vmax.f32 %v6685_v1, 0.0  ;;  %v13386_v13 = vpop.f32.mrb[8].mxu0  ;;  %v13388_v14 = vpop.f32.mrb[8].mxu1  ;;  %v980_v0 = vld [vmem:[#allocation2 + $0x750] sm:$0xff]  ;;  %v754_v1 = vld [vmem:[#allocation2 + $0x40] sm:$0xff] }
 0x11b   : > { %v7357_v10 = vmax.f32 %v6909_v2, 0.0  ;;  %v6686_v11 = vadd.f32 %v13351_v25, %v6231_v3  ;;  %v6910_v12 = vadd.f32 %v13351_v25, %v6455_v4  ;;  %v10653_v16 = vpack.c.bf16 %v7135_v5, %v7135_v5  ;;  %v13391_v20 = vpop.f32.mrb[9].mxu0  ;;  %v13393_v21 = vpop.f32.mrb[9].mxu1  ;;  %v978_v2 = vld [vmem:[#allocation2 + $0x740] sm:$0xff] }
 0x11c   : > { %v10877_v17 = vpack.c.bf16 %v7359_v6, %v7359_v6  ;;  %v7136_v18 = vmax.f32 %v6688_v7, 0.0  ;;  %v7360_v19 = vmax.f32 %v6912_v8, 0.0  ;;  %v10651_v26 = vpack.c.bf16 %v7133_v9, %v7133_v9  ;;  %v5781_v30 = vld [vmem:[#allocation2 + $0x30] sm:$0xff]  ;;  %v13397_v32 = vpop.f32.mrb[10].mxu0  ;;  %v13399_v33 = vpop.f32.mrb[10].mxu1  ;;  %v757_v7 = vld [vmem:[#allocation2 + $0x58] sm:$0xff] }
 0x11d   : > { %v10875_v27 = vpack.c.bf16 %v7357_v10, %v7357_v10  ;;  %v7134_v28 = vmax.f32 %v6686_v11, 0.0  ;;  %v7358_v29 = vmax.f32 %v6910_v12, 0.0  ;;  %v6005_v31 = vld [vmem:[#allocation2 + $0x730] sm:$0xff]  ;;  %9376 = vst.msk [vmem:[%s13402_s14 + $0x8] sm:$0xf] %vm9373_vm1, %v10653_v16  ;;  %v6236_v36 = vmul.f32 %v13346_v22, %v5781_v30  ;;  %v5779_v38 = vld [vmem:[#allocation2 + $0x20] sm:$0xff] }
 0x11e   : > { %9600 = vst.msk [vmem:[%s13402_s14 + $0x388] sm:$0xf] %vm9373_vm1, %v10877_v17  ;;  %v10654_v34 = vpack.c.bf16 %v7136_v18, %v7136_v18  ;;  %v10878_v35 = vpack.c.bf16 %v7360_v19, %v7360_v19  ;;  %v6460_v37 = vmul.f32 %v13346_v22, %v6005_v31  ;;  %v6003_v39 = vld [vmem:[#allocation2 + $0x720] sm:$0xff]  ;;  %v13410_v40 = vpop.f32.mrb[11].mxu0  ;;  %v13412_v41 = vpop.f32.mrb[11].mxu1  ;;  %v6234_v45 = vmul.f32 %v13346_v22, %v5779_v38  ;;  %v5782_v47 = vld [vmem:[#allocation2 + $0x38] sm:$0xff] }
 0x11f   : > { %9374 = vst.msk [vmem:[%s13402_s14] sm:$0xf] %vm9373_vm1, %v10651_v26  ;;  %9598 = vst.msk [vmem:[%s13402_s14 + $0x380] sm:$0xf] %vm9373_vm1, %v10875_v27  ;;  %v10652_v43 = vpack.c.bf16 %v7134_v28, %v7134_v28  ;;  %v10876_v44 = vpack.c.bf16 %v7358_v29, %v7358_v29  ;;  %v6458_v46 = vmul.f32 %v13346_v22, %v6003_v39  ;;  %v6006_v48 = vld [vmem:[#allocation2 + $0x738] sm:$0xff]  ;;  %v5780_v53 = vld [vmem:[#allocation2 + $0x28] sm:$0xff] }
 0x120   : > { %9377 = vst.msk [vmem:[%s13402_s14 + $0xc] sm:$0xf] %vm9373_vm1, %v10654_v34  ;;  %9601 = vst.msk [vmem:[%s13402_s14 + $0x38c] sm:$0xf] %vm9373_vm1, %v10878_v35  ;;  %v6691_v49 = vadd.f32 %v13351_v25, %v6236_v36  ;;  %v6915_v50 = vadd.f32 %v13351_v25, %v6460_v37  ;;  %v6237_v51 = vmul.f32 %v13346_v22, %v5782_v47  ;;  %v6004_v54 = vld [vmem:[#allocation2 + $0x728] sm:$0xff]  ;;  %11465 = vmatmul.mubr.bf16.gmra.mrb[116].mxu0 %v11997_v15  ;;  %v981_v8 = vld [vmem:[#allocation2 + $0x758] sm:$0xff] }
 0x121   : > { %v6461_v52 = vmul.f32 %v13346_v22, %v6006_v48  ;;  %9375 = vst.msk [vmem:[%s13402_s14 + $0x4] sm:$0xf] %vm9373_vm1, %v10652_v43  ;;  %9599 = vst.msk [vmem:[%s13402_s14 + $0x384] sm:$0xf] %vm9373_vm1, %v10876_v44  ;;  %v6689_v55 = vadd.f32 %v13351_v25, %v6234_v45  ;;  %v6913_v56 = vadd.f32 %v13351_v25, %v6458_v46  ;;  %11689 = vmatmul.mubr.bf16.gmra.mrb[116].mxu1 %v11998_v23  ;;  %v755_v9 = vld [vmem:[#allocation2 + $0x48] sm:$0xff]  ;;  %v760_v19 = vld [vmem:[#allocation2 + $0x70] sm:$0xff] }
 0x122   : > { %v6235_v57 = vmul.f32 %v13346_v22, %v5780_v53  ;;  %v6459_v58 = vmul.f32 %v13346_v22, %v6004_v54  ;;  %v7139_v60 = vmax.f32 %v6691_v49, 0.0  ;;  %v7363_v61 = vmax.f32 %v6915_v50, 0.0  ;;  %11468 = vmatprep.mubr.bf16.mxu0 %v11999_v24  ;;  %11692 = vmatprep.mubr.bf16.mxu1 %v12000_v42  ;;  %v979_v10 = vld [vmem:[#allocation2 + $0x748] sm:$0xff]  ;;  %v11362_v11 = vpop.f32.mrb[12].mxu0  ;;  %v11586_v12 = vpop.f32.mrb[12].mxu1  ;;  %v984_v23 = vld [vmem:[#allocation2 + $0x770] sm:$0xff] }
 0x123   : > { %v6692_v62 = vadd.f32 %v13351_v25, %v6237_v51  ;;  %v6916_v63 = vadd.f32 %v13351_v25, %v6461_v52  ;;  %v7137_v3 = vmax.f32 %v6689_v55, 0.0  ;;  %v7361_v4 = vmax.f32 %v6913_v56, 0.0  ;;  %v758_v24 = vld [vmem:[#allocation2 + $0x60] sm:$0xff]  ;;  %v3132_v26 = vpop.f32.mrb[13].mxu0  ;;  %v4028_v27 = vpop.f32.mrb[13].mxu1  ;;  %v12001_v28 = vld [vmem:[%s12299_s21 + $0x1e8] sm:$0xff]  }
 0x124   : > { %v6690_v5 = vadd.f32 %v13351_v25, %v6235_v57  ;;  %v6914_v6 = vadd.f32 %v13351_v25, %v6459_v58  ;;  %v10657_v15 = vpack.c.bf16 %v7139_v60, %v7139_v60  ;;  %v10881_v16 = vpack.c.bf16 %v7363_v61, %v7363_v61  ;;  %v982_v35 = vld [vmem:[#allocation2 + $0x760] sm:$0xff]  ;;  %v11363_v36 = vpop.f32.mrb[14].mxu0  ;;  %v11587_v37 = vpop.f32.mrb[14].mxu1  ;;  %v12002_v38 = vld [vmem:[%s12299_s21 + $0x568] sm:$0xff]   ;;  %v761_v45 = vld [vmem:[#allocation2 + $0x78] sm:$0xff] }
 0x125   : > { %v7140_v17 = vmax.f32 %v6692_v62, 0.0  ;;  %v7364_v18 = vmax.f32 %v6916_v63, 0.0  ;;  %v10655_v29 = vpack.c.bf16 %v7137_v3, %v7137_v3  ;;  %v10879_v30 = vpack.c.bf16 %v7361_v4, %v7361_v4  ;;  %v985_v46 = vld [vmem:[#allocation2 + $0x778] sm:$0xff]  ;;  %v3135_v47 = vpop.f32.mrb[15].mxu0  ;;  %v4031_v48 = vpop.f32.mrb[15].mxu1  ;;  %v12003_v49 = vld [vmem:[%s12299_s21 + $0x1f0] sm:$0xff]  }
 0x126   : > { %v7138_v31 = vmax.f32 %v6690_v5, 0.0  ;;  %v7362_v34 = vmax.f32 %v6914_v6, 0.0  ;;  %9380 = vst.msk [vmem:[%s13402_s14 + $0x18] sm:$0xf] %vm9373_vm1, %v10657_v15  ;;  %9604 = vst.msk [vmem:[%s13402_s14 + $0x398] sm:$0xf] %vm9373_vm1, %v10881_v16  ;;  %v4885_v43 = vadd.f32 %v13386_v13, %v756_v59  ;;  %v5109_v44 = vadd.f32 %v13388_v14, %v980_v0 }
 0x127   : > { %v10658_v39 = vpack.c.bf16 %v7140_v17, %v7140_v17  ;;  %v10882_v42 = vpack.c.bf16 %v7364_v18, %v7364_v18  ;;  %9378 = vst.msk [vmem:[%s13402_s14 + $0x10] sm:$0xf] %vm9373_vm1, %v10655_v29  ;;  %9602 = vst.msk [vmem:[%s13402_s14 + $0x390] sm:$0xf] %vm9373_vm1, %v10879_v30  ;;  %v4883_v52 = vadd.f32 %v13391_v20, %v754_v1  ;;  %v759_v53 = vld [vmem:[#allocation2 + $0x68] sm:$0xff]  ;;  %v12004_v54 = vld [vmem:[%s12299_s21 + $0x570] sm:$0xff]  }
 0x128   : > { %v10656_v50 = vpack.c.bf16 %v7138_v31, %v7138_v31  ;;  %v10880_v51 = vpack.c.bf16 %v7362_v34, %v7362_v34  ;;  %v5107_v13 = vadd.f32 %v13393_v21, %v978_v2  ;;  %v983_v14 = vld [vmem:[#allocation2 + $0x768] sm:$0xff]  ;;  %5334 = vst.msk [vmem:[#allocation2 + $0x50] sm:$0xff] %vm297_vm0, %v4885_v43  ;;  %5558 = vst.msk [vmem:[#allocation2 + $0x750] sm:$0xff] %vm297_vm0, %v5109_v44  ;;  %11469 = vmatmul.mubr.bf16.gmra.mrb[120].mxu0 %v12001_v28  ;;  %v762_v63 = vld [vmem:[#allocation2 + $0x80] sm:$0xff] }
 0x129   : > { %9381 = vst.msk [vmem:[%s13402_s14 + $0x1c] sm:$0xf] %vm9373_vm1, %v10658_v39  ;;  %9605 = vst.msk [vmem:[%s13402_s14 + $0x39c] sm:$0xf] %vm9373_vm1, %v10882_v42  ;;  %v4886_v55 = vadd.f32 %v13397_v32, %v757_v7  ;;  %v5110_v56 = vadd.f32 %v13399_v33, %v981_v8  ;;  %v4884_v57 = vadd.f32 %v13410_v40, %v755_v9  ;;  %11693 = vmatmul.mubr.bf16.gmra.mrb[120].mxu1 %v12002_v38  ;;  %v764_v32 = vld [vmem:[#allocation2 + $0x90] sm:$0xff]  ;;  %v986_v0 = vld [vmem:[#allocation2 + $0x780] sm:$0xff] }
 0x12a   : > { %v5108_v20 = vadd.f32 %v13412_v41, %v979_v10  ;;  %9379 = vst.msk [vmem:[%s13402_s14 + $0x14] sm:$0xf] %vm9373_vm1, %v10656_v50  ;;  %9603 = vst.msk [vmem:[%s13402_s14 + $0x394] sm:$0xf] %vm9373_vm1, %v10880_v51  ;;  %v4889_v21 = vadd.f32 %v11362_v11, %v760_v19  ;;  %v5113_v58 = vadd.f32 %v11586_v12, %v984_v23  ;;  %v988_v33 = vld [vmem:[#allocation2 + $0x790] sm:$0xff]  ;;  %11472 = vmatprep.mubr.bf16.mxu0 %v12003_v49  ;;  %v11366_v1 = vpop.f32.mrb[16].mxu0 }
 0x12b   : > { %5332 = vst.msk [vmem:[#allocation2 + $0x40] sm:$0xff] %vm297_vm0, %v4883_v52  ;;  %5556 = vst.msk [vmem:[#allocation2 + $0x740] sm:$0xff] %vm297_vm0, %v5107_v13  ;;  %v4887_v59 = vadd.f32 %v3132_v26, %v758_v24  ;;  %v5111_v60 = vadd.f32 %v4028_v27, %v982_v35  ;;  %v4890_v40 = vadd.f32 %v11363_v36, %v761_v45  ;;  %v11590_v2 = vpop.f32.mrb[16].mxu1  ;;  %v765_v3 = vld [vmem:[#allocation2 + $0x98] sm:$0xff]  ;;  %11696 = vmatprep.mubr.bf16.mxu1 %v12004_v54  ;;  %v3148_v7 = vpop.f32.mrb[17].mxu0  ;;  %v763_v9 = vld [vmem:[#allocation2 + $0x88] sm:$0xff] }
 0x12c   : > { %5335 = vst.msk [vmem:[#allocation2 + $0x58] sm:$0xff] %vm297_vm0, %v4886_v55  ;;  %5559 = vst.msk [vmem:[#allocation2 + $0x758] sm:$0xff] %vm297_vm0, %v5110_v56  ;;  %v5114_v41 = vadd.f32 %v11587_v37, %v985_v46  ;;  %v4888_v61 = vadd.f32 %v3135_v47, %v759_v53  ;;  %v5112_v62 = vadd.f32 %v4031_v48, %v983_v14  ;;  %v989_v4 = vld [vmem:[#allocation2 + $0x798] sm:$0xff]  ;;  %v4044_v8 = vpop.f32.mrb[17].mxu1  ;;  %v987_v10 = vld [vmem:[#allocation2 + $0x788] sm:$0xff]  ;;  %v11367_v16 = vpop.f32.mrb[18].mxu0 }
 0x12d   : > { %5333 = vst.msk [vmem:[#allocation2 + $0x48] sm:$0xff] %vm297_vm0, %v4884_v57  ;;  %5557 = vst.msk [vmem:[#allocation2 + $0x748] sm:$0xff] %vm297_vm0, %v5108_v20  ;;  %v4893_v5 = vadd.f32 %v11366_v1, %v764_v32  ;;  %v5117_v6 = vadd.f32 %v11590_v2, %v988_v33  ;;  %v12005_v11 = vld [vmem:[%s12299_s21 + $0x1f8] sm:$0xff]   ;;  %v4891_v12 = vadd.f32 %v3148_v7, %v762_v63  ;;  %v11591_v17 = vpop.f32.mrb[18].mxu1  ;;  %v12007_v19 = vld [vmem:[%s12299_s21 + $0x200] sm:$0xff]   ;;  %v3151_v26 = vpop.f32.mrb[19].mxu0 }
 0x12e   : > { %5338 = vst.msk [vmem:[#allocation2 + $0x70] sm:$0xff] %vm297_vm0, %v4889_v21  ;;  %5562 = vst.msk [vmem:[#allocation2 + $0x770] sm:$0xff] %vm297_vm0, %v5113_v58  ;;  %v5115_v15 = vadd.f32 %v4044_v8, %v986_v0  ;;  %v12006_v18 = vld [vmem:[%s12299_s21 + $0x578] sm:$0xff]   ;;  %v4894_v23 = vadd.f32 %v11367_v16, %v765_v3  ;;  %v5118_v24 = vadd.f32 %v11591_v17, %v989_v4  ;;  %v4047_v27 = vpop.f32.mrb[19].mxu1  ;;  %v12008_v28 = vld [vmem:[%s12299_s21 + $0x580] sm:$0xff]  }
 0x12f   : > { %5336 = vst.msk [vmem:[#allocation2 + $0x60] sm:$0xff] %vm297_vm0, %v4887_v59  ;;  %5560 = vst.msk [vmem:[#allocation2 + $0x760] sm:$0xff] %vm297_vm0, %v5111_v60  ;;  %v5785_v29 = vld [vmem:[#allocation2 + $0x50] sm:$0xff]  ;;  %v4892_v31 = vadd.f32 %v3151_v26, %v763_v9  ;;  %v5116_v34 = vadd.f32 %v4047_v27, %v987_v10  ;;  %v12009_v58 = vld [vmem:[%s12299_s21 + $0x208] sm:$0xff]  }
 0x130   : > { %5339 = vst.msk [vmem:[#allocation2 + $0x78] sm:$0xff] %vm297_vm0, %v4890_v40  ;;  %5563 = vst.msk [vmem:[#allocation2 + $0x778] sm:$0xff] %vm297_vm0, %v5114_v41  ;;  %v6009_v30 = vld [vmem:[#allocation2 + $0x750] sm:$0xff]  ;;  %v6240_v35 = vmul.f32 %v13346_v22, %v5785_v29  ;;  %11473 = vmatmul.mubr.bf16.gmra.mrb[124].mxu0 %v12005_v11  ;;  %v12010_v59 = vld [vmem:[%s12299_s21 + $0x588] sm:$0xff]  }
 0x131   : > { %5337 = vst.msk [vmem:[#allocation2 + $0x68] sm:$0xff] %vm297_vm0, %v4888_v61  ;;  %5561 = vst.msk [vmem:[#allocation2 + $0x768] sm:$0xff] %vm297_vm0, %v5112_v62  ;;  %v6464_v36 = vmul.f32 %v13346_v22, %v6009_v30  ;;  %11697 = vmatmul.mubr.bf16.gmra.mrb[124].mxu1 %v12006_v18  ;;  %11476 = vmatprep.mubr.bf16.mxu0 %v12007_v19  ;;  %v12011_v60 = vld [vmem:[%s12299_s21 + $0x210] sm:$0xff]  }
 0x132   : > { %5342 = vst.msk [vmem:[#allocation2 + $0x90] sm:$0xff] %vm297_vm0, %v4893_v5  ;;  %5566 = vst.msk [vmem:[#allocation2 + $0x790] sm:$0xff] %vm297_vm0, %v5117_v6  ;;  %v5783_v37 = vld [vmem:[#allocation2 + $0x40] sm:$0xff]  ;;  %v6695_v46 = vadd.f32 %v13351_v25, %v6240_v35  ;;  %11700 = vmatprep.mubr.bf16.mxu1 %v12008_v28  ;;  %v13509_v14 = vpop.f32.mrb[20].mxu0  ;;  %v13511_v54 = vpop.f32.mrb[20].mxu1  ;;  %v12012_v18 = vld [vmem:[%s12299_s21 + $0x590] sm:$0xff]  }
 0x133   : > { %5340 = vst.msk [vmem:[#allocation2 + $0x80] sm:$0xff] %vm297_vm0, %v4891_v12  ;;  %5564 = vst.msk [vmem:[#allocation2 + $0x780] sm:$0xff] %vm297_vm0, %v5115_v15  ;;  %v6007_v38 = vld [vmem:[#allocation2 + $0x740] sm:$0xff]  ;;  %v6238_v39 = vmul.f32 %v13346_v22, %v5783_v37  ;;  %v5786_v43 = vld [vmem:[#allocation2 + $0x58] sm:$0xff]  ;;  %v6919_v47 = vadd.f32 %v13351_v25, %v6464_v36  ;;  %v13515_v21 = vpop.f32.mrb[21].mxu0  ;;  %v13522_v63 = vpop.f32.mrb[21].mxu1 }
 0x134   : > { %5343 = vst.msk [vmem:[#allocation2 + $0x98] sm:$0xff] %vm297_vm0, %v4894_v23  ;;  %5567 = vst.msk [vmem:[#allocation2 + $0x798] sm:$0xff] %vm297_vm0, %v5118_v24  ;;  %v6462_v42 = vmul.f32 %v13346_v22, %v6007_v38  ;;  %v6010_v44 = vld [vmem:[#allocation2 + $0x758] sm:$0xff]  ;;  %v5784_v45 = vld [vmem:[#allocation2 + $0x48] sm:$0xff]  ;;  %v6241_v48 = vmul.f32 %v13346_v22, %v5786_v43  ;;  %v7143_v55 = vmax.f32 %v6695_v46, 0.0  ;;  %v13524_v0 = vpop.f32.mrb[22].mxu0 }
 0x135   : > { %5341 = vst.msk [vmem:[#allocation2 + $0x88] sm:$0xff] %vm297_vm0, %v4892_v31  ;;  %5565 = vst.msk [vmem:[#allocation2 + $0x788] sm:$0xff] %vm297_vm0, %v5116_v34  ;;  %v6465_v49 = vmul.f32 %v13346_v22, %v6010_v44  ;;  %v6008_v50 = vld [vmem:[#allocation2 + $0x748] sm:$0xff]  ;;  %v6693_v51 = vadd.f32 %v13351_v25, %v6238_v39  ;;  %v6239_v13 = vmul.f32 %v13346_v22, %v5784_v45  ;;  %v7367_v56 = vmax.f32 %v6919_v47, 0.0  ;;  %v5789_v61 = vld [vmem:[#allocation2 + $0x70] sm:$0xff]  ;;  %v13526_v7 = vpop.f32.mrb[22].mxu1 }
 0x136   : > { %v6917_v52 = vadd.f32 %v13351_v25, %v6462_v42  ;;  %v6463_v53 = vmul.f32 %v13346_v22, %v6008_v50  ;;  %v6696_v57 = vadd.f32 %v13351_v25, %v6241_v48  ;;  %v6013_v62 = vld [vmem:[#allocation2 + $0x770] sm:$0xff]  ;;  %v10661_v1 = vpack.c.bf16 %v7143_v55, %v7143_v55  ;;  %v5787_v5 = vld [vmem:[#allocation2 + $0x60] sm:$0xff]  ;;  %v13528_v8 = vpop.f32.mrb[23].mxu0  ;;  %v13530_v17 = vpop.f32.mrb[23].mxu1  ;;  %v12013_v47 = vld [vmem:[%s12299_s21 + $0x218] sm:$0xff]  }
 0x137   : > { %v6920_v20 = vadd.f32 %v13351_v25, %v6465_v49  ;;  %v7141_v32 = vmax.f32 %v6693_v51, 0.0  ;;  %v6694_v40 = vadd.f32 %v13351_v25, %v6239_v13  ;;  %v10885_v2 = vpack.c.bf16 %v7367_v56, %v7367_v56  ;;  %v6011_v6 = vld [vmem:[#allocation2 + $0x760] sm:$0xff]  ;;  %v5790_v15 = vld [vmem:[#allocation2 + $0x78] sm:$0xff] }
 0x138   : > { %v7365_v33 = vmax.f32 %v6917_v52, 0.0  ;;  %v6918_v41 = vadd.f32 %v13351_v25, %v6463_v53  ;;  %v7144_v3 = vmax.f32 %v6696_v57, 0.0  ;;  %v6014_v16 = vld [vmem:[#allocation2 + $0x778] sm:$0xff]  ;;  %9384 = vst.msk [vmem:[%s13402_s14 + $0x28] sm:$0xf] %vm9373_vm1, %v10661_v1  ;;  %v6244_v24 = vmul.f32 %v13346_v22, %v5789_v61  ;;  %v5788_v27 = vld [vmem:[#allocation2 + $0x68] sm:$0xff]  ;;  %11477 = vmatmul.mubr.bf16.gmra.mrb[128].mxu0 %v12009_v58 }
 0x139   : > { %v7368_v4 = vmax.f32 %v6920_v20, 0.0  ;;  %v10659_v9 = vpack.c.bf16 %v7141_v32, %v7141_v32  ;;  %v7142_v11 = vmax.f32 %v6694_v40, 0.0  ;;  %9608 = vst.msk [vmem:[%s13402_s14 + $0x3a8] sm:$0xf] %vm9373_vm1, %v10885_v2  ;;  %v6468_v26 = vmul.f32 %v13346_v22, %v6013_v62  ;;  %v6012_v28 = vld [vmem:[#allocation2 + $0x768] sm:$0xff]  ;;  %11701 = vmatmul.mubr.bf16.gmra.mrb[128].mxu1 %v12010_v59  ;;  %11480 = vmatprep.mubr.bf16.mxu0 %v12011_v60  ;;  %v12014_v53 = vld [vmem:[%s12299_s21 + $0x598] sm:$0xff]  }
 0x13a   : > { %v10883_v10 = vpack.c.bf16 %v7365_v33, %v7365_v33  ;;  %v7366_v12 = vmax.f32 %v6918_v41, 0.0  ;;  %v10662_v19 = vpack.c.bf16 %v7144_v3, %v7144_v3  ;;  %v6242_v31 = vmul.f32 %v13346_v22, %v5787_v5  ;;  %v13561_v45 = vpop.f32.mrb[24].mxu0  ;;  %v13563_v46 = vpop.f32.mrb[24].mxu1  ;;  %11704 = vmatprep.mubr.bf16.mxu1 %v12012_v18  ;;  %v12015_v55 = vld [vmem:[%s12299_s21 + $0x220] sm:$0xff]   ;;  %v5793_v59 = vld [vmem:[#allocation2 + $0x90] sm:$0xff] }
 0x13b   : > { %v10886_v23 = vpack.c.bf16 %v7368_v4, %v7368_v4  ;;  %9382 = vst.msk [vmem:[%s13402_s14 + $0x20] sm:$0xf] %vm9373_vm1, %v10659_v9  ;;  %v10660_v29 = vpack.c.bf16 %v7142_v11, %v7142_v11  ;;  %v6466_v34 = vmul.f32 %v13346_v22, %v6011_v6  ;;  %v6699_v35 = vadd.f32 %v13351_v25, %v6244_v24  ;;  %v13568_v52 = vpop.f32.mrb[25].mxu0  ;;  %v13570_v13 = vpop.f32.mrb[25].mxu1  ;;  %v6017_v60 = vld [vmem:[#allocation2 + $0x790] sm:$0xff]  ;;  %v5791_v1 = vld [vmem:[#allocation2 + $0x80] sm:$0xff] }
 0x13c   : > { %9606 = vst.msk [vmem:[%s13402_s14 + $0x3a0] sm:$0xf] %vm9373_vm1, %v10883_v10  ;;  %v10884_v30 = vpack.c.bf16 %v7366_v12, %v7366_v12  ;;  %9385 = vst.msk [vmem:[%s13402_s14 + $0x2c] sm:$0xf] %vm9373_vm1, %v10662_v19  ;;  %v6923_v36 = vadd.f32 %v13351_v25, %v6468_v26  ;;  %v6245_v37 = vmul.f32 %v13346_v22, %v5790_v15  ;;  %v13576_v32 = vpop.f32.mrb[26].mxu0  ;;  %v13578_v33 = vpop.f32.mrb[26].mxu1 }
 0x13d   : > { %9609 = vst.msk [vmem:[%s13402_s14 + $0x3ac] sm:$0xf] %vm9373_vm1, %v10886_v23  ;;  %v6469_v38 = vmul.f32 %v13346_v22, %v6014_v16  ;;  %9383 = vst.msk [vmem:[%s13402_s14 + $0x24] sm:$0xf] %vm9373_vm1, %v10660_v29  ;;  %v6697_v39 = vadd.f32 %v13351_v25, %v6242_v31  ;;  %v6921_v42 = vadd.f32 %v13351_v25, %v6466_v34  ;;  %v7147_v48 = vmax.f32 %v6699_v35, 0.0  ;;  %v6015_v2 = vld [vmem:[#allocation2 + $0x780] sm:$0xff] }
 0x13e   : > { %9607 = vst.msk [vmem:[%s13402_s14 + $0x3a4] sm:$0xf] %vm9373_vm1, %v10884_v30  ;;  %v6243_v43 = vmul.f32 %v13346_v22, %v5788_v27  ;;  %v6467_v44 = vmul.f32 %v13346_v22, %v6012_v28  ;;  %v7371_v49 = vmax.f32 %v6923_v36, 0.0  ;;  %v6700_v50 = vadd.f32 %v13351_v25, %v6245_v37  ;;  %v13580_v3 = vpop.f32.mrb[27].mxu0  ;;  %v13582_v4 = vpop.f32.mrb[27].mxu1  ;;  %v5794_v11 = vld [vmem:[#allocation2 + $0x98] sm:$0xff] }
 0x13f   : > { %v6924_v51 = vadd.f32 %v13351_v25, %v6469_v38  ;;  %v7145_v56 = vmax.f32 %v6697_v39, 0.0  ;;  %v7369_v57 = vmax.f32 %v6921_v42, 0.0  ;;  %v10665_v40 = vpack.c.bf16 %v7147_v48, %v7147_v48  ;;  %v6018_v12 = vld [vmem:[#allocation2 + $0x798] sm:$0xff]  ;;  %v12016_v15 = vld [vmem:[%s12299_s21 + $0x5a0] sm:$0xff]   ;;  %v5792_v24 = vld [vmem:[#allocation2 + $0x88] sm:$0xff] }
 0x140   : > { %v6698_v20 = vadd.f32 %v13351_v25, %v6243_v43  ;;  %v6922_v58 = vadd.f32 %v13351_v25, %v6467_v44  ;;  %v10889_v41 = vpack.c.bf16 %v7371_v49, %v7371_v49  ;;  %v7148_v61 = vmax.f32 %v6700_v50, 0.0  ;;  %v6016_v26 = vld [vmem:[#allocation2 + $0x788] sm:$0xff]  ;;  %11481 = vmatmul.mubr.bf16.gmra.mrb[132].mxu0 %v12013_v47  ;;  %v768_v43 = vld [vmem:[#allocation2 + $0xb0] sm:$0xff] }
 0x141   : > { %v7372_v62 = vmax.f32 %v6924_v51, 0.0  ;;  %v10663_v5 = vpack.c.bf16 %v7145_v56, %v7145_v56  ;;  %v10887_v6 = vpack.c.bf16 %v7369_v57, %v7369_v57  ;;  %9388 = vst.msk [vmem:[%s13402_s14 + $0x38] sm:$0xf] %vm9373_vm1, %v10665_v40  ;;  %v6248_v19 = vmul.f32 %v13346_v22, %v5793_v59  ;;  %11705 = vmatmul.mubr.bf16.gmra.mrb[132].mxu1 %v12014_v53  ;;  %v992_v44 = vld [vmem:[#allocation2 + $0x7b0] sm:$0xff]  ;;  %v990_v56 = vld [vmem:[#allocation2 + $0x7a0] sm:$0xff] }
 0x142   : > { %v7146_v9 = vmax.f32 %v6698_v20, 0.0  ;;  %v7370_v10 = vmax.f32 %v6922_v58, 0.0  ;;  %9612 = vst.msk [vmem:[%s13402_s14 + $0x3b8] sm:$0xf] %vm9373_vm1, %v10889_v41  ;;  %v10666_v16 = vpack.c.bf16 %v7148_v61, %v7148_v61  ;;  %v6472_v23 = vmul.f32 %v13346_v22, %v6017_v60  ;;  %11484 = vmatprep.mubr.bf16.mxu0 %v12015_v55  ;;  %v13613_v47 = vpop.f32.mrb[28].mxu0  ;;  %v13615_v48 = vpop.f32.mrb[28].mxu1  ;;  %11708 = vmatprep.mubr.bf16.mxu1 %v12016_v15 }
 0x143   : > { %v10890_v18 = vpack.c.bf16 %v7372_v62, %v7372_v62  ;;  %9386 = vst.msk [vmem:[%s13402_s14 + $0x30] sm:$0xf] %vm9373_vm1, %v10663_v5  ;;  %9610 = vst.msk [vmem:[%s13402_s14 + $0x3b0] sm:$0xf] %vm9373_vm1, %v10887_v6  ;;  %v6246_v29 = vmul.f32 %v13346_v22, %v5791_v1  ;;  %v6470_v30 = vmul.f32 %v13346_v22, %v6015_v2  ;;  %v766_v55 = vld [vmem:[#allocation2 + $0xa0] sm:$0xff]  ;;  %v13619_v57 = vpop.f32.mrb[29].mxu0 }
 0x144   : > { %v10664_v27 = vpack.c.bf16 %v7146_v9, %v7146_v9  ;;  %v10888_v28 = vpack.c.bf16 %v7370_v10, %v7370_v10  ;;  %9389 = vst.msk [vmem:[%s13402_s14 + $0x3c] sm:$0xf] %vm9373_vm1, %v10666_v16  ;;  %v6703_v31 = vadd.f32 %v13351_v25, %v6248_v19  ;;  %v6927_v34 = vadd.f32 %v13351_v25, %v6472_v23  ;;  %v13621_v20 = vpop.f32.mrb[29].mxu1  ;;  %v769_v41 = vld [vmem:[#allocation2 + $0xb8] sm:$0xff]  ;;  %v767_v62 = vld [vmem:[#allocation2 + $0xa8] sm:$0xff]  ;;  %v13626_v2 = vpop.f32.mrb[30].mxu0 }
 0x145   : > { %9613 = vst.msk [vmem:[%s13402_s14 + $0x3bc] sm:$0xf] %vm9373_vm1, %v10890_v18  ;;  %v6249_v35 = vmul.f32 %v13346_v22, %v5794_v11  ;;  %v6473_v36 = vmul.f32 %v13346_v22, %v6018_v12  ;;  %v6701_v37 = vadd.f32 %v13351_v25, %v6246_v29  ;;  %v6925_v38 = vadd.f32 %v13351_v25, %v6470_v30  ;;  %v993_v61 = vld [vmem:[#allocation2 + $0x7b8] sm:$0xff]  ;;  %v991_v1 = vld [vmem:[#allocation2 + $0x7a8] sm:$0xff]  ;;  %v13628_v5 = vpop.f32.mrb[30].mxu1  ;;  %v772_v15 = vld [vmem:[#allocation2 + $0xd0] sm:$0xff] }
 0x146   : > { %9387 = vst.msk [vmem:[%s13402_s14 + $0x34] sm:$0xf] %vm9373_vm1, %v10664_v27  ;;  %9611 = vst.msk [vmem:[%s13402_s14 + $0x3b4] sm:$0xf] %vm9373_vm1, %v10888_v28  ;;  %v6247_v39 = vmul.f32 %v13346_v22, %v5792_v24  ;;  %v6471_v42 = vmul.f32 %v13346_v22, %v6016_v26  ;;  %v7151_v49 = vmax.f32 %v6703_v31, 0.0  ;;  %v7375_v50 = vmax.f32 %v6927_v34, 0.0 }
 0x147   : > { %v6704_v51 = vadd.f32 %v13351_v25, %v6249_v35  ;;  %v6928_v53 = vadd.f32 %v13351_v25, %v6473_v36  ;;  %v12017_v22 = vld [vmem:[%s12299_s21 + $0x228] sm:$0xff]   ;;  %v7149_v58 = vmax.f32 %v6701_v37, 0.0  ;;  %v7373_v59 = vmax.f32 %v6925_v38, 0.0  ;;  %v996_v16 = vld [vmem:[#allocation2 + $0x7d0] sm:$0xff]  ;;  %v994_v18 = vld [vmem:[#allocation2 + $0x7c0] sm:$0xff]  ;;  %v13631_v19 = vpop.f32.mrb[31].mxu0 }
 0x148   : > { %v6702_v60 = vadd.f32 %v13351_v25, %v6247_v39  ;;  %v6926_v40 = vadd.f32 %v13351_v25, %v6471_v42  ;;  %v12018_v6 = vld [vmem:[%s12299_s21 + $0x5a8] sm:$0xff]   ;;  %v10669_v9 = vpack.c.bf16 %v7151_v49, %v7151_v49  ;;  %v10893_v10 = vpack.c.bf16 %v7375_v50, %v7375_v50  ;;  %v770_v25 = vld [vmem:[#allocation2 + $0xc0] sm:$0xff]  ;;  %v13633_v23 = vpop.f32.mrb[31].mxu1  ;;  %v12019_v24 = vld [vmem:[%s12299_s21 + $0x230] sm:$0xff]   ;;  %11485 = vmatmul.mubr.bf16.gmra.mrb[136].mxu0 %v12017_v22 }
 0x149   : > { %v7152_v11 = vmax.f32 %v6704_v51, 0.0  ;;  %v7376_v12 = vmax.f32 %v6928_v53, 0.0  ;;  %v10667_v26 = vpack.c.bf16 %v7149_v58, %v7149_v58  ;;  %v10891_v27 = vpack.c.bf16 %v7373_v59, %v7373_v59  ;;  %v773_v30 = vld [vmem:[#allocation2 + $0xd8] sm:$0xff]  ;;  %v771_v34 = vld [vmem:[#allocation2 + $0xc8] sm:$0xff]  ;;  %v12020_v36 = vld [vmem:[%s12299_s21 + $0x5b0] sm:$0xff]   ;;  %11709 = vmatmul.mubr.bf16.gmra.mrb[136].mxu1 %v12018_v6  ;;  %11488 = vmatprep.mubr.bf16.mxu0 %v12019_v24 }
 0x14a   : > { %v7150_v28 = vmax.f32 %v6702_v60, 0.0  ;;  %v7374_v29 = vmax.f32 %v6926_v40, 0.0  ;;  %v997_v31 = vld [vmem:[#allocation2 + $0x7d8] sm:$0xff]  ;;  %v995_v35 = vld [vmem:[#allocation2 + $0x7c8] sm:$0xff]  ;;  %9392 = vst.msk [vmem:[%s13402_s14 + $0x48] sm:$0xf] %vm9373_vm1, %v10669_v9  ;;  %v4897_v39 = vadd.f32 %v13509_v14, %v768_v43  ;;  %v5121_v42 = vadd.f32 %v13511_v54, %v992_v44  ;;  %11712 = vmatprep.mubr.bf16.mxu1 %v12020_v36 }
 0x14b   : > { %9616 = vst.msk [vmem:[%s13402_s14 + $0x3c8] sm:$0xf] %vm9373_vm1, %v10893_v10  ;;  %v10670_v37 = vpack.c.bf16 %v7152_v11, %v7152_v11  ;;  %v10894_v38 = vpack.c.bf16 %v7376_v12, %v7376_v12  ;;  %v776_v49 = vld [vmem:[#allocation2 + $0xf0] sm:$0xff]  ;;  %v774_v51 = vld [vmem:[#allocation2 + $0xe0] sm:$0xff]  ;;  %9390 = vst.msk [vmem:[%s13402_s14 + $0x40] sm:$0xf] %vm9373_vm1, %v10667_v26  ;;  %v4895_v60 = vadd.f32 %v13515_v21, %v766_v55 }
 0x14c   : > { %v1000_v50 = vld [vmem:[#allocation2 + $0x7f0] sm:$0xff]  ;;  %v998_v53 = vld [vmem:[#allocation2 + $0x7e0] sm:$0xff]  ;;  %9614 = vst.msk [vmem:[%s13402_s14 + $0x3c0] sm:$0xf] %vm9373_vm1, %v10891_v27  ;;  %v10668_v58 = vpack.c.bf16 %v7150_v28, %v7150_v28  ;;  %v10892_v59 = vpack.c.bf16 %v7374_v29, %v7374_v29  ;;  %v5119_v40 = vadd.f32 %v13522_v63, %v990_v56  ;;  %v777_v14 = vld [vmem:[#allocation2 + $0xf8] sm:$0xff]  ;;  %v4898_v44 = vadd.f32 %v13524_v0, %v769_v41  ;;  %v11382_v41 = vpop.f32.mrb[32].mxu0 }
 0x14d   : > { %v1001_v54 = vld [vmem:[#allocation2 + $0x7f8] sm:$0xff]  ;;  %v775_v43 = vld [vmem:[#allocation2 + $0xe8] sm:$0xff]  ;;  %9393 = vst.msk [vmem:[%s13402_s14 + $0x4c] sm:$0xf] %vm9373_vm1, %v10670_v37  ;;  %9617 = vst.msk [vmem:[%s13402_s14 + $0x3cc] sm:$0xf] %vm9373_vm1, %v10894_v38  ;;  %v5122_v21 = vadd.f32 %v13526_v7, %v993_v61  ;;  %v4896_v63 = vadd.f32 %v13528_v8, %v767_v62  ;;  %v5120_v55 = vadd.f32 %v13530_v17, %v991_v1 }
 0x14e   : > { %5346 = vst.msk [vmem:[#allocation2 + $0xb0] sm:$0xff] %vm297_vm0, %v4897_v39  ;;  %5570 = vst.msk [vmem:[#allocation2 + $0x7b0] sm:$0xff] %vm297_vm0, %v5121_v42  ;;  %v999_v56 = vld [vmem:[#allocation2 + $0x7e8] sm:$0xff]  ;;  %v780_v22 = vld [vmem:[#allocation2 + $0x110] sm:$0xff]  ;;  %v4901_v0 = vadd.f32 %v13561_v45, %v772_v15  ;;  %v5125_v7 = vadd.f32 %v13563_v46, %v996_v16  ;;  %v4899_v8 = vadd.f32 %v13568_v52, %v770_v25  ;;  %v11606_v61 = vpop.f32.mrb[32].mxu1  ;;  %v3212_v10 = vpop.f32.mrb[33].mxu0 }
 0x14f   : > { %v1004_v9 = vld [vmem:[#allocation2 + $0x810] sm:$0xff]  ;;  %9391 = vst.msk [vmem:[%s13402_s14 + $0x44] sm:$0xf] %vm9373_vm1, %v10668_v58  ;;  %9615 = vst.msk [vmem:[%s13402_s14 + $0x3c4] sm:$0xf] %vm9373_vm1, %v10892_v59  ;;  %v5123_v17 = vadd.f32 %v13570_v13, %v994_v18  ;;  %v778_v62 = vld [vmem:[#allocation2 + $0x100] sm:$0xff]  ;;  %v4902_v45 = vadd.f32 %v13576_v32, %v773_v30  ;;  %v5126_v46 = vadd.f32 %v13578_v33, %v997_v31 }
 0x150   : > { %5344 = vst.msk [vmem:[#allocation2 + $0xa0] sm:$0xff] %vm297_vm0, %v4895_v60  ;;  %5568 = vst.msk [vmem:[#allocation2 + $0x7a0] sm:$0xff] %vm297_vm0, %v5119_v40  ;;  %v1002_v1 = vld [vmem:[#allocation2 + $0x800] sm:$0xff]  ;;  %v781_v6 = vld [vmem:[#allocation2 + $0x118] sm:$0xff]  ;;  %v4900_v52 = vadd.f32 %v13580_v3, %v771_v34  ;;  %v5124_v13 = vadd.f32 %v13582_v4, %v995_v35  ;;  %v4108_v11 = vpop.f32.mrb[33].mxu1  ;;  %v4905_v32 = vadd.f32 %v13613_v47, %v776_v49  ;;  %v11383_v25 = vpop.f32.mrb[34].mxu0 }
 0x151   : > { %5347 = vst.msk [vmem:[#allocation2 + $0xb8] sm:$0xff] %vm297_vm0, %v4898_v44  ;;  %5571 = vst.msk [vmem:[#allocation2 + $0x7b8] sm:$0xff] %vm297_vm0, %v5122_v21  ;;  %v1005_v12 = vld [vmem:[#allocation2 + $0x818] sm:$0xff]  ;;  %v779_v15 = vld [vmem:[#allocation2 + $0x108] sm:$0xff]  ;;  %v5129_v33 = vadd.f32 %v13615_v48, %v1000_v50  ;;  %v4903_v3 = vadd.f32 %v13619_v57, %v774_v51  ;;  %v5127_v4 = vadd.f32 %v13621_v20, %v998_v53  ;;  %v11607_v18 = vpop.f32.mrb[34].mxu1  ;;  %v3215_v28 = vpop.f32.mrb[35].mxu0 }
 0x152   : > { %5345 = vst.msk [vmem:[#allocation2 + $0xa8] sm:$0xff] %vm297_vm0, %v4896_v63  ;;  %5569 = vst.msk [vmem:[#allocation2 + $0x7a8] sm:$0xff] %vm297_vm0, %v5120_v55  ;;  %v12021_v16 = vld [vmem:[%s12299_s21 + $0x238] sm:$0xff]   ;;  %v1003_v24 = vld [vmem:[#allocation2 + $0x808] sm:$0xff]  ;;  %v4906_v47 = vadd.f32 %v13626_v2, %v777_v14  ;;  %v5130_v48 = vadd.f32 %v13628_v5, %v1001_v54  ;;  %v4904_v57 = vadd.f32 %v13631_v19, %v775_v43  ;;  %v4111_v29 = vpop.f32.mrb[35].mxu1  ;;  %v13722_v14 = vpop.f32.mrb[36].mxu0 }
 0x153   : > { %5350 = vst.msk [vmem:[#allocation2 + $0xd0] sm:$0xff] %vm297_vm0, %v4901_v0  ;;  %5574 = vst.msk [vmem:[#allocation2 + $0x7d0] sm:$0xff] %vm297_vm0, %v5125_v7  ;;  %v12022_v26 = vld [vmem:[%s12299_s21 + $0x5b8] sm:$0xff]   ;;  %v12023_v27 = vld [vmem:[%s12299_s21 + $0x240] sm:$0xff]   ;;  %v5128_v20 = vadd.f32 %v13633_v23, %v999_v56  ;;  %v4909_v31 = vadd.f32 %v11382_v41, %v780_v22  ;;  %v5133_v34 = vadd.f32 %v11606_v61, %v1004_v9  ;;  %11489 = vmatmul.mubr.bf16.gmra.mrb[140].mxu0 %v12021_v16  ;;  %v13724_v54 = vpop.f32.mrb[36].mxu1  ;;  %v13735_v22 = vpop.f32.mrb[37].mxu0 }
 0x154   : > { %5348 = vst.msk [vmem:[#allocation2 + $0xc0] sm:$0xff] %vm297_vm0, %v4899_v8  ;;  %5572 = vst.msk [vmem:[#allocation2 + $0x7c0] sm:$0xff] %vm297_vm0, %v5123_v17  ;;  %v12024_v30 = vld [vmem:[%s12299_s21 + $0x5c0] sm:$0xff]   ;;  %v4907_v2 = vadd.f32 %v3212_v10, %v778_v62  ;;  %v5131_v35 = vadd.f32 %v4108_v11, %v1002_v1  ;;  %v4910_v5 = vadd.f32 %v11383_v25, %v781_v6  ;;  %11713 = vmatmul.mubr.bf16.gmra.mrb[140].mxu1 %v12022_v26  ;;  %v13737_v9 = vpop.f32.mrb[37].mxu1  ;;  %v12025_v0 = vld [vmem:[%s12299_s21 + $0x248] sm:$0xff]   ;;  %v13744_v61 = vpop.f32.mrb[38].mxu0 }
 0x155   : > { %5351 = vst.msk [vmem:[#allocation2 + $0xd8] sm:$0xff] %vm297_vm0, %v4902_v45  ;;  %5575 = vst.msk [vmem:[#allocation2 + $0x7d8] sm:$0xff] %vm297_vm0, %v5126_v46  ;;  %v5134_v19 = vadd.f32 %v11607_v18, %v1005_v12  ;;  %v4908_v23 = vadd.f32 %v3215_v28, %v779_v15  ;;  %v5132_v36 = vadd.f32 %v4111_v29, %v1003_v24  ;;  %v5797_v37 = vld [vmem:[#allocation2 + $0xb0] sm:$0xff]  ;;  %11492 = vmatprep.mubr.bf16.mxu0 %v12023_v27  ;;  %v13712_v39 = vld [vmem:[%s17066_s2] ss:$0 sm:$0xff]  ;;  %v13746_v62 = vpop.f32.mrb[38].mxu1 }
 0x156   : > { %5349 = vst.msk [vmem:[#allocation2 + $0xc8] sm:$0xff] %vm297_vm0, %v4900_v52  ;;  %5573 = vst.msk [vmem:[#allocation2 + $0x7c8] sm:$0xff] %vm297_vm0, %v5124_v13  ;;  %v6021_v38 = vld [vmem:[#allocation2 + $0x7b0] sm:$0xff]  ;;  %v6252_v42 = vmul.f32 %v13712_v39, %v5797_v37  ;;  %11716 = vmatprep.mubr.bf16.mxu1 %v12024_v30  ;;  %v13729_v43 = vld [vmem:[%s17067_s3] ss:$0 sm:$0xff]  ;;  %v13752_v10 = vpop.f32.mrb[39].mxu0 }
 0x157   : > { %5354 = vst.msk [vmem:[#allocation2 + $0xf0] sm:$0xff] %vm297_vm0, %v4905_v32  ;;  %5578 = vst.msk [vmem:[#allocation2 + $0x7f0] sm:$0xff] %vm297_vm0, %v5129_v33  ;;  %v6476_v49 = vmul.f32 %v13712_v39, %v6021_v38  ;;  %v5795_v50 = vld [vmem:[#allocation2 + $0xa0] sm:$0xff]  ;;  %v12026_v1 = vld [vmem:[%s12299_s21 + $0x5c8] sm:$0xff]  }
 0x158   : > { %5352 = vst.msk [vmem:[#allocation2 + $0xe0] sm:$0xff] %vm297_vm0, %v4903_v3  ;;  %5576 = vst.msk [vmem:[#allocation2 + $0x7e0] sm:$0xff] %vm297_vm0, %v5127_v4  ;;  %v6019_v51 = vld [vmem:[#allocation2 + $0x7a0] sm:$0xff]  ;;  %v6250_v53 = vmul.f32 %v13712_v39, %v5795_v50  ;;  %v5798_v59 = vld [vmem:[#allocation2 + $0xb8] sm:$0xff]  ;;  %v6707_v44 = vadd.f32 %v13729_v43, %v6252_v42  ;;  %v13757_v4 = vpop.f32.mrb[39].mxu1 }
 0x159   : > { %5355 = vst.msk [vmem:[#allocation2 + $0xf8] sm:$0xff] %vm297_vm0, %v4906_v47  ;;  %5579 = vst.msk [vmem:[#allocation2 + $0x7f8] sm:$0xff] %vm297_vm0, %v5130_v48  ;;  %v6474_v58 = vmul.f32 %v13712_v39, %v6019_v51  ;;  %v6022_v60 = vld [vmem:[#allocation2 + $0x7b8] sm:$0xff]  ;;  %v5796_v40 = vld [vmem:[#allocation2 + $0xa8] sm:$0xff]  ;;  %v6931_v21 = vadd.f32 %v13729_v43, %v6476_v49  ;;  %v6253_v63 = vmul.f32 %v13712_v39, %v5798_v59 }
 0x15a   : > { %5353 = vst.msk [vmem:[#allocation2 + $0xe8] sm:$0xff] %vm297_vm0, %v4904_v57  ;;  %5577 = vst.msk [vmem:[#allocation2 + $0x7e8] sm:$0xff] %vm297_vm0, %v5128_v20  ;;  %v6477_v55 = vmul.f32 %v13712_v39, %v6022_v60  ;;  %v6020_v56 = vld [vmem:[#allocation2 + $0x7a8] sm:$0xff]  ;;  %v6705_v7 = vadd.f32 %v13729_v43, %v6250_v53  ;;  %v6251_v17 = vmul.f32 %v13712_v39, %v5796_v40  ;;  %v12027_v6 = vld [vmem:[%s12299_s21 + $0x250] sm:$0xff]   ;;  %v7155_v45 = vmax.f32 %v6707_v44, 0.0  ;;  %v13771_v42 = vpop.f32.mrb[40].mxu0 }
 0x15b   : > { %5358 = vst.msk [vmem:[#allocation2 + $0x110] sm:$0xff] %vm297_vm0, %v4909_v31  ;;  %5582 = vst.msk [vmem:[#allocation2 + $0x810] sm:$0xff] %vm297_vm0, %v5133_v34  ;;  %v6929_v8 = vadd.f32 %v13729_v43, %v6474_v58  ;;  %v6475_v41 = vmul.f32 %v13712_v39, %v6020_v56  ;;  %v7379_v46 = vmax.f32 %v6931_v21, 0.0  ;;  %v6708_v52 = vadd.f32 %v13729_v43, %v6253_v63  ;;  %v12028_v11 = vld [vmem:[%s12299_s21 + $0x5d0] sm:$0xff]   ;;  %v5799_v27 = vld [vmem:[#allocation2 + $0xc0] sm:$0xff]  ;;  %v13773_v49 = vpop.f32.mrb[40].mxu1 }
 0x15c   : > { %5356 = vst.msk [vmem:[#allocation2 + $0x100] sm:$0xff] %vm297_vm0, %v4907_v2  ;;  %5580 = vst.msk [vmem:[#allocation2 + $0x800] sm:$0xff] %vm297_vm0, %v5131_v35  ;;  %v6932_v13 = vadd.f32 %v13729_v43, %v6477_v55  ;;  %v7153_v12 = vmax.f32 %v6705_v7, 0.0  ;;  %v6706_v16 = vadd.f32 %v13729_v43, %v6251_v17  ;;  %v5801_v33 = vld [vmem:[#allocation2 + $0xd0] sm:$0xff]  ;;  %v10673_v25 = vpack.c.bf16 %v7155_v45, %v7155_v45  ;;  %v6023_v47 = vld [vmem:[#allocation2 + $0x7c0] sm:$0xff]  ;;  %v13783_v59 = vpop.f32.mrb[41].mxu0 }
 0x15d   : > { %17083 = vst [vmem:[#allocation6_spill] sm:$0xff] %v13712_v39  ;;  %5359 = vst.msk [vmem:[#allocation2 + $0x118] sm:$0xff] %vm297_vm0, %v4910_v5  ;;  %v7377_v15 = vmax.f32 %v6929_v8, 0.0  ;;  %v6930_v32 = vadd.f32 %v13729_v43, %v6475_v41  ;;  %v6025_v3 = vld [vmem:[#allocation2 + $0x7d0] sm:$0xff]  ;;  %v10897_v18 = vpack.c.bf16 %v7379_v46, %v7379_v46  ;;  %v7156_v24 = vmax.f32 %v6708_v52, 0.0  ;;  %11493 = vmatmul.mubr.bf16.gmra.mrb[144].mxu0 %v12025_v0  ;;  %v5802_v29 = vld [vmem:[#allocation2 + $0xd8] sm:$0xff] }
 0x15e   : > { %5583 = vst.msk [vmem:[#allocation2 + $0x818] sm:$0xff] %vm297_vm0, %v5134_v19  ;;  %5357 = vst.msk [vmem:[#allocation2 + $0x108] sm:$0xff] %vm297_vm0, %v4908_v23  ;;  %v7380_v26 = vmax.f32 %v6932_v13, 0.0  ;;  %v10671_v48 = vpack.c.bf16 %v7153_v12, %v7153_v12  ;;  %v7154_v20 = vmax.f32 %v6706_v16, 0.0  ;;  %v6026_v30 = vld [vmem:[#allocation2 + $0x7d8] sm:$0xff]  ;;  %11717 = vmatmul.mubr.bf16.gmra.mrb[144].mxu1 %v12026_v1  ;;  %11496 = vmatprep.mubr.bf16.mxu0 %v12027_v6  ;;  %v5800_v5 = vld [vmem:[#allocation2 + $0xc8] sm:$0xff] }
 0x15f   : > { %5581 = vst.msk [vmem:[#allocation2 + $0x808] sm:$0xff] %vm297_vm0, %v5132_v36  ;;  %17084 = vst [vmem:[#allocation7_spill] sm:$0xff] %v13729_v43  ;;  %v10895_v57 = vpack.c.bf16 %v7377_v15, %v7377_v15  ;;  %v7378_v28 = vmax.f32 %v6930_v32, 0.0  ;;  %v10674_v31 = vpack.c.bf16 %v7156_v24, %v7156_v24  ;;  %v6256_v2 = vmul.f32 %v13712_v39, %v5801_v33  ;;  %v6024_v19 = vld [vmem:[#allocation2 + $0x7c8] sm:$0xff]  ;;  %v13785_v60 = vpop.f32.mrb[41].mxu1  ;;  %v12029_v40 = vld [vmem:[%s12299_s21 + $0x258] sm:$0xff]  }
 0x160   : > { %9396 = vst.msk [vmem:[%s13402_s14 + $0x58] sm:$0xf] %vm9373_vm1, %v10673_v25  ;;  %9620 = vst.msk [vmem:[%s13402_s14 + $0x3d8] sm:$0xf] %vm9373_vm1, %v10897_v18  ;;  %v10898_v34 = vpack.c.bf16 %v7380_v26, %v7380_v26  ;;  %v6480_v35 = vmul.f32 %v13712_v39, %v6025_v3  ;;  %11720 = vmatprep.mubr.bf16.mxu1 %v12028_v11  ;;  %v10672_v23 = vpack.c.bf16 %v7154_v20, %v7154_v20  ;;  %v13796_v56 = vpop.f32.mrb[42].mxu0  ;;  %v13798_v0 = vpop.f32.mrb[42].mxu1 }
 0x161   : > { %9394 = vst.msk [vmem:[%s13402_s14 + $0x50] sm:$0xf] %vm9373_vm1, %v10671_v48  ;;  %9618 = vst.msk [vmem:[%s13402_s14 + $0x3d0] sm:$0xf] %vm9373_vm1, %v10895_v57  ;;  %v10896_v36 = vpack.c.bf16 %v7378_v28, %v7378_v28  ;;  %v6254_v37 = vmul.f32 %v13712_v39, %v5799_v27  ;;  %v6478_v38 = vmul.f32 %v13712_v39, %v6023_v47  ;;  %v12030_v7 = vld [vmem:[%s12299_s21 + $0x5d8] sm:$0xff]   ;;  %v12031_v8 = vld [vmem:[%s12299_s21 + $0x260] sm:$0xff]  }
 0x162   : > { %9397 = vst.msk [vmem:[%s13402_s14 + $0x5c] sm:$0xf] %vm9373_vm1, %v10674_v31  ;;  %9621 = vst.msk [vmem:[%s13402_s14 + $0x3dc] sm:$0xf] %vm9373_vm1, %v10898_v34  ;;  %v6711_v50 = vadd.f32 %v13729_v43, %v6256_v2  ;;  %v6935_v51 = vadd.f32 %v13729_v43, %v6480_v35  ;;  %v6257_v53 = vmul.f32 %v13712_v39, %v5802_v29  ;;  %v13804_v45 = vpop.f32.mrb[43].mxu0  ;;  %v13806_v46 = vpop.f32.mrb[43].mxu1 }
 0x163   : > { %v6481_v58 = vmul.f32 %v13712_v39, %v6026_v30  ;;  %9395 = vst.msk [vmem:[%s13402_s14 + $0x54] sm:$0xf] %vm9373_vm1, %v10672_v23  ;;  %9619 = vst.msk [vmem:[%s13402_s14 + $0x3d4] sm:$0xf] %vm9373_vm1, %v10896_v36  ;;  %v6709_v44 = vadd.f32 %v13729_v43, %v6254_v37  ;;  %v6933_v21 = vadd.f32 %v13729_v43, %v6478_v38  ;;  %v12032_v52 = vld [vmem:[%s12299_s21 + $0x5e0] sm:$0xff]   ;;  %v5805_v16 = vld [vmem:[#allocation2 + $0xf0] sm:$0xff] }
 0x164   : > { %v6255_v63 = vmul.f32 %v13712_v39, %v5800_v5  ;;  %v6479_v55 = vmul.f32 %v13712_v39, %v6024_v19  ;;  %v7159_v17 = vmax.f32 %v6711_v50, 0.0  ;;  %v7383_v41 = vmax.f32 %v6935_v51, 0.0  ;;  %v6029_v32 = vld [vmem:[#allocation2 + $0x7f0] sm:$0xff]  ;;  %v5803_v24 = vld [vmem:[#allocation2 + $0xe0] sm:$0xff]  ;;  %v5806_v20 = vld [vmem:[#allocation2 + $0xf8] sm:$0xff]  ;;  %v13823_v37 = vpop.f32.mrb[44].mxu0 }
 0x165   : > { %v6712_v1 = vadd.f32 %v13729_v43, %v6257_v53  ;;  %v6936_v6 = vadd.f32 %v13729_v43, %v6481_v58  ;;  %v7157_v13 = vmax.f32 %v6709_v44, 0.0  ;;  %v7381_v11 = vmax.f32 %v6933_v21, 0.0  ;;  %v6027_v26 = vld [vmem:[#allocation2 + $0x7e0] sm:$0xff]  ;;  %11497 = vmatmul.mubr.bf16.gmra.mrb[148].mxu0 %v12029_v40  ;;  %v6030_v28 = vld [vmem:[#allocation2 + $0x7f8] sm:$0xff]  ;;  %v5804_v2 = vld [vmem:[#allocation2 + $0xe8] sm:$0xff]  ;;  %v13825_v38 = vpop.f32.mrb[44].mxu1 }
 0x166   : > { %v6710_v12 = vadd.f32 %v13729_v43, %v6255_v63  ;;  %v6934_v15 = vadd.f32 %v13729_v43, %v6479_v55  ;;  %v10677_v33 = vpack.c.bf16 %v7159_v17, %v7159_v17  ;;  %v10901_v3 = vpack.c.bf16 %v7383_v41, %v7383_v41  ;;  %11721 = vmatmul.mubr.bf16.gmra.mrb[148].mxu1 %v12030_v7  ;;  %v6028_v35 = vld [vmem:[#allocation2 + $0x7e8] sm:$0xff]  ;;  %v13835_v40 = vpop.f32.mrb[45].mxu0  ;;  %v13837_v44 = vpop.f32.mrb[45].mxu1 }
 0x167   : > { %v7160_v25 = vmax.f32 %v6712_v1, 0.0  ;;  %v7384_v18 = vmax.f32 %v6936_v6, 0.0  ;;  %v10675_v27 = vpack.c.bf16 %v7157_v13, %v7157_v13  ;;  %v10899_v47 = vpack.c.bf16 %v7381_v11, %v7381_v11  ;;  %11500 = vmatprep.mubr.bf16.mxu0 %v12031_v8  ;;  %11724 = vmatprep.mubr.bf16.mxu1 %v12032_v52  ;;  %v12033_v21 = vld [vmem:[%s12299_s21 + $0x268] sm:$0xff]   ;;  %v13848_v17 = vpop.f32.mrb[46].mxu0  ;;  %v13850_v41 = vpop.f32.mrb[46].mxu1  ;;  %v12035_v6 = vld [vmem:[%s12299_s21 + $0x270] sm:$0xff]  }
 0x168   : > { %v7158_v48 = vmax.f32 %v6710_v12, 0.0  ;;  %v7382_v57 = vmax.f32 %v6934_v15, 0.0  ;;  %9400 = vst.msk [vmem:[%s13402_s14 + $0x68] sm:$0xf] %vm9373_vm1, %v10677_v33  ;;  %9624 = vst.msk [vmem:[%s13402_s14 + $0x3e8] sm:$0xf] %vm9373_vm1, %v10901_v3  ;;  %v6260_v31 = vmul.f32 %v13712_v39, %v5805_v16  ;;  %v6484_v34 = vmul.f32 %v13712_v39, %v6029_v32 }
 0x169   : > { %v10678_v29 = vpack.c.bf16 %v7160_v25, %v7160_v25  ;;  %v10902_v30 = vpack.c.bf16 %v7384_v18, %v7384_v18  ;;  %9398 = vst.msk [vmem:[%s13402_s14 + $0x60] sm:$0xf] %vm9373_vm1, %v10675_v27  ;;  %9622 = vst.msk [vmem:[%s13402_s14 + $0x3e0] sm:$0xf] %vm9373_vm1, %v10899_v47  ;;  %v6258_v23 = vmul.f32 %v13712_v39, %v5803_v24  ;;  %v12034_v1 = vld [vmem:[%s12299_s21 + $0x5e8] sm:$0xff]   ;;  %v13856_v15 = vpop.f32.mrb[47].mxu0 }
 0x16a   : > { %v10676_v5 = vpack.c.bf16 %v7158_v48, %v7158_v48  ;;  %v10900_v19 = vpack.c.bf16 %v7382_v57, %v7382_v57  ;;  %v6482_v36 = vmul.f32 %v13712_v39, %v6027_v26  ;;  %v6715_v50 = vadd.f32 %v13729_v43, %v6260_v31  ;;  %v13858_v16 = vpop.f32.mrb[47].mxu1  ;;  %v12036_v32 = vld [vmem:[%s12299_s21 + $0x5f0] sm:$0xff]  }
 0x16b   : > { %9401 = vst.msk [vmem:[%s13402_s14 + $0x6c] sm:$0xf] %vm9373_vm1, %v10678_v29  ;;  %9625 = vst.msk [vmem:[%s13402_s14 + $0x3ec] sm:$0xf] %vm9373_vm1, %v10902_v30  ;;  %v6939_v51 = vadd.f32 %v13729_v43, %v6484_v34  ;;  %v6261_v53 = vmul.f32 %v13712_v39, %v5806_v20  ;;  %v6485_v58 = vmul.f32 %v13712_v39, %v6030_v28  ;;  %v5809_v24 = vld [vmem:[#allocation2 + $0x110] sm:$0xff]  ;;  %v5807_v20 = vld [vmem:[#allocation2 + $0x100] sm:$0xff] }
 0x16c   : > { %9399 = vst.msk [vmem:[%s13402_s14 + $0x64] sm:$0xf] %vm9373_vm1, %v10676_v5  ;;  %9623 = vst.msk [vmem:[%s13402_s14 + $0x3e4] sm:$0xf] %vm9373_vm1, %v10900_v19  ;;  %v6713_v63 = vadd.f32 %v13729_v43, %v6258_v23  ;;  %v6937_v55 = vadd.f32 %v13729_v43, %v6482_v36  ;;  %v6259_v7 = vmul.f32 %v13712_v39, %v5804_v2  ;;  %v7163_v52 = vmax.f32 %v6715_v50, 0.0  ;;  %v6033_v26 = vld [vmem:[#allocation2 + $0x810] sm:$0xff] }
 0x16d   : > { %v6483_v8 = vmul.f32 %v13712_v39, %v6028_v35  ;;  %v7387_v13 = vmax.f32 %v6939_v51, 0.0  ;;  %v6716_v11 = vadd.f32 %v13729_v43, %v6261_v53  ;;  %v6940_v12 = vadd.f32 %v13729_v43, %v6485_v58  ;;  %v6031_v28 = vld [vmem:[#allocation2 + $0x800] sm:$0xff]  ;;  %11501 = vmatmul.mubr.bf16.gmra.mrb[152].mxu0 %v12033_v21  ;;  %v5810_v2 = vld [vmem:[#allocation2 + $0x118] sm:$0xff]  ;;  %v5808_v50 = vld [vmem:[#allocation2 + $0x108] sm:$0xff] }
 0x16e   : > { %v7161_v33 = vmax.f32 %v6713_v63, 0.0  ;;  %v7385_v3 = vmax.f32 %v6937_v55, 0.0  ;;  %v6714_v25 = vadd.f32 %v13729_v43, %v6259_v7  ;;  %v10681_v27 = vpack.c.bf16 %v7163_v52, %v7163_v52  ;;  %v6034_v35 = vld [vmem:[#allocation2 + $0x818] sm:$0xff]  ;;  %11725 = vmatmul.mubr.bf16.gmra.mrb[152].mxu1 %v12034_v1  ;;  %11504 = vmatprep.mubr.bf16.mxu0 %v12035_v6  ;;  %v6032_v51 = vld [vmem:[#allocation2 + $0x808] sm:$0xff]  ;;  %v13875_v55 = vpop.f32.mrb[48].mxu0  ;;  %v13877_v7 = vpop.f32.mrb[48].mxu1 }
 0x16f   : > { %v6938_v18 = vadd.f32 %v13729_v43, %v6483_v8  ;;  %v10905_v47 = vpack.c.bf16 %v7387_v13, %v7387_v13  ;;  %v7164_v48 = vmax.f32 %v6716_v11, 0.0  ;;  %v7388_v57 = vmax.f32 %v6940_v12, 0.0  ;;  %11728 = vmatprep.mubr.bf16.mxu1 %v12036_v32  ;;  %v13887_v13 = vpop.f32.mrb[49].mxu0  ;;  %v13889_v11 = vpop.f32.mrb[49].mxu1  ;;  %v12037_v12 = vld [vmem:[%s12299_s21 + $0x278] sm:$0xff]  }
 0x170   : > { %v10679_v29 = vpack.c.bf16 %v7161_v33, %v7161_v33  ;;  %v10903_v30 = vpack.c.bf16 %v7385_v3, %v7385_v3  ;;  %v7162_v31 = vmax.f32 %v6714_v25, 0.0  ;;  %9404 = vst.msk [vmem:[%s13402_s14 + $0x78] sm:$0xf] %vm9373_vm1, %v10681_v27  ;;  %v6264_v23 = vmul.f32 %v13712_v39, %v5809_v24  ;;  %v1008_v24 = vld [vmem:[#allocation2 + $0x830] sm:$0xff]  ;;  %v13902_v27 = vpop.f32.mrb[50].mxu1 }
 0x171   : > { %v7386_v34 = vmax.f32 %v6938_v18, 0.0  ;;  %9628 = vst.msk [vmem:[%s13402_s14 + $0x3f8] sm:$0xf] %vm9373_vm1, %v10905_v47  ;;  %v10682_v5 = vpack.c.bf16 %v7164_v48, %v7164_v48  ;;  %v10906_v19 = vpack.c.bf16 %v7388_v57, %v7388_v57  ;;  %v6488_v36 = vmul.f32 %v13712_v39, %v6033_v26  ;;  %v784_v18 = vld [vmem:[#allocation2 + $0x130] sm:$0xff]  ;;  %v13900_v26 = vpop.f32.mrb[50].mxu0  ;;  %17085 = vst [vmem:[#allocation8_spill] sm:$0xff] %v13902_v27 }
 0x172   : > { %9402 = vst.msk [vmem:[%s13402_s14 + $0x70] sm:$0xf] %vm9373_vm1, %v10679_v29  ;;  %9626 = vst.msk [vmem:[%s13402_s14 + $0x3f0] sm:$0xf] %vm9373_vm1, %v10903_v30  ;;  %v10680_v53 = vpack.c.bf16 %v7162_v31, %v7162_v31  ;;  %v6262_v21 = vmul.f32 %v13712_v39, %v5807_v20  ;;  %v6486_v63 = vmul.f32 %v13712_v39, %v6031_v28  ;;  %v12038_v47 = vld [vmem:[%s12299_s21 + $0x5f8] sm:$0xff]   ;;  %v12039_v48 = vld [vmem:[%s12299_s21 + $0x280] sm:$0xff]  }
 0x173   : > { %v10904_v58 = vpack.c.bf16 %v7386_v34, %v7386_v34  ;;  %9405 = vst.msk [vmem:[%s13402_s14 + $0x7c] sm:$0xf] %vm9373_vm1, %v10682_v5  ;;  %9629 = vst.msk [vmem:[%s13402_s14 + $0x3fc] sm:$0xf] %vm9373_vm1, %v10906_v19  ;;  %v6719_v8 = vadd.f32 %v13729_v43, %v6264_v23  ;;  %v6943_v1 = vadd.f32 %v13729_v43, %v6488_v36  ;;  %v782_v30 = vld [vmem:[#allocation2 + $0x120] sm:$0xff]  ;;  %v13908_v34 = vpop.f32.mrb[51].mxu0 }
 0x174   : > { %v6265_v6 = vmul.f32 %v13712_v39, %v5810_v2  ;;  %v6489_v52 = vmul.f32 %v13712_v39, %v6034_v35  ;;  %9403 = vst.msk [vmem:[%s13402_s14 + $0x74] sm:$0xf] %vm9373_vm1, %v10680_v53  ;;  %v6717_v32 = vadd.f32 %v13729_v43, %v6262_v21  ;;  %v6941_v33 = vadd.f32 %v13729_v43, %v6486_v63  ;;  %v1006_v31 = vld [vmem:[#allocation2 + $0x820] sm:$0xff]  ;;  %v13910_v2 = vpop.f32.mrb[51].mxu1  ;;  %v783_v53 = vld [vmem:[#allocation2 + $0x128] sm:$0xff] }
 0x175   : > { %9627 = vst.msk [vmem:[%s13402_s14 + $0x3f4] sm:$0xf] %vm9373_vm1, %v10904_v58  ;;  %v6263_v3 = vmul.f32 %v13712_v39, %v5808_v50  ;;  %v6487_v25 = vmul.f32 %v13712_v39, %v6032_v51  ;;  %v7167_v57 = vmax.f32 %v6719_v8, 0.0  ;;  %v7391_v20 = vmax.f32 %v6943_v1, 0.0  ;;  %17086 = vst [vmem:[#allocation9_spill] sm:$0xff] %v13908_v34  ;;  %v12040_v35 = vld [vmem:[%s12299_s21 + $0x600] sm:$0xff]   ;;  %11505 = vmatmul.mubr.bf16.gmra.mrb[156].mxu0 %v12037_v12 }
 0x176   : > { %v6720_v28 = vadd.f32 %v13729_v43, %v6265_v6  ;;  %v6944_v29 = vadd.f32 %v13729_v43, %v6489_v52  ;;  %17087 = vst [vmem:[#allocation10_spill] sm:$0xff] %v13910_v2  ;;  %v7165_v5 = vmax.f32 %v6717_v32, 0.0  ;;  %v7389_v19 = vmax.f32 %v6941_v33, 0.0  ;;  %v785_v50 = vld [vmem:[#allocation2 + $0x138] sm:$0xff]  ;;  %v1007_v58 = vld [vmem:[#allocation2 + $0x828] sm:$0xff]  ;;  %v788_v6 = vld [vmem:[#allocation2 + $0x150] sm:$0xff]  ;;  %11729 = vmatmul.mubr.bf16.gmra.mrb[156].mxu1 %v12038_v47  ;;  %11508 = vmatprep.mubr.bf16.mxu0 %v12039_v48 }
 0x177   : > { %v6718_v23 = vadd.f32 %v13729_v43, %v6263_v3  ;;  %v6942_v36 = vadd.f32 %v13729_v43, %v6487_v25  ;;  %v1009_v51 = vld [vmem:[#allocation2 + $0x838] sm:$0xff]  ;;  %v10685_v21 = vpack.c.bf16 %v7167_v57, %v7167_v57  ;;  %v10909_v63 = vpack.c.bf16 %v7391_v20, %v7391_v20  ;;  %v1012_v52 = vld [vmem:[#allocation2 + $0x850] sm:$0xff]  ;;  %v786_v39 = vld [vmem:[#allocation2 + $0x140] sm:$0xff]  ;;  %11732 = vmatprep.mubr.bf16.mxu1 %v12040_v35 }
 0x178   : > { %v7168_v8 = vmax.f32 %v6720_v28, 0.0  ;;  %v7392_v1 = vmax.f32 %v6944_v29, 0.0  ;;  %v1010_v2 = vld [vmem:[#allocation2 + $0x840] sm:$0xff]  ;;  %v10683_v32 = vpack.c.bf16 %v7165_v5, %v7165_v5  ;;  %v10907_v33 = vpack.c.bf16 %v7389_v19, %v7389_v19  ;;  %v789_v25 = vld [vmem:[#allocation2 + $0x158] sm:$0xff]  ;;  %v787_v27 = vld [vmem:[#allocation2 + $0x148] sm:$0xff] }
 0x179   : > { %v7166_v3 = vmax.f32 %v6718_v23, 0.0  ;;  %v7390_v34 = vmax.f32 %v6942_v36, 0.0  ;;  %v1013_v43 = vld [vmem:[#allocation2 + $0x858] sm:$0xff]  ;;  %v1011_v57 = vld [vmem:[#allocation2 + $0x848] sm:$0xff]  ;;  %9408 = vst.msk [vmem:[%s13402_s14 + $0x88] sm:$0xf] %vm9373_vm1, %v10685_v21  ;;  %v4913_v12 = vadd.f32 %v13722_v14, %v784_v18  ;;  %v5137_v29 = vadd.f32 %v13724_v54, %v1008_v24 }
 0x17a   : > { %9632 = vst.msk [vmem:[%s13402_s14 + $0x408] sm:$0xf] %vm9373_vm1, %v10909_v63  ;;  %v10686_v20 = vpack.c.bf16 %v7168_v8, %v7168_v8  ;;  %v10910_v28 = vpack.c.bf16 %v7392_v1, %v7392_v1  ;;  %v792_v5 = vld [vmem:[#allocation2 + $0x170] sm:$0xff]  ;;  %v790_v23 = vld [vmem:[#allocation2 + $0x160] sm:$0xff]  ;;  %9406 = vst.msk [vmem:[%s13402_s14 + $0x80] sm:$0xf] %vm9373_vm1, %v10683_v32  ;;  %v4911_v21 = vadd.f32 %v13735_v22, %v782_v30 }
 0x17b   : > { %v1016_v19 = vld [vmem:[#allocation2 + $0x870] sm:$0xff]  ;;  %v1014_v36 = vld [vmem:[#allocation2 + $0x860] sm:$0xff]  ;;  %9630 = vst.msk [vmem:[%s13402_s14 + $0x400] sm:$0xf] %vm9373_vm1, %v10907_v33  ;;  %v10684_v47 = vpack.c.bf16 %v7166_v3, %v7166_v3  ;;  %v10908_v48 = vpack.c.bf16 %v7390_v34, %v7390_v34  ;;  %v5135_v63 = vadd.f32 %v13737_v9, %v1006_v31  ;;  %v793_v14 = vld [vmem:[#allocation2 + $0x178] sm:$0xff]  ;;  %v13927_v8 = vpop.f32.mrb[52].mxu0  ;;  %v4914_v22 = vadd.f32 %v13744_v61, %v785_v50 }
 0x17c   : > { %v1017_v18 = vld [vmem:[#allocation2 + $0x878] sm:$0xff]  ;;  %v791_v54 = vld [vmem:[#allocation2 + $0x168] sm:$0xff]  ;;  %v13929_v1 = vpop.f32.mrb[52].mxu1  ;;  %9409 = vst.msk [vmem:[%s13402_s14 + $0x8c] sm:$0xf] %vm9373_vm1, %v10686_v20  ;;  %v5138_v9 = vadd.f32 %v13746_v62, %v1009_v51  ;;  %v4912_v30 = vadd.f32 %v13752_v10, %v783_v53  ;;  %v5136_v31 = vadd.f32 %v13757_v4, %v1007_v58  ;;  %v796_v34 = vld [vmem:[#allocation2 + $0x190] sm:$0xff]  ;;  %v4917_v61 = vadd.f32 %v13771_v42, %v788_v6 }
 0x17d   : > { %v1015_v24 = vld [vmem:[#allocation2 + $0x868] sm:$0xff]  ;;  %9633 = vst.msk [vmem:[%s13402_s14 + $0x40c] sm:$0xf] %vm9373_vm1, %v10910_v28  ;;  %v1020_v35 = vld [vmem:[#allocation2 + $0x890] sm:$0xff]  ;;  %v794_v32 = vld [vmem:[#allocation2 + $0x180] sm:$0xff]  ;;  %v13941_v33 = vpop.f32.mrb[53].mxu0  ;;  %v5141_v62 = vadd.f32 %v13773_v49, %v1012_v52  ;;  %v4915_v10 = vadd.f32 %v13783_v59, %v786_v39  ;;  %v5139_v4 = vadd.f32 %v13785_v60, %v1010_v2  ;;  %v4918_v39 = vadd.f32 %v13796_v56, %v789_v25 }
 0x17e   : > { %5362 = vst.msk [vmem:[#allocation2 + $0x130] sm:$0xff] %vm297_vm0, %v4913_v12  ;;  %5586 = vst.msk [vmem:[#allocation2 + $0x830] sm:$0xff] %vm297_vm0, %v5137_v29  ;;  %v13943_v3 = vpop.f32.mrb[53].mxu1  ;;  %v12041_v20 = vld [vmem:[%s12299_s21 + $0x288] sm:$0xff]   ;;  %v1018_v50 = vld [vmem:[#allocation2 + $0x880] sm:$0xff]  ;;  %v13956_v53 = vpop.f32.mrb[54].mxu0  ;;  %v5142_v42 = vadd.f32 %v13798_v0, %v1013_v43  ;;  %v4916_v49 = vadd.f32 %v13804_v45, %v787_v27  ;;  %v5140_v59 = vadd.f32 %v13806_v46, %v1011_v57 }
 0x17f   : > { %9407 = vst.msk [vmem:[%s13402_s14 + $0x84] sm:$0xf] %vm9373_vm1, %v10684_v47  ;;  %9631 = vst.msk [vmem:[%s13402_s14 + $0x404] sm:$0xf] %vm9373_vm1, %v10908_v48  ;;  %v797_v51 = vld [vmem:[#allocation2 + $0x198] sm:$0xff]  ;;  %v13958_v58 = vpop.f32.mrb[54].mxu1  ;;  %v4921_v43 = vadd.f32 %v13823_v37, %v792_v5  ;;  %v5145_v56 = vadd.f32 %v13825_v38, %v1016_v19  ;;  %v4919_v0 = vadd.f32 %v13835_v40, %v790_v23  ;;  %11509 = vmatmul.mubr.bf16.gmra.mrb[160].mxu0 %v12041_v20 }
 0x180   : > { %5360 = vst.msk [vmem:[#allocation2 + $0x120] sm:$0xff] %vm297_vm0, %v4911_v21  ;;  %5584 = vst.msk [vmem:[#allocation2 + $0x820] sm:$0xff] %vm297_vm0, %v5135_v63  ;;  %v12042_v28 = vld [vmem:[%s12299_s21 + $0x608] sm:$0xff]   ;;  %v1021_v60 = vld [vmem:[#allocation2 + $0x898] sm:$0xff]  ;;  %v13969_v6 = vpop.f32.mrb[55].mxu0  ;;  %v13971_v52 = vpop.f32.mrb[55].mxu1  ;;  %v5143_v45 = vadd.f32 %v13837_v44, %v1014_v36  ;;  %v4922_v57 = vadd.f32 %v13848_v17, %v793_v14  ;;  %v5146_v37 = vadd.f32 %v13850_v41, %v1017_v18 }
 0x181   : > { %5363 = vst.msk [vmem:[#allocation2 + $0x138] sm:$0xff] %vm297_vm0, %v4914_v22  ;;  %5587 = vst.msk [vmem:[#allocation2 + $0x838] sm:$0xff] %vm297_vm0, %v5138_v9  ;;  %v795_v2 = vld [vmem:[#allocation2 + $0x188] sm:$0xff]  ;;  %v12043_v12 = vld [vmem:[%s12299_s21 + $0x290] sm:$0xff]   ;;  %v4920_v38 = vadd.f32 %v13856_v15, %v791_v54  ;;  %v5144_v40 = vadd.f32 %v13858_v16, %v1015_v24  ;;  %v4925_v17 = vadd.f32 %v13875_v55, %v796_v34  ;;  %11733 = vmatmul.mubr.bf16.gmra.mrb[160].mxu1 %v12042_v28 }
 0x182   : > { %5361 = vst.msk [vmem:[#allocation2 + $0x128] sm:$0xff] %vm297_vm0, %v4912_v30  ;;  %5585 = vst.msk [vmem:[#allocation2 + $0x828] sm:$0xff] %vm297_vm0, %v5136_v31  ;;  %v1019_v46 = vld [vmem:[#allocation2 + $0x888] sm:$0xff]  ;;  %v800_v27 = vld [vmem:[#allocation2 + $0x1b0] sm:$0xff]  ;;  %v5149_v41 = vadd.f32 %v13877_v7, %v1020_v35  ;;  %v4923_v15 = vadd.f32 %v13887_v13, %v794_v32  ;;  %v5147_v16 = vadd.f32 %v13889_v11, %v1018_v50  ;;  %11512 = vmatprep.mubr.bf16.mxu0 %v12043_v12  ;;  %v14016_v30 = vpop.f32.mrb[56].mxu0  ;;  %v14018_v31 = vpop.f32.mrb[56].mxu1 }
 0x183   : > { %5366 = vst.msk [vmem:[#allocation2 + $0x150] sm:$0xff] %vm297_vm0, %v4917_v61  ;;  %5590 = vst.msk [vmem:[#allocation2 + $0x850] sm:$0xff] %vm297_vm0, %v5141_v62  ;;  %v12044_v25 = vld [vmem:[%s12299_s21 + $0x610] sm:$0xff]   ;;  %v798_v29 = vld [vmem:[#allocation2 + $0x1a0] sm:$0xff]  ;;  %v4926_v55 = vadd.f32 %v13900_v26, %v797_v51  ;;  %v4929_v26 = vadd.f32 %v13927_v8, %v800_v27 }
 0x184   : > { %5364 = vst.msk [vmem:[#allocation2 + $0x140] sm:$0xff] %vm297_vm0, %v4915_v10  ;;  %5588 = vst.msk [vmem:[#allocation2 + $0x840] sm:$0xff] %vm297_vm0, %v5139_v4  ;;  %v1024_v44 = vld [vmem:[#allocation2 + $0x8b0] sm:$0xff]  ;;  %v1022_v5 = vld [vmem:[#allocation2 + $0x8a0] sm:$0xff]  ;;  %v4927_v22 = vadd.f32 %v13941_v33, %v798_v29  ;;  %11736 = vmatprep.mubr.bf16.mxu1 %v12044_v25  ;;  %v14029_v33 = vpop.f32.mrb[57].mxu0 }
 0x185   : > { %5367 = vst.msk [vmem:[#allocation2 + $0x158] sm:$0xff] %vm297_vm0, %v4918_v39  ;;  %5591 = vst.msk [vmem:[#allocation2 + $0x858] sm:$0xff] %vm297_vm0, %v5142_v42  ;;  %v801_v19 = vld [vmem:[#allocation2 + $0x1b8] sm:$0xff]  ;;  %v17088_v36 = vld [vmem:[#allocation8_spill] sm:$0xff]  ;;  %v5153_v24 = vadd.f32 %v13929_v1, %v1024_v44  ;;  %v5151_v9 = vadd.f32 %v13943_v3, %v1022_v5  ;;  %v14031_v3 = vpop.f32.mrb[57].mxu1  ;;  %v14042_v42 = vpop.f32.mrb[58].mxu0 }
 0x186   : > { %5365 = vst.msk [vmem:[#allocation2 + $0x148] sm:$0xff] %vm297_vm0, %v4916_v49  ;;  %5589 = vst.msk [vmem:[#allocation2 + $0x848] sm:$0xff] %vm297_vm0, %v5140_v59  ;;  %v1025_v23 = vld [vmem:[#allocation2 + $0x8b8] sm:$0xff]  ;;  %v5150_v7 = vadd.f32 %v17088_v36, %v1021_v60  ;;  %v17090_v48 = vld [vmem:[#allocation10_spill] sm:$0xff]  ;;  %v4930_v8 = vadd.f32 %v13956_v53, %v801_v19  ;;  %v14044_v49 = vpop.f32.mrb[58].mxu1 }
 0x187   : > { %5370 = vst.msk [vmem:[#allocation2 + $0x170] sm:$0xff] %vm297_vm0, %v4921_v43  ;;  %5594 = vst.msk [vmem:[#allocation2 + $0x870] sm:$0xff] %vm297_vm0, %v5145_v56  ;;  %v17089_v47 = vld [vmem:[#allocation9_spill] sm:$0xff]  ;;  %v5148_v21 = vadd.f32 %v17090_v48, %v1019_v46  ;;  %v799_v11 = vld [vmem:[#allocation2 + $0x1a8] sm:$0xff]  ;;  %v5154_v1 = vadd.f32 %v13958_v58, %v1025_v23 }
 0x188   : > { %5368 = vst.msk [vmem:[#allocation2 + $0x160] sm:$0xff] %vm297_vm0, %v4919_v0  ;;  %5592 = vst.msk [vmem:[#allocation2 + $0x860] sm:$0xff] %vm297_vm0, %v5143_v45  ;;  %v4924_v13 = vadd.f32 %v17089_v47, %v795_v2  ;;  %v1023_v63 = vld [vmem:[#allocation2 + $0x8a8] sm:$0xff]  ;;  %v12045_v14 = vld [vmem:[%s12299_s21 + $0x298] sm:$0xff]   ;;  %v4928_v53 = vadd.f32 %v13969_v6, %v799_v11  ;;  %v14052_v6 = vpop.f32.mrb[59].mxu0 }
 0x189   : > { %5371 = vst.msk [vmem:[#allocation2 + $0x178] sm:$0xff] %vm297_vm0, %v4922_v57  ;;  %5595 = vst.msk [vmem:[#allocation2 + $0x878] sm:$0xff] %vm297_vm0, %v5146_v37  ;;  %v5813_v18 = vld [vmem:[#allocation2 + $0x130] sm:$0xff]  ;;  %v12046_v34 = vld [vmem:[%s12299_s21 + $0x618] sm:$0xff]   ;;  %v5152_v58 = vadd.f32 %v13971_v52, %v1023_v63  ;;  %v14054_v52 = vpop.f32.mrb[59].mxu1  ;;  %11513 = vmatmul.mubr.bf16.gmra.mrb[164].mxu0 %v12045_v14  ;;  %v14067_v14 = vpop.f32.mrb[60].mxu0 }
 0x18a   : > { %5369 = vst.msk [vmem:[#allocation2 + $0x168] sm:$0xff] %vm297_vm0, %v4920_v38  ;;  %5593 = vst.msk [vmem:[#allocation2 + $0x868] sm:$0xff] %vm297_vm0, %v5144_v40  ;;  %v6037_v54 = vld [vmem:[#allocation2 + $0x830] sm:$0xff]  ;;  %v17091_v35 = vld [vmem:[#allocation6_spill] sm:$0xff]  ;;  %11737 = vmatmul.mubr.bf16.gmra.mrb[164].mxu1 %v12046_v34  ;;  %v14075_v34 = vpop.f32.mrb[60].mxu1 }
 0x18b   : > { %5374 = vst.msk [vmem:[#allocation2 + $0x190] sm:$0xff] %vm297_vm0, %v4925_v17  ;;  %5598 = vst.msk [vmem:[#allocation2 + $0x890] sm:$0xff] %vm297_vm0, %v5149_v41  ;;  %v6268_v32 = vmul.f32 %v17091_v35, %v5813_v18  ;;  %v6492_v20 = vmul.f32 %v17091_v35, %v6037_v54  ;;  %v5811_v61 = vld [vmem:[#allocation2 + $0x120] sm:$0xff]  ;;  %v5814_v51 = vld [vmem:[#allocation2 + $0x138] sm:$0xff] }
 0x18c   : > { %5372 = vst.msk [vmem:[#allocation2 + $0x180] sm:$0xff] %vm297_vm0, %v4923_v15  ;;  %5596 = vst.msk [vmem:[#allocation2 + $0x880] sm:$0xff] %vm297_vm0, %v5147_v16  ;;  %v6035_v62 = vld [vmem:[#allocation2 + $0x820] sm:$0xff]  ;;  %v6266_v4 = vmul.f32 %v17091_v35, %v5811_v61  ;;  %v6038_v28 = vld [vmem:[#allocation2 + $0x838] sm:$0xff]  ;;  %v6269_v12 = vmul.f32 %v17091_v35, %v5814_v51 }
 0x18d   : > { %5375 = vst.msk [vmem:[#allocation2 + $0x198] sm:$0xff] %vm297_vm0, %v4926_v55  ;;  %5599 = vst.msk [vmem:[#allocation2 + $0x898] sm:$0xff] %vm297_vm0, %v5150_v7  ;;  %v12047_v10 = vld [vmem:[%s12299_s21 + $0x2a0] sm:$0xff]   ;;  %v6490_v50 = vmul.f32 %v17091_v35, %v6035_v62  ;;  %v5812_v39 = vld [vmem:[#allocation2 + $0x128] sm:$0xff]  ;;  %v6493_v43 = vmul.f32 %v17091_v35, %v6038_v28 }
 0x18e   : > { %5373 = vst.msk [vmem:[#allocation2 + $0x188] sm:$0xff] %vm297_vm0, %v4924_v13  ;;  %5597 = vst.msk [vmem:[#allocation2 + $0x888] sm:$0xff] %vm297_vm0, %v5148_v21  ;;  %v17092_v59 = vld [vmem:[#allocation7_spill] sm:$0xff]  ;;  %v12048_v0 = vld [vmem:[%s12299_s21 + $0x620] sm:$0xff]   ;;  %v6267_v27 = vmul.f32 %v17091_v35, %v5812_v39  ;;  %11516 = vmatprep.mubr.bf16.mxu0 %v12047_v10  ;;  %v14086_v10 = vpop.f32.mrb[61].mxu1 }
 0x18f   : > { %5378 = vst.msk [vmem:[#allocation2 + $0x1b0] sm:$0xff] %vm297_vm0, %v4929_v26  ;;  %5602 = vst.msk [vmem:[#allocation2 + $0x8b0] sm:$0xff] %vm297_vm0, %v5153_v24  ;;  %v6723_v60 = vadd.f32 %v17092_v59, %v6268_v32  ;;  %v6947_v2 = vadd.f32 %v17092_v59, %v6492_v20  ;;  %v6036_v56 = vld [vmem:[#allocation2 + $0x828] sm:$0xff]  ;;  %v6721_v45 = vadd.f32 %v17092_v59, %v6266_v4  ;;  %v5817_v41 = vld [vmem:[#allocation2 + $0x150] sm:$0xff]  ;;  %11740 = vmatprep.mubr.bf16.mxu1 %v12048_v0  ;;  %v14077_v32 = vpop.f32.mrb[61].mxu0 }
 0x190   : > { %5376 = vst.msk [vmem:[#allocation2 + $0x1a0] sm:$0xff] %vm297_vm0, %v4927_v22  ;;  %5600 = vst.msk [vmem:[#allocation2 + $0x8a0] sm:$0xff] %vm297_vm0, %v5151_v9  ;;  %v6945_v46 = vadd.f32 %v17092_v59, %v6490_v50  ;;  %v6491_v25 = vmul.f32 %v17091_v35, %v6036_v56  ;;  %v6724_v38 = vadd.f32 %v17092_v59, %v6269_v12  ;;  %v6041_v15 = vld [vmem:[#allocation2 + $0x850] sm:$0xff]  ;;  %v5815_v36 = vld [vmem:[#allocation2 + $0x140] sm:$0xff]  ;;  %v14088_v4 = vpop.f32.mrb[62].mxu0 }
 0x191   : > { %5379 = vst.msk [vmem:[#allocation2 + $0x1b8] sm:$0xff] %vm297_vm0, %v4930_v8  ;;  %5603 = vst.msk [vmem:[#allocation2 + $0x8b8] sm:$0xff] %vm297_vm0, %v5154_v1  ;;  %v7171_v57 = vmax.f32 %v6723_v60, 0.0  ;;  %v7395_v37 = vmax.f32 %v6947_v2, 0.0  ;;  %v6948_v40 = vadd.f32 %v17092_v59, %v6493_v43  ;;  %v7169_v44 = vmax.f32 %v6721_v45, 0.0  ;;  %v6039_v7 = vld [vmem:[#allocation2 + $0x840] sm:$0xff] }
 0x192   : > { %5377 = vst.msk [vmem:[#allocation2 + $0x1a8] sm:$0xff] %vm297_vm0, %v4928_v53  ;;  %5601 = vst.msk [vmem:[#allocation2 + $0x8a8] sm:$0xff] %vm297_vm0, %v5152_v58  ;;  %v7393_v29 = vmax.f32 %v6945_v46, 0.0  ;;  %v6722_v5 = vadd.f32 %v17092_v59, %v6267_v27  ;;  %v6946_v17 = vadd.f32 %v17092_v59, %v6491_v25  ;;  %v7172_v23 = vmax.f32 %v6724_v38, 0.0  ;;  %v5818_v11 = vld [vmem:[#allocation2 + $0x158] sm:$0xff]  ;;  %v5816_v22 = vld [vmem:[#allocation2 + $0x148] sm:$0xff] }
 0x193   : > { %v10689_v16 = vpack.c.bf16 %v7171_v57, %v7171_v57  ;;  %v10913_v19 = vpack.c.bf16 %v7395_v37, %v7395_v37  ;;  %v7396_v55 = vmax.f32 %v6948_v40, 0.0  ;;  %v10687_v47 = vpack.c.bf16 %v7169_v44, %v7169_v44  ;;  %v6042_v63 = vld [vmem:[#allocation2 + $0x858] sm:$0xff]  ;;  %v6040_v9 = vld [vmem:[#allocation2 + $0x848] sm:$0xff]  ;;  %v12051_v51 = vld [vmem:[%s12299_s21 + $0x2b0] sm:$0xff]   ;;  %v14100_v60 = vpop.f32.mrb[62].mxu1  ;;  %v14102_v2 = vpop.f32.mrb[63].mxu0 }
 0x194   : > { %v10911_v13 = vpack.c.bf16 %v7393_v29, %v7393_v29  ;;  %v7170_v48 = vmax.f32 %v6722_v5, 0.0  ;;  %v7394_v21 = vmax.f32 %v6946_v17, 0.0  ;;  %v10690_v18 = vpack.c.bf16 %v7172_v23, %v7172_v23  ;;  %v12049_v20 = vld [vmem:[%s12299_s21 + $0x2a8] sm:$0xff]   ;;  %v12052_v12 = vld [vmem:[%s12299_s21 + $0x630] sm:$0xff]   ;;  %v14113_v46 = vpop.f32.mrb[63].mxu1  ;;  %v6043_v23 = vld [vmem:[#allocation2 + $0x860] sm:$0xff] }
 0x195   : > { %9412 = vst.msk [vmem:[%s13402_s14 + $0x98] sm:$0xf] %vm9373_vm1, %v10689_v16  ;;  %9636 = vst.msk [vmem:[%s13402_s14 + $0x418] sm:$0xf] %vm9373_vm1, %v10913_v19  ;;  %v10914_v54 = vpack.c.bf16 %v7396_v55, %v7396_v55  ;;  %v6272_v26 = vmul.f32 %v17091_v35, %v5817_v41  ;;  %v6496_v24 = vmul.f32 %v17091_v35, %v6041_v15  ;;  %v12050_v50 = vld [vmem:[%s12299_s21 + $0x628] sm:$0xff]   ;;  %11517 = vmatmul.mubr.bf16.gmra.mrb[168].mxu0 %v12049_v20  ;;  %v5821_v5 = vld [vmem:[#allocation2 + $0x170] sm:$0xff] }
 0x196   : > { %9410 = vst.msk [vmem:[%s13402_s14 + $0x90] sm:$0xf] %vm9373_vm1, %v10687_v47  ;;  %9634 = vst.msk [vmem:[%s13402_s14 + $0x410] sm:$0xf] %vm9373_vm1, %v10911_v13  ;;  %v10688_v61 = vpack.c.bf16 %v7170_v48, %v7170_v48  ;;  %v10912_v62 = vpack.c.bf16 %v7394_v21, %v7394_v21  ;;  %v6270_v8 = vmul.f32 %v17091_v35, %v5815_v36  ;;  %v6045_v17 = vld [vmem:[#allocation2 + $0x870] sm:$0xff]  ;;  %11741 = vmatmul.mubr.bf16.gmra.mrb[168].mxu1 %v12050_v50  ;;  %v5819_v19 = vld [vmem:[#allocation2 + $0x160] sm:$0xff] }
 0x197   : > { %v6494_v1 = vmul.f32 %v17091_v35, %v6039_v7  ;;  %9413 = vst.msk [vmem:[%s13402_s14 + $0x9c] sm:$0xf] %vm9373_vm1, %v10690_v18  ;;  %9637 = vst.msk [vmem:[%s13402_s14 + $0x41c] sm:$0xf] %vm9373_vm1, %v10914_v54  ;;  %v6727_v28 = vadd.f32 %v17092_v59, %v6272_v26  ;;  %v6951_v39 = vadd.f32 %v17092_v59, %v6496_v24  ;;  %11520 = vmatprep.mubr.bf16.mxu0 %v12051_v51  ;;  %v5822_v13 = vld [vmem:[#allocation2 + $0x178] sm:$0xff]  ;;  %v14119_v48 = vpop.f32.mrb[64].mxu0 }
 0x198   : > { %v6273_v53 = vmul.f32 %v17091_v35, %v5818_v11  ;;  %v6497_v58 = vmul.f32 %v17091_v35, %v6042_v63  ;;  %9411 = vst.msk [vmem:[%s13402_s14 + $0x94] sm:$0xf] %vm9373_vm1, %v10688_v61  ;;  %9635 = vst.msk [vmem:[%s13402_s14 + $0x414] sm:$0xf] %vm9373_vm1, %v10912_v62  ;;  %v6725_v43 = vadd.f32 %v17092_v59, %v6270_v8  ;;  %11744 = vmatprep.mubr.bf16.mxu1 %v12052_v12  ;;  %v14121_v21 = vpop.f32.mrb[64].mxu1  ;;  %v5820_v24 = vld [vmem:[#allocation2 + $0x168] sm:$0xff] }
 0x199   : > { %v6949_v56 = vadd.f32 %v17092_v59, %v6494_v1  ;;  %v6271_v0 = vmul.f32 %v17091_v35, %v5816_v22  ;;  %v6495_v45 = vmul.f32 %v17091_v35, %v6040_v9  ;;  %v7175_v27 = vmax.f32 %v6727_v28, 0.0  ;;  %v14130_v18 = vld [vmem:[%s17066_s2] ss:$0 sm:$0xff]  ;;  %v6044_v22 = vld [vmem:[#allocation2 + $0x868] sm:$0xff]  ;;  %v14134_v9 = vpop.f32.mrb[65].mxu0  ;;  %v14136_v20 = vpop.f32.mrb[65].mxu1 }
 0x19a   : > { %v7399_v25 = vmax.f32 %v6951_v39, 0.0  ;;  %v6728_v57 = vadd.f32 %v17092_v59, %v6273_v53  ;;  %v6952_v37 = vadd.f32 %v17092_v59, %v6497_v58  ;;  %v7173_v38 = vmax.f32 %v6725_v43, 0.0  ;;  %17093 = vst [vmem:[#allocation8_spill] sm:$0xff] %v14130_v18  ;;  %v12053_v61 = vld [vmem:[%s12299_s21 + $0x2b8] sm:$0xff]   ;;  %v14145_v51 = vpop.f32.mrb[66].mxu0  ;;  %v14147_v28 = vpop.f32.mrb[66].mxu1 }
 0x19b   : > { %v7397_v40 = vmax.f32 %v6949_v56, 0.0  ;;  %v6726_v44 = vadd.f32 %v17092_v59, %v6271_v0  ;;  %v6950_v29 = vadd.f32 %v17092_v59, %v6495_v45  ;;  %v10693_v35 = vpack.c.bf16 %v7175_v27, %v7175_v27  ;;  %v6046_v59 = vld [vmem:[#allocation2 + $0x878] sm:$0xff]  ;;  %v12055_v53 = vld [vmem:[%s12299_s21 + $0x2c0] sm:$0xff]   ;;  %v14164_v45 = vpop.f32.mrb[67].mxu0  ;;  %v14166_v27 = vpop.f32.mrb[67].mxu1 }
 0x19c   : > { %v10917_v41 = vpack.c.bf16 %v7399_v25, %v7399_v25  ;;  %v7176_v15 = vmax.f32 %v6728_v57, 0.0  ;;  %v7400_v16 = vmax.f32 %v6952_v37, 0.0  ;;  %v10691_v55 = vpack.c.bf16 %v7173_v38, %v7173_v38  ;;  %v12054_v39 = vld [vmem:[%s12299_s21 + $0x638] sm:$0xff]   ;;  %v14158_v58 = vld [vmem:[%s17067_s3] ss:$0 sm:$0xff] }
 0x19d   : > { %v10915_v36 = vpack.c.bf16 %v7397_v40, %v7397_v40  ;;  %v7174_v7 = vmax.f32 %v6726_v44, 0.0  ;;  %v7398_v47 = vmax.f32 %v6950_v29, 0.0  ;;  %9416 = vst.msk [vmem:[%s13402_s14 + $0xa8] sm:$0xf] %vm9373_vm1, %v10693_v35  ;;  %v6276_v54 = vmul.f32 %v14130_v18, %v5821_v5  ;;  %17094 = vst [vmem:[#allocation9_spill] sm:$0xff] %v14158_v58  ;;  %v12056_v25 = vld [vmem:[%s12299_s21 + $0x640] sm:$0xff]   ;;  %11521 = vmatmul.mubr.bf16.gmra.mrb[172].mxu0 %v12053_v61 }
 0x19e   : > { %9640 = vst.msk [vmem:[%s13402_s14 + $0x428] sm:$0xf] %vm9373_vm1, %v10917_v41  ;;  %v10694_v11 = vpack.c.bf16 %v7176_v15, %v7176_v15  ;;  %v10918_v63 = vpack.c.bf16 %v7400_v16, %v7400_v16  ;;  %v6500_v26 = vmul.f32 %v14130_v18, %v6045_v17  ;;  %9414 = vst.msk [vmem:[%s13402_s14 + $0xa0] sm:$0xf] %vm9373_vm1, %v10691_v55  ;;  %11745 = vmatmul.mubr.bf16.gmra.mrb[172].mxu1 %v12054_v39  ;;  %v14181_v61 = vpop.f32.mrb[68].mxu0 }
 0x19f   : > { %9638 = vst.msk [vmem:[%s13402_s14 + $0x420] sm:$0xf] %vm9373_vm1, %v10915_v36  ;;  %v10692_v62 = vpack.c.bf16 %v7174_v7, %v7174_v7  ;;  %v10916_v8 = vpack.c.bf16 %v7398_v47, %v7398_v47  ;;  %v6274_v1 = vmul.f32 %v14130_v18, %v5819_v19  ;;  %v6498_v50 = vmul.f32 %v14130_v18, %v6043_v23  ;;  %v5825_v19 = vld [vmem:[#allocation2 + $0x190] sm:$0xff] }
 0x1a0   : > { %9417 = vst.msk [vmem:[%s13402_s14 + $0xac] sm:$0xf] %vm9373_vm1, %v10694_v11  ;;  %9641 = vst.msk [vmem:[%s13402_s14 + $0x42c] sm:$0xf] %vm9373_vm1, %v10918_v63  ;;  %v6731_v12 = vadd.f32 %v14158_v58, %v6276_v54  ;;  %v6955_v43 = vadd.f32 %v14158_v58, %v6500_v26  ;;  %v6277_v56 = vmul.f32 %v14130_v18, %v5822_v13  ;;  %v6049_v23 = vld [vmem:[#allocation2 + $0x890] sm:$0xff]  ;;  %11524 = vmatprep.mubr.bf16.mxu0 %v12055_v53  ;;  %v5823_v13 = vld [vmem:[#allocation2 + $0x180] sm:$0xff] }
 0x1a1   : > { %v6501_v0 = vmul.f32 %v14130_v18, %v6046_v59  ;;  %9415 = vst.msk [vmem:[%s13402_s14 + $0xa4] sm:$0xf] %vm9373_vm1, %v10692_v62  ;;  %9639 = vst.msk [vmem:[%s13402_s14 + $0x424] sm:$0xf] %vm9373_vm1, %v10916_v8  ;;  %v6729_v57 = vadd.f32 %v14158_v58, %v6274_v1  ;;  %v6953_v37 = vadd.f32 %v14158_v58, %v6498_v50  ;;  %v6047_v59 = vld [vmem:[#allocation2 + $0x880] sm:$0xff]  ;;  %11748 = vmatprep.mubr.bf16.mxu1 %v12056_v25  ;;  %v14183_v62 = vpop.f32.mrb[68].mxu1 }
 0x1a2   : > { %v6275_v38 = vmul.f32 %v14130_v18, %v5820_v24  ;;  %v6499_v40 = vmul.f32 %v14130_v18, %v6044_v22  ;;  %v7179_v44 = vmax.f32 %v6731_v12, 0.0  ;;  %v7403_v29 = vmax.f32 %v6955_v43, 0.0  ;;  %v5826_v24 = vld [vmem:[#allocation2 + $0x198] sm:$0xff]  ;;  %v5824_v53 = vld [vmem:[#allocation2 + $0x188] sm:$0xff]  ;;  %v14191_v43 = vpop.f32.mrb[69].mxu0 }
 0x1a3   : > { %v6732_v5 = vadd.f32 %v14158_v58, %v6277_v56  ;;  %v6956_v17 = vadd.f32 %v14158_v58, %v6501_v0  ;;  %v7177_v35 = vmax.f32 %v6729_v57, 0.0  ;;  %v7401_v41 = vmax.f32 %v6953_v37, 0.0  ;;  %v6050_v22 = vld [vmem:[#allocation2 + $0x898] sm:$0xff]  ;;  %v6048_v12 = vld [vmem:[#allocation2 + $0x888] sm:$0xff]  ;;  %v14193_v56 = vpop.f32.mrb[69].mxu1 }
 0x1a4   : > { %v6730_v15 = vadd.f32 %v14158_v58, %v6275_v38  ;;  %v6954_v16 = vadd.f32 %v14158_v58, %v6499_v40  ;;  %v10697_v55 = vpack.c.bf16 %v7179_v44, %v7179_v44  ;;  %v10921_v36 = vpack.c.bf16 %v7403_v29, %v7403_v29  ;;  %v12057_v0 = vld [vmem:[%s12299_s21 + $0x2c8] sm:$0xff]   ;;  %v14202_v40 = vpop.f32.mrb[70].mxu0  ;;  %v14204_v44 = vpop.f32.mrb[70].mxu1 }
 0x1a5   : > { %v7180_v7 = vmax.f32 %v6732_v5, 0.0  ;;  %v7404_v47 = vmax.f32 %v6956_v17, 0.0  ;;  %v10695_v11 = vpack.c.bf16 %v7177_v35, %v7177_v35  ;;  %v10919_v63 = vpack.c.bf16 %v7401_v41, %v7401_v41  ;;  %17095 = vst [vmem:[#allocation10_spill] sm:$0xff] %v14204_v44  ;;  %v12058_v29 = vld [vmem:[%s12299_s21 + $0x648] sm:$0xff]   ;;  %v12059_v5 = vld [vmem:[%s12299_s21 + $0x2d0] sm:$0xff]   ;;  %11525 = vmatmul.mubr.bf16.gmra.mrb[176].mxu0 %v12057_v0 }
 0x1a6   : > { %v7178_v54 = vmax.f32 %v6730_v15, 0.0  ;;  %v7402_v26 = vmax.f32 %v6954_v16, 0.0  ;;  %9420 = vst.msk [vmem:[%s13402_s14 + $0xb8] sm:$0xf] %vm9373_vm1, %v10697_v55  ;;  %9644 = vst.msk [vmem:[%s13402_s14 + $0x438] sm:$0xf] %vm9373_vm1, %v10921_v36  ;;  %v6280_v50 = vmul.f32 %v14130_v18, %v5825_v19  ;;  %v6504_v39 = vmul.f32 %v14130_v18, %v6049_v23  ;;  %11749 = vmatmul.mubr.bf16.gmra.mrb[176].mxu1 %v12058_v29 }
 0x1a7   : > { %v10698_v8 = vpack.c.bf16 %v7180_v7, %v7180_v7  ;;  %v10922_v1 = vpack.c.bf16 %v7404_v47, %v7404_v47  ;;  %9418 = vst.msk [vmem:[%s13402_s14 + $0xb0] sm:$0xf] %vm9373_vm1, %v10695_v11  ;;  %9642 = vst.msk [vmem:[%s13402_s14 + $0x430] sm:$0xf] %vm9373_vm1, %v10919_v63  ;;  %v6278_v37 = vmul.f32 %v14130_v18, %v5823_v13  ;;  %v14216_v16 = vpop.f32.mrb[71].mxu0  ;;  %v14218_v19 = vpop.f32.mrb[71].mxu1  ;;  %11528 = vmatprep.mubr.bf16.mxu0 %v12059_v5 }
 0x1a8   : > { %v10696_v25 = vpack.c.bf16 %v7178_v54, %v7178_v54  ;;  %v10920_v57 = vpack.c.bf16 %v7402_v26, %v7402_v26  ;;  %v6502_v38 = vmul.f32 %v14130_v18, %v6047_v59  ;;  %v6735_v17 = vadd.f32 %v14158_v58, %v6280_v50  ;;  %17096 = vst [vmem:[#allocation6_spill] sm:$0xff] %v14216_v16  ;;  %v12060_v23 = vld [vmem:[%s12299_s21 + $0x650] sm:$0xff]   ;;  %v14233_v29 = vpop.f32.mrb[72].mxu0  ;;  %v14235_v5 = vpop.f32.mrb[72].mxu1  ;;  %v807_v16 = vld [vmem:[#allocation2 + $0x1e8] sm:$0xff] }
 0x1a9   : > { %9421 = vst.msk [vmem:[%s13402_s14 + $0xbc] sm:$0xf] %vm9373_vm1, %v10698_v8  ;;  %9645 = vst.msk [vmem:[%s13402_s14 + $0x43c] sm:$0xf] %vm9373_vm1, %v10922_v1  ;;  %v6959_v35 = vadd.f32 %v14158_v58, %v6504_v39  ;;  %v6281_v41 = vmul.f32 %v14130_v18, %v5826_v24  ;;  %v6505_v15 = vmul.f32 %v14130_v18, %v6050_v22  ;;  %v5829_v8 = vld [vmem:[#allocation2 + $0x1b0] sm:$0xff]  ;;  %11752 = vmatprep.mubr.bf16.mxu1 %v12060_v23 }
 0x1aa   : > { %17097 = vst [vmem:[#allocation7_spill] sm:$0xff] %v14218_v19  ;;  %9419 = vst.msk [vmem:[%s13402_s14 + $0xb4] sm:$0xf] %vm9373_vm1, %v10696_v25  ;;  %v6733_v55 = vadd.f32 %v14158_v58, %v6278_v37  ;;  %v6957_v36 = vadd.f32 %v14158_v58, %v6502_v38  ;;  %v6279_v7 = vmul.f32 %v14130_v18, %v5824_v53  ;;  %v7183_v13 = vmax.f32 %v6735_v17, 0.0  ;;  %v6053_v1 = vld [vmem:[#allocation2 + $0x8b0] sm:$0xff]  ;;  %v5827_v25 = vld [vmem:[#allocation2 + $0x1a0] sm:$0xff] }
 0x1ab   : > { %9643 = vst.msk [vmem:[%s13402_s14 + $0x434] sm:$0xf] %vm9373_vm1, %v10920_v57  ;;  %v6503_v47 = vmul.f32 %v14130_v18, %v6048_v12  ;;  %v7407_v59 = vmax.f32 %v6959_v35, 0.0  ;;  %v6736_v11 = vadd.f32 %v14158_v58, %v6281_v41  ;;  %v6960_v63 = vadd.f32 %v14158_v58, %v6505_v15  ;;  %v6051_v57 = vld [vmem:[#allocation2 + $0x8a0] sm:$0xff]  ;;  %v5830_v35 = vld [vmem:[#allocation2 + $0x1b8] sm:$0xff]  ;;  %17098 = vst [vmem:[#allocation11_spill] sm:$0xff] %v14233_v29 }
 0x1ac   : > { %v7181_v54 = vmax.f32 %v6733_v55, 0.0  ;;  %v7405_v26 = vmax.f32 %v6957_v36, 0.0  ;;  %v6734_v24 = vadd.f32 %v14158_v58, %v6279_v7  ;;  %v10701_v50 = vpack.c.bf16 %v7183_v13, %v7183_v13  ;;  %v6054_v41 = vld [vmem:[#allocation2 + $0x8b8] sm:$0xff]  ;;  %17099 = vst [vmem:[#allocation12_spill] sm:$0xff] %v14235_v5  ;;  %v5828_v7 = vld [vmem:[#allocation2 + $0x1a8] sm:$0xff]  ;;  %v14243_v13 = vpop.f32.mrb[73].mxu0 }
 0x1ad   : > { %v6958_v22 = vadd.f32 %v14158_v58, %v6503_v47  ;;  %v10925_v39 = vpack.c.bf16 %v7407_v59, %v7407_v59  ;;  %v7184_v53 = vmax.f32 %v6736_v11, 0.0  ;;  %v7408_v12 = vmax.f32 %v6960_v63, 0.0  ;;  %v6052_v47 = vld [vmem:[#allocation2 + $0x8a8] sm:$0xff]  ;;  %17100 = vst [vmem:[#allocation13_spill] sm:$0xff] %v14243_v13  ;;  %v14245_v59 = vpop.f32.mrb[73].mxu1  ;;  %v12061_v11 = vld [vmem:[%s12299_s21 + $0x2d8] sm:$0xff]  }
 0x1ae   : > { %v10699_v0 = vpack.c.bf16 %v7181_v54, %v7181_v54  ;;  %v10923_v37 = vpack.c.bf16 %v7405_v26, %v7405_v26  ;;  %v7182_v38 = vmax.f32 %v6734_v24, 0.0  ;;  %9424 = vst.msk [vmem:[%s13402_s14 + $0xc8] sm:$0xf] %vm9373_vm1, %v10701_v50  ;;  %v6284_v23 = vmul.f32 %v14130_v18, %v5829_v8  ;;  %17101 = vst [vmem:[#allocation14_spill] sm:$0xff] %v14245_v59  ;;  %v14256_v8 = vpop.f32.mrb[74].mxu1  ;;  %v12063_v50 = vld [vmem:[%s12299_s21 + $0x2e0] sm:$0xff]  }
 0x1af   : > { %v7406_v17 = vmax.f32 %v6958_v22, 0.0  ;;  %9648 = vst.msk [vmem:[%s13402_s14 + $0x448] sm:$0xf] %vm9373_vm1, %v10925_v39  ;;  %v10702_v15 = vpack.c.bf16 %v7184_v53, %v7184_v53  ;;  %v10926_v55 = vpack.c.bf16 %v7408_v12, %v7408_v12  ;;  %v6508_v36 = vmul.f32 %v14130_v18, %v6053_v1  ;;  %v14254_v22 = vpop.f32.mrb[74].mxu0  ;;  %17103 = vst [vmem:[#allocation16_spill] sm:$0xff] %v14256_v8  ;;  %v12062_v1 = vld [vmem:[%s12299_s21 + $0x658] sm:$0xff]  }
 0x1b0   : > { %9422 = vst.msk [vmem:[%s13402_s14 + $0xc0] sm:$0xf] %vm9373_vm1, %v10699_v0  ;;  %9646 = vst.msk [vmem:[%s13402_s14 + $0x440] sm:$0xf] %vm9373_vm1, %v10923_v37  ;;  %v10700_v63 = vpack.c.bf16 %v7182_v38, %v7182_v38  ;;  %v6282_v26 = vmul.f32 %v14130_v18, %v5827_v25  ;;  %v6506_v24 = vmul.f32 %v14130_v18, %v6051_v57  ;;  %v14268_v0 = vpop.f32.mrb[75].mxu0  ;;  %v14270_v57 = vpop.f32.mrb[75].mxu1  ;;  %11529 = vmatmul.mubr.bf16.gmra.mrb[180].mxu0 %v12061_v11 }
 0x1b1   : > { %v10924_v54 = vpack.c.bf16 %v7406_v17, %v7406_v17  ;;  %17102 = vst [vmem:[#allocation15_spill] sm:$0xff] %v14254_v22  ;;  %9425 = vst.msk [vmem:[%s13402_s14 + $0xcc] sm:$0xf] %vm9373_vm1, %v10702_v15  ;;  %v6739_v39 = vadd.f32 %v14158_v58, %v6284_v23  ;;  %v6963_v53 = vadd.f32 %v14158_v58, %v6508_v36  ;;  %v12064_v37 = vld [vmem:[%s12299_s21 + $0x660] sm:$0xff]   ;;  %v1029_v59 = vld [vmem:[#allocation2 + $0x8d8] sm:$0xff]  ;;  %11753 = vmatmul.mubr.bf16.gmra.mrb[180].mxu1 %v12062_v1 }
 0x1b2   : > { %9649 = vst.msk [vmem:[%s13402_s14 + $0x44c] sm:$0xf] %vm9373_vm1, %v10926_v55  ;;  %v6285_v12 = vmul.f32 %v14130_v18, %v5830_v35  ;;  %v6509_v25 = vmul.f32 %v14130_v18, %v6054_v41  ;;  %17104 = vst [vmem:[#allocation17_spill] sm:$0xff] %v14268_v0  ;;  %v6737_v38 = vadd.f32 %v14158_v58, %v6282_v26  ;;  %v804_v35 = vld [vmem:[#allocation2 + $0x1d0] sm:$0xff]  ;;  %v802_v8 = vld [vmem:[#allocation2 + $0x1c0] sm:$0xff]  ;;  %11532 = vmatprep.mubr.bf16.mxu0 %v12063_v50  ;;  %v14285_v50 = vpop.f32.mrb[76].mxu0 }
 0x1b3   : > { %17105 = vst [vmem:[#allocation18_spill] sm:$0xff] %v14270_v57  ;;  %9423 = vst.msk [vmem:[%s13402_s14 + $0xc4] sm:$0xf] %vm9373_vm1, %v10700_v63  ;;  %v6961_v17 = vadd.f32 %v14158_v58, %v6506_v24  ;;  %v6283_v15 = vmul.f32 %v14130_v18, %v5828_v7  ;;  %v6507_v55 = vmul.f32 %v14130_v18, %v6052_v47  ;;  %v7187_v23 = vmax.f32 %v6739_v39, 0.0  ;;  %v1028_v0 = vld [vmem:[#allocation2 + $0x8d0] sm:$0xff]  ;;  %v1026_v63 = vld [vmem:[#allocation2 + $0x8c0] sm:$0xff] }
 0x1b4   : > { %9647 = vst.msk [vmem:[%s13402_s14 + $0x444] sm:$0xf] %vm9373_vm1, %v10924_v54  ;;  %v7411_v41 = vmax.f32 %v6963_v53, 0.0  ;;  %v6740_v36 = vadd.f32 %v14158_v58, %v6285_v12  ;;  %v6964_v57 = vadd.f32 %v14158_v58, %v6509_v25  ;;  %v7185_v54 = vmax.f32 %v6737_v38, 0.0  ;;  %v805_v7 = vld [vmem:[#allocation2 + $0x1d8] sm:$0xff]  ;;  %v803_v47 = vld [vmem:[#allocation2 + $0x1c8] sm:$0xff]  ;;  %11756 = vmatprep.mubr.bf16.mxu1 %v12064_v37 }
 0x1b5   : > { %v7409_v22 = vmax.f32 %v6961_v17, 0.0  ;;  %v6738_v26 = vadd.f32 %v14158_v58, %v6283_v15  ;;  %v6962_v24 = vadd.f32 %v14158_v58, %v6507_v55  ;;  %v1027_v18 = vld [vmem:[#allocation2 + $0x8c8] sm:$0xff]  ;;  %v10705_v39 = vpack.c.bf16 %v7187_v23, %v7187_v23  ;;  %v808_v13 = vld [vmem:[#allocation2 + $0x1f0] sm:$0xff]  ;;  %v806_v38 = vld [vmem:[#allocation2 + $0x1e0] sm:$0xff]  ;;  %17106 = vst [vmem:[#allocation19_spill] sm:$0xff] %v14285_v50  ;;  %v14295_v50 = vpop.f32.mrb[77].mxu0 }
 0x1b6   : > { %v10929_v53 = vpack.c.bf16 %v7411_v41, %v7411_v41  ;;  %v7188_v12 = vmax.f32 %v6740_v36, 0.0  ;;  %v7412_v25 = vmax.f32 %v6964_v57, 0.0  ;;  %v1032_v11 = vld [vmem:[#allocation2 + $0x8f0] sm:$0xff]  ;;  %v1030_v17 = vld [vmem:[#allocation2 + $0x8e0] sm:$0xff]  ;;  %v10703_v15 = vpack.c.bf16 %v7185_v54, %v7185_v54  ;;  %v809_v29 = vld [vmem:[#allocation2 + $0x1f8] sm:$0xff]  ;;  %v14287_v57 = vpop.f32.mrb[76].mxu1 }
 0x1b7   : > { %v10927_v5 = vpack.c.bf16 %v7409_v22, %v7409_v22  ;;  %v7186_v55 = vmax.f32 %v6738_v26, 0.0  ;;  %v7410_v58 = vmax.f32 %v6962_v24, 0.0  ;;  %v1033_v19 = vld [vmem:[#allocation2 + $0x8f8] sm:$0xff]  ;;  %v1031_v1 = vld [vmem:[#allocation2 + $0x8e8] sm:$0xff]  ;;  %17107 = vst [vmem:[#allocation20_spill] sm:$0xff] %v14287_v57  ;;  %v4933_v22 = vadd.f32 %v14016_v30, %v804_v35  ;;  %v812_v36 = vld [vmem:[#allocation2 + $0x210] sm:$0xff] }
 0x1b8   : > { %9428 = vst.msk [vmem:[%s13402_s14 + $0xd8] sm:$0xf] %vm9373_vm1, %v10705_v39  ;;  %9652 = vst.msk [vmem:[%s13402_s14 + $0x458] sm:$0xf] %vm9373_vm1, %v10929_v53  ;;  %v10706_v37 = vpack.c.bf16 %v7188_v12, %v7188_v12  ;;  %v10930_v23 = vpack.c.bf16 %v7412_v25, %v7412_v25  ;;  %v5157_v41 = vadd.f32 %v14018_v31, %v1028_v0  ;;  %v1036_v54 = vld [vmem:[#allocation2 + $0x910] sm:$0xff]  ;;  %v810_v26 = vld [vmem:[#allocation2 + $0x200] sm:$0xff] }
 0x1b9   : > { %v1034_v24 = vld [vmem:[#allocation2 + $0x900] sm:$0xff]  ;;  %17108 = vst [vmem:[#allocation21_spill] sm:$0xff] %v14295_v50  ;;  %v14297_v57 = vpop.f32.mrb[77].mxu1  ;;  %v12065_v39 = vld [vmem:[%s12299_s21 + $0x2e8] sm:$0xff]   ;;  %9426 = vst.msk [vmem:[%s13402_s14 + $0xd0] sm:$0xf] %vm9373_vm1, %v10703_v15  ;;  %v10704_v53 = vpack.c.bf16 %v7186_v55, %v7186_v55  ;;  %v10928_v30 = vpack.c.bf16 %v7410_v58, %v7410_v58  ;;  %v4931_v31 = vadd.f32 %v14029_v33, %v802_v8 }
 0x1ba   : > { %17109 = vst [vmem:[#allocation22_spill] sm:$0xff] %v14297_v57  ;;  %9650 = vst.msk [vmem:[%s13402_s14 + $0x450] sm:$0xf] %vm9373_vm1, %v10927_v5  ;;  %v5155_v0 = vadd.f32 %v14031_v3, %v1026_v63  ;;  %v813_v35 = vld [vmem:[#allocation2 + $0x218] sm:$0xff]  ;;  %v811_v25 = vld [vmem:[#allocation2 + $0x208] sm:$0xff]  ;;  %v14306_v44 = vpop.f32.mrb[78].mxu0  ;;  %v4934_v33 = vadd.f32 %v14042_v42, %v805_v7  ;;  %v5158_v3 = vadd.f32 %v14044_v49, %v1029_v59  ;;  %11533 = vmatmul.mubr.bf16.gmra.mrb[184].mxu0 %v12065_v39 }
 0x1bb   : > { %v1037_v12 = vld [vmem:[#allocation2 + $0x918] sm:$0xff]  ;;  %v14308_v50 = vpop.f32.mrb[78].mxu1  ;;  %v12066_v57 = vld [vmem:[%s12299_s21 + $0x668] sm:$0xff]   ;;  %9429 = vst.msk [vmem:[%s13402_s14 + $0xdc] sm:$0xf] %vm9373_vm1, %v10706_v37  ;;  %v4932_v58 = vadd.f32 %v14052_v6, %v803_v47  ;;  %v5156_v5 = vadd.f32 %v14054_v52, %v1027_v18  ;;  %v816_v63 = vld [vmem:[#allocation2 + $0x230] sm:$0xff]  ;;  %v4937_v42 = vadd.f32 %v14067_v14, %v808_v13  ;;  %v5161_v49 = vadd.f32 %v14075_v34, %v1032_v11 }
 0x1bc   : > { %9653 = vst.msk [vmem:[%s13402_s14 + $0x45c] sm:$0xf] %vm9373_vm1, %v10930_v23  ;;  %v1035_v8 = vld [vmem:[#allocation2 + $0x908] sm:$0xff]  ;;  %v14321_v15 = vpop.f32.mrb[79].mxu0  ;;  %v14323_v55 = vpop.f32.mrb[79].mxu1  ;;  %v12067_v37 = vld [vmem:[%s12299_s21 + $0x2f0] sm:$0xff]   ;;  %v4935_v6 = vadd.f32 %v14077_v32, %v806_v38  ;;  %v5159_v52 = vadd.f32 %v14086_v10, %v1030_v17  ;;  %v4938_v47 = vadd.f32 %v14088_v4, %v809_v29  ;;  %v5162_v14 = vadd.f32 %v14100_v60, %v1033_v19 }
 0x1bd   : > { %5382 = vst.msk [vmem:[#allocation2 + $0x1d0] sm:$0xff] %vm297_vm0, %v4933_v22  ;;  %5606 = vst.msk [vmem:[#allocation2 + $0x8d0] sm:$0xff] %vm297_vm0, %v5157_v41  ;;  %v1040_v18 = vld [vmem:[#allocation2 + $0x930] sm:$0xff]  ;;  %v814_v59 = vld [vmem:[#allocation2 + $0x220] sm:$0xff]  ;;  %v4936_v34 = vadd.f32 %v14102_v2, %v807_v16  ;;  %v5160_v32 = vadd.f32 %v14113_v46, %v1031_v1  ;;  %v4941_v4 = vadd.f32 %v14119_v48, %v812_v36  ;;  %11757 = vmatmul.mubr.bf16.gmra.mrb[184].mxu1 %v12066_v57  ;;  %v14369_v41 = vpop.f32.mrb[80].mxu0  ;;  %v14371_v36 = vpop.f32.mrb[80].mxu1 }
 0x1be   : > { %9427 = vst.msk [vmem:[%s13402_s14 + $0xd4] sm:$0xf] %vm9373_vm1, %v10704_v53  ;;  %9651 = vst.msk [vmem:[%s13402_s14 + $0x454] sm:$0xf] %vm9373_vm1, %v10928_v30  ;;  %v12068_v7 = vld [vmem:[%s12299_s21 + $0x670] sm:$0xff]   ;;  %v1038_v10 = vld [vmem:[#allocation2 + $0x920] sm:$0xff]  ;;  %v5165_v60 = vadd.f32 %v14121_v21, %v1036_v54  ;;  %v4939_v2 = vadd.f32 %v14134_v9, %v810_v26  ;;  %v5163_v46 = vadd.f32 %v14136_v20, %v1034_v24  ;;  %11536 = vmatprep.mubr.bf16.mxu0 %v12067_v37 }
 0x1bf   : > { %5380 = vst.msk [vmem:[#allocation2 + $0x1c0] sm:$0xff] %vm297_vm0, %v4931_v31  ;;  %5604 = vst.msk [vmem:[#allocation2 + $0x8c0] sm:$0xff] %vm297_vm0, %v5155_v0  ;;  %v817_v13 = vld [vmem:[#allocation2 + $0x238] sm:$0xff]  ;;  %v815_v16 = vld [vmem:[#allocation2 + $0x228] sm:$0xff]  ;;  %v4942_v48 = vadd.f32 %v14145_v51, %v813_v35  ;;  %v5166_v21 = vadd.f32 %v14147_v28, %v1037_v12  ;;  %v4940_v9 = vadd.f32 %v14164_v45, %v811_v25  ;;  %11760 = vmatprep.mubr.bf16.mxu1 %v12068_v7  ;;  %v14381_v53 = vpop.f32.mrb[81].mxu0  ;;  %v14383_v30 = vpop.f32.mrb[81].mxu1 }
 0x1c0   : > { %5383 = vst.msk [vmem:[#allocation2 + $0x1d8] sm:$0xff] %vm297_vm0, %v4934_v33  ;;  %5607 = vst.msk [vmem:[#allocation2 + $0x8d8] sm:$0xff] %vm297_vm0, %v5158_v3  ;;  %v1041_v11 = vld [vmem:[#allocation2 + $0x938] sm:$0xff]  ;;  %v1039_v19 = vld [vmem:[#allocation2 + $0x928] sm:$0xff]  ;;  %v5164_v20 = vadd.f32 %v14166_v27, %v1035_v8  ;;  %v4945_v51 = vadd.f32 %v14181_v61, %v816_v63  ;;  %v5169_v28 = vadd.f32 %v14183_v62, %v1040_v18  ;;  %v14395_v37 = vpop.f32.mrb[82].mxu0 }
 0x1c1   : > { %5381 = vst.msk [vmem:[#allocation2 + $0x1c8] sm:$0xff] %vm297_vm0, %v4932_v58  ;;  %5605 = vst.msk [vmem:[#allocation2 + $0x8c8] sm:$0xff] %vm297_vm0, %v5156_v5  ;;  %v820_v29 = vld [vmem:[#allocation2 + $0x250] sm:$0xff]  ;;  %v818_v17 = vld [vmem:[#allocation2 + $0x240] sm:$0xff]  ;;  %v4943_v45 = vadd.f32 %v14191_v43, %v814_v59  ;;  %v5167_v27 = vadd.f32 %v14193_v56, %v1038_v10  ;;  %v4946_v61 = vadd.f32 %v14202_v40, %v817_v13  ;;  %v14408_v10 = vpop.f32.mrb[83].mxu0 }
 0x1c2   : > { %5386 = vst.msk [vmem:[#allocation2 + $0x1f0] sm:$0xff] %vm297_vm0, %v4937_v42  ;;  %5610 = vst.msk [vmem:[#allocation2 + $0x8f0] sm:$0xff] %vm297_vm0, %v5161_v49  ;;  %v1044_v38 = vld [vmem:[#allocation2 + $0x950] sm:$0xff]  ;;  %v1042_v1 = vld [vmem:[#allocation2 + $0x940] sm:$0xff]  ;;  %v14397_v42 = vpop.f32.mrb[82].mxu1 }
 0x1c3   : > { %5384 = vst.msk [vmem:[#allocation2 + $0x1e0] sm:$0xff] %vm297_vm0, %v4935_v6  ;;  %5608 = vst.msk [vmem:[#allocation2 + $0x8e0] sm:$0xff] %vm297_vm0, %v5159_v52  ;;  %v821_v57 = vld [vmem:[#allocation2 + $0x258] sm:$0xff]  ;;  %v819_v22 = vld [vmem:[#allocation2 + $0x248] sm:$0xff]  ;;  %v14410_v13 = vpop.f32.mrb[83].mxu1 }
 0x1c4   : > { %5387 = vst.msk [vmem:[#allocation2 + $0x1f8] sm:$0xff] %vm297_vm0, %v4938_v47  ;;  %5611 = vst.msk [vmem:[#allocation2 + $0x8f8] sm:$0xff] %vm297_vm0, %v5162_v14  ;;  %v1045_v23 = vld [vmem:[#allocation2 + $0x958] sm:$0xff]  ;;  %v17110_v62 = vld [vmem:[#allocation10_spill] sm:$0xff] }
 0x1c5   : > { %5385 = vst.msk [vmem:[#allocation2 + $0x1e8] sm:$0xff] %vm297_vm0, %v4936_v34  ;;  %5609 = vst.msk [vmem:[#allocation2 + $0x8e8] sm:$0xff] %vm297_vm0, %v5160_v32  ;;  %v5170_v43 = vadd.f32 %v17110_v62, %v1041_v11  ;;  %v17111_v56 = vld [vmem:[#allocation6_spill] sm:$0xff]  ;;  %v17112_v26 = vld [vmem:[#allocation7_spill] sm:$0xff] }
 0x1c6   : > { %5390 = vst.msk [vmem:[#allocation2 + $0x210] sm:$0xff] %vm297_vm0, %v4941_v4  ;;  %5614 = vst.msk [vmem:[#allocation2 + $0x910] sm:$0xff] %vm297_vm0, %v5165_v60  ;;  %v4944_v54 = vadd.f32 %v17111_v56, %v815_v16  ;;  %v5168_v24 = vadd.f32 %v17112_v26, %v1039_v19  ;;  %v1043_v39 = vld [vmem:[#allocation2 + $0x948] sm:$0xff]  ;;  %v12069_v31 = vld [vmem:[%s12299_s21 + $0x2f8] sm:$0xff]  }
 0x1c7   : > { %5388 = vst.msk [vmem:[#allocation2 + $0x200] sm:$0xff] %vm297_vm0, %v4939_v2  ;;  %5612 = vst.msk [vmem:[#allocation2 + $0x900] sm:$0xff] %vm297_vm0, %v5163_v46  ;;  %v12070_v0 = vld [vmem:[%s12299_s21 + $0x678] sm:$0xff]   ;;  %v5833_v35 = vld [vmem:[#allocation2 + $0x1d0] sm:$0xff]  ;;  %11537 = vmatmul.mubr.bf16.gmra.mrb[188].mxu0 %v12069_v31  ;;  %v14437_v31 = vpop.f32.mrb[84].mxu0 }
 0x1c8   : > { %5391 = vst.msk [vmem:[#allocation2 + $0x218] sm:$0xff] %vm297_vm0, %v4942_v48  ;;  %5615 = vst.msk [vmem:[#allocation2 + $0x918] sm:$0xff] %vm297_vm0, %v5166_v21  ;;  %v6057_v12 = vld [vmem:[#allocation2 + $0x8d0] sm:$0xff]  ;;  %v17113_v40 = vld [vmem:[#allocation11_spill] sm:$0xff]  ;;  %11761 = vmatmul.mubr.bf16.gmra.mrb[188].mxu1 %v12070_v0 }
 0x1c9   : > { %5389 = vst.msk [vmem:[#allocation2 + $0x208] sm:$0xff] %vm297_vm0, %v4940_v9  ;;  %5613 = vst.msk [vmem:[#allocation2 + $0x908] sm:$0xff] %vm297_vm0, %v5164_v20  ;;  %v4949_v25 = vadd.f32 %v17113_v40, %v820_v29  ;;  %v17114_v33 = vld [vmem:[#allocation12_spill] sm:$0xff]  ;;  %v17115_v58 = vld [vmem:[#allocation13_spill] sm:$0xff] }
 0x1ca   : > { %5394 = vst.msk [vmem:[#allocation2 + $0x230] sm:$0xff] %vm297_vm0, %v4945_v51  ;;  %5618 = vst.msk [vmem:[#allocation2 + $0x930] sm:$0xff] %vm297_vm0, %v5169_v28  ;;  %v5173_v3 = vadd.f32 %v17114_v33, %v1044_v38  ;;  %v4947_v5 = vadd.f32 %v17115_v58, %v818_v17  ;;  %v17116_v8 = vld [vmem:[#allocation14_spill] sm:$0xff]  ;;  %v17117_v6 = vld [vmem:[#allocation8_spill] sm:$0xff]  ;;  %v14440_v58 = vpop.f32.mrb[84].mxu1 }
 0x1cb   : > { %5392 = vst.msk [vmem:[#allocation2 + $0x220] sm:$0xff] %vm297_vm0, %v4943_v45  ;;  %5616 = vst.msk [vmem:[#allocation2 + $0x920] sm:$0xff] %vm297_vm0, %v5167_v27  ;;  %v5171_v63 = vadd.f32 %v17116_v8, %v1042_v1  ;;  %v12071_v49 = vld [vmem:[%s12299_s21 + $0x300] sm:$0xff]   ;;  %v6288_v52 = vmul.f32 %v17117_v6, %v5833_v35  ;;  %v6512_v18 = vmul.f32 %v17117_v6, %v6057_v12  ;;  %v17118_v47 = vld [vmem:[#allocation15_spill] sm:$0xff] }
 0x1cc   : > { %v5831_v59 = vld [vmem:[#allocation2 + $0x1c0] sm:$0xff]  ;;  %5395 = vst.msk [vmem:[#allocation2 + $0x238] sm:$0xff] %vm297_vm0, %v4946_v61  ;;  %5619 = vst.msk [vmem:[#allocation2 + $0x938] sm:$0xff] %vm297_vm0, %v5170_v43  ;;  %v4950_v14 = vadd.f32 %v17118_v47, %v821_v57  ;;  %v17119_v34 = vld [vmem:[#allocation16_spill] sm:$0xff]  ;;  %11540 = vmatprep.mubr.bf16.mxu0 %v12071_v49 }
 0x1cd   : > { %v6055_v7 = vld [vmem:[#allocation2 + $0x8c0] sm:$0xff]  ;;  %5393 = vst.msk [vmem:[#allocation2 + $0x228] sm:$0xff] %vm297_vm0, %v4944_v54  ;;  %5617 = vst.msk [vmem:[#allocation2 + $0x928] sm:$0xff] %vm297_vm0, %v5168_v24  ;;  %v5174_v32 = vadd.f32 %v17119_v34, %v1045_v23  ;;  %v6286_v4 = vmul.f32 %v17117_v6, %v5831_v59  ;;  %v5834_v2 = vld [vmem:[#allocation2 + $0x1d8] sm:$0xff] }
 0x1ce   : > { %v12072_v11 = vld [vmem:[%s12299_s21 + $0x680] sm:$0xff]   ;;  %v6510_v60 = vmul.f32 %v17117_v6, %v6055_v7  ;;  %v6058_v46 = vld [vmem:[#allocation2 + $0x8d8] sm:$0xff]  ;;  %v5832_v16 = vld [vmem:[#allocation2 + $0x1c8] sm:$0xff]  ;;  %5398 = vst.msk [vmem:[#allocation2 + $0x250] sm:$0xff] %vm297_vm0, %v4949_v25  ;;  %v6289_v17 = vmul.f32 %v17117_v6, %v5834_v2  ;;  %v14443_v7 = vpop.f32.mrb[85].mxu0  ;;  %v14452_v2 = vpop.f32.mrb[85].mxu1 }
 0x1cf   : > { %5622 = vst.msk [vmem:[#allocation2 + $0x950] sm:$0xff] %vm297_vm0, %v5173_v3  ;;  %5396 = vst.msk [vmem:[#allocation2 + $0x240] sm:$0xff] %vm297_vm0, %v4947_v5  ;;  %v17120_v19 = vld [vmem:[#allocation17_spill] sm:$0xff]  ;;  %v17121_v48 = vld [vmem:[#allocation18_spill] sm:$0xff]  ;;  %v6513_v1 = vmul.f32 %v17117_v6, %v6058_v46  ;;  %v6287_v27 = vmul.f32 %v17117_v6, %v5832_v16  ;;  %11764 = vmatprep.mubr.bf16.mxu1 %v12072_v11  ;;  %v14454_v46 = vpop.f32.mrb[86].mxu0 }
 0x1d0   : > { %5620 = vst.msk [vmem:[#allocation2 + $0x940] sm:$0xff] %vm297_vm0, %v5171_v63  ;;  %v4948_v29 = vadd.f32 %v17120_v19, %v819_v22  ;;  %v5172_v21 = vadd.f32 %v17121_v48, %v1043_v39  ;;  %v17122_v9 = vld [vmem:[#allocation9_spill] sm:$0xff]  ;;  %v6056_v51 = vld [vmem:[#allocation2 + $0x8c8] sm:$0xff]  ;;  %5399 = vst.msk [vmem:[#allocation2 + $0x258] sm:$0xff] %vm297_vm0, %v4950_v14 }
 0x1d1   : > { %v6743_v20 = vadd.f32 %v17122_v9, %v6288_v52  ;;  %v6967_v38 = vadd.f32 %v17122_v9, %v6512_v18  ;;  %5623 = vst.msk [vmem:[#allocation2 + $0x958] sm:$0xff] %vm297_vm0, %v5174_v32  ;;  %v6741_v28 = vadd.f32 %v17122_v9, %v6286_v4  ;;  %v6965_v45 = vadd.f32 %v17122_v9, %v6510_v60  ;;  %v5837_v24 = vld [vmem:[#allocation2 + $0x1f0] sm:$0xff]  ;;  %v12073_v0 = vld [vmem:[%s12299_s21 + $0x308] sm:$0xff]   ;;  %v5835_v33 = vld [vmem:[#allocation2 + $0x1e0] sm:$0xff] }
 0x1d2   : > { %v6511_v57 = vmul.f32 %v17117_v6, %v6056_v51  ;;  %5397 = vst.msk [vmem:[#allocation2 + $0x248] sm:$0xff] %vm297_vm0, %v4948_v29  ;;  %5621 = vst.msk [vmem:[#allocation2 + $0x948] sm:$0xff] %vm297_vm0, %v5172_v21  ;;  %v6744_v61 = vadd.f32 %v17122_v9, %v6289_v17  ;;  %v6968_v62 = vadd.f32 %v17122_v9, %v6513_v1  ;;  %v6061_v39 = vld [vmem:[#allocation2 + $0x8f0] sm:$0xff]  ;;  %v6059_v3 = vld [vmem:[#allocation2 + $0x8e0] sm:$0xff]  ;;  %11541 = vmatmul.mubr.bf16.gmra.mrb[192].mxu0 %v12073_v0 }
 0x1d3   : > { %v7191_v23 = vmax.f32 %v6743_v20, 0.0  ;;  %v7415_v22 = vmax.f32 %v6967_v38, 0.0  ;;  %v7189_v43 = vmax.f32 %v6741_v28, 0.0  ;;  %v7413_v56 = vmax.f32 %v6965_v45, 0.0  ;;  %v12074_v5 = vld [vmem:[%s12299_s21 + $0x688] sm:$0xff]   ;;  %v5838_v18 = vld [vmem:[#allocation2 + $0x1f8] sm:$0xff] }
 0x1d4   : > { %v6742_v54 = vadd.f32 %v17122_v9, %v6287_v27  ;;  %v6966_v26 = vadd.f32 %v17122_v9, %v6511_v57  ;;  %v7192_v40 = vmax.f32 %v6744_v61, 0.0  ;;  %v7416_v25 = vmax.f32 %v6968_v62, 0.0  ;;  %v6062_v59 = vld [vmem:[#allocation2 + $0x8f8] sm:$0xff]  ;;  %v12075_v47 = vld [vmem:[%s12299_s21 + $0x310] sm:$0xff]   ;;  %v5836_v4 = vld [vmem:[#allocation2 + $0x1e8] sm:$0xff]  ;;  %v14463_v20 = vpop.f32.mrb[86].mxu1  ;;  %11765 = vmatmul.mubr.bf16.gmra.mrb[192].mxu1 %v12074_v5 }
 0x1d5   : > { %v10709_v35 = vpack.c.bf16 %v7191_v23, %v7191_v23  ;;  %v10933_v12 = vpack.c.bf16 %v7415_v22, %v7415_v22  ;;  %v10707_v8 = vpack.c.bf16 %v7189_v43, %v7189_v43  ;;  %v10931_v63 = vpack.c.bf16 %v7413_v56, %v7413_v56  ;;  %v6060_v60 = vld [vmem:[#allocation2 + $0x8e8] sm:$0xff]  ;;  %v12076_v16 = vld [vmem:[%s12299_s21 + $0x690] sm:$0xff]   ;;  %v14465_v38 = vpop.f32.mrb[87].mxu0  ;;  %v14475_v45 = vpop.f32.mrb[87].mxu1  ;;  %11544 = vmatprep.mubr.bf16.mxu0 %v12075_v47  ;;  %v12079_v47 = vld [vmem:[%s12299_s21 + $0x320] sm:$0xff]  }
 0x1d6   : > { %v7190_v49 = vmax.f32 %v6742_v54, 0.0  ;;  %v7414_v52 = vmax.f32 %v6966_v26, 0.0  ;;  %v10710_v14 = vpack.c.bf16 %v7192_v40, %v7192_v40  ;;  %v10934_v34 = vpack.c.bf16 %v7416_v25, %v7416_v25  ;;  %11768 = vmatprep.mubr.bf16.mxu1 %v12076_v16  ;;  %v12077_v54 = vld [vmem:[%s12299_s21 + $0x318] sm:$0xff]   ;;  %v14490_v40 = vpop.f32.mrb[88].mxu0  ;;  %v14492_v25 = vpop.f32.mrb[88].mxu1 }
 0x1d7   : > { %9432 = vst.msk [vmem:[%s13402_s14 + $0xe8] sm:$0xf] %vm9373_vm1, %v10709_v35  ;;  %9656 = vst.msk [vmem:[%s13402_s14 + $0x468] sm:$0xf] %vm9373_vm1, %v10933_v12  ;;  %v6292_v32 = vmul.f32 %v17117_v6, %v5837_v24  ;;  %v6516_v11 = vmul.f32 %v17117_v6, %v6061_v39  ;;  %v6290_v48 = vmul.f32 %v17117_v6, %v5835_v33  ;;  %v5841_v35 = vld [vmem:[#allocation2 + $0x210] sm:$0xff]  ;;  %v12078_v33 = vld [vmem:[%s12299_s21 + $0x698] sm:$0xff]  }
 0x1d8   : > { %9430 = vst.msk [vmem:[%s13402_s14 + $0xe0] sm:$0xf] %vm9373_vm1, %v10707_v8  ;;  %9654 = vst.msk [vmem:[%s13402_s14 + $0x460] sm:$0xf] %vm9373_vm1, %v10931_v63  ;;  %v10708_v19 = vpack.c.bf16 %v7190_v49, %v7190_v49  ;;  %v10932_v29 = vpack.c.bf16 %v7414_v52, %v7414_v52  ;;  %v6514_v21 = vmul.f32 %v17117_v6, %v6059_v3  ;;  %v6065_v12 = vld [vmem:[#allocation2 + $0x910] sm:$0xff]  ;;  %v5839_v49 = vld [vmem:[#allocation2 + $0x200] sm:$0xff] }
 0x1d9   : > { %9433 = vst.msk [vmem:[%s13402_s14 + $0xec] sm:$0xf] %vm9373_vm1, %v10710_v14  ;;  %9657 = vst.msk [vmem:[%s13402_s14 + $0x46c] sm:$0xf] %vm9373_vm1, %v10934_v34  ;;  %v6747_v17 = vadd.f32 %v17122_v9, %v6292_v32  ;;  %v6971_v1 = vadd.f32 %v17122_v9, %v6516_v11  ;;  %v6293_v51 = vmul.f32 %v17117_v6, %v5838_v18  ;;  %v6063_v52 = vld [vmem:[#allocation2 + $0x900] sm:$0xff]  ;;  %v14495_v18 = vpop.f32.mrb[89].mxu0 }
 0x1da   : > { %v6517_v28 = vmul.f32 %v17117_v6, %v6062_v59  ;;  %9431 = vst.msk [vmem:[%s13402_s14 + $0xe4] sm:$0xf] %vm9373_vm1, %v10708_v19  ;;  %9655 = vst.msk [vmem:[%s13402_s14 + $0x464] sm:$0xf] %vm9373_vm1, %v10932_v29  ;;  %v6745_v27 = vadd.f32 %v17122_v9, %v6290_v48  ;;  %v6969_v57 = vadd.f32 %v17122_v9, %v6514_v21  ;;  %v14497_v59 = vpop.f32.mrb[89].mxu1  ;;  %v14500_v16 = vpop.f32.mrb[90].mxu0  ;;  %11545 = vmatmul.mubr.bf16.gmra.mrb[196].mxu0 %v12077_v54 }
 0x1db   : > { %v6291_v23 = vmul.f32 %v17117_v6, %v5836_v4  ;;  %v6515_v22 = vmul.f32 %v17117_v6, %v6060_v60  ;;  %v7195_v61 = vmax.f32 %v6747_v17, 0.0  ;;  %v7419_v62 = vmax.f32 %v6971_v1, 0.0  ;;  %v5842_v4 = vld [vmem:[#allocation2 + $0x218] sm:$0xff]  ;;  %17123 = vst [vmem:[#allocation10_spill] sm:$0xff] %v14500_v16  ;;  %v14502_v19 = vpop.f32.mrb[90].mxu1  ;;  %v5840_v1 = vld [vmem:[#allocation2 + $0x208] sm:$0xff]  ;;  %11548 = vmatprep.mubr.bf16.mxu0 %v12079_v47 }
 0x1dc   : > { %v6748_v43 = vadd.f32 %v17122_v9, %v6293_v51  ;;  %v6972_v56 = vadd.f32 %v17122_v9, %v6517_v28  ;;  %v7193_v26 = vmax.f32 %v6745_v27, 0.0  ;;  %v7417_v24 = vmax.f32 %v6969_v57, 0.0  ;;  %v6066_v60 = vld [vmem:[#allocation2 + $0x918] sm:$0xff]  ;;  %17124 = vst [vmem:[#allocation6_spill] sm:$0xff] %v14502_v19  ;;  %v6064_v51 = vld [vmem:[#allocation2 + $0x908] sm:$0xff]  ;;  %v14510_v28 = vpop.f32.mrb[91].mxu0  ;;  %11769 = vmatmul.mubr.bf16.gmra.mrb[196].mxu1 %v12078_v33 }
 0x1dd   : > { %v6746_v39 = vadd.f32 %v17122_v9, %v6291_v23  ;;  %v6970_v0 = vadd.f32 %v17122_v9, %v6515_v22  ;;  %v10713_v3 = vpack.c.bf16 %v7195_v61, %v7195_v61  ;;  %v10937_v5 = vpack.c.bf16 %v7419_v62, %v7419_v62  ;;  %17125 = vst [vmem:[#allocation7_spill] sm:$0xff] %v14510_v28  ;;  %v14512_v27 = vpop.f32.mrb[91].mxu1  ;;  %v12080_v57 = vld [vmem:[%s12299_s21 + $0x6a0] sm:$0xff]   ;;  %v14542_v33 = vpop.f32.mrb[92].mxu0  ;;  %v1057_v19 = vld [vmem:[#allocation2 + $0x9b8] sm:$0xff]  ;;  %v12092_v16 = vld [vmem:[%s12299_s21 + $0x6d0] sm:$0xff]  }
 0x1de   : > { %v7196_v8 = vmax.f32 %v6748_v43, 0.0  ;;  %v7420_v63 = vmax.f32 %v6972_v56, 0.0  ;;  %v10711_v14 = vpack.c.bf16 %v7193_v26, %v7193_v26  ;;  %v10935_v34 = vpack.c.bf16 %v7417_v24, %v7417_v24  ;;  %17126 = vst [vmem:[#allocation11_spill] sm:$0xff] %v14512_v27  ;;  %11772 = vmatprep.mubr.bf16.mxu1 %v12080_v57  ;;  %17127 = vst [vmem:[#allocation12_spill] sm:$0xff] %v14542_v33  ;;  %v1056_v33 = vld [vmem:[#allocation2 + $0x9b0] sm:$0xff]  ;;  %v1054_v27 = vld [vmem:[#allocation2 + $0x9a0] sm:$0xff] }
 0x1df   : > { %v7194_v32 = vmax.f32 %v6746_v39, 0.0  ;;  %v7418_v11 = vmax.f32 %v6970_v0, 0.0  ;;  %9436 = vst.msk [vmem:[%s13402_s14 + $0xf8] sm:$0xf] %vm9373_vm1, %v10713_v3  ;;  %9660 = vst.msk [vmem:[%s13402_s14 + $0x478] sm:$0xf] %vm9373_vm1, %v10937_v5  ;;  %v6296_v21 = vmul.f32 %v17117_v6, %v5841_v35  ;;  %v6520_v17 = vmul.f32 %v17117_v6, %v6065_v12 }
 0x1e0   : > { %v10714_v29 = vpack.c.bf16 %v7196_v8, %v7196_v8  ;;  %v10938_v48 = vpack.c.bf16 %v7420_v63, %v7420_v63  ;;  %9434 = vst.msk [vmem:[%s13402_s14 + $0xf0] sm:$0xf] %vm9373_vm1, %v10711_v14  ;;  %9658 = vst.msk [vmem:[%s13402_s14 + $0x470] sm:$0xf] %vm9373_vm1, %v10935_v34  ;;  %v6294_v61 = vmul.f32 %v17117_v6, %v5839_v49  ;;  %v12081_v63 = vld [vmem:[%s12299_s21 + $0x328] sm:$0xff]  }
 0x1e1   : > { %v10712_v23 = vpack.c.bf16 %v7194_v32, %v7194_v32  ;;  %v10936_v22 = vpack.c.bf16 %v7418_v11, %v7418_v11  ;;  %v6518_v62 = vmul.f32 %v17117_v6, %v6063_v52  ;;  %v6751_v43 = vadd.f32 %v17122_v9, %v6296_v21  ;;  %v5845_v32 = vld [vmem:[#allocation2 + $0x230] sm:$0xff]  ;;  %v14544_v11 = vpop.f32.mrb[92].mxu1  ;;  %v5843_v21 = vld [vmem:[#allocation2 + $0x220] sm:$0xff] }
 0x1e2   : > { %9437 = vst.msk [vmem:[%s13402_s14 + $0xfc] sm:$0xf] %vm9373_vm1, %v10714_v29  ;;  %9661 = vst.msk [vmem:[%s13402_s14 + $0x47c] sm:$0xf] %vm9373_vm1, %v10938_v48  ;;  %v6975_v56 = vadd.f32 %v17122_v9, %v6520_v17  ;;  %v6297_v26 = vmul.f32 %v17117_v6, %v5842_v4  ;;  %v6521_v24 = vmul.f32 %v17117_v6, %v6066_v60  ;;  %v12082_v4 = vld [vmem:[%s12299_s21 + $0x6a8] sm:$0xff]   ;;  %v6067_v17 = vld [vmem:[#allocation2 + $0x920] sm:$0xff]  ;;  %11549 = vmatmul.mubr.bf16.gmra.mrb[200].mxu0 %v12081_v63 }
 0x1e3   : > { %9435 = vst.msk [vmem:[%s13402_s14 + $0xf4] sm:$0xf] %vm9373_vm1, %v10712_v23  ;;  %9659 = vst.msk [vmem:[%s13402_s14 + $0x474] sm:$0xf] %vm9373_vm1, %v10936_v22  ;;  %v6749_v39 = vadd.f32 %v17122_v9, %v6294_v61  ;;  %v6973_v0 = vadd.f32 %v17122_v9, %v6518_v62  ;;  %v6295_v35 = vmul.f32 %v17117_v6, %v5840_v1  ;;  %v7199_v3 = vmax.f32 %v6751_v43, 0.0  ;;  %v14547_v1 = vpop.f32.mrb[93].mxu0 }
 0x1e4   : > { %v6519_v12 = vmul.f32 %v17117_v6, %v6064_v51  ;;  %v7423_v5 = vmax.f32 %v6975_v56, 0.0  ;;  %v6752_v8 = vadd.f32 %v17122_v9, %v6297_v26  ;;  %v6976_v54 = vadd.f32 %v17122_v9, %v6521_v24  ;;  %v6069_v6 = vld [vmem:[#allocation2 + $0x930] sm:$0xff]  ;;  %17128 = vst [vmem:[#allocation13_spill] sm:$0xff] %v14544_v11  ;;  %17129 = vst [vmem:[#allocation14_spill] sm:$0xff] %v14547_v1  ;;  %v14549_v51 = vpop.f32.mrb[93].mxu1  ;;  %v5846_v62 = vld [vmem:[#allocation2 + $0x238] sm:$0xff] }
 0x1e5   : > { %v7197_v49 = vmax.f32 %v6749_v39, 0.0  ;;  %v7421_v52 = vmax.f32 %v6973_v0, 0.0  ;;  %v6750_v14 = vadd.f32 %v17122_v9, %v6295_v35  ;;  %v10717_v60 = vpack.c.bf16 %v7199_v3, %v7199_v3  ;;  %17130 = vst [vmem:[#allocation8_spill] sm:$0xff] %v14549_v51  ;;  %v6070_v43 = vld [vmem:[#allocation2 + $0x938] sm:$0xff]  ;;  %v14552_v56 = vpop.f32.mrb[94].mxu0  ;;  %v14554_v26 = vpop.f32.mrb[94].mxu1  ;;  %11773 = vmatmul.mubr.bf16.gmra.mrb[200].mxu1 %v12082_v4 }
 0x1e6   : > { %v6974_v34 = vadd.f32 %v17122_v9, %v6519_v12  ;;  %v10941_v29 = vpack.c.bf16 %v7423_v5, %v7423_v5  ;;  %v7200_v47 = vmax.f32 %v6752_v8, 0.0  ;;  %v7424_v48 = vmax.f32 %v6976_v54, 0.0  ;;  %v12083_v9 = vld [vmem:[%s12299_s21 + $0x330] sm:$0xff]   ;;  %17131 = vst [vmem:[#allocation15_spill] sm:$0xff] %v14552_v56  ;;  %17132 = vst [vmem:[#allocation16_spill] sm:$0xff] %v14554_v26  ;;  %v5844_v3 = vld [vmem:[#allocation2 + $0x228] sm:$0xff] }
 0x1e7   : > { %v10715_v57 = vpack.c.bf16 %v7197_v49, %v7197_v49  ;;  %v10939_v23 = vpack.c.bf16 %v7421_v52, %v7421_v52  ;;  %v7198_v22 = vmax.f32 %v6750_v14, 0.0  ;;  %9440 = vst.msk [vmem:[%s13402_s14 + $0x108] sm:$0xf] %vm9373_vm1, %v10717_v60  ;;  %v14563_v0 = vld [vmem:[%s17066_s2] ss:$0 sm:$0xff]  ;;  %v6068_v5 = vld [vmem:[#allocation2 + $0x928] sm:$0xff]  ;;  %11552 = vmatprep.mubr.bf16.mxu0 %v12083_v9 }
 0x1e8   : > { %v7422_v61 = vmax.f32 %v6974_v34, 0.0  ;;  %9664 = vst.msk [vmem:[%s13402_s14 + $0x488] sm:$0xf] %vm9373_vm1, %v10941_v29  ;;  %v10718_v24 = vpack.c.bf16 %v7200_v47, %v7200_v47  ;;  %v10942_v39 = vpack.c.bf16 %v7424_v48, %v7424_v48  ;;  %17133 = vst [vmem:[#allocation17_spill] sm:$0xff] %v14563_v0  ;;  %v6300_v35 = vmul.f32 %v14563_v0, %v5845_v32  ;;  %v14567_v8 = vpop.f32.mrb[95].mxu0  ;;  %v14569_v54 = vpop.f32.mrb[95].mxu1 }
 0x1e9   : > { %v6524_v12 = vmul.f32 %v14563_v0, %v6069_v6  ;;  %17134 = vst [vmem:[#allocation18_spill] sm:$0xff] %v14567_v8  ;;  %17135 = vst [vmem:[#allocation9_spill] sm:$0xff] %v14569_v54  ;;  %v12084_v49 = vld [vmem:[%s12299_s21 + $0x6b0] sm:$0xff]   ;;  %v10716_v52 = vpack.c.bf16 %v7198_v22, %v7198_v22  ;;  %v6298_v34 = vmul.f32 %v14563_v0, %v5843_v21  ;;  %v14585_v6 = vld [vmem:[%s17067_s3] ss:$0 sm:$0xff]  ;;  %v14604_v4 = vpop.f32.mrb[96].mxu0 }
 0x1ea   : > { %9438 = vst.msk [vmem:[%s13402_s14 + $0x100] sm:$0xf] %vm9373_vm1, %v10715_v57  ;;  %9662 = vst.msk [vmem:[%s13402_s14 + $0x480] sm:$0xf] %vm9373_vm1, %v10939_v23  ;;  %v10940_v14 = vpack.c.bf16 %v7422_v61, %v7422_v61  ;;  %v6522_v32 = vmul.f32 %v14563_v0, %v6067_v17  ;;  %v6755_v60 = vadd.f32 %v14585_v6, %v6300_v35  ;;  %11776 = vmatprep.mubr.bf16.mxu1 %v12084_v49  ;;  %v12089_v8 = vld [vmem:[%s12299_s21 + $0x348] sm:$0xff]   ;;  %v832_v11 = vld [vmem:[#allocation2 + $0x2b0] sm:$0xff] }
 0x1eb   : > { %9441 = vst.msk [vmem:[%s13402_s14 + $0x10c] sm:$0xf] %vm9373_vm1, %v10718_v24  ;;  %9665 = vst.msk [vmem:[%s13402_s14 + $0x48c] sm:$0xf] %vm9373_vm1, %v10942_v39  ;;  %v6979_v29 = vadd.f32 %v14585_v6, %v6524_v12  ;;  %v6301_v47 = vmul.f32 %v14563_v0, %v5846_v62  ;;  %v6525_v48 = vmul.f32 %v14563_v0, %v6070_v43  ;;  %v12085_v43 = vld [vmem:[%s12299_s21 + $0x338] sm:$0xff]   ;;  %v12090_v1 = vld [vmem:[%s12299_s21 + $0x6c8] sm:$0xff]  }
 0x1ec   : > { %17136 = vst [vmem:[#allocation23_spill] sm:$0xff] %v14585_v6  ;;  %9439 = vst.msk [vmem:[%s13402_s14 + $0x104] sm:$0xf] %vm9373_vm1, %v10716_v52  ;;  %v6753_v21 = vadd.f32 %v14585_v6, %v6298_v34  ;;  %v6977_v17 = vadd.f32 %v14585_v6, %v6522_v32  ;;  %v6299_v57 = vmul.f32 %v14563_v0, %v5844_v3  ;;  %v7203_v22 = vmax.f32 %v6755_v60, 0.0  ;;  %v5849_v3 = vld [vmem:[#allocation2 + $0x250] sm:$0xff]  ;;  %v14606_v52 = vpop.f32.mrb[96].mxu1 }
 0x1ed   : > { %9663 = vst.msk [vmem:[%s13402_s14 + $0x484] sm:$0xf] %vm9373_vm1, %v10940_v14  ;;  %v6523_v23 = vmul.f32 %v14563_v0, %v6068_v5  ;;  %v7427_v61 = vmax.f32 %v6979_v29, 0.0  ;;  %v6756_v62 = vadd.f32 %v14585_v6, %v6301_v47  ;;  %v6980_v63 = vadd.f32 %v14585_v6, %v6525_v48  ;;  %v6073_v5 = vld [vmem:[#allocation2 + $0x950] sm:$0xff]  ;;  %17137 = vst [vmem:[#allocation24_spill] sm:$0xff] %v14604_v4  ;;  %v12086_v14 = vld [vmem:[%s12299_s21 + $0x6b8] sm:$0xff]  }
 0x1ee   : > { %v7201_v24 = vmax.f32 %v6753_v21, 0.0  ;;  %v7425_v39 = vmax.f32 %v6977_v17, 0.0  ;;  %v6754_v35 = vadd.f32 %v14585_v6, %v6299_v57  ;;  %17138 = vst [vmem:[#allocation25_spill] sm:$0xff] %v14606_v52  ;;  %v10721_v34 = vpack.c.bf16 %v7203_v22, %v7203_v22  ;;  %v5847_v60 = vld [vmem:[#allocation2 + $0x240] sm:$0xff]  ;;  %v14609_v47 = vpop.f32.mrb[97].mxu0  ;;  %v14611_v48 = vpop.f32.mrb[97].mxu1  ;;  %11553 = vmatmul.mubr.bf16.gmra.mrb[204].mxu0 %v12085_v43  ;;  %11777 = vmatmul.mubr.bf16.gmra.mrb[204].mxu1 %v12086_v14 }
 0x1ef   : > { %v6978_v12 = vadd.f32 %v14585_v6, %v6523_v23  ;;  %v10945_v32 = vpack.c.bf16 %v7427_v61, %v7427_v61  ;;  %v7204_v9 = vmax.f32 %v6756_v62, 0.0  ;;  %v7428_v49 = vmax.f32 %v6980_v63, 0.0  ;;  %v6071_v29 = vld [vmem:[#allocation2 + $0x940] sm:$0xff]  ;;  %17139 = vst [vmem:[#allocation26_spill] sm:$0xff] %v14609_v47  ;;  %17140 = vst [vmem:[#allocation27_spill] sm:$0xff] %v14611_v48  ;;  %v5850_v52 = vld [vmem:[#allocation2 + $0x258] sm:$0xff] }
 0x1f0   : > { %v12087_v21 = vld [vmem:[%s12299_s21 + $0x340] sm:$0xff]   ;;  %v10719_v17 = vpack.c.bf16 %v7201_v24, %v7201_v24  ;;  %v10943_v57 = vpack.c.bf16 %v7425_v39, %v7425_v39  ;;  %v7202_v23 = vmax.f32 %v6754_v35, 0.0  ;;  %v6074_v22 = vld [vmem:[#allocation2 + $0x958] sm:$0xff]  ;;  %v14614_v61 = vpop.f32.mrb[98].mxu0  ;;  %v14616_v62 = vpop.f32.mrb[98].mxu1  ;;  %v6304_v39 = vmul.f32 %v14563_v0, %v5849_v3  ;;  %v6072_v48 = vld [vmem:[#allocation2 + $0x948] sm:$0xff] }
 0x1f1   : > { %v7426_v4 = vmax.f32 %v6978_v12, 0.0  ;;  %17141 = vst [vmem:[#allocation28_spill] sm:$0xff] %v14614_v61  ;;  %17142 = vst [vmem:[#allocation29_spill] sm:$0xff] %v14616_v62  ;;  %v10722_v63 = vpack.c.bf16 %v7204_v9, %v7204_v9  ;;  %v10946_v24 = vpack.c.bf16 %v7428_v49, %v7428_v49  ;;  %v6528_v35 = vmul.f32 %v14563_v0, %v6073_v5  ;;  %v5848_v12 = vld [vmem:[#allocation2 + $0x248] sm:$0xff]  ;;  %v14624_v47 = vpop.f32.mrb[99].mxu0  ;;  %v14626_v61 = vpop.f32.mrb[99].mxu1 }
 0x1f2   : > { %9444 = vst.msk [vmem:[%s13402_s14 + $0x118] sm:$0xf] %vm9373_vm1, %v10721_v34  ;;  %9668 = vst.msk [vmem:[%s13402_s14 + $0x498] sm:$0xf] %vm9373_vm1, %v10945_v32  ;;  %v12088_v62 = vld [vmem:[%s12299_s21 + $0x6c0] sm:$0xff]   ;;  %v10720_v34 = vpack.c.bf16 %v7202_v23, %v7202_v23  ;;  %v6302_v9 = vmul.f32 %v14563_v0, %v5847_v60  ;;  %v6526_v3 = vmul.f32 %v14563_v0, %v6071_v29  ;;  %v824_v23 = vld [vmem:[#allocation2 + $0x270] sm:$0xff]  ;;  %11556 = vmatprep.mubr.bf16.mxu0 %v12087_v21 }
 0x1f3   : > { %17143 = vst [vmem:[#allocation30_spill] sm:$0xff] %v14624_v47  ;;  %17144 = vst [vmem:[#allocation31_spill] sm:$0xff] %v14626_v61  ;;  %v10944_v32 = vpack.c.bf16 %v7426_v4, %v7426_v4  ;;  %v6759_v5 = vadd.f32 %v14585_v6, %v6304_v39  ;;  %v6983_v49 = vadd.f32 %v14585_v6, %v6528_v35  ;;  %v822_v39 = vld [vmem:[#allocation2 + $0x260] sm:$0xff]  ;;  %11780 = vmatprep.mubr.bf16.mxu1 %v12088_v62  ;;  %v1049_v14 = vld [vmem:[#allocation2 + $0x978] sm:$0xff] }
 0x1f4   : > { %9442 = vst.msk [vmem:[%s13402_s14 + $0x110] sm:$0xf] %vm9373_vm1, %v10719_v17  ;;  %9666 = vst.msk [vmem:[%s13402_s14 + $0x490] sm:$0xf] %vm9373_vm1, %v10943_v57  ;;  %v6305_v61 = vmul.f32 %v14563_v0, %v5850_v52  ;;  %v6529_v17 = vmul.f32 %v14563_v0, %v6074_v22  ;;  %v6757_v4 = vadd.f32 %v14585_v6, %v6302_v9  ;;  %v1048_v22 = vld [vmem:[#allocation2 + $0x970] sm:$0xff]  ;;  %v1046_v35 = vld [vmem:[#allocation2 + $0x960] sm:$0xff] }
 0x1f5   : > { %9445 = vst.msk [vmem:[%s13402_s14 + $0x11c] sm:$0xf] %vm9373_vm1, %v10722_v63  ;;  %9669 = vst.msk [vmem:[%s13402_s14 + $0x49c] sm:$0xf] %vm9373_vm1, %v10946_v24  ;;  %v6981_v60 = vadd.f32 %v14585_v6, %v6526_v3  ;;  %v6303_v29 = vmul.f32 %v14563_v0, %v5848_v12  ;;  %v6527_v57 = vmul.f32 %v14563_v0, %v6072_v48  ;;  %v7207_v63 = vmax.f32 %v6759_v5, 0.0  ;;  %v825_v48 = vld [vmem:[#allocation2 + $0x278] sm:$0xff] }
 0x1f6   : > { %9443 = vst.msk [vmem:[%s13402_s14 + $0x114] sm:$0xf] %vm9373_vm1, %v10720_v34  ;;  %9667 = vst.msk [vmem:[%s13402_s14 + $0x494] sm:$0xf] %vm9373_vm1, %v10944_v32  ;;  %v7431_v24 = vmax.f32 %v6983_v49, 0.0  ;;  %v6760_v52 = vadd.f32 %v14585_v6, %v6305_v61  ;;  %v6984_v43 = vadd.f32 %v14585_v6, %v6529_v17  ;;  %v7205_v34 = vmax.f32 %v6757_v4, 0.0  ;;  %11557 = vmatmul.mubr.bf16.gmra.mrb[208].mxu0 %v12089_v8 }
 0x1f7   : > { %v7429_v32 = vmax.f32 %v6981_v60, 0.0  ;;  %v6758_v9 = vadd.f32 %v14585_v6, %v6303_v29  ;;  %v6982_v12 = vadd.f32 %v14585_v6, %v6527_v57  ;;  %v823_v3 = vld [vmem:[#allocation2 + $0x268] sm:$0xff]  ;;  %v14655_v49 = vpop.f32.mrb[100].mxu0  ;;  %v14657_v61 = vpop.f32.mrb[100].mxu1  ;;  %v10725_v17 = vpack.c.bf16 %v7207_v63, %v7207_v63  ;;  %v828_v62 = vld [vmem:[#allocation2 + $0x290] sm:$0xff]  ;;  %v826_v60 = vld [vmem:[#allocation2 + $0x280] sm:$0xff]  ;;  %11781 = vmatmul.mubr.bf16.gmra.mrb[208].mxu1 %v12090_v1 }
 0x1f8   : > { %v1047_v5 = vld [vmem:[#allocation2 + $0x968] sm:$0xff]  ;;  %17145 = vst [vmem:[#allocation32_spill] sm:$0xff] %v14655_v49  ;;  %17146 = vst [vmem:[#allocation33_spill] sm:$0xff] %v14657_v61  ;;  %v10949_v47 = vpack.c.bf16 %v7431_v24, %v7431_v24  ;;  %v7208_v54 = vmax.f32 %v6760_v52, 0.0  ;;  %v7432_v21 = vmax.f32 %v6984_v43, 0.0  ;;  %v1052_v4 = vld [vmem:[#allocation2 + $0x990] sm:$0xff]  ;;  %v10723_v26 = vpack.c.bf16 %v7205_v34, %v7205_v34  ;;  %11784 = vmatprep.mubr.bf16.mxu1 %v12092_v16 }
 0x1f9   : > { %v1050_v29 = vld [vmem:[#allocation2 + $0x980] sm:$0xff]  ;;  %v14659_v57 = vpop.f32.mrb[101].mxu0  ;;  %v14661_v6 = vpop.f32.mrb[101].mxu1  ;;  %v10947_v49 = vpack.c.bf16 %v7429_v32, %v7429_v32  ;;  %v7206_v56 = vmax.f32 %v6758_v9, 0.0  ;;  %v7430_v61 = vmax.f32 %v6982_v12, 0.0  ;;  %v829_v63 = vld [vmem:[#allocation2 + $0x298] sm:$0xff] }
 0x1fa   : > { %17147 = vst [vmem:[#allocation34_spill] sm:$0xff] %v14659_v57  ;;  %17148 = vst [vmem:[#allocation35_spill] sm:$0xff] %v14661_v6  ;;  %v1053_v24 = vld [vmem:[#allocation2 + $0x998] sm:$0xff]  ;;  %v827_v52 = vld [vmem:[#allocation2 + $0x288] sm:$0xff]  ;;  %v14664_v0 = vpop.f32.mrb[102].mxu0  ;;  %v14666_v51 = vpop.f32.mrb[102].mxu1  ;;  %v10726_v34 = vpack.c.bf16 %v7208_v54, %v7208_v54  ;;  %v10950_v32 = vpack.c.bf16 %v7432_v21, %v7432_v21 }
 0x1fb   : > { %v1051_v43 = vld [vmem:[#allocation2 + $0x988] sm:$0xff]  ;;  %17149 = vst [vmem:[#allocation36_spill] sm:$0xff] %v14664_v0  ;;  %17150 = vst [vmem:[#allocation37_spill] sm:$0xff] %v14666_v51  ;;  %v17152_v6 = vld [vmem:[#allocation20_spill] sm:$0xff]  ;;  %v14675_v51 = vpop.f32.mrb[103].mxu0  ;;  %v14677_v28 = vpop.f32.mrb[103].mxu1  ;;  %v10724_v54 = vpack.c.bf16 %v7206_v56, %v7206_v56  ;;  %v4954_v56 = vadd.f32 %v14306_v44, %v825_v48  ;;  %v4957_v44 = vadd.f32 %v14369_v41, %v828_v62 }
 0x1fc   : > { %9448 = vst.msk [vmem:[%s13402_s14 + $0x128] sm:$0xf] %vm9373_vm1, %v10725_v17  ;;  %9672 = vst.msk [vmem:[%s13402_s14 + $0x4a8] sm:$0xf] %vm9373_vm1, %v10949_v47  ;;  %v17151_v9 = vld [vmem:[#allocation19_spill] sm:$0xff]  ;;  %v5177_v57 = vadd.f32 %v17152_v6, %v1048_v22  ;;  %v830_v0 = vld [vmem:[#allocation2 + $0x2a0] sm:$0xff]  ;;  %v10948_v47 = vpack.c.bf16 %v7430_v61, %v7430_v61  ;;  %v4958_v41 = vadd.f32 %v14395_v37, %v829_v63 }
 0x1fd   : > { %v4953_v12 = vadd.f32 %v17151_v9, %v824_v23  ;;  %v12091_v17 = vld [vmem:[%s12299_s21 + $0x350] sm:$0xff]   ;;  %9446 = vst.msk [vmem:[%s13402_s14 + $0x120] sm:$0xf] %vm9373_vm1, %v10723_v26  ;;  %9670 = vst.msk [vmem:[%s13402_s14 + $0x4a0] sm:$0xf] %vm9373_vm1, %v10947_v49  ;;  %v17153_v23 = vld [vmem:[#allocation21_spill] sm:$0xff]  ;;  %v5178_v26 = vadd.f32 %v14308_v50, %v1049_v14  ;;  %v5181_v50 = vadd.f32 %v14371_v36, %v1052_v4 }
 0x1fe   : > { %v4951_v6 = vadd.f32 %v17153_v23, %v822_v39  ;;  %v17154_v22 = vld [vmem:[#allocation22_spill] sm:$0xff]  ;;  %v833_v9 = vld [vmem:[#allocation2 + $0x2b8] sm:$0xff]  ;;  %9449 = vst.msk [vmem:[%s13402_s14 + $0x12c] sm:$0xf] %vm9373_vm1, %v10726_v34  ;;  %9673 = vst.msk [vmem:[%s13402_s14 + $0x4ac] sm:$0xf] %vm9373_vm1, %v10950_v32  ;;  %v4952_v39 = vadd.f32 %v14321_v15, %v823_v3  ;;  %v4955_v15 = vadd.f32 %v14381_v53, %v826_v60  ;;  %11560 = vmatprep.mubr.bf16.mxu0 %v12091_v17 }
 0x1ff   : > { %v5175_v21 = vadd.f32 %v17154_v22, %v1046_v35  ;;  %5402 = vst.msk [vmem:[#allocation2 + $0x270] sm:$0xff] %vm297_vm0, %v4953_v12  ;;  %5626 = vst.msk [vmem:[#allocation2 + $0x970] sm:$0xff] %vm297_vm0, %v5177_v57  ;;  %v5176_v35 = vadd.f32 %v14323_v55, %v1047_v5  ;;  %v831_v49 = vld [vmem:[#allocation2 + $0x2a8] sm:$0xff]  ;;  %v836_v23 = vld [vmem:[#allocation2 + $0x2d0] sm:$0xff]  ;;  %v5179_v55 = vadd.f32 %v14383_v30, %v1050_v29  ;;  %v14723_v29 = vpop.f32.mrb[104].mxu0  ;;  %v14725_v57 = vpop.f32.mrb[104].mxu1 }
 0x200   : > { %v1055_v61 = vld [vmem:[#allocation2 + $0x9a8] sm:$0xff]  ;;  %9447 = vst.msk [vmem:[%s13402_s14 + $0x124] sm:$0xf] %vm9373_vm1, %v10724_v54  ;;  %9671 = vst.msk [vmem:[%s13402_s14 + $0x4a4] sm:$0xf] %vm9373_vm1, %v10948_v47  ;;  %v1060_v48 = vld [vmem:[#allocation2 + $0x9d0] sm:$0xff]  ;;  %v5182_v36 = vadd.f32 %v14397_v42, %v1053_v24  ;;  %v4956_v53 = vadd.f32 %v14408_v10, %v827_v52  ;;  %v5180_v30 = vadd.f32 %v14410_v13, %v1051_v43 }
 0x201   : > { %5400 = vst.msk [vmem:[#allocation2 + $0x260] sm:$0xff] %vm297_vm0, %v4951_v6  ;;  %5624 = vst.msk [vmem:[#allocation2 + $0x960] sm:$0xff] %vm297_vm0, %v5175_v21  ;;  %v834_v14 = vld [vmem:[#allocation2 + $0x2c0] sm:$0xff]  ;;  %v837_v8 = vld [vmem:[#allocation2 + $0x2d8] sm:$0xff]  ;;  %v4961_v37 = vadd.f32 %v14437_v31, %v832_v11  ;;  %v5185_v42 = vadd.f32 %v14440_v58, %v1056_v33  ;;  %v4959_v10 = vadd.f32 %v14443_v7, %v830_v0  ;;  %v14735_v16 = vpop.f32.mrb[105].mxu0  ;;  %v14737_v11 = vpop.f32.mrb[105].mxu1 }
 0x202   : > { %v1058_v3 = vld [vmem:[#allocation2 + $0x9c0] sm:$0xff]  ;;  %5403 = vst.msk [vmem:[#allocation2 + $0x278] sm:$0xff] %vm297_vm0, %v4954_v56  ;;  %5627 = vst.msk [vmem:[#allocation2 + $0x978] sm:$0xff] %vm297_vm0, %v5178_v26  ;;  %v1061_v5 = vld [vmem:[#allocation2 + $0x9d8] sm:$0xff]  ;;  %v5183_v13 = vadd.f32 %v14452_v2, %v1054_v27  ;;  %v4962_v31 = vadd.f32 %v14454_v46, %v833_v9  ;;  %v5186_v58 = vadd.f32 %v14463_v20, %v1057_v19  ;;  %v14748_v24 = vpop.f32.mrb[106].mxu0  ;;  %v14750_v52 = vpop.f32.mrb[106].mxu1 }
 0x203   : > { %5401 = vst.msk [vmem:[#allocation2 + $0x268] sm:$0xff] %vm297_vm0, %v4952_v39  ;;  %5625 = vst.msk [vmem:[#allocation2 + $0x968] sm:$0xff] %vm297_vm0, %v5176_v35  ;;  %v835_v62 = vld [vmem:[#allocation2 + $0x2c8] sm:$0xff]  ;;  %v840_v4 = vld [vmem:[#allocation2 + $0x2f0] sm:$0xff]  ;;  %v4960_v7 = vadd.f32 %v14465_v38, %v831_v49  ;;  %v5184_v2 = vadd.f32 %v14475_v45, %v1055_v61  ;;  %v4965_v46 = vadd.f32 %v14490_v40, %v836_v23  ;;  %v14761_v6 = vpop.f32.mrb[107].mxu0  ;;  %v14763_v22 = vpop.f32.mrb[107].mxu1 }
 0x204   : > { %5406 = vst.msk [vmem:[#allocation2 + $0x290] sm:$0xff] %vm297_vm0, %v4957_v44  ;;  %5630 = vst.msk [vmem:[#allocation2 + $0x990] sm:$0xff] %vm297_vm0, %v5181_v50  ;;  %v1059_v1 = vld [vmem:[#allocation2 + $0x9c8] sm:$0xff]  ;;  %v1064_v60 = vld [vmem:[#allocation2 + $0x9f0] sm:$0xff]  ;;  %v5189_v20 = vadd.f32 %v14492_v25, %v1060_v48  ;;  %v4963_v38 = vadd.f32 %v14495_v18, %v834_v14  ;;  %v5187_v45 = vadd.f32 %v14497_v59, %v1058_v3 }
 0x205   : > { %5404 = vst.msk [vmem:[#allocation2 + $0x280] sm:$0xff] %vm297_vm0, %v4955_v15  ;;  %5628 = vst.msk [vmem:[#allocation2 + $0x980] sm:$0xff] %vm297_vm0, %v5179_v55  ;;  %v838_v27 = vld [vmem:[#allocation2 + $0x2e0] sm:$0xff]  ;;  %v12093_v0 = vld [vmem:[%s12299_s21 + $0x358] sm:$0xff]  }
 0x206   : > { %5407 = vst.msk [vmem:[#allocation2 + $0x298] sm:$0xff] %vm297_vm0, %v4958_v41  ;;  %5631 = vst.msk [vmem:[#allocation2 + $0x998] sm:$0xff] %vm297_vm0, %v5182_v36  ;;  %v1062_v33 = vld [vmem:[#allocation2 + $0x9e0] sm:$0xff]  ;;  %v841_v19 = vld [vmem:[#allocation2 + $0x2f8] sm:$0xff]  ;;  %11561 = vmatmul.mubr.bf16.gmra.mrb[212].mxu0 %v12093_v0 }
 0x207   : > { %5405 = vst.msk [vmem:[#allocation2 + $0x288] sm:$0xff] %vm297_vm0, %v4956_v53  ;;  %5629 = vst.msk [vmem:[#allocation2 + $0x988] sm:$0xff] %vm297_vm0, %v5180_v30  ;;  %v1065_v63 = vld [vmem:[#allocation2 + $0x9f8] sm:$0xff]  ;;  %v17155_v40 = vld [vmem:[#allocation10_spill] sm:$0xff] }
 0x208   : > { %5410 = vst.msk [vmem:[#allocation2 + $0x2b0] sm:$0xff] %vm297_vm0, %v4961_v37  ;;  %5634 = vst.msk [vmem:[#allocation2 + $0x9b0] sm:$0xff] %vm297_vm0, %v5185_v42  ;;  %v12094_v43 = vld [vmem:[%s12299_s21 + $0x6d8] sm:$0xff]   ;;  %v4966_v25 = vadd.f32 %v17155_v40, %v837_v8  ;;  %v17156_v18 = vld [vmem:[#allocation6_spill] sm:$0xff] }
 0x209   : > { %5408 = vst.msk [vmem:[#allocation2 + $0x2a0] sm:$0xff] %vm297_vm0, %v4959_v10  ;;  %5632 = vst.msk [vmem:[#allocation2 + $0x9a0] sm:$0xff] %vm297_vm0, %v5183_v13  ;;  %v5190_v59 = vadd.f32 %v17156_v18, %v1061_v5  ;;  %v17157_v34 = vld [vmem:[#allocation7_spill] sm:$0xff]  ;;  %v12095_v21 = vld [vmem:[%s12299_s21 + $0x360] sm:$0xff]   ;;  %11785 = vmatmul.mubr.bf16.gmra.mrb[212].mxu1 %v12094_v43 }
 0x20a   : > { %5411 = vst.msk [vmem:[#allocation2 + $0x2b8] sm:$0xff] %vm297_vm0, %v4962_v31  ;;  %5635 = vst.msk [vmem:[#allocation2 + $0x9b8] sm:$0xff] %vm297_vm0, %v5186_v58  ;;  %v4964_v32 = vadd.f32 %v17157_v34, %v835_v62  ;;  %v17158_v12 = vld [vmem:[#allocation11_spill] sm:$0xff]  ;;  %v5853_v9 = vld [vmem:[#allocation2 + $0x270] sm:$0xff]  ;;  %11564 = vmatprep.mubr.bf16.mxu0 %v12095_v21 }
 0x20b   : > { %5409 = vst.msk [vmem:[#allocation2 + $0x2a8] sm:$0xff] %vm297_vm0, %v4960_v7  ;;  %5633 = vst.msk [vmem:[#allocation2 + $0x9a8] sm:$0xff] %vm297_vm0, %v5184_v2  ;;  %v5188_v17 = vadd.f32 %v17158_v12, %v1059_v1  ;;  %v839_v54 = vld [vmem:[#allocation2 + $0x2e8] sm:$0xff]  ;;  %v6077_v56 = vld [vmem:[#allocation2 + $0x970] sm:$0xff] }
 0x20c   : > { %v1063_v47 = vld [vmem:[#allocation2 + $0x9e8] sm:$0xff]  ;;  %5414 = vst.msk [vmem:[#allocation2 + $0x2d0] sm:$0xff] %vm297_vm0, %v4965_v46  ;;  %5638 = vst.msk [vmem:[#allocation2 + $0x9d0] sm:$0xff] %vm297_vm0, %v5189_v20  ;;  %v17159_v26 = vld [vmem:[#allocation12_spill] sm:$0xff] }
 0x20d   : > { %5412 = vst.msk [vmem:[#allocation2 + $0x2c0] sm:$0xff] %vm297_vm0, %v4963_v38  ;;  %5636 = vst.msk [vmem:[#allocation2 + $0x9c0] sm:$0xff] %vm297_vm0, %v5187_v45  ;;  %v4969_v39 = vadd.f32 %v17159_v26, %v840_v4  ;;  %v17160_v35 = vld [vmem:[#allocation13_spill] sm:$0xff]  ;;  %v17161_v61 = vld [vmem:[#allocation14_spill] sm:$0xff]  ;;  %v14803_v45 = vpop.f32.mrb[108].mxu0 }
 0x20e   : > { %v5193_v49 = vadd.f32 %v17160_v35, %v1064_v60  ;;  %v4967_v23 = vadd.f32 %v17161_v61, %v838_v27  ;;  %v17162_v44 = vld [vmem:[#allocation8_spill] sm:$0xff]  ;;  %v12096_v15 = vld [vmem:[%s12299_s21 + $0x6e0] sm:$0xff]   ;;  %v17163_v55 = vld [vmem:[#allocation17_spill] sm:$0xff]  ;;  %5415 = vst.msk [vmem:[#allocation2 + $0x2d8] sm:$0xff] %vm297_vm0, %v4966_v25  ;;  %v14809_v18 = vpop.f32.mrb[109].mxu0 }
 0x20f   : > { %v5191_v50 = vadd.f32 %v17162_v44, %v1062_v33  ;;  %v6308_v48 = vmul.f32 %v17163_v55, %v5853_v9  ;;  %v6532_v14 = vmul.f32 %v17163_v55, %v6077_v56  ;;  %v5851_v3 = vld [vmem:[#allocation2 + $0x260] sm:$0xff]  ;;  %5639 = vst.msk [vmem:[#allocation2 + $0x9d8] sm:$0xff] %vm297_vm0, %v5190_v59  ;;  %5413 = vst.msk [vmem:[#allocation2 + $0x2c8] sm:$0xff] %vm297_vm0, %v4964_v32  ;;  %v17164_v36 = vld [vmem:[#allocation15_spill] sm:$0xff]  ;;  %11788 = vmatprep.mubr.bf16.mxu1 %v12096_v15 }
 0x210   : > { %v6075_v41 = vld [vmem:[#allocation2 + $0x960] sm:$0xff]  ;;  %5637 = vst.msk [vmem:[#allocation2 + $0x9c8] sm:$0xff] %vm297_vm0, %v5188_v17  ;;  %v4970_v53 = vadd.f32 %v17164_v36, %v841_v19  ;;  %v17165_v30 = vld [vmem:[#allocation16_spill] sm:$0xff]  ;;  %v6306_v5 = vmul.f32 %v17163_v55, %v5851_v3  ;;  %v5854_v37 = vld [vmem:[#allocation2 + $0x278] sm:$0xff]  ;;  %v14805_v19 = vpop.f32.mrb[108].mxu1 }
 0x211   : > { %v5194_v8 = vadd.f32 %v17165_v30, %v1065_v63  ;;  %v6530_v62 = vmul.f32 %v17163_v55, %v6075_v41  ;;  %v6078_v42 = vld [vmem:[#allocation2 + $0x978] sm:$0xff]  ;;  %v5852_v10 = vld [vmem:[#allocation2 + $0x268] sm:$0xff]  ;;  %5418 = vst.msk [vmem:[#allocation2 + $0x2f0] sm:$0xff] %vm297_vm0, %v4969_v39  ;;  %5642 = vst.msk [vmem:[#allocation2 + $0x9f0] sm:$0xff] %vm297_vm0, %v5193_v49  ;;  %v6309_v2 = vmul.f32 %v17163_v55, %v5854_v37  ;;  %v14814_v21 = vpop.f32.mrb[109].mxu1 }
 0x212   : > { %5416 = vst.msk [vmem:[#allocation2 + $0x2e0] sm:$0xff] %vm297_vm0, %v4967_v23  ;;  %5640 = vst.msk [vmem:[#allocation2 + $0x9e0] sm:$0xff] %vm297_vm0, %v5191_v50  ;;  %v17166_v13 = vld [vmem:[#allocation18_spill] sm:$0xff]  ;;  %v17167_v4 = vld [vmem:[#allocation9_spill] sm:$0xff]  ;;  %v6533_v27 = vmul.f32 %v17163_v55, %v6078_v42  ;;  %v6307_v20 = vmul.f32 %v17163_v55, %v5852_v10  ;;  %v14817_v23 = vpop.f32.mrb[110].mxu0  ;;  %v14820_v36 = vpop.f32.mrb[110].mxu1 }
 0x213   : > { %v4968_v1 = vadd.f32 %v17166_v13, %v839_v54  ;;  %v5192_v60 = vadd.f32 %v17167_v4, %v1063_v47  ;;  %v17168_v31 = vld [vmem:[#allocation23_spill] sm:$0xff]  ;;  %5419 = vst.msk [vmem:[#allocation2 + $0x2f8] sm:$0xff] %vm297_vm0, %v4970_v53  ;;  %5643 = vst.msk [vmem:[#allocation2 + $0x9f8] sm:$0xff] %vm297_vm0, %v5194_v8  ;;  %v5857_v54 = vld [vmem:[#allocation2 + $0x290] sm:$0xff]  ;;  %v14829_v10 = vpop.f32.mrb[111].mxu0  ;;  %v14831_v13 = vpop.f32.mrb[111].mxu1 }
 0x214   : > { %v6763_v58 = vadd.f32 %v17168_v31, %v6308_v48  ;;  %v6987_v7 = vadd.f32 %v17168_v31, %v6532_v14  ;;  %v6076_v33 = vld [vmem:[#allocation2 + $0x968] sm:$0xff]  ;;  %v6761_v0 = vadd.f32 %v17168_v31, %v6306_v5  ;;  %v6985_v46 = vadd.f32 %v17168_v31, %v6530_v62  ;;  %v6081_v47 = vld [vmem:[#allocation2 + $0x990] sm:$0xff]  ;;  %v5855_v49 = vld [vmem:[#allocation2 + $0x280] sm:$0xff] }
 0x215   : > { %v6531_v38 = vmul.f32 %v17163_v55, %v6076_v33  ;;  %5417 = vst.msk [vmem:[#allocation2 + $0x2e8] sm:$0xff] %vm297_vm0, %v4968_v1  ;;  %5641 = vst.msk [vmem:[#allocation2 + $0x9e8] sm:$0xff] %vm297_vm0, %v5192_v60  ;;  %v6764_v40 = vadd.f32 %v17168_v31, %v6309_v2  ;;  %v6988_v25 = vadd.f32 %v17168_v31, %v6533_v27  ;;  %v12097_v59 = vld [vmem:[%s12299_s21 + $0x368] sm:$0xff]   ;;  %v6079_v61 = vld [vmem:[#allocation2 + $0x980] sm:$0xff] }
 0x216   : > { %v7211_v63 = vmax.f32 %v6763_v58, 0.0  ;;  %v7435_v43 = vmax.f32 %v6987_v7, 0.0  ;;  %v7209_v34 = vmax.f32 %v6761_v0, 0.0  ;;  %v7433_v32 = vmax.f32 %v6985_v46, 0.0  ;;  %v12098_v9 = vld [vmem:[%s12299_s21 + $0x6e8] sm:$0xff]   ;;  %v12099_v44 = vld [vmem:[%s12299_s21 + $0x370] sm:$0xff]   ;;  %11565 = vmatmul.mubr.bf16.gmra.mrb[216].mxu0 %v12097_v59 }
 0x217   : > { %v6762_v12 = vadd.f32 %v17168_v31, %v6307_v20  ;;  %v6986_v17 = vadd.f32 %v17168_v31, %v6531_v38  ;;  %v7212_v39 = vmax.f32 %v6764_v40, 0.0  ;;  %v7436_v35 = vmax.f32 %v6988_v25, 0.0  ;;  %v5858_v3 = vld [vmem:[#allocation2 + $0x298] sm:$0xff]  ;;  %v12100_v53 = vld [vmem:[%s12299_s21 + $0x6f0] sm:$0xff]   ;;  %v5856_v37 = vld [vmem:[#allocation2 + $0x288] sm:$0xff]  ;;  %11789 = vmatmul.mubr.bf16.gmra.mrb[216].mxu1 %v12098_v9  ;;  %11568 = vmatprep.mubr.bf16.mxu0 %v12099_v44 }
 0x218   : > { %v10729_v56 = vpack.c.bf16 %v7211_v63, %v7211_v63  ;;  %v10953_v26 = vpack.c.bf16 %v7435_v43, %v7435_v43  ;;  %v10727_v50 = vpack.c.bf16 %v7209_v34, %v7209_v34  ;;  %v10951_v15 = vpack.c.bf16 %v7433_v32, %v7433_v32  ;;  %v6082_v41 = vld [vmem:[#allocation2 + $0x998] sm:$0xff]  ;;  %v6080_v42 = vld [vmem:[#allocation2 + $0x988] sm:$0xff]  ;;  %v14855_v63 = vpop.f32.mrb[112].mxu0  ;;  %11792 = vmatprep.mubr.bf16.mxu1 %v12100_v53  ;;  %v14859_v34 = vpop.f32.mrb[112].mxu1 }
 0x219   : > { %v7210_v48 = vmax.f32 %v6762_v12, 0.0  ;;  %v7434_v14 = vmax.f32 %v6986_v17, 0.0  ;;  %v10730_v30 = vpack.c.bf16 %v7212_v39, %v7212_v39  ;;  %v10954_v8 = vpack.c.bf16 %v7436_v35, %v7436_v35  ;;  %v12101_v32 = vld [vmem:[%s12299_s21 + $0x378] sm:$0xff]   ;;  %v14865_v39 = vpop.f32.mrb[113].mxu0  ;;  %v14867_v35 = vpop.f32.mrb[113].mxu1 }
 0x21a   : > { %9452 = vst.msk [vmem:[%s13402_s14 + $0x138] sm:$0xf] %vm9373_vm1, %v10729_v56  ;;  %9676 = vst.msk [vmem:[%s13402_s14 + $0x4b8] sm:$0xf] %vm9373_vm1, %v10953_v26  ;;  %v6312_v5 = vmul.f32 %v17163_v55, %v5857_v54  ;;  %v6536_v62 = vmul.f32 %v17163_v55, %v6081_v47  ;;  %v6310_v60 = vmul.f32 %v17163_v55, %v5855_v49  ;;  %v12102_v12 = vld [vmem:[%s12299_s21 + $0x6f8] sm:$0xff]   ;;  %v5861_v56 = vld [vmem:[#allocation2 + $0x2b0] sm:$0xff] }
 0x21b   : > { %9450 = vst.msk [vmem:[%s13402_s14 + $0x130] sm:$0xf] %vm9373_vm1, %v10727_v50  ;;  %9674 = vst.msk [vmem:[%s13402_s14 + $0x4b0] sm:$0xf] %vm9373_vm1, %v10951_v15  ;;  %v10728_v1 = vpack.c.bf16 %v7210_v48, %v7210_v48  ;;  %v10952_v4 = vpack.c.bf16 %v7434_v14, %v7434_v14  ;;  %v6534_v58 = vmul.f32 %v17163_v55, %v6079_v61  ;;  %v6085_v26 = vld [vmem:[#allocation2 + $0x9b0] sm:$0xff]  ;;  %v5859_v15 = vld [vmem:[#allocation2 + $0x2a0] sm:$0xff] }
 0x21c   : > { %9453 = vst.msk [vmem:[%s13402_s14 + $0x13c] sm:$0xf] %vm9373_vm1, %v10730_v30  ;;  %9677 = vst.msk [vmem:[%s13402_s14 + $0x4bc] sm:$0xf] %vm9373_vm1, %v10954_v8  ;;  %v6767_v7 = vadd.f32 %v17168_v31, %v6312_v5  ;;  %v6991_v2 = vadd.f32 %v17168_v31, %v6536_v62  ;;  %v6313_v27 = vmul.f32 %v17163_v55, %v5858_v3  ;;  %v6083_v48 = vld [vmem:[#allocation2 + $0x9a0] sm:$0xff]  ;;  %v14869_v14 = vpop.f32.mrb[114].mxu0 }
 0x21d   : > { %v6537_v33 = vmul.f32 %v17163_v55, %v6082_v41  ;;  %9451 = vst.msk [vmem:[%s13402_s14 + $0x134] sm:$0xf] %vm9373_vm1, %v10728_v1  ;;  %9675 = vst.msk [vmem:[%s13402_s14 + $0x4b4] sm:$0xf] %vm9373_vm1, %v10952_v4  ;;  %v6765_v0 = vadd.f32 %v17168_v31, %v6310_v60  ;;  %v6989_v46 = vadd.f32 %v17168_v31, %v6534_v58  ;;  %v14871_v3 = vpop.f32.mrb[114].mxu1  ;;  %v5862_v5 = vld [vmem:[#allocation2 + $0x2b8] sm:$0xff] }
 0x21e   : > { %v6311_v20 = vmul.f32 %v17163_v55, %v5856_v37  ;;  %v6535_v38 = vmul.f32 %v17163_v55, %v6080_v42  ;;  %v7215_v43 = vmax.f32 %v6767_v7, 0.0  ;;  %v7439_v40 = vmax.f32 %v6991_v2, 0.0  ;;  %v6086_v62 = vld [vmem:[#allocation2 + $0x9b8] sm:$0xff]  ;;  %v14873_v37 = vpop.f32.mrb[115].mxu0  ;;  %v14875_v42 = vpop.f32.mrb[115].mxu1  ;;  %v5860_v7 = vld [vmem:[#allocation2 + $0x2a8] sm:$0xff]  ;;  %11569 = vmatmul.mubr.bf16.gmra.mrb[220].mxu0 %v12101_v32 }
 0x21f   : > { %v6768_v25 = vadd.f32 %v17168_v31, %v6313_v27  ;;  %v6992_v59 = vadd.f32 %v17168_v31, %v6537_v33  ;;  %v7213_v17 = vmax.f32 %v6765_v0, 0.0  ;;  %v7437_v54 = vmax.f32 %v6989_v46, 0.0  ;;  %v6084_v2 = vld [vmem:[#allocation2 + $0x9a8] sm:$0xff]  ;;  %11793 = vmatmul.mubr.bf16.gmra.mrb[220].mxu1 %v12102_v12  ;;  %s12125_s21 = scalar_lea.vmem %s12124_s11, 57344 }
 0x220   : > { %v6766_v47 = vadd.f32 %v17168_v31, %v6311_v20  ;;  %v6990_v9 = vadd.f32 %v17168_v31, %v6535_v38  ;;  %v10733_v49 = vpack.c.bf16 %v7215_v43, %v7215_v43  ;;  %v10957_v61 = vpack.c.bf16 %v7439_v40, %v7439_v40  ;;  %p12127_p2 = scmp.lt.s32.totalorder %s12125_s21, %s12119_s9 }
 0x221   : > { %v7216_v44 = vmax.f32 %v6768_v25, 0.0  ;;  %v7440_v50 = vmax.f32 %v6992_v59, 0.0  ;;  %v10731_v41 = vpack.c.bf16 %v7213_v17, %v7213_v17  ;;  %v10955_v53 = vpack.c.bf16 %v7437_v54, %v7437_v54  ;;  %v14905_v17 = vpop.f32.mrb[116].mxu0 }
 0x222   : > { %v7214_v30 = vmax.f32 %v6766_v47, 0.0  ;;  %v7438_v8 = vmax.f32 %v6990_v9, 0.0  ;;  %9456 = vst.msk [vmem:[%s13402_s14 + $0x148] sm:$0xf] %vm9373_vm1, %v10733_v49  ;;  %9680 = vst.msk [vmem:[%s13402_s14 + $0x4c8] sm:$0xf] %vm9373_vm1, %v10957_v61  ;;  %v6316_v60 = vmul.f32 %v17163_v55, %v5861_v56  ;;  %v6540_v58 = vmul.f32 %v17163_v55, %v6085_v26  ;;  %p12128_p3 = por %p12127_p2, %p12126_p1 }
 0x223   : > { %v10734_v1 = vpack.c.bf16 %v7216_v44, %v7216_v44  ;;  %v10958_v4 = vpack.c.bf16 %v7440_v50, %v7440_v50  ;;  %9454 = vst.msk [vmem:[%s13402_s14 + $0x140] sm:$0xf] %vm9373_vm1, %v10731_v41  ;;  %9678 = vst.msk [vmem:[%s13402_s14 + $0x4c0] sm:$0xf] %vm9373_vm1, %v10955_v53  ;;  %v6314_v0 = vmul.f32 %v17163_v55, %v5859_v15  ;;  %v14909_v26 = vpop.f32.mrb[116].mxu1  ;;  %v14911_v49 = vpop.f32.mrb[117].mxu0 }
 0x224   : > { %v10732_v27 = vpack.c.bf16 %v7214_v30, %v7214_v30  ;;  %v10956_v33 = vpack.c.bf16 %v7438_v8, %v7438_v8  ;;  %v6538_v46 = vmul.f32 %v17163_v55, %v6083_v48  ;;  %v6771_v20 = vadd.f32 %v17168_v31, %v6316_v60  ;;  %17169 = vst [vmem:[#allocation19_spill] sm:$0xff] %v14905_v17  ;;  %v5865_v48 = vld [vmem:[#allocation2 + $0x2d0] sm:$0xff]  ;;  %v14915_v53 = vpop.f32.mrb[117].mxu1  ;;  %v14917_v30 = vpop.f32.mrb[118].mxu0  ;;  %v6087_v60 = vld [vmem:[#allocation2 + $0x9c0] sm:$0xff]  ;;  %p12129_p5 = pnand %p12128_p3, %p12122_p0 }
 0x225   : > { %9457 = vst.msk [vmem:[%s13402_s14 + $0x14c] sm:$0xf] %vm9373_vm1, %v10734_v1  ;;  %9681 = vst.msk [vmem:[%s13402_s14 + $0x4cc] sm:$0xf] %vm9373_vm1, %v10958_v4  ;;  %v6995_v38 = vadd.f32 %v17168_v31, %v6540_v58  ;;  %v6317_v43 = vmul.f32 %v17163_v55, %v5862_v5  ;;  %v6541_v40 = vmul.f32 %v17163_v55, %v6086_v62  ;;  %v6089_v41 = vld [vmem:[#allocation2 + $0x9d0] sm:$0xff]  ;;  %v5863_v4 = vld [vmem:[#allocation2 + $0x2c0] sm:$0xff] }
 0x226   : > { %9455 = vst.msk [vmem:[%s13402_s14 + $0x144] sm:$0xf] %vm9373_vm1, %v10732_v27  ;;  %9679 = vst.msk [vmem:[%s13402_s14 + $0x4c4] sm:$0xf] %vm9373_vm1, %v10956_v33  ;;  %v6769_v25 = vadd.f32 %v17168_v31, %v6314_v0  ;;  %v6993_v59 = vadd.f32 %v17168_v31, %v6538_v46  ;;  %v6315_v32 = vmul.f32 %v17163_v55, %v5860_v7  ;;  %v7219_v54 = vmax.f32 %v6771_v20, 0.0  ;;  %v14919_v58 = vpop.f32.mrb[118].mxu1 }
 0x227   : > { %v6539_v12 = vmul.f32 %v17163_v55, %v6084_v2  ;;  %v7443_v47 = vmax.f32 %v6995_v38, 0.0  ;;  %v6772_v9 = vadd.f32 %v17168_v31, %v6317_v43  ;;  %v6996_v56 = vadd.f32 %v17168_v31, %v6541_v40  ;;  %17170 = vst [vmem:[#allocation20_spill] sm:$0xff] %v14909_v26  ;;  %17171 = vst [vmem:[#allocation21_spill] sm:$0xff] %v14911_v49  ;;  %v14921_v7 = vpop.f32.mrb[119].mxu0  ;;  %v5866_v46 = vld [vmem:[#allocation2 + $0x2d8] sm:$0xff]  ;;  %v14923_v38 = vpop.f32.mrb[119].mxu1 }
 0x228   : > { %v7217_v61 = vmax.f32 %v6769_v25, 0.0  ;;  %v7441_v44 = vmax.f32 %v6993_v59, 0.0  ;;  %v6770_v50 = vadd.f32 %v17168_v31, %v6315_v32  ;;  %17172 = vst [vmem:[#allocation22_spill] sm:$0xff] %v14915_v53  ;;  %17173 = vst [vmem:[#allocation10_spill] sm:$0xff] %v14917_v30  ;;  %v10737_v8 = vpack.c.bf16 %v7219_v54, %v7219_v54  ;;  %v6090_v20 = vld [vmem:[#allocation2 + $0x9d8] sm:$0xff]  ;;  %v5864_v32 = vld [vmem:[#allocation2 + $0x2c8] sm:$0xff] }
 0x229   : > { %v6994_v15 = vadd.f32 %v17168_v31, %v6539_v12  ;;  %v10961_v5 = vpack.c.bf16 %v7443_v47, %v7443_v47  ;;  %v7220_v62 = vmax.f32 %v6772_v9, 0.0  ;;  %v7444_v1 = vmax.f32 %v6996_v56, 0.0  ;;  %17174 = vst [vmem:[#allocation6_spill] sm:$0xff] %v14919_v58  ;;  %17175 = vst [vmem:[#allocation7_spill] sm:$0xff] %v14921_v7  ;;  %v6088_v12 = vld [vmem:[#allocation2 + $0x9c8] sm:$0xff]  ;;  %v17193_v30 = vld [vmem:[#allocation24_spill] sm:$0xff] }
 0x22a   : > { %v10735_v2 = vpack.c.bf16 %v7217_v61, %v7217_v61  ;;  %v10959_v27 = vpack.c.bf16 %v7441_v44, %v7441_v44  ;;  %v7218_v33 = vmax.f32 %v6770_v50, 0.0  ;;  %17176 = vst [vmem:[#allocation11_spill] sm:$0xff] %v14923_v38  ;;  %9460 = vst.msk [vmem:[%s13402_s14 + $0x158] sm:$0xf] %vm9373_vm1, %v10737_v8  ;;  %v6320_v25 = vmul.f32 %v17163_v55, %v5865_v48  ;;  %v852_v53 = vld [vmem:[#allocation2 + $0x350] sm:$0xff]  ;;  %v1074_v17 = vld [vmem:[#allocation2 + $0xa40] sm:$0xff] }
 0x22b   : > { %v7442_v0 = vmax.f32 %v6994_v15, 0.0  ;;  %9684 = vst.msk [vmem:[%s13402_s14 + $0x4d8] sm:$0xf] %vm9373_vm1, %v10961_v5  ;;  %v10738_v43 = vpack.c.bf16 %v7220_v62, %v7220_v62  ;;  %v10962_v40 = vpack.c.bf16 %v7444_v1, %v7444_v1  ;;  %v6544_v59 = vmul.f32 %v17163_v55, %v6089_v41  ;;  %v14953_v62 = vpop.f32.mrb[120].mxu0 }
 0x22c   : > { %9458 = vst.msk [vmem:[%s13402_s14 + $0x150] sm:$0xf] %vm9373_vm1, %v10735_v2  ;;  %9682 = vst.msk [vmem:[%s13402_s14 + $0x4d0] sm:$0xf] %vm9373_vm1, %v10959_v27  ;;  %v10736_v54 = vpack.c.bf16 %v7218_v33, %v7218_v33  ;;  %v6318_v9 = vmul.f32 %v17163_v55, %v5863_v4  ;;  %v6542_v56 = vmul.f32 %v17163_v55, %v6087_v60  ;;  %v14957_v27 = vpop.f32.mrb[120].mxu1  ;;  %v14959_v33 = vpop.f32.mrb[121].mxu0 }
 0x22d   : > { %v10960_v47 = vpack.c.bf16 %v7442_v0, %v7442_v0  ;;  %9461 = vst.msk [vmem:[%s13402_s14 + $0x15c] sm:$0xf] %vm9373_vm1, %v10738_v43  ;;  %9685 = vst.msk [vmem:[%s13402_s14 + $0x4dc] sm:$0xf] %vm9373_vm1, %v10962_v40  ;;  %v6775_v61 = vadd.f32 %v17168_v31, %v6320_v25  ;;  %v6999_v44 = vadd.f32 %v17168_v31, %v6544_v59  ;;  %v5869_v40 = vld [vmem:[#allocation2 + $0x2f0] sm:$0xff]  ;;  %v14963_v59 = vpop.f32.mrb[121].mxu1 }
 0x22e   : > { %v6321_v50 = vmul.f32 %v17163_v55, %v5866_v46  ;;  %v6545_v15 = vmul.f32 %v17163_v55, %v6090_v20  ;;  %9459 = vst.msk [vmem:[%s13402_s14 + $0x154] sm:$0xf] %vm9373_vm1, %v10736_v54  ;;  %v6773_v48 = vadd.f32 %v17168_v31, %v6318_v9  ;;  %v6997_v41 = vadd.f32 %v17168_v31, %v6542_v56  ;;  %v6093_v25 = vld [vmem:[#allocation2 + $0x9f0] sm:$0xff]  ;;  %v5867_v56 = vld [vmem:[#allocation2 + $0x2e0] sm:$0xff] }
 0x22f   : > { %9683 = vst.msk [vmem:[%s13402_s14 + $0x4d4] sm:$0xf] %vm9373_vm1, %v10960_v47  ;;  %v6319_v8 = vmul.f32 %v17163_v55, %v5864_v32  ;;  %v6543_v5 = vmul.f32 %v17163_v55, %v6088_v12  ;;  %17177 = vst [vmem:[#allocation12_spill] sm:$0xff] %v14953_v62  ;;  %v7223_v1 = vmax.f32 %v6775_v61, 0.0  ;;  %v7447_v4 = vmax.f32 %v6999_v44, 0.0  ;;  %v14965_v32 = vpop.f32.mrb[122].mxu0 }
 0x230   : > { %v6776_v60 = vadd.f32 %v17168_v31, %v6321_v50  ;;  %v7000_v2 = vadd.f32 %v17168_v31, %v6545_v15  ;;  %17178 = vst [vmem:[#allocation13_spill] sm:$0xff] %v14957_v27  ;;  %17179 = vst [vmem:[#allocation14_spill] sm:$0xff] %v14959_v33  ;;  %v7221_v0 = vmax.f32 %v6773_v48, 0.0  ;;  %v7445_v46 = vmax.f32 %v6997_v41, 0.0  ;;  %v6091_v61 = vld [vmem:[#allocation2 + $0x9e0] sm:$0xff]  ;;  %v14967_v44 = vpop.f32.mrb[122].mxu1 }
 0x231   : > { %v6774_v20 = vadd.f32 %v17168_v31, %v6319_v8  ;;  %v6998_v43 = vadd.f32 %v17168_v31, %v6543_v5  ;;  %17180 = vst [vmem:[#allocation8_spill] sm:$0xff] %v14963_v59  ;;  %17181 = vst [vmem:[#allocation17_spill] sm:$0xff] %v14965_v32  ;;  %v10741_v12 = vpack.c.bf16 %v7223_v1, %v7223_v1  ;;  %v14969_v50 = vpop.f32.mrb[123].mxu0  ;;  %v5870_v5 = vld [vmem:[#allocation2 + $0x2f8] sm:$0xff]  ;;  %v14971_v59 = vpop.f32.mrb[123].mxu1 }
 0x232   : > { %v10965_v54 = vpack.c.bf16 %v7447_v4, %v7447_v4  ;;  %v7224_v47 = vmax.f32 %v6776_v60, 0.0  ;;  %v7448_v9 = vmax.f32 %v7000_v2, 0.0  ;;  %17182 = vst [vmem:[#allocation15_spill] sm:$0xff] %v14967_v44  ;;  %17183 = vst [vmem:[#allocation16_spill] sm:$0xff] %v14969_v50  ;;  %v10739_v15 = vpack.c.bf16 %v7221_v0, %v7221_v0  ;;  %v6094_v32 = vld [vmem:[#allocation2 + $0x9f8] sm:$0xff]  ;;  %v5868_v0 = vld [vmem:[#allocation2 + $0x2e8] sm:$0xff] }
 0x233   : > { %v10963_v48 = vpack.c.bf16 %v7445_v46, %v7445_v46  ;;  %v7222_v41 = vmax.f32 %v6774_v20, 0.0  ;;  %v7446_v8 = vmax.f32 %v6998_v43, 0.0  ;;  %17184 = vst [vmem:[#allocation18_spill] sm:$0xff] %v14971_v59  ;;  %9464 = vst.msk [vmem:[%s13402_s14 + $0x168] sm:$0xf] %vm9373_vm1, %v10741_v12  ;;  %v6324_v60 = vmul.f32 %v17163_v55, %v5869_v40  ;;  %v6092_v46 = vld [vmem:[#allocation2 + $0x9e8] sm:$0xff] }
 0x234   : > { %9688 = vst.msk [vmem:[%s13402_s14 + $0x4e8] sm:$0xf] %vm9373_vm1, %v10965_v54  ;;  %v10742_v1 = vpack.c.bf16 %v7224_v47, %v7224_v47  ;;  %v10966_v4 = vpack.c.bf16 %v7448_v9, %v7448_v9  ;;  %v6548_v2 = vmul.f32 %v17163_v55, %v6093_v25  ;;  %9462 = vst.msk [vmem:[%s13402_s14 + $0x160] sm:$0xf] %vm9373_vm1, %v10739_v15  ;;  %v14986_v12 = vld [vmem:[%s17066_s2] ss:$0 sm:$0xff] }
 0x235   : > { %9686 = vst.msk [vmem:[%s13402_s14 + $0x4e0] sm:$0xf] %vm9373_vm1, %v10963_v48  ;;  %v10740_v20 = vpack.c.bf16 %v7222_v41, %v7222_v41  ;;  %v10964_v43 = vpack.c.bf16 %v7446_v8, %v7446_v8  ;;  %v6322_v54 = vmul.f32 %v14986_v12, %v5867_v56  ;;  %v6546_v40 = vmul.f32 %v14986_v12, %v6091_v61  ;;  %v844_v41 = vld [vmem:[#allocation2 + $0x310] sm:$0xff]  ;;  %v843_v59 = vld [vmem:[#allocation2 + $0x308] sm:$0xff] }
 0x236   : > { %9465 = vst.msk [vmem:[%s13402_s14 + $0x16c] sm:$0xf] %vm9373_vm1, %v10742_v1  ;;  %9689 = vst.msk [vmem:[%s13402_s14 + $0x4ec] sm:$0xf] %vm9373_vm1, %v10966_v4  ;;  %v6779_v55 = vadd.f32 %v17168_v31, %v6324_v60  ;;  %v7003_v25 = vadd.f32 %v17168_v31, %v6548_v2  ;;  %v6325_v47 = vmul.f32 %v14986_v12, %v5870_v5  ;;  %v1068_v8 = vld [vmem:[#allocation2 + $0xa10] sm:$0xff]  ;;  %v15006_v1 = vpop.f32.mrb[124].mxu0 }
 0x237   : > { %v6549_v9 = vmul.f32 %v14986_v12, %v6094_v32  ;;  %9463 = vst.msk [vmem:[%s13402_s14 + $0x164] sm:$0xf] %vm9373_vm1, %v10740_v20  ;;  %9687 = vst.msk [vmem:[%s13402_s14 + $0x4e4] sm:$0xf] %vm9373_vm1, %v10964_v43  ;;  %v6777_v56 = vadd.f32 %v17168_v31, %v6322_v54  ;;  %v7001_v61 = vadd.f32 %v17168_v31, %v6546_v40  ;;  %v15011_v32 = vld [vmem:[%s17067_s3] ss:$0 sm:$0xff] }
 0x238   : > { %v6323_v15 = vmul.f32 %v14986_v12, %v5868_v0  ;;  %v6547_v48 = vmul.f32 %v14986_v12, %v6092_v46  ;;  %17185 = vst [vmem:[#allocation9_spill] sm:$0xff] %v15006_v1  ;;  %v7227_v4 = vmax.f32 %v6779_v55, 0.0  ;;  %v7451_v5 = vmax.f32 %v7003_v25, 0.0  ;;  %v842_v31 = vld [vmem:[#allocation2 + $0x300] sm:$0xff]  ;;  %v15015_v0 = vpop.f32.mrb[124].mxu1  ;;  %v15017_v46 = vpop.f32.mrb[125].mxu0 }
 0x239   : > { %v6780_v60 = vadd.f32 %v15011_v32, %v6325_v47  ;;  %v7004_v2 = vadd.f32 %v15011_v32, %v6549_v9  ;;  %v1066_v20 = vld [vmem:[#allocation2 + $0xa00] sm:$0xff]  ;;  %17186 = vst [vmem:[#allocation23_spill] sm:$0xff] %v15015_v0  ;;  %17187 = vst [vmem:[#allocation38_spill] sm:$0xff] %v15017_v46  ;;  %v7225_v43 = vmax.f32 %v6777_v56, 0.0  ;;  %v7449_v54 = vmax.f32 %v7001_v61, 0.0  ;;  %v845_v25 = vld [vmem:[#allocation2 + $0x318] sm:$0xff] }
 0x23a   : > { %v6778_v40 = vadd.f32 %v15011_v32, %v6323_v15  ;;  %v7002_v55 = vadd.f32 %v15011_v32, %v6547_v48  ;;  %v1069_v1 = vld [vmem:[#allocation2 + $0xa18] sm:$0xff]  ;;  %v1067_v50 = vld [vmem:[#allocation2 + $0xa08] sm:$0xff]  ;;  %v15021_v44 = vpop.f32.mrb[125].mxu1  ;;  %v15023_v47 = vpop.f32.mrb[126].mxu0  ;;  %v10745_v9 = vpack.c.bf16 %v7227_v4, %v7227_v4  ;;  %v10969_v33 = vpack.c.bf16 %v7451_v5, %v7451_v5  ;;  %v848_v56 = vld [vmem:[#allocation2 + $0x330] sm:$0xff] }
 0x23b   : > { %17188 = vst [vmem:[#allocation39_spill] sm:$0xff] %v15021_v44  ;;  %17189 = vst [vmem:[#allocation40_spill] sm:$0xff] %v15023_v47  ;;  %v7228_v27 = vmax.f32 %v6780_v60, 0.0  ;;  %v7452_v0 = vmax.f32 %v7004_v2, 0.0  ;;  %v1072_v61 = vld [vmem:[#allocation2 + $0xa30] sm:$0xff]  ;;  %v846_v46 = vld [vmem:[#allocation2 + $0x320] sm:$0xff]  ;;  %v10743_v38 = vpack.c.bf16 %v7225_v43, %v7225_v43  ;;  %v10967_v7 = vpack.c.bf16 %v7449_v54, %v7449_v54 }
 0x23c   : > { %v1070_v15 = vld [vmem:[#allocation2 + $0xa20] sm:$0xff]  ;;  %v15025_v62 = vpop.f32.mrb[126].mxu1  ;;  %v15027_v48 = vpop.f32.mrb[127].mxu0  ;;  %v7226_v44 = vmax.f32 %v6778_v40, 0.0  ;;  %v7450_v47 = vmax.f32 %v7002_v55, 0.0  ;;  %v849_v4 = vld [vmem:[#allocation2 + $0x338] sm:$0xff]  ;;  %v4973_v43 = vadd.f32 %v17193_v30, %v844_v41 }
 0x23d   : > { %17190 = vst [vmem:[#allocation41_spill] sm:$0xff] %v15025_v62  ;;  %17191 = vst [vmem:[#allocation42_spill] sm:$0xff] %v15027_v48  ;;  %v1073_v5 = vld [vmem:[#allocation2 + $0xa38] sm:$0xff]  ;;  %v847_v60 = vld [vmem:[#allocation2 + $0x328] sm:$0xff]  ;;  %v15029_v58 = vpop.f32.mrb[127].mxu1  ;;  %v10746_v2 = vpack.c.bf16 %v7228_v27, %v7228_v27  ;;  %v10970_v62 = vpack.c.bf16 %v7452_v0, %v7452_v0 }
 0x23e   : > { %17192 = vst [vmem:[#allocation43_spill] sm:$0xff] %v15029_v58  ;;  %9468 = vst.msk [vmem:[%s13402_s14 + $0x178] sm:$0xf] %vm9373_vm1, %v10745_v9  ;;  %v17194_v54 = vld [vmem:[#allocation25_spill] sm:$0xff]  ;;  %v1071_v40 = vld [vmem:[#allocation2 + $0xa28] sm:$0xff]  ;;  %v10744_v58 = vpack.c.bf16 %v7226_v44, %v7226_v44  ;;  %v10968_v49 = vpack.c.bf16 %v7450_v47, %v7450_v47 }
 0x23f   : > { %9692 = vst.msk [vmem:[%s13402_s14 + $0x4f8] sm:$0xf] %vm9373_vm1, %v10969_v33  ;;  %v5197_v48 = vadd.f32 %v17194_v54, %v1068_v8  ;;  %v1076_v55 = vld [vmem:[#allocation2 + $0xa50] sm:$0xff]  ;;  %9466 = vst.msk [vmem:[%s13402_s14 + $0x170] sm:$0xf] %vm9373_vm1, %v10743_v38  ;;  %v17195_v9 = vld [vmem:[#allocation26_spill] sm:$0xff] }
 0x240   : > { %9690 = vst.msk [vmem:[%s13402_s14 + $0x4f0] sm:$0xf] %vm9373_vm1, %v10967_v7  ;;  %v4971_v26 = vadd.f32 %v17195_v9, %v842_v31  ;;  %v17196_v33 = vld [vmem:[#allocation27_spill] sm:$0xff]  ;;  %v850_v0 = vld [vmem:[#allocation2 + $0x340] sm:$0xff]  ;;  %v853_v30 = vld [vmem:[#allocation2 + $0x358] sm:$0xff] }
 0x241   : > { %v5195_v27 = vadd.f32 %v17196_v33, %v1066_v20  ;;  %9469 = vst.msk [vmem:[%s13402_s14 + $0x17c] sm:$0xf] %vm9373_vm1, %v10746_v2  ;;  %9693 = vst.msk [vmem:[%s13402_s14 + $0x4fc] sm:$0xf] %vm9373_vm1, %v10970_v62  ;;  %v17197_v7 = vld [vmem:[#allocation28_spill] sm:$0xff]  ;;  %v17198_v44 = vld [vmem:[#allocation29_spill] sm:$0xff] }
 0x242   : > { %5422 = vst.msk [vmem:[#allocation2 + $0x310] sm:$0xff] %vm297_vm0, %v4973_v43  ;;  %5646 = vst.msk [vmem:[#allocation2 + $0xa10] sm:$0xff] %vm297_vm0, %v5197_v48  ;;  %v4974_v38 = vadd.f32 %v17197_v7, %v845_v25  ;;  %v5198_v41 = vadd.f32 %v17198_v44, %v1069_v1  ;;  %v17199_v8 = vld [vmem:[#allocation30_spill] sm:$0xff]  ;;  %v17200_v47 = vld [vmem:[#allocation31_spill] sm:$0xff] }
 0x243   : > { %v4972_v31 = vadd.f32 %v17199_v8, %v843_v59  ;;  %v5196_v20 = vadd.f32 %v17200_v47, %v1067_v50  ;;  %v1077_v54 = vld [vmem:[#allocation2 + $0xa58] sm:$0xff]  ;;  %v851_v9 = vld [vmem:[#allocation2 + $0x348] sm:$0xff]  ;;  %9467 = vst.msk [vmem:[%s13402_s14 + $0x174] sm:$0xf] %vm9373_vm1, %v10744_v58  ;;  %9691 = vst.msk [vmem:[%s13402_s14 + $0x4f4] sm:$0xf] %vm9373_vm1, %v10968_v49 }
 0x244   : > { %v1075_v33 = vld [vmem:[#allocation2 + $0xa48] sm:$0xff]  ;;  %5420 = vst.msk [vmem:[#allocation2 + $0x300] sm:$0xff] %vm297_vm0, %v4971_v26  ;;  %5644 = vst.msk [vmem:[#allocation2 + $0xa00] sm:$0xff] %vm297_vm0, %v5195_v27  ;;  %v17201_v62 = vld [vmem:[#allocation32_spill] sm:$0xff]  ;;  %v15063_v47 = vpop.f32.mrb[128].mxu0 }
 0x245   : > { %v4977_v48 = vadd.f32 %v17201_v62, %v848_v56  ;;  %v17202_v25 = vld [vmem:[#allocation33_spill] sm:$0xff]  ;;  %v17203_v1 = vld [vmem:[#allocation34_spill] sm:$0xff]  ;;  %v17204_v59 = vld [vmem:[#allocation35_spill] sm:$0xff]  ;;  %5423 = vst.msk [vmem:[#allocation2 + $0x318] sm:$0xff] %vm297_vm0, %v4974_v38  ;;  %v15075_v38 = vpop.f32.mrb[129].mxu0 }
 0x246   : > { %v5201_v2 = vadd.f32 %v17202_v25, %v1072_v61  ;;  %v4975_v43 = vadd.f32 %v17203_v1, %v846_v46  ;;  %v5199_v7 = vadd.f32 %v17204_v59, %v1070_v15  ;;  %v856_v50 = vld [vmem:[#allocation2 + $0x370] sm:$0xff]  ;;  %v854_v8 = vld [vmem:[#allocation2 + $0x360] sm:$0xff]  ;;  %5647 = vst.msk [vmem:[#allocation2 + $0xa18] sm:$0xff] %vm297_vm0, %v5198_v41  ;;  %5421 = vst.msk [vmem:[#allocation2 + $0x308] sm:$0xff] %vm297_vm0, %v4972_v31  ;;  %v15073_v25 = vpop.f32.mrb[128].mxu1 }
 0x247   : > { %v1080_v44 = vld [vmem:[#allocation2 + $0xa70] sm:$0xff]  ;;  %5645 = vst.msk [vmem:[#allocation2 + $0xa08] sm:$0xff] %vm297_vm0, %v5196_v20  ;;  %v17206_v58 = vld [vmem:[#allocation37_spill] sm:$0xff]  ;;  %v4976_v46 = vadd.f32 %v14675_v51, %v847_v60  ;;  %v5200_v61 = vadd.f32 %v14677_v28, %v1071_v40  ;;  %v1078_v15 = vld [vmem:[#allocation2 + $0xa60] sm:$0xff]  ;;  %v5205_v51 = vadd.f32 %v14725_v57, %v1076_v55  ;;  %v4979_v28 = vadd.f32 %v14735_v16, %v850_v0  ;;  %v15085_v31 = vpop.f32.mrb[129].mxu1  ;;  %v15087_v20 = vpop.f32.mrb[130].mxu0 }
 0x248   : > { %v17205_v26 = vld [vmem:[#allocation36_spill] sm:$0xff]  ;;  %v5202_v56 = vadd.f32 %v17206_v58, %v1073_v5  ;;  %v857_v27 = vld [vmem:[#allocation2 + $0x378] sm:$0xff]  ;;  %5426 = vst.msk [vmem:[#allocation2 + $0x330] sm:$0xff] %vm297_vm0, %v4977_v48  ;;  %5650 = vst.msk [vmem:[#allocation2 + $0xa30] sm:$0xff] %vm297_vm0, %v5201_v2  ;;  %v5203_v5 = vadd.f32 %v14737_v11, %v1074_v17  ;;  %v5206_v57 = vadd.f32 %v14750_v52, %v1077_v54  ;;  %v15097_v0 = vpop.f32.mrb[130].mxu1  ;;  %v15099_v48 = vpop.f32.mrb[131].mxu0 }
 0x249   : > { %v4978_v49 = vadd.f32 %v17205_v26, %v849_v4  ;;  %v1081_v62 = vld [vmem:[#allocation2 + $0xa78] sm:$0xff]  ;;  %5424 = vst.msk [vmem:[#allocation2 + $0x320] sm:$0xff] %vm297_vm0, %v4975_v43  ;;  %5648 = vst.msk [vmem:[#allocation2 + $0xa20] sm:$0xff] %vm297_vm0, %v5199_v7  ;;  %v4981_v4 = vadd.f32 %v14723_v29, %v852_v53  ;;  %v855_v60 = vld [vmem:[#allocation2 + $0x368] sm:$0xff]  ;;  %v4982_v29 = vadd.f32 %v14748_v24, %v853_v30 }
 0x24a   : > { %v1079_v40 = vld [vmem:[#allocation2 + $0xa68] sm:$0xff]  ;;  %v860_v41 = vld [vmem:[#allocation2 + $0x390] sm:$0xff]  ;;  %5651 = vst.msk [vmem:[#allocation2 + $0xa38] sm:$0xff] %vm297_vm0, %v5202_v56  ;;  %5425 = vst.msk [vmem:[#allocation2 + $0x328] sm:$0xff] %vm297_vm0, %v4976_v46  ;;  %v4980_v16 = vadd.f32 %v14761_v6, %v851_v9  ;;  %v5204_v11 = vadd.f32 %v14763_v22, %v1075_v33  ;;  %v4985_v24 = vadd.f32 %v14803_v45, %v856_v50  ;;  %v15109_v9 = vpop.f32.mrb[131].mxu1 }
 0x24b   : > { %5427 = vst.msk [vmem:[#allocation2 + $0x338] sm:$0xff] %vm297_vm0, %v4978_v49  ;;  %5649 = vst.msk [vmem:[#allocation2 + $0xa28] sm:$0xff] %vm297_vm0, %v5200_v61  ;;  %v1084_v17 = vld [vmem:[#allocation2 + $0xa90] sm:$0xff]  ;;  %v858_v53 = vld [vmem:[#allocation2 + $0x380] sm:$0xff]  ;;  %v5209_v52 = vadd.f32 %v14805_v19, %v1080_v44  ;;  %v4983_v6 = vadd.f32 %v14809_v18, %v854_v8  ;;  %v5207_v22 = vadd.f32 %v14814_v21, %v1078_v15 }
 0x24c   : > { %v1082_v55 = vld [vmem:[#allocation2 + $0xa80] sm:$0xff]  ;;  %5430 = vst.msk [vmem:[#allocation2 + $0x350] sm:$0xff] %vm297_vm0, %v4981_v4  ;;  %5654 = vst.msk [vmem:[#allocation2 + $0xa50] sm:$0xff] %vm297_vm0, %v5205_v51  ;;  %v861_v30 = vld [vmem:[#allocation2 + $0x398] sm:$0xff]  ;;  %v4986_v45 = vadd.f32 %v14817_v23, %v857_v27  ;;  %v5210_v19 = vadd.f32 %v14820_v36, %v1081_v62  ;;  %v4984_v18 = vadd.f32 %v14829_v10, %v855_v60  ;;  %v15151_v62 = vpop.f32.mrb[132].mxu1 }
 0x24d   : > { %5428 = vst.msk [vmem:[#allocation2 + $0x340] sm:$0xff] %vm297_vm0, %v4979_v28  ;;  %5652 = vst.msk [vmem:[#allocation2 + $0xa40] sm:$0xff] %vm297_vm0, %v5203_v5  ;;  %v1085_v54 = vld [vmem:[#allocation2 + $0xa98] sm:$0xff]  ;;  %v5208_v21 = vadd.f32 %v14831_v13, %v1079_v40  ;;  %v859_v33 = vld [vmem:[#allocation2 + $0x388] sm:$0xff]  ;;  %v4989_v23 = vadd.f32 %v14855_v63, %v860_v41  ;;  %v5213_v36 = vadd.f32 %v14859_v34, %v1084_v17  ;;  %v15161_v5 = vpop.f32.mrb[133].mxu1 }
 0x24e   : > { %5431 = vst.msk [vmem:[#allocation2 + $0x358] sm:$0xff] %vm297_vm0, %v4982_v29  ;;  %5655 = vst.msk [vmem:[#allocation2 + $0xa58] sm:$0xff] %vm297_vm0, %v5206_v57  ;;  %v1083_v2 = vld [vmem:[#allocation2 + $0xa88] sm:$0xff]  ;;  %v5873_v1 = vld [vmem:[#allocation2 + $0x310] sm:$0xff]  ;;  %v4987_v10 = vadd.f32 %v14865_v39, %v858_v53  ;;  %v5211_v13 = vadd.f32 %v14867_v35, %v1082_v55  ;;  %v4990_v63 = vadd.f32 %v14869_v14, %v861_v30 }
 0x24f   : > { %5429 = vst.msk [vmem:[#allocation2 + $0x348] sm:$0xff] %vm297_vm0, %v4980_v16  ;;  %5653 = vst.msk [vmem:[#allocation2 + $0xa48] sm:$0xff] %vm297_vm0, %v5204_v11  ;;  %v6097_v43 = vld [vmem:[#allocation2 + $0xa10] sm:$0xff]  ;;  %v6328_v59 = vmul.f32 %v14986_v12, %v5873_v1  ;;  %v5871_v50 = vld [vmem:[#allocation2 + $0x300] sm:$0xff]  ;;  %v5214_v34 = vadd.f32 %v14871_v3, %v1085_v54  ;;  %v4988_v58 = vadd.f32 %v14873_v37, %v859_v33  ;;  %v15143_v3 = vpop.f32.mrb[132].mxu0  ;;  %v15167_v16 = vpop.f32.mrb[134].mxu1 }
 0x250   : > { %5434 = vst.msk [vmem:[#allocation2 + $0x370] sm:$0xff] %vm297_vm0, %v4985_v24  ;;  %5658 = vst.msk [vmem:[#allocation2 + $0xa70] sm:$0xff] %vm297_vm0, %v5209_v52  ;;  %v6552_v7 = vmul.f32 %v14986_v12, %v6097_v43  ;;  %v6095_v44 = vld [vmem:[#allocation2 + $0xa00] sm:$0xff]  ;;  %v6326_v39 = vmul.f32 %v14986_v12, %v5871_v50  ;;  %v5874_v8 = vld [vmem:[#allocation2 + $0x318] sm:$0xff]  ;;  %v5212_v14 = vadd.f32 %v14875_v42, %v1083_v2  ;;  %v15153_v37 = vpop.f32.mrb[133].mxu0 }
 0x251   : > { %5432 = vst.msk [vmem:[#allocation2 + $0x360] sm:$0xff] %vm297_vm0, %v4983_v6  ;;  %5656 = vst.msk [vmem:[#allocation2 + $0xa60] sm:$0xff] %vm297_vm0, %v5207_v22  ;;  %v6550_v35 = vmul.f32 %v14986_v12, %v6095_v44  ;;  %v6098_v26 = vld [vmem:[#allocation2 + $0xa18] sm:$0xff]  ;;  %v5872_v49 = vld [vmem:[#allocation2 + $0x308] sm:$0xff]  ;;  %v6783_v56 = vadd.f32 %v15011_v32, %v6328_v59  ;;  %v6329_v61 = vmul.f32 %v14986_v12, %v5874_v8  ;;  %v15163_v60 = vpop.f32.mrb[134].mxu0 }
 0x252   : > { %5435 = vst.msk [vmem:[#allocation2 + $0x378] sm:$0xff] %vm297_vm0, %v4986_v45  ;;  %5659 = vst.msk [vmem:[#allocation2 + $0xa78] sm:$0xff] %vm297_vm0, %v5210_v19  ;;  %v7007_v46 = vadd.f32 %v15011_v32, %v6552_v7  ;;  %v6553_v15 = vmul.f32 %v14986_v12, %v6098_v26  ;;  %v6096_v27 = vld [vmem:[#allocation2 + $0xa08] sm:$0xff]  ;;  %v6781_v42 = vadd.f32 %v15011_v32, %v6326_v39  ;;  %v5877_v24 = vld [vmem:[#allocation2 + $0x330] sm:$0xff]  ;;  %v15171_v6 = vpop.f32.mrb[135].mxu0 }
 0x253   : > { %5433 = vst.msk [vmem:[#allocation2 + $0x368] sm:$0xff] %vm297_vm0, %v4984_v18  ;;  %5657 = vst.msk [vmem:[#allocation2 + $0xa68] sm:$0xff] %vm297_vm0, %v5208_v21  ;;  %v7005_v4 = vadd.f32 %v15011_v32, %v6550_v35  ;;  %v6327_v51 = vmul.f32 %v14986_v12, %v5872_v49  ;;  %v6551_v28 = vmul.f32 %v14986_v12, %v6096_v27  ;;  %v7231_v40 = vmax.f32 %v6783_v56, 0.0  ;;  %v6101_v52 = vld [vmem:[#allocation2 + $0xa30] sm:$0xff]  ;;  %v5875_v19 = vld [vmem:[#allocation2 + $0x320] sm:$0xff]  ;;  %v15173_v21 = vpop.f32.mrb[135].mxu1 }
 0x254   : > { %5438 = vst.msk [vmem:[#allocation2 + $0x390] sm:$0xff] %vm297_vm0, %v4989_v23  ;;  %5662 = vst.msk [vmem:[#allocation2 + $0xa90] sm:$0xff] %vm297_vm0, %v5213_v36  ;;  %v7455_v41 = vmax.f32 %v7007_v46, 0.0  ;;  %v6784_v29 = vadd.f32 %v15011_v32, %v6329_v61  ;;  %v7008_v57 = vadd.f32 %v15011_v32, %v6553_v15  ;;  %v7229_v11 = vmax.f32 %v6781_v42, 0.0  ;;  %v6099_v18 = vld [vmem:[#allocation2 + $0xa20] sm:$0xff]  ;;  %v5878_v23 = vld [vmem:[#allocation2 + $0x338] sm:$0xff] }
 0x255   : > { %5436 = vst.msk [vmem:[#allocation2 + $0x380] sm:$0xff] %vm297_vm0, %v4987_v10  ;;  %5660 = vst.msk [vmem:[#allocation2 + $0xa80] sm:$0xff] %vm297_vm0, %v5211_v13  ;;  %v7453_v17 = vmax.f32 %v7005_v4, 0.0  ;;  %v6782_v53 = vadd.f32 %v15011_v32, %v6327_v51  ;;  %v7006_v55 = vadd.f32 %v15011_v32, %v6551_v28  ;;  %v10749_v22 = vpack.c.bf16 %v7231_v40, %v7231_v40  ;;  %v6102_v36 = vld [vmem:[#allocation2 + $0xa38] sm:$0xff]  ;;  %v5876_v50 = vld [vmem:[#allocation2 + $0x328] sm:$0xff]  ;;  %v15187_v8 = vpop.f32.mrb[136].mxu0 }
 0x256   : > { %5439 = vst.msk [vmem:[#allocation2 + $0x398] sm:$0xff] %vm297_vm0, %v4990_v63  ;;  %5663 = vst.msk [vmem:[#allocation2 + $0xa98] sm:$0xff] %vm297_vm0, %v5214_v34  ;;  %v10973_v30 = vpack.c.bf16 %v7455_v41, %v7455_v41  ;;  %v7232_v54 = vmax.f32 %v6784_v29, 0.0  ;;  %v7456_v45 = vmax.f32 %v7008_v57, 0.0  ;;  %v10747_v33 = vpack.c.bf16 %v7229_v11, %v7229_v11  ;;  %v6100_v44 = vld [vmem:[#allocation2 + $0xa28] sm:$0xff]  ;;  %v15197_v56 = vpop.f32.mrb[136].mxu1 }
 0x257   : > { %5437 = vst.msk [vmem:[#allocation2 + $0x388] sm:$0xff] %vm297_vm0, %v4988_v58  ;;  %5661 = vst.msk [vmem:[#allocation2 + $0xa88] sm:$0xff] %vm297_vm0, %v5212_v14  ;;  %v10971_v2 = vpack.c.bf16 %v7453_v17, %v7453_v17  ;;  %v7230_v1 = vmax.f32 %v6782_v53, 0.0  ;;  %v7454_v43 = vmax.f32 %v7006_v55, 0.0  ;;  %v6332_v59 = vmul.f32 %v14986_v12, %v5877_v24  ;;  %v15199_v46 = vpop.f32.mrb[137].mxu0  ;;  %v15209_v4 = vpop.f32.mrb[137].mxu1 }
 0x258   : > { %9472 = vst.msk [vmem:[%s13402_s14 + $0x188] sm:$0xf] %vm9373_vm1, %v10749_v22  ;;  %9696 = vst.msk [vmem:[%s13402_s14 + $0x508] sm:$0xf] %vm9373_vm1, %v10973_v30  ;;  %v10750_v10 = vpack.c.bf16 %v7232_v54, %v7232_v54  ;;  %v10974_v13 = vpack.c.bf16 %v7456_v45, %v7456_v45  ;;  %v6556_v7 = vmul.f32 %v14986_v12, %v6101_v52  ;;  %v15211_v51 = vpop.f32.mrb[138].mxu0  ;;  %v15215_v57 = vpop.f32.mrb[138].mxu1 }
 0x259   : > { %9470 = vst.msk [vmem:[%s13402_s14 + $0x180] sm:$0xf] %vm9373_vm1, %v10747_v33  ;;  %9694 = vst.msk [vmem:[%s13402_s14 + $0x500] sm:$0xf] %vm9373_vm1, %v10971_v2  ;;  %v10748_v63 = vpack.c.bf16 %v7230_v1, %v7230_v1  ;;  %v10972_v34 = vpack.c.bf16 %v7454_v43, %v7454_v43  ;;  %v6330_v39 = vmul.f32 %v14986_v12, %v5875_v19  ;;  %v5881_v24 = vld [vmem:[#allocation2 + $0x350] sm:$0xff]  ;;  %v15219_v22 = vpop.f32.mrb[139].mxu0 }
 0x25a   : > { %v6554_v35 = vmul.f32 %v14986_v12, %v6099_v18  ;;  %9473 = vst.msk [vmem:[%s13402_s14 + $0x18c] sm:$0xf] %vm9373_vm1, %v10750_v10  ;;  %9697 = vst.msk [vmem:[%s13402_s14 + $0x50c] sm:$0xf] %vm9373_vm1, %v10974_v13  ;;  %v6787_v26 = vadd.f32 %v15011_v32, %v6332_v59  ;;  %v7011_v49 = vadd.f32 %v15011_v32, %v6556_v7  ;;  %v6105_v52 = vld [vmem:[#allocation2 + $0xa50] sm:$0xff]  ;;  %v15221_v30 = vpop.f32.mrb[139].mxu1 }
 0x25b   : > { %v6333_v58 = vmul.f32 %v14986_v12, %v5878_v23  ;;  %v6557_v14 = vmul.f32 %v14986_v12, %v6102_v36  ;;  %9471 = vst.msk [vmem:[%s13402_s14 + $0x184] sm:$0xf] %vm9373_vm1, %v10748_v63  ;;  %9695 = vst.msk [vmem:[%s13402_s14 + $0x504] sm:$0xf] %vm9373_vm1, %v10972_v34  ;;  %v6785_v61 = vadd.f32 %v15011_v32, %v6330_v39  ;;  %v5879_v33 = vld [vmem:[#allocation2 + $0x340] sm:$0xff]  ;;  %v5882_v10 = vld [vmem:[#allocation2 + $0x358] sm:$0xff] }
 0x25c   : > { %v7009_v15 = vadd.f32 %v15011_v32, %v6554_v35  ;;  %v6331_v27 = vmul.f32 %v14986_v12, %v5876_v50  ;;  %v6555_v42 = vmul.f32 %v14986_v12, %v6100_v44  ;;  %v7235_v28 = vmax.f32 %v6787_v26, 0.0  ;;  %v6103_v2 = vld [vmem:[#allocation2 + $0xa40] sm:$0xff]  ;;  %v6106_v13 = vld [vmem:[#allocation2 + $0xa58] sm:$0xff]  ;;  %v5880_v63 = vld [vmem:[#allocation2 + $0x348] sm:$0xff] }
 0x25d   : > { %v7459_v40 = vmax.f32 %v7011_v49, 0.0  ;;  %v6788_v41 = vadd.f32 %v15011_v32, %v6333_v58  ;;  %v7012_v29 = vadd.f32 %v15011_v32, %v6557_v14  ;;  %v7233_v11 = vmax.f32 %v6785_v61, 0.0  ;;  %v6104_v34 = vld [vmem:[#allocation2 + $0xa48] sm:$0xff]  ;;  %v15235_v58 = vpop.f32.mrb[140].mxu0 }
 0x25e   : > { %v7457_v17 = vmax.f32 %v7009_v15, 0.0  ;;  %v6786_v53 = vadd.f32 %v15011_v32, %v6331_v27  ;;  %v7010_v55 = vadd.f32 %v15011_v32, %v6555_v42  ;;  %v10753_v54 = vpack.c.bf16 %v7235_v28, %v7235_v28  ;;  %v15245_v42 = vpop.f32.mrb[140].mxu1  ;;  %v15247_v28 = vpop.f32.mrb[141].mxu0 }
 0x25f   : > { %v10977_v45 = vpack.c.bf16 %v7459_v40, %v7459_v40  ;;  %v7236_v19 = vmax.f32 %v6788_v41, 0.0  ;;  %v7460_v18 = vmax.f32 %v7012_v29, 0.0  ;;  %v10751_v1 = vpack.c.bf16 %v7233_v11, %v7233_v11 }
 0x260   : > { %v10975_v43 = vpack.c.bf16 %v7457_v17, %v7457_v17  ;;  %v7234_v23 = vmax.f32 %v6786_v53, 0.0  ;;  %v7458_v36 = vmax.f32 %v7010_v55, 0.0  ;;  %9476 = vst.msk [vmem:[%s13402_s14 + $0x198] sm:$0xf] %vm9373_vm1, %v10753_v54  ;;  %v6336_v50 = vmul.f32 %v14986_v12, %v5881_v24  ;;  %v15257_v17 = vpop.f32.mrb[141].mxu1  ;;  %v15259_v53 = vpop.f32.mrb[142].mxu0 }
 0x261   : > { %9700 = vst.msk [vmem:[%s13402_s14 + $0x518] sm:$0xf] %vm9373_vm1, %v10977_v45  ;;  %v10754_v59 = vpack.c.bf16 %v7236_v19, %v7236_v19  ;;  %v10978_v7 = vpack.c.bf16 %v7460_v18, %v7460_v18  ;;  %v6560_v44 = vmul.f32 %v14986_v12, %v6105_v52  ;;  %9474 = vst.msk [vmem:[%s13402_s14 + $0x190] sm:$0xf] %vm9373_vm1, %v10751_v1  ;;  %v15263_v45 = vpop.f32.mrb[142].mxu1  ;;  %v15265_v19 = vpop.f32.mrb[143].mxu0 }
 0x262   : > { %9698 = vst.msk [vmem:[%s13402_s14 + $0x510] sm:$0xf] %vm9373_vm1, %v10975_v43  ;;  %v10752_v39 = vpack.c.bf16 %v7234_v23, %v7234_v23  ;;  %v10976_v35 = vpack.c.bf16 %v7458_v36, %v7458_v36  ;;  %v6334_v26 = vmul.f32 %v14986_v12, %v5879_v33  ;;  %v6558_v49 = vmul.f32 %v14986_v12, %v6103_v2  ;;  %v5885_v43 = vld [vmem:[#allocation2 + $0x370] sm:$0xff]  ;;  %v15269_v36 = vpop.f32.mrb[143].mxu1 }
 0x263   : > { %9477 = vst.msk [vmem:[%s13402_s14 + $0x19c] sm:$0xf] %vm9373_vm1, %v10754_v59  ;;  %9701 = vst.msk [vmem:[%s13402_s14 + $0x51c] sm:$0xf] %vm9373_vm1, %v10978_v7  ;;  %v6791_v14 = vadd.f32 %v15011_v32, %v6336_v50  ;;  %v7015_v61 = vadd.f32 %v15011_v32, %v6560_v44  ;;  %v6337_v15 = vmul.f32 %v14986_v12, %v5882_v10  ;;  %v6109_v23 = vld [vmem:[#allocation2 + $0xa70] sm:$0xff]  ;;  %v5883_v50 = vld [vmem:[#allocation2 + $0x360] sm:$0xff] }
 0x264   : > { %v6561_v27 = vmul.f32 %v14986_v12, %v6106_v13  ;;  %9475 = vst.msk [vmem:[%s13402_s14 + $0x194] sm:$0xf] %vm9373_vm1, %v10752_v39  ;;  %9699 = vst.msk [vmem:[%s13402_s14 + $0x514] sm:$0xf] %vm9373_vm1, %v10976_v35  ;;  %v6789_v40 = vadd.f32 %v15011_v32, %v6334_v26  ;;  %v7013_v41 = vadd.f32 %v15011_v32, %v6558_v49  ;;  %v6107_v44 = vld [vmem:[#allocation2 + $0xa60] sm:$0xff]  ;;  %v5886_v26 = vld [vmem:[#allocation2 + $0x378] sm:$0xff] }
 0x265   : > { %v6335_v29 = vmul.f32 %v14986_v12, %v5880_v63  ;;  %v6559_v11 = vmul.f32 %v14986_v12, %v6104_v34  ;;  %17207 = vst [vmem:[#allocation24_spill] sm:$0xff] %v15257_v17  ;;  %17208 = vst [vmem:[#allocation25_spill] sm:$0xff] %v15259_v53  ;;  %v7239_v55 = vmax.f32 %v6791_v14, 0.0  ;;  %v7463_v24 = vmax.f32 %v7015_v61, 0.0  ;;  %v6110_v49 = vld [vmem:[#allocation2 + $0xa78] sm:$0xff]  ;;  %v1094_v53 = vld [vmem:[#allocation2 + $0xae0] sm:$0xff] }
 0x266   : > { %v6792_v52 = vadd.f32 %v15011_v32, %v6337_v15  ;;  %v7016_v54 = vadd.f32 %v15011_v32, %v6561_v27  ;;  %17209 = vst [vmem:[#allocation26_spill] sm:$0xff] %v15263_v45  ;;  %17210 = vst [vmem:[#allocation27_spill] sm:$0xff] %v15265_v19  ;;  %v7237_v18 = vmax.f32 %v6789_v40, 0.0  ;;  %v7461_v33 = vmax.f32 %v7013_v41, 0.0  ;;  %v5884_v40 = vld [vmem:[#allocation2 + $0x368] sm:$0xff]  ;;  %v1096_v19 = vld [vmem:[#allocation2 + $0xaf0] sm:$0xff] }
 0x267   : > { %v6790_v2 = vadd.f32 %v15011_v32, %v6335_v29  ;;  %v7014_v1 = vadd.f32 %v15011_v32, %v6559_v11  ;;  %17211 = vst [vmem:[#allocation28_spill] sm:$0xff] %v15269_v36  ;;  %v10757_v10 = vpack.c.bf16 %v7239_v55, %v7239_v55  ;;  %v10981_v13 = vpack.c.bf16 %v7463_v24, %v7463_v24  ;;  %v6108_v41 = vld [vmem:[#allocation2 + $0xa68] sm:$0xff] }
 0x268   : > { %v7240_v59 = vmax.f32 %v6792_v52, 0.0  ;;  %v7464_v7 = vmax.f32 %v7016_v54, 0.0  ;;  %v10755_v63 = vpack.c.bf16 %v7237_v18, %v7237_v18  ;;  %v10979_v34 = vpack.c.bf16 %v7461_v33, %v7461_v33  ;;  %v15283_v52 = vpop.f32.mrb[144].mxu0  ;;  %v1091_v36 = vld [vmem:[#allocation2 + $0xac8] sm:$0xff] }
 0x269   : > { %v7238_v39 = vmax.f32 %v6790_v2, 0.0  ;;  %v7462_v35 = vmax.f32 %v7014_v1, 0.0  ;;  %9480 = vst.msk [vmem:[%s13402_s14 + $0x1a8] sm:$0xf] %vm9373_vm1, %v10757_v10  ;;  %9704 = vst.msk [vmem:[%s13402_s14 + $0x528] sm:$0xf] %vm9373_vm1, %v10981_v13  ;;  %v6340_v15 = vmul.f32 %v14986_v12, %v5885_v43  ;;  %v6564_v27 = vmul.f32 %v14986_v12, %v6109_v23 }
 0x26a   : > { %v10758_v14 = vpack.c.bf16 %v7240_v59, %v7240_v59  ;;  %v10982_v61 = vpack.c.bf16 %v7464_v7, %v7464_v7  ;;  %9478 = vst.msk [vmem:[%s13402_s14 + $0x1a0] sm:$0xf] %vm9373_vm1, %v10755_v63  ;;  %9702 = vst.msk [vmem:[%s13402_s14 + $0x520] sm:$0xf] %vm9373_vm1, %v10979_v34  ;;  %v6338_v55 = vmul.f32 %v14986_v12, %v5883_v50  ;;  %v15293_v1 = vpop.f32.mrb[144].mxu1  ;;  %v15295_v43 = vpop.f32.mrb[145].mxu0 }
 0x26b   : > { %v10756_v29 = vpack.c.bf16 %v7238_v39, %v7238_v39  ;;  %v10980_v11 = vpack.c.bf16 %v7462_v35, %v7462_v35  ;;  %v6562_v24 = vmul.f32 %v14986_v12, %v6107_v44  ;;  %17212 = vst [vmem:[#allocation29_spill] sm:$0xff] %v15283_v52  ;;  %v6795_v54 = vadd.f32 %v15011_v32, %v6340_v15  ;;  %v15305_v7 = vpop.f32.mrb[145].mxu1  ;;  %v15307_v50 = vpop.f32.mrb[146].mxu0  ;;  %v867_v52 = vld [vmem:[#allocation2 + $0x3c8] sm:$0xff] }
 0x26c   : > { %9481 = vst.msk [vmem:[%s13402_s14 + $0x1ac] sm:$0xf] %vm9373_vm1, %v10758_v14  ;;  %9705 = vst.msk [vmem:[%s13402_s14 + $0x52c] sm:$0xf] %vm9373_vm1, %v10982_v61  ;;  %v7019_v18 = vadd.f32 %v15011_v32, %v6564_v27  ;;  %v6341_v33 = vmul.f32 %v14986_v12, %v5886_v26  ;;  %v6565_v2 = vmul.f32 %v14986_v12, %v6110_v49  ;;  %v15311_v35 = vpop.f32.mrb[146].mxu1  ;;  %v15313_v26 = vpop.f32.mrb[147].mxu0 }
 0x26d   : > { %17213 = vst [vmem:[#allocation30_spill] sm:$0xff] %v15293_v1  ;;  %17214 = vst [vmem:[#allocation31_spill] sm:$0xff] %v15295_v43  ;;  %v6793_v23 = vadd.f32 %v15011_v32, %v6338_v55  ;;  %v7017_v10 = vadd.f32 %v15011_v32, %v6562_v24  ;;  %v6339_v13 = vmul.f32 %v14986_v12, %v5884_v40  ;;  %v7243_v44 = vmax.f32 %v6795_v54, 0.0  ;;  %v5889_v27 = vld [vmem:[#allocation2 + $0x390] sm:$0xff]  ;;  %v5887_v54 = vld [vmem:[#allocation2 + $0x380] sm:$0xff] }
 0x26e   : > { %9479 = vst.msk [vmem:[%s13402_s14 + $0x1a4] sm:$0xf] %vm9373_vm1, %v10756_v29  ;;  %9703 = vst.msk [vmem:[%s13402_s14 + $0x524] sm:$0xf] %vm9373_vm1, %v10980_v11  ;;  %v6563_v59 = vmul.f32 %v14986_v12, %v6108_v41  ;;  %v7467_v63 = vmax.f32 %v7019_v18, 0.0  ;;  %v6796_v34 = vadd.f32 %v15011_v32, %v6341_v33  ;;  %v7020_v39 = vadd.f32 %v15011_v32, %v6565_v2  ;;  %v6113_v40 = vld [vmem:[#allocation2 + $0xa90] sm:$0xff] }
 0x26f   : > { %17215 = vst [vmem:[#allocation32_spill] sm:$0xff] %v15305_v7  ;;  %17216 = vst [vmem:[#allocation33_spill] sm:$0xff] %v15307_v50  ;;  %v7241_v49 = vmax.f32 %v6793_v23, 0.0  ;;  %v7465_v14 = vmax.f32 %v7017_v10, 0.0  ;;  %v6794_v61 = vadd.f32 %v15011_v32, %v6339_v13  ;;  %v15317_v41 = vpop.f32.mrb[147].mxu1  ;;  %v10761_v29 = vpack.c.bf16 %v7243_v44, %v7243_v44  ;;  %v6111_v18 = vld [vmem:[#allocation2 + $0xa80] sm:$0xff] }
 0x270   : > { %17217 = vst [vmem:[#allocation34_spill] sm:$0xff] %v15311_v35  ;;  %17218 = vst [vmem:[#allocation35_spill] sm:$0xff] %v15313_v26  ;;  %v7018_v15 = vadd.f32 %v15011_v32, %v6563_v59  ;;  %v10985_v11 = vpack.c.bf16 %v7467_v63, %v7467_v63  ;;  %v7244_v55 = vmax.f32 %v6796_v34, 0.0  ;;  %v7468_v24 = vmax.f32 %v7020_v39, 0.0  ;;  %v5890_v13 = vld [vmem:[#allocation2 + $0x398] sm:$0xff]  ;;  %v6112_v26 = vld [vmem:[#allocation2 + $0xa88] sm:$0xff] }
 0x271   : > { %17219 = vst [vmem:[#allocation36_spill] sm:$0xff] %v15317_v41  ;;  %v10759_v33 = vpack.c.bf16 %v7241_v49, %v7241_v49  ;;  %v10983_v2 = vpack.c.bf16 %v7465_v14, %v7465_v14  ;;  %v7242_v23 = vmax.f32 %v6794_v61, 0.0  ;;  %v6114_v59 = vld [vmem:[#allocation2 + $0xa98] sm:$0xff]  ;;  %9484 = vst.msk [vmem:[%s13402_s14 + $0x1b8] sm:$0xf] %vm9373_vm1, %v10761_v29  ;;  %v6344_v34 = vmul.f32 %v14986_v12, %v5889_v27  ;;  %v5888_v41 = vld [vmem:[#allocation2 + $0x388] sm:$0xff] }
 0x272   : > { %v7466_v10 = vmax.f32 %v7018_v15, 0.0  ;;  %9708 = vst.msk [vmem:[%s13402_s14 + $0x538] sm:$0xf] %vm9373_vm1, %v10985_v11  ;;  %v10762_v44 = vpack.c.bf16 %v7244_v55, %v7244_v55  ;;  %v10986_v63 = vpack.c.bf16 %v7468_v24, %v7468_v24  ;;  %v6568_v39 = vmul.f32 %v14986_v12, %v6113_v40  ;;  %v15331_v29 = vpop.f32.mrb[148].mxu0  ;;  %v15341_v24 = vpop.f32.mrb[148].mxu1  ;;  %v868_v50 = vld [vmem:[#allocation2 + $0x3d0] sm:$0xff] }
 0x273   : > { %9482 = vst.msk [vmem:[%s13402_s14 + $0x1b0] sm:$0xf] %vm9373_vm1, %v10759_v33  ;;  %9706 = vst.msk [vmem:[%s13402_s14 + $0x530] sm:$0xf] %vm9373_vm1, %v10983_v2  ;;  %v10760_v49 = vpack.c.bf16 %v7242_v23, %v7242_v23  ;;  %v6342_v61 = vmul.f32 %v14986_v12, %v5887_v54  ;;  %v6566_v15 = vmul.f32 %v14986_v12, %v6111_v18  ;;  %v15343_v33 = vpop.f32.mrb[149].mxu0  ;;  %v869_v43 = vld [vmem:[#allocation2 + $0x3d8] sm:$0xff] }
 0x274   : > { %v10984_v14 = vpack.c.bf16 %v7466_v10, %v7466_v10  ;;  %17220 = vst [vmem:[#allocation37_spill] sm:$0xff] %v15331_v29  ;;  %9485 = vst.msk [vmem:[%s13402_s14 + $0x1bc] sm:$0xf] %vm9373_vm1, %v10762_v44  ;;  %v6799_v27 = vadd.f32 %v15011_v32, %v6344_v34  ;;  %v7023_v40 = vadd.f32 %v15011_v32, %v6568_v39  ;;  %v864_v10 = vld [vmem:[#allocation2 + $0x3b0] sm:$0xff]  ;;  %v15353_v44 = vpop.f32.mrb[149].mxu1  ;;  %v1093_v1 = vld [vmem:[#allocation2 + $0xad8] sm:$0xff] }
 0x275   : > { %9709 = vst.msk [vmem:[%s13402_s14 + $0x53c] sm:$0xf] %vm9373_vm1, %v10986_v63  ;;  %v6345_v11 = vmul.f32 %v14986_v12, %v5890_v13  ;;  %v6569_v55 = vmul.f32 %v14986_v12, %v6114_v59  ;;  %17221 = vst [vmem:[#allocation44_spill] sm:$0xff] %v15341_v24  ;;  %v6797_v54 = vadd.f32 %v15011_v32, %v6342_v61  ;;  %v1088_v13 = vld [vmem:[#allocation2 + $0xab0] sm:$0xff]  ;;  %v15355_v59 = vpop.f32.mrb[150].mxu0  ;;  %v1086_v61 = vld [vmem:[#allocation2 + $0xaa0] sm:$0xff] }
 0x276   : > { %17222 = vst [vmem:[#allocation45_spill] sm:$0xff] %v15343_v33  ;;  %9483 = vst.msk [vmem:[%s13402_s14 + $0x1b4] sm:$0xf] %vm9373_vm1, %v10760_v49  ;;  %v7021_v18 = vadd.f32 %v15011_v32, %v6566_v15  ;;  %v6343_v2 = vmul.f32 %v14986_v12, %v5888_v41  ;;  %v6567_v23 = vmul.f32 %v14986_v12, %v6112_v26  ;;  %v7247_v63 = vmax.f32 %v6799_v27, 0.0  ;;  %v15359_v33 = vpop.f32.mrb[150].mxu1  ;;  %v15361_v15 = vpop.f32.mrb[151].mxu0 }
 0x277   : > { %9707 = vst.msk [vmem:[%s13402_s14 + $0x534] sm:$0xf] %vm9373_vm1, %v10984_v14  ;;  %17223 = vst [vmem:[#allocation46_spill] sm:$0xff] %v15353_v44  ;;  %v7471_v34 = vmax.f32 %v7023_v40, 0.0  ;;  %v6800_v39 = vadd.f32 %v15011_v32, %v6345_v11  ;;  %v7024_v49 = vadd.f32 %v15011_v32, %v6569_v55  ;;  %v862_v14 = vld [vmem:[#allocation2 + $0x3a0] sm:$0xff]  ;;  %v7245_v41 = vmax.f32 %v6797_v54, 0.0 }
 0x278   : > { %17224 = vst [vmem:[#allocation47_spill] sm:$0xff] %v15355_v59  ;;  %17225 = vst [vmem:[#allocation48_spill] sm:$0xff] %v15359_v33  ;;  %v7469_v12 = vmax.f32 %v7021_v18, 0.0  ;;  %v6798_v26 = vadd.f32 %v15011_v32, %v6343_v2  ;;  %v7022_v44 = vadd.f32 %v15011_v32, %v6567_v23  ;;  %v865_v24 = vld [vmem:[#allocation2 + $0x3b8] sm:$0xff]  ;;  %v863_v27 = vld [vmem:[#allocation2 + $0x3a8] sm:$0xff]  ;;  %v15365_v29 = vpop.f32.mrb[151].mxu1  ;;  %v10765_v11 = vpack.c.bf16 %v7247_v63, %v7247_v63 }
 0x279   : > { %17226 = vst [vmem:[#allocation49_spill] sm:$0xff] %v15361_v15  ;;  %v1089_v59 = vld [vmem:[#allocation2 + $0xab8] sm:$0xff]  ;;  %v1087_v40 = vld [vmem:[#allocation2 + $0xaa8] sm:$0xff]  ;;  %17227 = vst [vmem:[#allocation50_spill] sm:$0xff] %v15365_v29  ;;  %v10989_v55 = vpack.c.bf16 %v7471_v34, %v7471_v34  ;;  %v7248_v35 = vmax.f32 %v6800_v39, 0.0  ;;  %v7472_v33 = vmax.f32 %v7024_v49, 0.0  ;;  %v10763_v7 = vpack.c.bf16 %v7245_v41, %v7245_v41 }
 0x27a   : > { %v1092_v15 = vld [vmem:[#allocation2 + $0xad0] sm:$0xff]  ;;  %v866_v54 = vld [vmem:[#allocation2 + $0x3c0] sm:$0xff]  ;;  %v10987_v2 = vpack.c.bf16 %v7469_v12, %v7469_v12  ;;  %v7246_v32 = vmax.f32 %v6798_v26, 0.0  ;;  %v7470_v23 = vmax.f32 %v7022_v44, 0.0  ;;  %9488 = vst.msk [vmem:[%s13402_s14 + $0x1c8] sm:$0xf] %vm9373_vm1, %v10765_v11 }
 0x27b   : > { %v1090_v18 = vld [vmem:[#allocation2 + $0xac0] sm:$0xff]  ;;  %9712 = vst.msk [vmem:[%s13402_s14 + $0x548] sm:$0xf] %vm9373_vm1, %v10989_v55  ;;  %v10766_v63 = vpack.c.bf16 %v7248_v35, %v7248_v35  ;;  %v10990_v34 = vpack.c.bf16 %v7472_v33, %v7472_v33  ;;  %v17228_v39 = vld [vmem:[#allocation19_spill] sm:$0xff]  ;;  %v17229_v29 = vld [vmem:[#allocation20_spill] sm:$0xff] }
 0x27c   : > { %v4993_v49 = vadd.f32 %v17228_v39, %v864_v10  ;;  %v5217_v41 = vadd.f32 %v17229_v29, %v1088_v13  ;;  %v872_v12 = vld [vmem:[#allocation2 + $0x3f0] sm:$0xff]  ;;  %9486 = vst.msk [vmem:[%s13402_s14 + $0x1c0] sm:$0xf] %vm9373_vm1, %v10763_v7  ;;  %9710 = vst.msk [vmem:[%s13402_s14 + $0x540] sm:$0xf] %vm9373_vm1, %v10987_v2  ;;  %v10764_v44 = vpack.c.bf16 %v7246_v32, %v7246_v32  ;;  %v17230_v11 = vld [vmem:[#allocation21_spill] sm:$0xff] }
 0x27d   : > { %v10988_v26 = vpack.c.bf16 %v7470_v23, %v7470_v23  ;;  %v4991_v45 = vadd.f32 %v17230_v11, %v862_v14  ;;  %v17231_v55 = vld [vmem:[#allocation22_spill] sm:$0xff]  ;;  %v873_v10 = vld [vmem:[#allocation2 + $0x3f8] sm:$0xff]  ;;  %v15379_v39 = vpop.f32.mrb[152].mxu0  ;;  %9489 = vst.msk [vmem:[%s13402_s14 + $0x1cc] sm:$0xf] %vm9373_vm1, %v10766_v63  ;;  %v17236_v32 = vld [vmem:[#allocation11_spill] sm:$0xff] }
 0x27e   : > { %v5215_v35 = vadd.f32 %v17231_v55, %v1086_v61  ;;  %v870_v33 = vld [vmem:[#allocation2 + $0x3e0] sm:$0xff]  ;;  %17232 = vst [vmem:[#allocation19_spill] sm:$0xff] %v15379_v39  ;;  %9713 = vst.msk [vmem:[%s13402_s14 + $0x54c] sm:$0xf] %vm9373_vm1, %v10990_v34  ;;  %v17235_v61 = vld [vmem:[#allocation7_spill] sm:$0xff]  ;;  %v5216_v23 = vadd.f32 %v17236_v32, %v1087_v40  ;;  %v15391_v39 = vpop.f32.mrb[152].mxu1 }
 0x27f   : > { %5442 = vst.msk [vmem:[#allocation2 + $0x3b0] sm:$0xff] %vm297_vm0, %v4993_v49  ;;  %5666 = vst.msk [vmem:[#allocation2 + $0xab0] sm:$0xff] %vm297_vm0, %v5217_v41  ;;  %v17233_v7 = vld [vmem:[#allocation10_spill] sm:$0xff]  ;;  %v4992_v2 = vadd.f32 %v17235_v61, %v863_v27  ;;  %v1097_v11 = vld [vmem:[#allocation2 + $0xaf8] sm:$0xff]  ;;  %v15393_v63 = vpop.f32.mrb[153].mxu0 }
 0x280   : > { %v4994_v29 = vadd.f32 %v17233_v7, %v865_v24  ;;  %v17234_v13 = vld [vmem:[#allocation6_spill] sm:$0xff]  ;;  %v871_v55 = vld [vmem:[#allocation2 + $0x3e8] sm:$0xff]  ;;  %17237 = vst [vmem:[#allocation20_spill] sm:$0xff] %v15393_v63  ;;  %9487 = vst.msk [vmem:[%s13402_s14 + $0x1c4] sm:$0xf] %vm9373_vm1, %v10764_v44  ;;  %v15405_v63 = vpop.f32.mrb[153].mxu1 }
 0x281   : > { %v5218_v14 = vadd.f32 %v17234_v13, %v1089_v59  ;;  %v1095_v17 = vld [vmem:[#allocation2 + $0xae8] sm:$0xff]  ;;  %9711 = vst.msk [vmem:[%s13402_s14 + $0x544] sm:$0xf] %vm9373_vm1, %v10988_v26  ;;  %v17238_v24 = vld [vmem:[#allocation12_spill] sm:$0xff]  ;;  %v17239_v27 = vld [vmem:[#allocation13_spill] sm:$0xff]  ;;  %v15407_v44 = vpop.f32.mrb[154].mxu0 }
 0x282   : > { %5440 = vst.msk [vmem:[#allocation2 + $0x3a0] sm:$0xff] %vm297_vm0, %v4991_v45  ;;  %5664 = vst.msk [vmem:[#allocation2 + $0xaa0] sm:$0xff] %vm297_vm0, %v5215_v35  ;;  %v4997_v59 = vadd.f32 %v17238_v24, %v868_v50  ;;  %v5221_v34 = vadd.f32 %v17239_v27, %v1092_v15  ;;  %v17240_v40 = vld [vmem:[#allocation14_spill] sm:$0xff]  ;;  %v17241_v41 = vld [vmem:[#allocation8_spill] sm:$0xff] }
 0x283   : > { %v4995_v49 = vadd.f32 %v17240_v40, %v866_v54  ;;  %v5219_v7 = vadd.f32 %v17241_v41, %v1090_v18  ;;  %v876_v13 = vld [vmem:[#allocation2 + $0x410] sm:$0xff]  ;;  %v874_v32 = vld [vmem:[#allocation2 + $0x400] sm:$0xff]  ;;  %17242 = vst [vmem:[#allocation21_spill] sm:$0xff] %v15407_v44  ;;  %5443 = vst.msk [vmem:[#allocation2 + $0x3b8] sm:$0xff] %vm297_vm0, %v4994_v29  ;;  %v15417_v44 = vpop.f32.mrb[154].mxu1  ;;  %v15419_v29 = vpop.f32.mrb[155].mxu0 }
 0x284   : > { %v1100_v61 = vld [vmem:[#allocation2 + $0xb10] sm:$0xff]  ;;  %5667 = vst.msk [vmem:[#allocation2 + $0xab8] sm:$0xff] %vm297_vm0, %v5218_v14  ;;  %5441 = vst.msk [vmem:[#allocation2 + $0x3a8] sm:$0xff] %vm297_vm0, %v4992_v2  ;;  %v17243_v45 = vld [vmem:[#allocation17_spill] sm:$0xff] }
 0x285   : > { %5665 = vst.msk [vmem:[#allocation2 + $0xaa8] sm:$0xff] %vm297_vm0, %v5216_v23  ;;  %v4998_v50 = vadd.f32 %v17243_v45, %v869_v43  ;;  %v17244_v15 = vld [vmem:[#allocation15_spill] sm:$0xff]  ;;  %v17245_v18 = vld [vmem:[#allocation16_spill] sm:$0xff]  ;;  %v17246_v35 = vld [vmem:[#allocation18_spill] sm:$0xff] }
 0x286   : > { %v5222_v54 = vadd.f32 %v17244_v15, %v1093_v1  ;;  %v4996_v26 = vadd.f32 %v17245_v18, %v867_v52  ;;  %v5220_v24 = vadd.f32 %v17246_v35, %v1091_v36  ;;  %v1098_v27 = vld [vmem:[#allocation2 + $0xb00] sm:$0xff]  ;;  %v877_v40 = vld [vmem:[#allocation2 + $0x418] sm:$0xff]  ;;  %17247 = vst [vmem:[#allocation22_spill] sm:$0xff] %v15419_v29  ;;  %5446 = vst.msk [vmem:[#allocation2 + $0x3d0] sm:$0xff] %vm297_vm0, %v4997_v59  ;;  %v15429_v29 = vpop.f32.mrb[155].mxu1 }
 0x287   : > { %v1101_v41 = vld [vmem:[#allocation2 + $0xb18] sm:$0xff]  ;;  %5670 = vst.msk [vmem:[#allocation2 + $0xad0] sm:$0xff] %vm297_vm0, %v5221_v34  ;;  %5444 = vst.msk [vmem:[#allocation2 + $0x3c0] sm:$0xff] %vm297_vm0, %v4995_v49  ;;  %v17249_v52 = vld [vmem:[#allocation23_spill] sm:$0xff] }
 0x288   : > { %5668 = vst.msk [vmem:[#allocation2 + $0xac0] sm:$0xff] %vm297_vm0, %v5219_v7  ;;  %v17248_v1 = vld [vmem:[#allocation9_spill] sm:$0xff]  ;;  %v5225_v14 = vadd.f32 %v17249_v52, %v1096_v19  ;;  %v17250_v36 = vld [vmem:[#allocation38_spill] sm:$0xff]  ;;  %v17251_v23 = vld [vmem:[#allocation39_spill] sm:$0xff] }
 0x289   : > { %v5001_v43 = vadd.f32 %v17248_v1, %v872_v12  ;;  %v4999_v2 = vadd.f32 %v17250_v36, %v870_v33  ;;  %v5223_v45 = vadd.f32 %v17251_v23, %v1094_v53  ;;  %v875_v15 = vld [vmem:[#allocation2 + $0x408] sm:$0xff]  ;;  %v880_v35 = vld [vmem:[#allocation2 + $0x430] sm:$0xff]  ;;  %5447 = vst.msk [vmem:[#allocation2 + $0x3d8] sm:$0xff] %vm297_vm0, %v4998_v50  ;;  %5671 = vst.msk [vmem:[#allocation2 + $0xad8] sm:$0xff] %vm297_vm0, %v5222_v54 }
 0x28a   : > { %v1099_v18 = vld [vmem:[#allocation2 + $0xb08] sm:$0xff]  ;;  %5445 = vst.msk [vmem:[#allocation2 + $0x3c8] sm:$0xff] %vm297_vm0, %v4996_v26  ;;  %5669 = vst.msk [vmem:[#allocation2 + $0xac8] sm:$0xff] %vm297_vm0, %v5220_v24  ;;  %v17252_v12 = vld [vmem:[#allocation40_spill] sm:$0xff]  ;;  %v5005_v50 = vadd.f32 %v15063_v47, %v876_v13  ;;  %v5006_v26 = vadd.f32 %v15087_v20, %v877_v40  ;;  %v5230_v47 = vadd.f32 %v15097_v0, %v1101_v41  ;;  %v15463_v24 = vpop.f32.mrb[156].mxu0 }
 0x28b   : > { %v5002_v59 = vadd.f32 %v17252_v12, %v873_v10  ;;  %v17253_v19 = vld [vmem:[#allocation41_spill] sm:$0xff]  ;;  %v17254_v33 = vld [vmem:[#allocation42_spill] sm:$0xff]  ;;  %v17255_v53 = vld [vmem:[#allocation43_spill] sm:$0xff]  ;;  %5450 = vst.msk [vmem:[#allocation2 + $0x3f0] sm:$0xff] %vm297_vm0, %v5001_v43  ;;  %v5229_v10 = vadd.f32 %v15073_v25, %v1100_v61  ;;  %v5004_v25 = vadd.f32 %v15099_v48, %v875_v15  ;;  %v5009_v20 = vadd.f32 %v15143_v3, %v880_v35 }
 0x28c   : > { %v5226_v34 = vadd.f32 %v17253_v19, %v1097_v11  ;;  %v5000_v49 = vadd.f32 %v17254_v33, %v871_v55  ;;  %v5224_v7 = vadd.f32 %v17255_v53, %v1095_v17  ;;  %v1104_v1 = vld [vmem:[#allocation2 + $0xb30] sm:$0xff]  ;;  %v878_v52 = vld [vmem:[#allocation2 + $0x420] sm:$0xff]  ;;  %5674 = vst.msk [vmem:[#allocation2 + $0xaf0] sm:$0xff] %vm297_vm0, %v5225_v14  ;;  %5448 = vst.msk [vmem:[#allocation2 + $0x3e0] sm:$0xff] %vm297_vm0, %v4999_v2 }
 0x28d   : > { %v1102_v36 = vld [vmem:[#allocation2 + $0xb20] sm:$0xff]  ;;  %5672 = vst.msk [vmem:[#allocation2 + $0xae0] sm:$0xff] %vm297_vm0, %v5223_v45  ;;  %v5003_v11 = vadd.f32 %v15075_v38, %v874_v32  ;;  %v5227_v55 = vadd.f32 %v15085_v31, %v1098_v27  ;;  %v881_v17 = vld [vmem:[#allocation2 + $0x438] sm:$0xff]  ;;  %5451 = vst.msk [vmem:[#allocation2 + $0x3f8] sm:$0xff] %vm297_vm0, %v5002_v59  ;;  %v5228_v38 = vadd.f32 %v15109_v9, %v1099_v18 }
 0x28e   : > { %v1105_v54 = vld [vmem:[#allocation2 + $0xb38] sm:$0xff]  ;;  %5675 = vst.msk [vmem:[#allocation2 + $0xaf8] sm:$0xff] %vm297_vm0, %v5226_v34  ;;  %5449 = vst.msk [vmem:[#allocation2 + $0x3e8] sm:$0xff] %vm297_vm0, %v5000_v49  ;;  %v879_v13 = vld [vmem:[#allocation2 + $0x428] sm:$0xff]  ;;  %v5233_v0 = vadd.f32 %v15151_v62, %v1104_v1  ;;  %v5007_v48 = vadd.f32 %v15153_v37, %v878_v52  ;;  %v5231_v9 = vadd.f32 %v15161_v5, %v1102_v36  ;;  %v15478_v37 = vpop.f32.mrb[156].mxu1  ;;  %v15480_v5 = vpop.f32.mrb[157].mxu0 }
 0x28f   : > { %5673 = vst.msk [vmem:[#allocation2 + $0xae8] sm:$0xff] %vm297_vm0, %v5224_v7  ;;  %v1103_v31 = vld [vmem:[#allocation2 + $0xb28] sm:$0xff]  ;;  %v5893_v61 = vld [vmem:[#allocation2 + $0x3b0] sm:$0xff]  ;;  %5454 = vst.msk [vmem:[#allocation2 + $0x410] sm:$0xff] %vm297_vm0, %v5005_v50  ;;  %v5010_v3 = vadd.f32 %v15163_v60, %v881_v17  ;;  %v5234_v62 = vadd.f32 %v15167_v16, %v1105_v54  ;;  %v5008_v60 = vadd.f32 %v15171_v6, %v879_v13  ;;  %v15490_v35 = vpop.f32.mrb[157].mxu1  ;;  %v15492_v12 = vpop.f32.mrb[158].mxu0 }
 0x290   : > { %v6117_v32 = vld [vmem:[#allocation2 + $0xab0] sm:$0xff]  ;;  %5678 = vst.msk [vmem:[#allocation2 + $0xb10] sm:$0xff] %vm297_vm0, %v5229_v10  ;;  %5452 = vst.msk [vmem:[#allocation2 + $0x400] sm:$0xff] %vm297_vm0, %v5003_v11  ;;  %v15468_v27 = vld [vmem:[%s17066_s2] ss:$0 sm:$0xff]  ;;  %v5232_v16 = vadd.f32 %v15173_v21, %v1103_v31  ;;  %v15505_v21 = vpop.f32.mrb[158].mxu1 }
 0x291   : > { %5676 = vst.msk [vmem:[#allocation2 + $0xb00] sm:$0xff] %vm297_vm0, %v5227_v55  ;;  %v6348_v40 = vmul.f32 %v15468_v27, %v5893_v61  ;;  %v6572_v41 = vmul.f32 %v15468_v27, %v6117_v32  ;;  %v5891_v43 = vld [vmem:[#allocation2 + $0x3a0] sm:$0xff]  ;;  %5455 = vst.msk [vmem:[#allocation2 + $0x418] sm:$0xff] %vm297_vm0, %v5006_v26  ;;  %v5894_v45 = vld [vmem:[#allocation2 + $0x3b8] sm:$0xff]  ;;  %v15507_v53 = vpop.f32.mrb[159].mxu0  ;;  %v15515_v50 = vpop.f32.mrb[159].mxu1 }
 0x292   : > { %v6115_v14 = vld [vmem:[#allocation2 + $0xaa0] sm:$0xff]  ;;  %5679 = vst.msk [vmem:[#allocation2 + $0xb18] sm:$0xff] %vm297_vm0, %v5230_v47  ;;  %5453 = vst.msk [vmem:[#allocation2 + $0x408] sm:$0xff] %vm297_vm0, %v5004_v25  ;;  %v6346_v2 = vmul.f32 %v15468_v27, %v5891_v43  ;;  %v6118_v15 = vld [vmem:[#allocation2 + $0xab8] sm:$0xff]  ;;  %v6349_v33 = vmul.f32 %v15468_v27, %v5894_v45 }
 0x293   : > { %5677 = vst.msk [vmem:[#allocation2 + $0xb08] sm:$0xff] %vm297_vm0, %v5228_v38  ;;  %v6570_v23 = vmul.f32 %v15468_v27, %v6115_v14  ;;  %v5892_v18 = vld [vmem:[#allocation2 + $0x3a8] sm:$0xff]  ;;  %5458 = vst.msk [vmem:[#allocation2 + $0x430] sm:$0xff] %vm297_vm0, %v5009_v20  ;;  %v15497_v59 = vld [vmem:[%s17067_s3] ss:$0 sm:$0xff]  ;;  %v6573_v49 = vmul.f32 %v15468_v27, %v6118_v15 }
 0x294   : > { %5682 = vst.msk [vmem:[#allocation2 + $0xb30] sm:$0xff] %vm297_vm0, %v5233_v0  ;;  %5456 = vst.msk [vmem:[#allocation2 + $0x420] sm:$0xff] %vm297_vm0, %v5007_v48  ;;  %v6803_v19 = vadd.f32 %v15497_v59, %v6348_v40  ;;  %v7027_v34 = vadd.f32 %v15497_v59, %v6572_v41  ;;  %v6116_v6 = vld [vmem:[#allocation2 + $0xaa8] sm:$0xff]  ;;  %v6801_v7 = vadd.f32 %v15497_v59, %v6346_v2  ;;  %v5897_v38 = vld [vmem:[#allocation2 + $0x3d0] sm:$0xff] }
 0x295   : > { %5680 = vst.msk [vmem:[#allocation2 + $0xb20] sm:$0xff] %vm297_vm0, %v5231_v9  ;;  %5459 = vst.msk [vmem:[#allocation2 + $0x438] sm:$0xff] %vm297_vm0, %v5010_v3  ;;  %v7025_v1 = vadd.f32 %v15497_v59, %v6570_v23  ;;  %v6347_v52 = vmul.f32 %v15468_v27, %v5892_v18  ;;  %v6571_v36 = vmul.f32 %v15468_v27, %v6116_v6  ;;  %v6121_v13 = vld [vmem:[#allocation2 + $0xad0] sm:$0xff]  ;;  %v5895_v0 = vld [vmem:[#allocation2 + $0x3c0] sm:$0xff] }
 0x296   : > { %5683 = vst.msk [vmem:[#allocation2 + $0xb38] sm:$0xff] %vm297_vm0, %v5234_v62  ;;  %5457 = vst.msk [vmem:[#allocation2 + $0x428] sm:$0xff] %vm297_vm0, %v5008_v60  ;;  %v7251_v10 = vmax.f32 %v6803_v19, 0.0  ;;  %v7475_v11 = vmax.f32 %v7027_v34, 0.0  ;;  %v6804_v55 = vadd.f32 %v15497_v59, %v6349_v33  ;;  %v7028_v17 = vadd.f32 %v15497_v59, %v6573_v49  ;;  %v6119_v48 = vld [vmem:[#allocation2 + $0xac0] sm:$0xff]  ;;  %v5898_v14 = vld [vmem:[#allocation2 + $0x3d8] sm:$0xff] }
 0x297   : > { %5681 = vst.msk [vmem:[#allocation2 + $0xb28] sm:$0xff] %vm297_vm0, %v5232_v16  ;;  %v7249_v54 = vmax.f32 %v6801_v7, 0.0  ;;  %v7473_v26 = vmax.f32 %v7025_v1, 0.0  ;;  %v6802_v47 = vadd.f32 %v15497_v59, %v6347_v52  ;;  %v7026_v25 = vadd.f32 %v15497_v59, %v6571_v36  ;;  %v6122_v3 = vld [vmem:[#allocation2 + $0xad8] sm:$0xff]  ;;  %v15521_v62 = vpop.f32.mrb[160].mxu0  ;;  %v5896_v18 = vld [vmem:[#allocation2 + $0x3c8] sm:$0xff] }
 0x298   : > { %v10769_v31 = vpack.c.bf16 %v7251_v10, %v7251_v10  ;;  %v10993_v61 = vpack.c.bf16 %v7475_v11, %v7475_v11  ;;  %v7252_v32 = vmax.f32 %v6804_v55, 0.0  ;;  %v7476_v20 = vmax.f32 %v7028_v17, 0.0  ;;  %v6120_v60 = vld [vmem:[#allocation2 + $0xac8] sm:$0xff]  ;;  %v15529_v16 = vpop.f32.mrb[160].mxu1  ;;  %v15531_v19 = vpop.f32.mrb[161].mxu0 }
 0x299   : > { %v10767_v9 = vpack.c.bf16 %v7249_v54, %v7249_v54  ;;  %v10991_v40 = vpack.c.bf16 %v7473_v26, %v7473_v26  ;;  %v7250_v41 = vmax.f32 %v6802_v47, 0.0  ;;  %v7474_v43 = vmax.f32 %v7026_v25, 0.0  ;;  %v15539_v7 = vpop.f32.mrb[161].mxu1  ;;  %v15541_v1 = vpop.f32.mrb[162].mxu0 }
 0x29a   : > { %9492 = vst.msk [vmem:[%s13402_s14 + $0x1d8] sm:$0xf] %vm9373_vm1, %v10769_v31  ;;  %9716 = vst.msk [vmem:[%s13402_s14 + $0x558] sm:$0xf] %vm9373_vm1, %v10993_v61  ;;  %v10770_v2 = vpack.c.bf16 %v7252_v32, %v7252_v32  ;;  %v10994_v23 = vpack.c.bf16 %v7476_v20, %v7476_v20  ;;  %v6352_v45 = vmul.f32 %v15468_v27, %v5897_v38  ;;  %v15551_v55 = vpop.f32.mrb[162].mxu1  ;;  %v15553_v17 = vpop.f32.mrb[163].mxu0 }
 0x29b   : > { %v6576_v15 = vmul.f32 %v15468_v27, %v6121_v13  ;;  %9490 = vst.msk [vmem:[%s13402_s14 + $0x1d0] sm:$0xf] %vm9373_vm1, %v10767_v9  ;;  %9714 = vst.msk [vmem:[%s13402_s14 + $0x550] sm:$0xf] %vm9373_vm1, %v10991_v40  ;;  %v10768_v34 = vpack.c.bf16 %v7250_v41, %v7250_v41  ;;  %v10992_v33 = vpack.c.bf16 %v7474_v43, %v7474_v43  ;;  %v15563_v38 = vpop.f32.mrb[163].mxu1  ;;  %v5901_v40 = vld [vmem:[#allocation2 + $0x3f0] sm:$0xff] }
 0x29c   : > { %v6350_v49 = vmul.f32 %v15468_v27, %v5895_v0  ;;  %v6574_v6 = vmul.f32 %v15468_v27, %v6119_v48  ;;  %9493 = vst.msk [vmem:[%s13402_s14 + $0x1dc] sm:$0xf] %vm9373_vm1, %v10770_v2  ;;  %9717 = vst.msk [vmem:[%s13402_s14 + $0x55c] sm:$0xf] %vm9373_vm1, %v10994_v23  ;;  %v6807_v52 = vadd.f32 %v15497_v59, %v6352_v45  ;;  %v6125_v41 = vld [vmem:[#allocation2 + $0xaf0] sm:$0xff]  ;;  %v5899_v23 = vld [vmem:[#allocation2 + $0x3e0] sm:$0xff] }
 0x29d   : > { %v7031_v36 = vadd.f32 %v15497_v59, %v6576_v15  ;;  %v6353_v10 = vmul.f32 %v15468_v27, %v5898_v14  ;;  %v6577_v11 = vmul.f32 %v15468_v27, %v6122_v3  ;;  %17256 = vst [vmem:[#allocation10_spill] sm:$0xff] %v15553_v17  ;;  %9491 = vst.msk [vmem:[%s13402_s14 + $0x1d4] sm:$0xf] %vm9373_vm1, %v10768_v34  ;;  %v6123_v45 = vld [vmem:[#allocation2 + $0xae0] sm:$0xff] }
 0x29e   : > { %9715 = vst.msk [vmem:[%s13402_s14 + $0x554] sm:$0xf] %vm9373_vm1, %v10992_v33  ;;  %v6805_v54 = vadd.f32 %v15497_v59, %v6350_v49  ;;  %v7029_v26 = vadd.f32 %v15497_v59, %v6574_v6  ;;  %v6351_v47 = vmul.f32 %v15468_v27, %v5896_v18  ;;  %v6575_v25 = vmul.f32 %v15468_v27, %v6120_v60  ;;  %v5902_v33 = vld [vmem:[#allocation2 + $0x3f8] sm:$0xff]  ;;  %v15569_v6 = vpop.f32.mrb[164].mxu0 }
 0x29f   : > { %17257 = vst [vmem:[#allocation6_spill] sm:$0xff] %v15563_v38  ;;  %v7255_v13 = vmax.f32 %v6807_v52, 0.0  ;;  %v7479_v31 = vmax.f32 %v7031_v36, 0.0  ;;  %v6808_v61 = vadd.f32 %v15497_v59, %v6353_v10  ;;  %v7032_v32 = vadd.f32 %v15497_v59, %v6577_v11  ;;  %v6126_v49 = vld [vmem:[#allocation2 + $0xaf8] sm:$0xff]  ;;  %17258 = vst [vmem:[#allocation7_spill] sm:$0xff] %v15569_v6  ;;  %v887_v6 = vld [vmem:[#allocation2 + $0x468] sm:$0xff] }
 0x2a0   : > { %v7253_v20 = vmax.f32 %v6805_v54, 0.0  ;;  %v7477_v0 = vmax.f32 %v7029_v26, 0.0  ;;  %v6806_v48 = vadd.f32 %v15497_v59, %v6351_v47  ;;  %v7030_v9 = vadd.f32 %v15497_v59, %v6575_v25  ;;  %v5900_v54 = vld [vmem:[#allocation2 + $0x3e8] sm:$0xff]  ;;  %v15577_v47 = vpop.f32.mrb[164].mxu1  ;;  %v15579_v25 = vpop.f32.mrb[165].mxu0 }
 0x2a1   : > { %v10773_v43 = vpack.c.bf16 %v7255_v13, %v7255_v13  ;;  %v10997_v14 = vpack.c.bf16 %v7479_v31, %v7479_v31  ;;  %v7256_v3 = vmax.f32 %v6808_v61, 0.0  ;;  %v7480_v2 = vmax.f32 %v7032_v32, 0.0  ;;  %v6124_v26 = vld [vmem:[#allocation2 + $0xae8] sm:$0xff]  ;;  %17259 = vst [vmem:[#allocation11_spill] sm:$0xff] %v15577_v47  ;;  %17260 = vst [vmem:[#allocation12_spill] sm:$0xff] %v15579_v25  ;;  %v1113_v47 = vld [vmem:[#allocation2 + $0xb78] sm:$0xff] }
 0x2a2   : > { %v10771_v15 = vpack.c.bf16 %v7253_v20, %v7253_v20  ;;  %v10995_v18 = vpack.c.bf16 %v7477_v0, %v7477_v0  ;;  %v7254_v60 = vmax.f32 %v6806_v48, 0.0  ;;  %v7478_v34 = vmax.f32 %v7030_v9, 0.0  ;;  %v15587_v20 = vpop.f32.mrb[165].mxu1  ;;  %v15589_v0 = vpop.f32.mrb[166].mxu0 }
 0x2a3   : > { %9496 = vst.msk [vmem:[%s13402_s14 + $0x1e8] sm:$0xf] %vm9373_vm1, %v10773_v43  ;;  %9720 = vst.msk [vmem:[%s13402_s14 + $0x568] sm:$0xf] %vm9373_vm1, %v10997_v14  ;;  %v10774_v52 = vpack.c.bf16 %v7256_v3, %v7256_v3  ;;  %v10998_v36 = vpack.c.bf16 %v7480_v2, %v7480_v2  ;;  %v6356_v10 = vmul.f32 %v15468_v27, %v5901_v40  ;;  %v15599_v43 = vpop.f32.mrb[166].mxu1  ;;  %v15601_v14 = vpop.f32.mrb[167].mxu0 }
 0x2a4   : > { %v6580_v11 = vmul.f32 %v15468_v27, %v6125_v41  ;;  %9494 = vst.msk [vmem:[%s13402_s14 + $0x1e0] sm:$0xf] %vm9373_vm1, %v10771_v15  ;;  %9718 = vst.msk [vmem:[%s13402_s14 + $0x560] sm:$0xf] %vm9373_vm1, %v10995_v18  ;;  %v10772_v13 = vpack.c.bf16 %v7254_v60, %v7254_v60  ;;  %v10996_v31 = vpack.c.bf16 %v7478_v34, %v7478_v34  ;;  %v15611_v15 = vpop.f32.mrb[167].mxu1 }
 0x2a5   : > { %v6354_v61 = vmul.f32 %v15468_v27, %v5899_v23  ;;  %v6578_v32 = vmul.f32 %v15468_v27, %v6123_v45  ;;  %17261 = vst [vmem:[#allocation13_spill] sm:$0xff] %v15587_v20  ;;  %17262 = vst [vmem:[#allocation14_spill] sm:$0xff] %v15589_v0  ;;  %v6811_v48 = vadd.f32 %v15497_v59, %v6356_v10  ;;  %v886_v0 = vld [vmem:[#allocation2 + $0x460] sm:$0xff] }
 0x2a6   : > { %9497 = vst.msk [vmem:[%s13402_s14 + $0x1ec] sm:$0xf] %vm9373_vm1, %v10774_v52  ;;  %9721 = vst.msk [vmem:[%s13402_s14 + $0x56c] sm:$0xf] %vm9373_vm1, %v10998_v36  ;;  %v7035_v9 = vadd.f32 %v15497_v59, %v6580_v11  ;;  %v6357_v40 = vmul.f32 %v15468_v27, %v5902_v33  ;;  %v6581_v41 = vmul.f32 %v15468_v27, %v6126_v49  ;;  %v5905_v11 = vld [vmem:[#allocation2 + $0x410] sm:$0xff]  ;;  %v1110_v20 = vld [vmem:[#allocation2 + $0xb60] sm:$0xff] }
 0x2a7   : > { %17263 = vst [vmem:[#allocation8_spill] sm:$0xff] %v15599_v43  ;;  %17264 = vst [vmem:[#allocation17_spill] sm:$0xff] %v15601_v14  ;;  %v6809_v3 = vadd.f32 %v15497_v59, %v6354_v61  ;;  %v7033_v2 = vadd.f32 %v15497_v59, %v6578_v32  ;;  %v6355_v23 = vmul.f32 %v15468_v27, %v5900_v54  ;;  %v7259_v18 = vmax.f32 %v6811_v48, 0.0  ;;  %v6129_v54 = vld [vmem:[#allocation2 + $0xb10] sm:$0xff]  ;;  %v5903_v32 = vld [vmem:[#allocation2 + $0x400] sm:$0xff] }
 0x2a8   : > { %9495 = vst.msk [vmem:[%s13402_s14 + $0x1e4] sm:$0xf] %vm9373_vm1, %v10772_v13  ;;  %9719 = vst.msk [vmem:[%s13402_s14 + $0x564] sm:$0xf] %vm9373_vm1, %v10996_v31  ;;  %v6579_v45 = vmul.f32 %v15468_v27, %v6124_v26  ;;  %v7483_v60 = vmax.f32 %v7035_v9, 0.0  ;;  %v6812_v34 = vadd.f32 %v15497_v59, %v6357_v40  ;;  %v7036_v33 = vadd.f32 %v15497_v59, %v6581_v41  ;;  %v6127_v48 = vld [vmem:[#allocation2 + $0xb00] sm:$0xff] }
 0x2a9   : > { %17265 = vst [vmem:[#allocation15_spill] sm:$0xff] %v15611_v15  ;;  %v7257_v49 = vmax.f32 %v6809_v3, 0.0  ;;  %v7481_v52 = vmax.f32 %v7033_v2, 0.0  ;;  %v6810_v36 = vadd.f32 %v15497_v59, %v6355_v23  ;;  %v10777_v13 = vpack.c.bf16 %v7259_v18, %v7259_v18  ;;  %v5906_v2 = vld [vmem:[#allocation2 + $0x418] sm:$0xff]  ;;  %v15617_v15 = vpop.f32.mrb[168].mxu0  ;;  %v1107_v14 = vld [vmem:[#allocation2 + $0xb48] sm:$0xff] }
 0x2aa   : > { %v7034_v10 = vadd.f32 %v15497_v59, %v6579_v45  ;;  %v11001_v26 = vpack.c.bf16 %v7483_v60, %v7483_v60  ;;  %v7260_v31 = vmax.f32 %v6812_v34, 0.0  ;;  %v7484_v61 = vmax.f32 %v7036_v33, 0.0  ;;  %v6130_v23 = vld [vmem:[#allocation2 + $0xb18] sm:$0xff]  ;;  %17266 = vst [vmem:[#allocation16_spill] sm:$0xff] %v15617_v15  ;;  %v5904_v33 = vld [vmem:[#allocation2 + $0x408] sm:$0xff]  ;;  %v1112_v43 = vld [vmem:[#allocation2 + $0xb70] sm:$0xff] }
 0x2ab   : > { %v10775_v9 = vpack.c.bf16 %v7257_v49, %v7257_v49  ;;  %v10999_v40 = vpack.c.bf16 %v7481_v52, %v7481_v52  ;;  %v7258_v41 = vmax.f32 %v6810_v36, 0.0  ;;  %9500 = vst.msk [vmem:[%s13402_s14 + $0x1f8] sm:$0xf] %vm9373_vm1, %v10777_v13  ;;  %v6360_v60 = vmul.f32 %v15468_v27, %v5905_v11  ;;  %v6128_v49 = vld [vmem:[#allocation2 + $0xb08] sm:$0xff]  ;;  %v15625_v52 = vpop.f32.mrb[168].mxu1  ;;  %v15627_v36 = vpop.f32.mrb[169].mxu0 }
 0x2ac   : > { %v7482_v3 = vmax.f32 %v7034_v10, 0.0  ;;  %9724 = vst.msk [vmem:[%s13402_s14 + $0x578] sm:$0xf] %vm9373_vm1, %v11001_v26  ;;  %v10778_v45 = vpack.c.bf16 %v7260_v31, %v7260_v31  ;;  %v11002_v18 = vpack.c.bf16 %v7484_v61, %v7484_v61  ;;  %v6584_v34 = vmul.f32 %v15468_v27, %v6129_v54  ;;  %17267 = vst [vmem:[#allocation18_spill] sm:$0xff] %v15625_v52  ;;  %v15635_v31 = vpop.f32.mrb[169].mxu1  ;;  %v15637_v54 = vpop.f32.mrb[170].mxu0 }
 0x2ad   : > { %17268 = vst [vmem:[#allocation9_spill] sm:$0xff] %v15627_v36  ;;  %9498 = vst.msk [vmem:[%s13402_s14 + $0x1f0] sm:$0xf] %vm9373_vm1, %v10775_v9  ;;  %v10776_v10 = vpack.c.bf16 %v7258_v41, %v7258_v41  ;;  %v6358_v26 = vmul.f32 %v15468_v27, %v5903_v32  ;;  %v6582_v11 = vmul.f32 %v15468_v27, %v6127_v48  ;;  %v15649_v32 = vpop.f32.mrb[171].mxu0 }
 0x2ae   : > { %9722 = vst.msk [vmem:[%s13402_s14 + $0x570] sm:$0xf] %vm9373_vm1, %v10999_v40  ;;  %v11000_v13 = vpack.c.bf16 %v7482_v3, %v7482_v3  ;;  %17269 = vst [vmem:[#allocation23_spill] sm:$0xff] %v15635_v31  ;;  %v6815_v61 = vadd.f32 %v15497_v59, %v6360_v60  ;;  %v7039_v9 = vadd.f32 %v15497_v59, %v6584_v34  ;;  %v15647_v3 = vpop.f32.mrb[170].mxu1  ;;  %v15665_v15 = vpop.f32.mrb[172].mxu0 }
 0x2af   : > { %17270 = vst [vmem:[#allocation38_spill] sm:$0xff] %v15637_v54  ;;  %9501 = vst.msk [vmem:[%s13402_s14 + $0x1fc] sm:$0xf] %vm9373_vm1, %v10778_v45  ;;  %v6361_v40 = vmul.f32 %v15468_v27, %v5906_v2  ;;  %v6585_v41 = vmul.f32 %v15468_v27, %v6130_v23  ;;  %v6813_v48 = vadd.f32 %v15497_v59, %v6358_v26  ;;  %v15659_v34 = vpop.f32.mrb[171].mxu1 }
 0x2b0   : > { %9725 = vst.msk [vmem:[%s13402_s14 + $0x57c] sm:$0xf] %vm9373_vm1, %v11002_v18  ;;  %17271 = vst [vmem:[#allocation39_spill] sm:$0xff] %v15647_v3  ;;  %v7037_v45 = vadd.f32 %v15497_v59, %v6582_v11  ;;  %v6359_v18 = vmul.f32 %v15468_v27, %v5904_v33  ;;  %v6583_v60 = vmul.f32 %v15468_v27, %v6128_v49  ;;  %v7263_v2 = vmax.f32 %v6815_v61, 0.0  ;;  %v5909_v11 = vld [vmem:[#allocation2 + $0x430] sm:$0xff]  ;;  %v5907_v61 = vld [vmem:[#allocation2 + $0x420] sm:$0xff] }
 0x2b1   : > { %17272 = vst [vmem:[#allocation40_spill] sm:$0xff] %v15649_v32  ;;  %9499 = vst.msk [vmem:[%s13402_s14 + $0x1f4] sm:$0xf] %vm9373_vm1, %v10776_v10  ;;  %v7487_v23 = vmax.f32 %v7039_v9, 0.0  ;;  %v6816_v3 = vadd.f32 %v15497_v59, %v6361_v40  ;;  %v7040_v32 = vadd.f32 %v15497_v59, %v6585_v41  ;;  %v7261_v54 = vmax.f32 %v6813_v48, 0.0  ;;  %v6133_v33 = vld [vmem:[#allocation2 + $0xb30] sm:$0xff] }
 0x2b2   : > { %9723 = vst.msk [vmem:[%s13402_s14 + $0x574] sm:$0xf] %vm9373_vm1, %v11000_v13  ;;  %17273 = vst [vmem:[#allocation41_spill] sm:$0xff] %v15659_v34  ;;  %v7485_v10 = vmax.f32 %v7037_v45, 0.0  ;;  %v6814_v13 = vadd.f32 %v15497_v59, %v6359_v18  ;;  %v7038_v26 = vadd.f32 %v15497_v59, %v6583_v60  ;;  %v10781_v31 = vpack.c.bf16 %v7263_v2, %v7263_v2  ;;  %v6131_v9 = vld [vmem:[#allocation2 + $0xb20] sm:$0xff]  ;;  %v5910_v45 = vld [vmem:[#allocation2 + $0x438] sm:$0xff] }
 0x2b3   : > { %v11005_v49 = vpack.c.bf16 %v7487_v23, %v7487_v23  ;;  %v7264_v36 = vmax.f32 %v6816_v3, 0.0  ;;  %v7488_v34 = vmax.f32 %v7040_v32, 0.0  ;;  %v10779_v52 = vpack.c.bf16 %v7261_v54, %v7261_v54  ;;  %v6134_v18 = vld [vmem:[#allocation2 + $0xb38] sm:$0xff]  ;;  %17274 = vst [vmem:[#allocation42_spill] sm:$0xff] %v15665_v15  ;;  %v5908_v2 = vld [vmem:[#allocation2 + $0x428] sm:$0xff] }
 0x2b4   : > { %v11003_v40 = vpack.c.bf16 %v7485_v10, %v7485_v10  ;;  %v7262_v41 = vmax.f32 %v6814_v13, 0.0  ;;  %v7486_v48 = vmax.f32 %v7038_v26, 0.0  ;;  %9504 = vst.msk [vmem:[%s13402_s14 + $0x208] sm:$0xf] %vm9373_vm1, %v10781_v31  ;;  %v6364_v32 = vmul.f32 %v15468_v27, %v5909_v11  ;;  %v6132_v23 = vld [vmem:[#allocation2 + $0xb28] sm:$0xff]  ;;  %v15673_v10 = vpop.f32.mrb[172].mxu1 }
 0x2b5   : > { %9728 = vst.msk [vmem:[%s13402_s14 + $0x588] sm:$0xf] %vm9373_vm1, %v11005_v49  ;;  %v10782_v60 = vpack.c.bf16 %v7264_v36, %v7264_v36  ;;  %v11006_v3 = vpack.c.bf16 %v7488_v34, %v7488_v34  ;;  %v6588_v54 = vmul.f32 %v15468_v27, %v6133_v33  ;;  %17275 = vst [vmem:[#allocation43_spill] sm:$0xff] %v15673_v10  ;;  %v15675_v13 = vpop.f32.mrb[173].mxu0  ;;  %v15683_v11 = vpop.f32.mrb[173].mxu1  ;;  %v885_v10 = vld [vmem:[#allocation2 + $0x458] sm:$0xff] }
 0x2b6   : > { %17276 = vst [vmem:[#allocation51_spill] sm:$0xff] %v15675_v13  ;;  %9502 = vst.msk [vmem:[%s13402_s14 + $0x200] sm:$0xf] %vm9373_vm1, %v10779_v52  ;;  %v10780_v36 = vpack.c.bf16 %v7262_v41, %v7262_v41  ;;  %v11004_v31 = vpack.c.bf16 %v7486_v48, %v7486_v48  ;;  %v6362_v34 = vmul.f32 %v15468_v27, %v5907_v61  ;;  %v15685_v33 = vpop.f32.mrb[174].mxu0  ;;  %v15695_v48 = vpop.f32.mrb[174].mxu1  ;;  %v883_v15 = vld [vmem:[#allocation2 + $0x448] sm:$0xff] }
 0x2b7   : > { %9726 = vst.msk [vmem:[%s13402_s14 + $0x580] sm:$0xf] %vm9373_vm1, %v11003_v40  ;;  %v6586_v26 = vmul.f32 %v15468_v27, %v6131_v9  ;;  %17277 = vst [vmem:[#allocation52_spill] sm:$0xff] %v15683_v11  ;;  %v6819_v52 = vadd.f32 %v15497_v59, %v6364_v32  ;;  %v7043_v49 = vadd.f32 %v15497_v59, %v6588_v54  ;;  %v15697_v61 = vpop.f32.mrb[175].mxu0  ;;  %v884_v54 = vld [vmem:[#allocation2 + $0x450] sm:$0xff]  ;;  %v882_v11 = vld [vmem:[#allocation2 + $0x440] sm:$0xff] }
 0x2b8   : > { %17278 = vst [vmem:[#allocation53_spill] sm:$0xff] %v15685_v33  ;;  %9505 = vst.msk [vmem:[%s13402_s14 + $0x20c] sm:$0xf] %vm9373_vm1, %v10782_v60  ;;  %v6365_v40 = vmul.f32 %v15468_v27, %v5910_v45  ;;  %v6589_v41 = vmul.f32 %v15468_v27, %v6134_v18  ;;  %v6817_v9 = vadd.f32 %v15497_v59, %v6362_v34  ;;  %v15707_v45 = vpop.f32.mrb[175].mxu1  ;;  %v15713_v38 = vpop.f32.mrb[176].mxu0 }
 0x2b9   : > { %9729 = vst.msk [vmem:[%s13402_s14 + $0x58c] sm:$0xf] %vm9373_vm1, %v11006_v3  ;;  %17279 = vst [vmem:[#allocation54_spill] sm:$0xff] %v15695_v48  ;;  %v7041_v60 = vadd.f32 %v15497_v59, %v6586_v26  ;;  %v6363_v3 = vmul.f32 %v15468_v27, %v5908_v2  ;;  %v6587_v32 = vmul.f32 %v15468_v27, %v6132_v23  ;;  %v7267_v18 = vmax.f32 %v6819_v52, 0.0  ;;  %v1109_v23 = vld [vmem:[#allocation2 + $0xb58] sm:$0xff]  ;;  %v15723_v17 = vpop.f32.mrb[177].mxu0 }
 0x2ba   : > { %17280 = vst [vmem:[#allocation55_spill] sm:$0xff] %v15697_v61  ;;  %9503 = vst.msk [vmem:[%s13402_s14 + $0x204] sm:$0xf] %vm9373_vm1, %v10780_v36  ;;  %v7491_v33 = vmax.f32 %v7043_v49, 0.0  ;;  %v6820_v48 = vadd.f32 %v15497_v59, %v6365_v40  ;;  %v7044_v61 = vadd.f32 %v15497_v59, %v6589_v41  ;;  %v1108_v36 = vld [vmem:[#allocation2 + $0xb50] sm:$0xff]  ;;  %v7265_v13 = vmax.f32 %v6817_v9, 0.0 }
 0x2bb   : > { %9727 = vst.msk [vmem:[%s13402_s14 + $0x584] sm:$0xf] %vm9373_vm1, %v11004_v31  ;;  %17281 = vst [vmem:[#allocation56_spill] sm:$0xff] %v15707_v45  ;;  %v1106_v31 = vld [vmem:[#allocation2 + $0xb40] sm:$0xff]  ;;  %v7489_v34 = vmax.f32 %v7041_v60, 0.0  ;;  %v6818_v26 = vadd.f32 %v15497_v59, %v6363_v3  ;;  %v7042_v2 = vadd.f32 %v15497_v59, %v6587_v32  ;;  %v10785_v45 = vpack.c.bf16 %v7267_v18, %v7267_v18  ;;  %v888_v41 = vld [vmem:[#allocation2 + $0x470] sm:$0xff] }
 0x2bc   : > { %v11009_v52 = vpack.c.bf16 %v7491_v33, %v7491_v33  ;;  %v7268_v49 = vmax.f32 %v6820_v48, 0.0  ;;  %v7492_v40 = vmax.f32 %v7044_v61, 0.0  ;;  %v10783_v9 = vpack.c.bf16 %v7265_v13, %v7265_v13  ;;  %v889_v32 = vld [vmem:[#allocation2 + $0x478] sm:$0xff]  ;;  %v1111_v18 = vld [vmem:[#allocation2 + $0xb68] sm:$0xff] }
 0x2bd   : > { %v11007_v60 = vpack.c.bf16 %v7489_v34, %v7489_v34  ;;  %v7266_v25 = vmax.f32 %v6818_v26, 0.0  ;;  %v7490_v3 = vmax.f32 %v7042_v2, 0.0  ;;  %9508 = vst.msk [vmem:[%s13402_s14 + $0x218] sm:$0xf] %vm9373_vm1, %v10785_v45  ;;  %v5013_v61 = vadd.f32 %v15187_v8, %v884_v54  ;;  %v892_v34 = vld [vmem:[#allocation2 + $0x490] sm:$0xff]  ;;  %v15721_v2 = vpop.f32.mrb[176].mxu1 }
 0x2be   : > { %9732 = vst.msk [vmem:[%s13402_s14 + $0x598] sm:$0xf] %vm9373_vm1, %v11009_v52  ;;  %v10786_v33 = vpack.c.bf16 %v7268_v49, %v7268_v49  ;;  %v11010_v48 = vpack.c.bf16 %v7492_v40, %v7492_v40  ;;  %v5237_v13 = vadd.f32 %v15197_v56, %v1108_v36  ;;  %v1116_v26 = vld [vmem:[#allocation2 + $0xb90] sm:$0xff]  ;;  %17282 = vst [vmem:[#allocation57_spill] sm:$0xff] %v15721_v2  ;;  %v890_v56 = vld [vmem:[#allocation2 + $0x480] sm:$0xff]  ;;  %v15731_v40 = vpop.f32.mrb[177].mxu1 }
 0x2bf   : > { %9506 = vst.msk [vmem:[%s13402_s14 + $0x210] sm:$0xf] %vm9373_vm1, %v10783_v9  ;;  %9730 = vst.msk [vmem:[%s13402_s14 + $0x590] sm:$0xf] %vm9373_vm1, %v11007_v60  ;;  %v10784_v45 = vpack.c.bf16 %v7266_v25, %v7266_v25  ;;  %v11008_v52 = vpack.c.bf16 %v7490_v3, %v7490_v3  ;;  %v5011_v49 = vadd.f32 %v15199_v46, %v882_v11  ;;  %v1114_v54 = vld [vmem:[#allocation2 + $0xb80] sm:$0xff]  ;;  %v893_v36 = vld [vmem:[#allocation2 + $0x498] sm:$0xff] }
 0x2c0   : > { %v5235_v8 = vadd.f32 %v15209_v4, %v1106_v31  ;;  %v15733_v2 = vpop.f32.mrb[178].mxu0  ;;  %9509 = vst.msk [vmem:[%s13402_s14 + $0x21c] sm:$0xf] %vm9373_vm1, %v10786_v33  ;;  %9733 = vst.msk [vmem:[%s13402_s14 + $0x59c] sm:$0xf] %vm9373_vm1, %v11010_v48  ;;  %v5014_v46 = vadd.f32 %v15211_v51, %v885_v10  ;;  %v5238_v4 = vadd.f32 %v15215_v57, %v1109_v23  ;;  %v1117_v31 = vld [vmem:[#allocation2 + $0xb98] sm:$0xff] }
 0x2c1   : > { %5462 = vst.msk [vmem:[#allocation2 + $0x450] sm:$0xff] %vm297_vm0, %v5013_v61  ;;  %5686 = vst.msk [vmem:[#allocation2 + $0xb50] sm:$0xff] %vm297_vm0, %v5237_v13  ;;  %v5012_v25 = vadd.f32 %v15219_v22, %v883_v15  ;;  %v5236_v11 = vadd.f32 %v15221_v30, %v1107_v14  ;;  %v891_v9 = vld [vmem:[#allocation2 + $0x488] sm:$0xff]  ;;  %v15745_v3 = vpop.f32.mrb[178].mxu1  ;;  %v15747_v33 = vpop.f32.mrb[179].mxu0  ;;  %v5017_v51 = vadd.f32 %v15235_v58, %v888_v41  ;;  %v17283_v30 = vld [vmem:[#allocation24_spill] sm:$0xff] }
 0x2c2   : > { %v1115_v60 = vld [vmem:[#allocation2 + $0xb88] sm:$0xff]  ;;  %9507 = vst.msk [vmem:[%s13402_s14 + $0x214] sm:$0xf] %vm9373_vm1, %v10784_v45  ;;  %9731 = vst.msk [vmem:[%s13402_s14 + $0x594] sm:$0xf] %vm9373_vm1, %v11008_v52  ;;  %v5241_v57 = vadd.f32 %v15245_v42, %v1112_v43  ;;  %v5015_v22 = vadd.f32 %v15247_v28, %v886_v0  ;;  %v5239_v14 = vadd.f32 %v17283_v30, %v1110_v20  ;;  %v896_v15 = vld [vmem:[#allocation2 + $0x4b0] sm:$0xff] }
 0x2c3   : > { %5460 = vst.msk [vmem:[#allocation2 + $0x440] sm:$0xff] %vm297_vm0, %v5011_v49  ;;  %5684 = vst.msk [vmem:[#allocation2 + $0xb40] sm:$0xff] %vm297_vm0, %v5235_v8  ;;  %v1120_v10 = vld [vmem:[#allocation2 + $0xbb0] sm:$0xff]  ;;  %v894_v23 = vld [vmem:[#allocation2 + $0x4a0] sm:$0xff]  ;;  %v15759_v48 = vpop.f32.mrb[179].mxu1 }
 0x2c4   : > { %5463 = vst.msk [vmem:[#allocation2 + $0x458] sm:$0xff] %vm297_vm0, %v5014_v46  ;;  %5687 = vst.msk [vmem:[#allocation2 + $0xb58] sm:$0xff] %vm297_vm0, %v5238_v4  ;;  %v17284_v58 = vld [vmem:[#allocation25_spill] sm:$0xff]  ;;  %v17285_v42 = vld [vmem:[#allocation26_spill] sm:$0xff] }
 0x2c5   : > { %5461 = vst.msk [vmem:[#allocation2 + $0x448] sm:$0xff] %vm297_vm0, %v5012_v25  ;;  %5685 = vst.msk [vmem:[#allocation2 + $0xb48] sm:$0xff] %vm297_vm0, %v5236_v11  ;;  %v5018_v41 = vadd.f32 %v17284_v58, %v889_v32  ;;  %v5242_v43 = vadd.f32 %v17285_v42, %v1113_v47  ;;  %v17286_v28 = vld [vmem:[#allocation27_spill] sm:$0xff]  ;;  %v17287_v20 = vld [vmem:[#allocation28_spill] sm:$0xff] }
 0x2c6   : > { %v5016_v0 = vadd.f32 %v17286_v28, %v887_v6  ;;  %v5240_v61 = vadd.f32 %v17287_v20, %v1111_v18  ;;  %v1118_v13 = vld [vmem:[#allocation2 + $0xba0] sm:$0xff]  ;;  %v897_v45 = vld [vmem:[#allocation2 + $0x4b8] sm:$0xff]  ;;  %5466 = vst.msk [vmem:[#allocation2 + $0x470] sm:$0xff] %vm297_vm0, %v5017_v51  ;;  %5690 = vst.msk [vmem:[#allocation2 + $0xb70] sm:$0xff] %vm297_vm0, %v5241_v57 }
 0x2c7   : > { %v1121_v52 = vld [vmem:[#allocation2 + $0xbb8] sm:$0xff]  ;;  %5464 = vst.msk [vmem:[#allocation2 + $0x460] sm:$0xff] %vm297_vm0, %v5015_v22  ;;  %5688 = vst.msk [vmem:[#allocation2 + $0xb60] sm:$0xff] %vm297_vm0, %v5239_v14  ;;  %v17289_v32 = vld [vmem:[#allocation30_spill] sm:$0xff] }
 0x2c8   : > { %v17288_v49 = vld [vmem:[#allocation29_spill] sm:$0xff]  ;;  %v5245_v46 = vadd.f32 %v17289_v32, %v1116_v26  ;;  %v17290_v47 = vld [vmem:[#allocation31_spill] sm:$0xff]  ;;  %v17291_v6 = vld [vmem:[#allocation32_spill] sm:$0xff]  ;;  %5467 = vst.msk [vmem:[#allocation2 + $0x478] sm:$0xff] %vm297_vm0, %v5018_v41  ;;  %v15793_v32 = vpop.f32.mrb[180].mxu0 }
 0x2c9   : > { %v5021_v8 = vadd.f32 %v17288_v49, %v892_v34  ;;  %v5019_v4 = vadd.f32 %v17290_v47, %v890_v56  ;;  %v5243_v25 = vadd.f32 %v17291_v6, %v1114_v54  ;;  %v895_v18 = vld [vmem:[#allocation2 + $0x4a8] sm:$0xff]  ;;  %v900_v30 = vld [vmem:[#allocation2 + $0x4d0] sm:$0xff]  ;;  %5691 = vst.msk [vmem:[#allocation2 + $0xb78] sm:$0xff] %vm297_vm0, %v5242_v43  ;;  %5465 = vst.msk [vmem:[#allocation2 + $0x468] sm:$0xff] %vm297_vm0, %v5016_v0 }
 0x2ca   : > { %v1119_v11 = vld [vmem:[#allocation2 + $0xba8] sm:$0xff]  ;;  %5689 = vst.msk [vmem:[#allocation2 + $0xb68] sm:$0xff] %vm297_vm0, %v5240_v61  ;;  %v17292_v51 = vld [vmem:[#allocation33_spill] sm:$0xff]  ;;  %v17293_v34 = vld [vmem:[#allocation34_spill] sm:$0xff] }
 0x2cb   : > { %v5022_v57 = vadd.f32 %v17292_v51, %v893_v36  ;;  %v5246_v22 = vadd.f32 %v17293_v34, %v1117_v31  ;;  %v17294_v26 = vld [vmem:[#allocation35_spill] sm:$0xff]  ;;  %v17295_v56 = vld [vmem:[#allocation36_spill] sm:$0xff]  ;;  %v898_v42 = vld [vmem:[#allocation2 + $0x4c0] sm:$0xff]  ;;  %5470 = vst.msk [vmem:[#allocation2 + $0x490] sm:$0xff] %vm297_vm0, %v5021_v8  ;;  %v15803_v51 = vpop.f32.mrb[180].mxu1  ;;  %v15805_v34 = vpop.f32.mrb[181].mxu0 }
 0x2cc   : > { %v5020_v14 = vadd.f32 %v17294_v26, %v891_v9  ;;  %v5244_v58 = vadd.f32 %v17295_v56, %v1115_v60  ;;  %v1124_v54 = vld [vmem:[#allocation2 + $0xbd0] sm:$0xff]  ;;  %v1122_v28 = vld [vmem:[#allocation2 + $0xbc0] sm:$0xff]  ;;  %5694 = vst.msk [vmem:[#allocation2 + $0xb90] sm:$0xff] %vm297_vm0, %v5245_v46  ;;  %5468 = vst.msk [vmem:[#allocation2 + $0x480] sm:$0xff] %vm297_vm0, %v5019_v4  ;;  %v15815_v56 = vpop.f32.mrb[181].mxu1 }
 0x2cd   : > { %5692 = vst.msk [vmem:[#allocation2 + $0xb80] sm:$0xff] %vm297_vm0, %v5243_v25  ;;  %v17296_v41 = vld [vmem:[#allocation37_spill] sm:$0xff]  ;;  %v17297_v36 = vld [vmem:[#allocation44_spill] sm:$0xff]  ;;  %v17299_v9 = vld [vmem:[#allocation46_spill] sm:$0xff] }
 0x2ce   : > { %v5025_v43 = vadd.f32 %v17296_v41, %v896_v15  ;;  %v5249_v0 = vadd.f32 %v17297_v36, %v1120_v10  ;;  %v17298_v31 = vld [vmem:[#allocation45_spill] sm:$0xff]  ;;  %v5247_v61 = vadd.f32 %v17299_v9, %v1118_v13  ;;  %5471 = vst.msk [vmem:[#allocation2 + $0x498] sm:$0xff] %vm297_vm0, %v5022_v57  ;;  %5695 = vst.msk [vmem:[#allocation2 + $0xb98] sm:$0xff] %vm297_vm0, %v5246_v22  ;;  %v17300_v8 = vld [vmem:[#allocation47_spill] sm:$0xff] }
 0x2cf   : > { %v5023_v20 = vadd.f32 %v17298_v31, %v894_v23  ;;  %v901_v60 = vld [vmem:[#allocation2 + $0x4d8] sm:$0xff]  ;;  %5469 = vst.msk [vmem:[#allocation2 + $0x488] sm:$0xff] %vm297_vm0, %v5020_v14  ;;  %5693 = vst.msk [vmem:[#allocation2 + $0xb88] sm:$0xff] %vm297_vm0, %v5244_v58  ;;  %v5026_v15 = vadd.f32 %v17300_v8, %v897_v45  ;;  %v17301_v46 = vld [vmem:[#allocation48_spill] sm:$0xff]  ;;  %v5251_v14 = vadd.f32 %v15405_v63, %v1122_v28  ;;  %v15817_v58 = vpop.f32.mrb[182].mxu0 }
 0x2d0   : > { %v1125_v49 = vld [vmem:[#allocation2 + $0xbd8] sm:$0xff]  ;;  %v5250_v10 = vadd.f32 %v17301_v46, %v1121_v52  ;;  %v17303_v4 = vld [vmem:[#allocation50_spill] sm:$0xff]  ;;  %v899_v6 = vld [vmem:[#allocation2 + $0x4c8] sm:$0xff]  ;;  %5474 = vst.msk [vmem:[#allocation2 + $0x4b0] sm:$0xff] %vm297_vm0, %v5025_v43 }
 0x2d1   : > { %v17302_v47 = vld [vmem:[#allocation49_spill] sm:$0xff]  ;;  %v5248_v13 = vadd.f32 %v17303_v4, %v1119_v11  ;;  %v1123_v25 = vld [vmem:[#allocation2 + $0xbc8] sm:$0xff]  ;;  %v5913_v57 = vld [vmem:[#allocation2 + $0x450] sm:$0xff]  ;;  %5698 = vst.msk [vmem:[#allocation2 + $0xbb0] sm:$0xff] %vm297_vm0, %v5249_v0 }
 0x2d2   : > { %v5024_v23 = vadd.f32 %v17302_v47, %v895_v18  ;;  %v6137_v22 = vld [vmem:[#allocation2 + $0xb50] sm:$0xff]  ;;  %5472 = vst.msk [vmem:[#allocation2 + $0x4a0] sm:$0xff] %vm297_vm0, %v5023_v20  ;;  %5696 = vst.msk [vmem:[#allocation2 + $0xba0] sm:$0xff] %vm297_vm0, %v5247_v61  ;;  %v17304_v45 = vld [vmem:[#allocation19_spill] sm:$0xff]  ;;  %v5253_v18 = vadd.f32 %v15391_v39, %v1124_v54  ;;  %v6368_v41 = vmul.f32 %v15468_v27, %v5913_v57  ;;  %v15827_v54 = vpop.f32.mrb[182].mxu1 }
 0x2d3   : > { %v5029_v52 = vadd.f32 %v17304_v45, %v900_v30  ;;  %v17305_v11 = vld [vmem:[#allocation20_spill] sm:$0xff]  ;;  %v6592_v43 = vmul.f32 %v15468_v27, %v6137_v22  ;;  %v5911_v36 = vld [vmem:[#allocation2 + $0x440] sm:$0xff]  ;;  %5475 = vst.msk [vmem:[#allocation2 + $0x4b8] sm:$0xff] %vm297_vm0, %v5026_v15  ;;  %5699 = vst.msk [vmem:[#allocation2 + $0xbb8] sm:$0xff] %vm297_vm0, %v5250_v10  ;;  %v5254_v30 = vadd.f32 %v15417_v44, %v1125_v49  ;;  %v15839_v8 = vpop.f32.mrb[183].mxu1 }
 0x2d4   : > { %v5027_v26 = vadd.f32 %v17305_v11, %v898_v42  ;;  %v6135_v0 = vld [vmem:[#allocation2 + $0xb40] sm:$0xff]  ;;  %5473 = vst.msk [vmem:[#allocation2 + $0x4a8] sm:$0xff] %vm297_vm0, %v5024_v23  ;;  %5697 = vst.msk [vmem:[#allocation2 + $0xba8] sm:$0xff] %vm297_vm0, %v5248_v13  ;;  %v17306_v39 = vld [vmem:[#allocation21_spill] sm:$0xff]  ;;  %v15829_v42 = vpop.f32.mrb[183].mxu0  ;;  %v6366_v28 = vmul.f32 %v15468_v27, %v5911_v36  ;;  %v5252_v49 = vadd.f32 %v15429_v29, %v1123_v25 }
 0x2d5   : > { %v5030_v63 = vadd.f32 %v17306_v39, %v901_v60  ;;  %v6590_v31 = vmul.f32 %v15468_v27, %v6135_v0  ;;  %v5914_v20 = vld [vmem:[#allocation2 + $0x458] sm:$0xff]  ;;  %v5912_v61 = vld [vmem:[#allocation2 + $0x448] sm:$0xff]  ;;  %5478 = vst.msk [vmem:[#allocation2 + $0x4d0] sm:$0xff] %vm297_vm0, %v5029_v52  ;;  %5702 = vst.msk [vmem:[#allocation2 + $0xbd0] sm:$0xff] %vm297_vm0, %v5253_v18  ;;  %v6823_v15 = vadd.f32 %v15497_v59, %v6368_v41 }
 0x2d6   : > { %v6138_v9 = vld [vmem:[#allocation2 + $0xb58] sm:$0xff]  ;;  %5476 = vst.msk [vmem:[#allocation2 + $0x4c0] sm:$0xff] %vm297_vm0, %v5027_v26  ;;  %5700 = vst.msk [vmem:[#allocation2 + $0xbc0] sm:$0xff] %vm297_vm0, %v5251_v14  ;;  %v17307_v44 = vld [vmem:[#allocation22_spill] sm:$0xff]  ;;  %v7047_v46 = vadd.f32 %v15497_v59, %v6592_v43  ;;  %v6369_v10 = vmul.f32 %v15468_v27, %v5914_v20  ;;  %v6821_v4 = vadd.f32 %v15497_v59, %v6366_v28  ;;  %v15857_v43 = vpop.f32.mrb[184].mxu0 }
 0x2d7   : > { %v5028_v60 = vadd.f32 %v17307_v44, %v899_v6  ;;  %v6593_v47 = vmul.f32 %v15468_v27, %v6138_v9  ;;  %v6136_v23 = vld [vmem:[#allocation2 + $0xb48] sm:$0xff]  ;;  %5479 = vst.msk [vmem:[#allocation2 + $0x4d8] sm:$0xff] %vm297_vm0, %v5030_v63  ;;  %5703 = vst.msk [vmem:[#allocation2 + $0xbd8] sm:$0xff] %vm297_vm0, %v5254_v30  ;;  %v7045_v13 = vadd.f32 %v15497_v59, %v6590_v31  ;;  %v7271_v25 = vmax.f32 %v6823_v15, 0.0  ;;  %v5917_v14 = vld [vmem:[#allocation2 + $0x470] sm:$0xff]  ;;  %v15859_v31 = vpop.f32.mrb[184].mxu1 }
 0x2d8   : > { %v6367_v29 = vmul.f32 %v15468_v27, %v5912_v61  ;;  %v6591_v6 = vmul.f32 %v15468_v27, %v6136_v23  ;;  %5701 = vst.msk [vmem:[#allocation2 + $0xbc8] sm:$0xff] %vm297_vm0, %v5252_v49  ;;  %v7495_v57 = vmax.f32 %v7047_v46, 0.0  ;;  %v6824_v22 = vadd.f32 %v15497_v59, %v6369_v10  ;;  %v6141_v41 = vld [vmem:[#allocation2 + $0xb70] sm:$0xff]  ;;  %17308 = vst [vmem:[#allocation24_spill] sm:$0xff] %v15857_v43  ;;  %v5915_v30 = vld [vmem:[#allocation2 + $0x460] sm:$0xff]  ;;  %v15861_v15 = vpop.f32.mrb[185].mxu0 }
 0x2d9   : > { %5477 = vst.msk [vmem:[#allocation2 + $0x4c8] sm:$0xff] %vm297_vm0, %v5028_v60  ;;  %v7048_v45 = vadd.f32 %v15497_v59, %v6593_v47  ;;  %v7269_v52 = vmax.f32 %v6821_v4, 0.0  ;;  %v7493_v18 = vmax.f32 %v7045_v13, 0.0  ;;  %v10789_v36 = vpack.c.bf16 %v7271_v25, %v7271_v25  ;;  %v6139_v28 = vld [vmem:[#allocation2 + $0xb60] sm:$0xff]  ;;  %17309 = vst [vmem:[#allocation25_spill] sm:$0xff] %v15859_v31  ;;  %v5918_v60 = vld [vmem:[#allocation2 + $0x478] sm:$0xff] }
 0x2da   : > { %v6822_v11 = vadd.f32 %v15497_v59, %v6367_v29  ;;  %v7046_v26 = vadd.f32 %v15497_v59, %v6591_v6  ;;  %v11013_v0 = vpack.c.bf16 %v7495_v57, %v7495_v57  ;;  %v7272_v39 = vmax.f32 %v6824_v22, 0.0  ;;  %v6142_v49 = vld [vmem:[#allocation2 + $0xb78] sm:$0xff]  ;;  %17310 = vst [vmem:[#allocation26_spill] sm:$0xff] %v15861_v15  ;;  %v5916_v4 = vld [vmem:[#allocation2 + $0x468] sm:$0xff]  ;;  %v15869_v29 = vpop.f32.mrb[185].mxu1  ;;  %v15871_v6 = vpop.f32.mrb[186].mxu0 }
 0x2db   : > { %v7496_v63 = vmax.f32 %v7048_v45, 0.0  ;;  %v10787_v20 = vpack.c.bf16 %v7269_v52, %v7269_v52  ;;  %v11011_v9 = vpack.c.bf16 %v7493_v18, %v7493_v18  ;;  %9512 = vst.msk [vmem:[%s13402_s14 + $0x228] sm:$0xf] %vm9373_vm1, %v10789_v36  ;;  %v6372_v47 = vmul.f32 %v15468_v27, %v5917_v14  ;;  %v6140_v13 = vld [vmem:[#allocation2 + $0xb68] sm:$0xff]  ;;  %17311 = vst [vmem:[#allocation27_spill] sm:$0xff] %v15869_v29  ;;  %v15879_v52 = vpop.f32.mrb[186].mxu1 }
 0x2dc   : > { %v7270_v61 = vmax.f32 %v6822_v11, 0.0  ;;  %v7494_v44 = vmax.f32 %v7046_v26, 0.0  ;;  %9736 = vst.msk [vmem:[%s13402_s14 + $0x5a8] sm:$0xf] %vm9373_vm1, %v11013_v0  ;;  %v10790_v46 = vpack.c.bf16 %v7272_v39, %v7272_v39  ;;  %v6596_v23 = vmul.f32 %v15468_v27, %v6141_v41  ;;  %17312 = vst [vmem:[#allocation28_spill] sm:$0xff] %v15871_v6  ;;  %v15881_v18 = vpop.f32.mrb[187].mxu0 }
 0x2dd   : > { %v11014_v10 = vpack.c.bf16 %v7496_v63, %v7496_v63  ;;  %9510 = vst.msk [vmem:[%s13402_s14 + $0x220] sm:$0xf] %vm9373_vm1, %v10787_v20  ;;  %9734 = vst.msk [vmem:[%s13402_s14 + $0x5a0] sm:$0xf] %vm9373_vm1, %v11011_v9  ;;  %v6370_v22 = vmul.f32 %v15468_v27, %v5915_v30  ;;  %v6594_v45 = vmul.f32 %v15468_v27, %v6139_v28  ;;  %v15891_v36 = vpop.f32.mrb[187].mxu1  ;;  %v909_v31 = vld [vmem:[#allocation2 + $0x518] sm:$0xff] }
 0x2de   : > { %v10788_v25 = vpack.c.bf16 %v7270_v61, %v7270_v61  ;;  %v11012_v57 = vpack.c.bf16 %v7494_v44, %v7494_v44  ;;  %17313 = vst [vmem:[#allocation29_spill] sm:$0xff] %v15879_v52  ;;  %17314 = vst [vmem:[#allocation30_spill] sm:$0xff] %v15881_v18  ;;  %v6827_v11 = vadd.f32 %v15497_v59, %v6372_v47  ;;  %v6145_v47 = vld [vmem:[#allocation2 + $0xb90] sm:$0xff] }
 0x2df   : > { %9513 = vst.msk [vmem:[%s13402_s14 + $0x22c] sm:$0xf] %vm9373_vm1, %v10790_v46  ;;  %9737 = vst.msk [vmem:[%s13402_s14 + $0x5ac] sm:$0xf] %vm9373_vm1, %v11014_v10  ;;  %v7051_v26 = vadd.f32 %v15497_v59, %v6596_v23  ;;  %v6373_v14 = vmul.f32 %v15468_v27, %v5918_v60  ;;  %v6597_v41 = vmul.f32 %v15468_v27, %v6142_v49  ;;  %v5921_v10 = vld [vmem:[#allocation2 + $0x490] sm:$0xff]  ;;  %v15905_v23 = vpop.f32.mrb[188].mxu0 }
 0x2e0   : > { %17315 = vst [vmem:[#allocation31_spill] sm:$0xff] %v15891_v36  ;;  %9511 = vst.msk [vmem:[%s13402_s14 + $0x224] sm:$0xf] %vm9373_vm1, %v10788_v25  ;;  %v6825_v0 = vadd.f32 %v15497_v59, %v6370_v22  ;;  %v7049_v39 = vadd.f32 %v15497_v59, %v6594_v45  ;;  %v6371_v63 = vmul.f32 %v15468_v27, %v5916_v4  ;;  %v7275_v28 = vmax.f32 %v6827_v11, 0.0  ;;  %v6143_v22 = vld [vmem:[#allocation2 + $0xb80] sm:$0xff]  ;;  %v15907_v45 = vpop.f32.mrb[188].mxu1 }
 0x2e1   : > { %9735 = vst.msk [vmem:[%s13402_s14 + $0x5a4] sm:$0xf] %vm9373_vm1, %v11012_v57  ;;  %v6595_v30 = vmul.f32 %v15468_v27, %v6140_v13  ;;  %v7499_v20 = vmax.f32 %v7051_v26, 0.0  ;;  %v6828_v9 = vadd.f32 %v15497_v59, %v6373_v14  ;;  %v7052_v61 = vadd.f32 %v15497_v59, %v6597_v41  ;;  %17316 = vst [vmem:[#allocation32_spill] sm:$0xff] %v15905_v23  ;;  %v5919_v57 = vld [vmem:[#allocation2 + $0x480] sm:$0xff]  ;;  %v15909_v11 = vpop.f32.mrb[189].mxu0 }
 0x2e2   : > { %v7273_v44 = vmax.f32 %v6825_v0, 0.0  ;;  %v7497_v60 = vmax.f32 %v7049_v39, 0.0  ;;  %v6826_v49 = vadd.f32 %v15497_v59, %v6371_v63  ;;  %v10793_v25 = vpack.c.bf16 %v7275_v28, %v7275_v28  ;;  %17317 = vst [vmem:[#allocation33_spill] sm:$0xff] %v15907_v45  ;;  %17318 = vst [vmem:[#allocation34_spill] sm:$0xff] %v15909_v11  ;;  %v5922_v0 = vld [vmem:[#allocation2 + $0x498] sm:$0xff]  ;;  %v15911_v63 = vpop.f32.mrb[189].mxu1 }
 0x2e3   : > { %v7050_v46 = vadd.f32 %v15497_v59, %v6595_v30  ;;  %v11017_v4 = vpack.c.bf16 %v7499_v20, %v7499_v20  ;;  %v7276_v27 = vmax.f32 %v6828_v9, 0.0  ;;  %v7500_v13 = vmax.f32 %v7052_v61, 0.0  ;;  %v6146_v39 = vld [vmem:[#allocation2 + $0xb98] sm:$0xff]  ;;  %17319 = vst [vmem:[#allocation35_spill] sm:$0xff] %v15911_v63  ;;  %v15913_v30 = vpop.f32.mrb[190].mxu0  ;;  %v1132_v18 = vld [vmem:[#allocation2 + $0xc10] sm:$0xff] }
 0x2e4   : > { %v10791_v26 = vpack.c.bf16 %v7273_v44, %v7273_v44  ;;  %v11015_v14 = vpack.c.bf16 %v7497_v60, %v7497_v60  ;;  %v7274_v41 = vmax.f32 %v6826_v49, 0.0  ;;  %17320 = vst [vmem:[#allocation36_spill] sm:$0xff] %v15913_v30  ;;  %9516 = vst.msk [vmem:[%s13402_s14 + $0x238] sm:$0xf] %vm9373_vm1, %v10793_v25  ;;  %v15922_v9 = vld [vmem:[%s17066_s2] ss:$0 sm:$0xff] }
 0x2e5   : > { %v7498_v59 = vmax.f32 %v7050_v46, 0.0  ;;  %9740 = vst.msk [vmem:[%s13402_s14 + $0x5b8] sm:$0xf] %vm9373_vm1, %v11017_v4  ;;  %v10794_v28 = vpack.c.bf16 %v7276_v27, %v7276_v27  ;;  %v11018_v20 = vpack.c.bf16 %v7500_v13, %v7500_v13  ;;  %v6376_v61 = vmul.f32 %v15922_v9, %v5921_v10  ;;  %v5920_v60 = vld [vmem:[#allocation2 + $0x488] sm:$0xff]  ;;  %v15926_v46 = vpop.f32.mrb[190].mxu1  ;;  %v15928_v25 = vpop.f32.mrb[191].mxu0 }
 0x2e6   : > { %v6600_v44 = vmul.f32 %v15922_v9, %v6145_v47  ;;  %v6144_v49 = vld [vmem:[#allocation2 + $0xb88] sm:$0xff]  ;;  %17321 = vst [vmem:[#allocation37_spill] sm:$0xff] %v15926_v46  ;;  %17322 = vst [vmem:[#allocation44_spill] sm:$0xff] %v15928_v25  ;;  %v10792_v4 = vpack.c.bf16 %v7274_v41, %v7274_v41  ;;  %v6374_v13 = vmul.f32 %v15922_v9, %v5919_v57  ;;  %v15936_v30 = vpop.f32.mrb[191].mxu1  ;;  %v15945_v47 = vld [vmem:[%s17067_s3] ss:$0 sm:$0xff] }
 0x2e7   : > { %9514 = vst.msk [vmem:[%s13402_s14 + $0x230] sm:$0xf] %vm9373_vm1, %v10791_v26  ;;  %9738 = vst.msk [vmem:[%s13402_s14 + $0x5b0] sm:$0xf] %vm9373_vm1, %v11015_v14  ;;  %v11016_v27 = vpack.c.bf16 %v7498_v59, %v7498_v59  ;;  %v6598_v10 = vmul.f32 %v15922_v9, %v6143_v22  ;;  %v6831_v26 = vadd.f32 %v15945_v47, %v6376_v61  ;;  %v5925_v46 = vld [vmem:[#allocation2 + $0x4b0] sm:$0xff]  ;;  %v15963_v63 = vpop.f32.mrb[192].mxu0 }
 0x2e8   : > { %17323 = vst [vmem:[#allocation45_spill] sm:$0xff] %v15936_v30  ;;  %9517 = vst.msk [vmem:[%s13402_s14 + $0x23c] sm:$0xf] %vm9373_vm1, %v10794_v28  ;;  %v7055_v14 = vadd.f32 %v15945_v47, %v6600_v44  ;;  %v6377_v41 = vmul.f32 %v15922_v9, %v5922_v0  ;;  %v6601_v57 = vmul.f32 %v15922_v9, %v6146_v39  ;;  %v15965_v11 = vpop.f32.mrb[192].mxu1  ;;  %v5926_v45 = vld [vmem:[#allocation2 + $0x4b8] sm:$0xff] }
 0x2e9   : > { %9741 = vst.msk [vmem:[%s13402_s14 + $0x5bc] sm:$0xf] %vm9373_vm1, %v11018_v20  ;;  %9515 = vst.msk [vmem:[%s13402_s14 + $0x234] sm:$0xf] %vm9373_vm1, %v10792_v4  ;;  %v6829_v22 = vadd.f32 %v15945_v47, %v6374_v13  ;;  %v7053_v59 = vadd.f32 %v15945_v47, %v6598_v10  ;;  %v6375_v28 = vmul.f32 %v15922_v9, %v5920_v60  ;;  %v7279_v30 = vmax.f32 %v6831_v26, 0.0  ;;  %v6149_v13 = vld [vmem:[#allocation2 + $0xbb0] sm:$0xff] }
 0x2ea   : > { %9739 = vst.msk [vmem:[%s13402_s14 + $0x5b4] sm:$0xf] %vm9373_vm1, %v11016_v27  ;;  %v6599_v20 = vmul.f32 %v15922_v9, %v6144_v49  ;;  %v7503_v61 = vmax.f32 %v7055_v14, 0.0  ;;  %v6832_v44 = vadd.f32 %v15945_v47, %v6377_v41  ;;  %v7056_v0 = vadd.f32 %v15945_v47, %v6601_v57  ;;  %17324 = vst [vmem:[#allocation46_spill] sm:$0xff] %v15963_v63  ;;  %v5923_v14 = vld [vmem:[#allocation2 + $0x4a0] sm:$0xff]  ;;  %v15967_v57 = vpop.f32.mrb[193].mxu0 }
 0x2eb   : > { %v7277_v25 = vmax.f32 %v6829_v22, 0.0  ;;  %v7501_v39 = vmax.f32 %v7053_v59, 0.0  ;;  %v6830_v4 = vadd.f32 %v15945_v47, %v6375_v28  ;;  %v10797_v10 = vpack.c.bf16 %v7279_v30, %v7279_v30  ;;  %v6147_v41 = vld [vmem:[#allocation2 + $0xba0] sm:$0xff]  ;;  %17325 = vst [vmem:[#allocation47_spill] sm:$0xff] %v15965_v11  ;;  %17326 = vst [vmem:[#allocation48_spill] sm:$0xff] %v15967_v57  ;;  %v6150_v63 = vld [vmem:[#allocation2 + $0xbb8] sm:$0xff] }
 0x2ec   : > { %v7054_v27 = vadd.f32 %v15945_v47, %v6599_v20  ;;  %v11021_v60 = vpack.c.bf16 %v7503_v61, %v7503_v61  ;;  %v7280_v49 = vmax.f32 %v6832_v44, 0.0  ;;  %v7504_v26 = vmax.f32 %v7056_v0, 0.0  ;;  %v15969_v30 = vpop.f32.mrb[193].mxu1  ;;  %v15971_v61 = vpop.f32.mrb[194].mxu0  ;;  %v5930_v11 = vld [vmem:[#allocation2 + $0x4d8] sm:$0xff] }
 0x2ed   : > { %v10795_v22 = vpack.c.bf16 %v7277_v25, %v7277_v25  ;;  %v11019_v59 = vpack.c.bf16 %v7501_v39, %v7501_v39  ;;  %v7278_v28 = vmax.f32 %v6830_v4, 0.0  ;;  %17327 = vst [vmem:[#allocation49_spill] sm:$0xff] %v15969_v30  ;;  %17328 = vst [vmem:[#allocation50_spill] sm:$0xff] %v15971_v61  ;;  %v6380_v25 = vmul.f32 %v15922_v9, %v5925_v46  ;;  %v5924_v4 = vld [vmem:[#allocation2 + $0x4a8] sm:$0xff]  ;;  %v15979_v57 = vpop.f32.mrb[194].mxu1  ;;  %v15981_v30 = vpop.f32.mrb[195].mxu0 }
 0x2ee   : > { %v7502_v20 = vmax.f32 %v7054_v27, 0.0  ;;  %9520 = vst.msk [vmem:[%s13402_s14 + $0x248] sm:$0xf] %vm9373_vm1, %v10797_v10  ;;  %9744 = vst.msk [vmem:[%s13402_s14 + $0x5c8] sm:$0xf] %vm9373_vm1, %v11021_v60  ;;  %v10798_v44 = vpack.c.bf16 %v7280_v49, %v7280_v49  ;;  %v11022_v0 = vpack.c.bf16 %v7504_v26, %v7504_v26  ;;  %v6604_v39 = vmul.f32 %v15922_v9, %v6149_v13  ;;  %v6148_v27 = vld [vmem:[#allocation2 + $0xba8] sm:$0xff] }
 0x2ef   : > { %17329 = vst [vmem:[#allocation19_spill] sm:$0xff] %v15979_v57  ;;  %17330 = vst [vmem:[#allocation20_spill] sm:$0xff] %v15981_v30  ;;  %v10796_v10 = vpack.c.bf16 %v7278_v28, %v7278_v28  ;;  %v6378_v49 = vmul.f32 %v15922_v9, %v5923_v14  ;;  %v6602_v46 = vmul.f32 %v15922_v9, %v6147_v41  ;;  %v15989_v26 = vpop.f32.mrb[195].mxu1  ;;  %v16011_v57 = vpop.f32.mrb[196].mxu0 }
 0x2f0   : > { %9518 = vst.msk [vmem:[%s13402_s14 + $0x240] sm:$0xf] %vm9373_vm1, %v10795_v22  ;;  %9742 = vst.msk [vmem:[%s13402_s14 + $0x5c0] sm:$0xf] %vm9373_vm1, %v11019_v59  ;;  %v11020_v60 = vpack.c.bf16 %v7502_v20, %v7502_v20  ;;  %v6835_v13 = vadd.f32 %v15945_v47, %v6380_v25  ;;  %v7059_v30 = vadd.f32 %v15945_v47, %v6604_v39  ;;  %v16013_v61 = vpop.f32.mrb[196].mxu1 }
 0x2f1   : > { %17331 = vst [vmem:[#allocation21_spill] sm:$0xff] %v15989_v26  ;;  %9521 = vst.msk [vmem:[%s13402_s14 + $0x24c] sm:$0xf] %vm9373_vm1, %v10798_v44  ;;  %v6381_v22 = vmul.f32 %v15922_v9, %v5926_v45  ;;  %v6605_v59 = vmul.f32 %v15922_v9, %v6150_v63  ;;  %v6833_v14 = vadd.f32 %v15945_v47, %v6378_v49  ;;  %v5929_v26 = vld [vmem:[#allocation2 + $0x4d0] sm:$0xff] }
 0x2f2   : > { %9745 = vst.msk [vmem:[%s13402_s14 + $0x5cc] sm:$0xf] %vm9373_vm1, %v11022_v0  ;;  %9519 = vst.msk [vmem:[%s13402_s14 + $0x244] sm:$0xf] %vm9373_vm1, %v10796_v10  ;;  %v7057_v41 = vadd.f32 %v15945_v47, %v6602_v46  ;;  %v6379_v28 = vmul.f32 %v15922_v9, %v5924_v4  ;;  %v6603_v20 = vmul.f32 %v15922_v9, %v6148_v27  ;;  %v7283_v44 = vmax.f32 %v6835_v13, 0.0  ;;  %v6153_v49 = vld [vmem:[#allocation2 + $0xbd0] sm:$0xff] }
 0x2f3   : > { %9743 = vst.msk [vmem:[%s13402_s14 + $0x5c4] sm:$0xf] %vm9373_vm1, %v11020_v60  ;;  %v7507_v0 = vmax.f32 %v7059_v30, 0.0  ;;  %v6836_v25 = vadd.f32 %v15945_v47, %v6381_v22  ;;  %v7060_v45 = vadd.f32 %v15945_v47, %v6605_v59  ;;  %v7281_v39 = vmax.f32 %v6833_v14, 0.0  ;;  %17332 = vst [vmem:[#allocation22_spill] sm:$0xff] %v16011_v57  ;;  %v5927_v13 = vld [vmem:[#allocation2 + $0x4c0] sm:$0xff] }
 0x2f4   : > { %v7505_v63 = vmax.f32 %v7057_v41, 0.0  ;;  %v6834_v10 = vadd.f32 %v15945_v47, %v6379_v28  ;;  %v7058_v60 = vadd.f32 %v15945_v47, %v6603_v20  ;;  %v10801_v46 = vpack.c.bf16 %v7283_v44, %v7283_v44  ;;  %v6151_v22 = vld [vmem:[#allocation2 + $0xbc0] sm:$0xff]  ;;  %17333 = vst [vmem:[#allocation58_spill] sm:$0xff] %v16013_v61  ;;  %v16015_v59 = vpop.f32.mrb[197].mxu0  ;;  %v6154_v57 = vld [vmem:[#allocation2 + $0xbd8] sm:$0xff]  ;;  %v16017_v44 = vpop.f32.mrb[197].mxu1 }
 0x2f5   : > { %v11025_v4 = vpack.c.bf16 %v7507_v0, %v7507_v0  ;;  %v7284_v27 = vmax.f32 %v6836_v25, 0.0  ;;  %v7508_v30 = vmax.f32 %v7060_v45, 0.0  ;;  %17334 = vst [vmem:[#allocation59_spill] sm:$0xff] %v16015_v59  ;;  %v10799_v14 = vpack.c.bf16 %v7281_v39, %v7281_v39  ;;  %17335 = vst [vmem:[#allocation60_spill] sm:$0xff] %v16017_v44  ;;  %v16019_v0 = vpop.f32.mrb[198].mxu0  ;;  %v16027_v59 = vpop.f32.mrb[198].mxu1 }
 0x2f6   : > { %v11023_v41 = vpack.c.bf16 %v7505_v63, %v7505_v63  ;;  %v7282_v28 = vmax.f32 %v6834_v10, 0.0  ;;  %v7506_v20 = vmax.f32 %v7058_v60, 0.0  ;;  %17336 = vst [vmem:[#allocation61_spill] sm:$0xff] %v16019_v0  ;;  %9524 = vst.msk [vmem:[%s13402_s14 + $0x258] sm:$0xf] %vm9373_vm1, %v10801_v46  ;;  %v6384_v39 = vmul.f32 %v15922_v9, %v5929_v26  ;;  %v5928_v10 = vld [vmem:[#allocation2 + $0x4c8] sm:$0xff] }
 0x2f7   : > { %9748 = vst.msk [vmem:[%s13402_s14 + $0x5d8] sm:$0xf] %vm9373_vm1, %v11025_v4  ;;  %v10802_v25 = vpack.c.bf16 %v7284_v27, %v7284_v27  ;;  %v11026_v45 = vpack.c.bf16 %v7508_v30, %v7508_v30  ;;  %v6608_v63 = vmul.f32 %v15922_v9, %v6153_v49  ;;  %v6152_v60 = vld [vmem:[#allocation2 + $0xbc8] sm:$0xff]  ;;  %17337 = vst [vmem:[#allocation62_spill] sm:$0xff] %v16027_v59  ;;  %v16029_v44 = vpop.f32.mrb[199].mxu0  ;;  %v16037_v30 = vpop.f32.mrb[199].mxu1 }
 0x2f8   : > { %17338 = vst [vmem:[#allocation63_spill] sm:$0xff] %v16029_v44  ;;  %9522 = vst.msk [vmem:[%s13402_s14 + $0x250] sm:$0xf] %vm9373_vm1, %v10799_v14  ;;  %v10800_v46 = vpack.c.bf16 %v7282_v28, %v7282_v28  ;;  %v11024_v4 = vpack.c.bf16 %v7506_v20, %v7506_v20  ;;  %v6382_v27 = vmul.f32 %v15922_v9, %v5927_v13  ;;  %v905_v0 = vld [vmem:[#allocation2 + $0x4f8] sm:$0xff]  ;;  %v903_v61 = vld [vmem:[#allocation2 + $0x4e8] sm:$0xff]  ;;  %v16059_v23 = vpop.f32.mrb[200].mxu0 }
 0x2f9   : > { %9746 = vst.msk [vmem:[%s13402_s14 + $0x5d0] sm:$0xf] %vm9373_vm1, %v11023_v41  ;;  %v6606_v26 = vmul.f32 %v15922_v9, %v6151_v22  ;;  %17339 = vst [vmem:[#allocation64_spill] sm:$0xff] %v16037_v30  ;;  %v6839_v49 = vadd.f32 %v15945_v47, %v6384_v39  ;;  %v7063_v44 = vadd.f32 %v15945_v47, %v6608_v63  ;;  %v902_v30 = vld [vmem:[#allocation2 + $0x4e0] sm:$0xff]  ;;  %v16061_v52 = vpop.f32.mrb[200].mxu1 }
 0x2fa   : > { %9525 = vst.msk [vmem:[%s13402_s14 + $0x25c] sm:$0xf] %vm9373_vm1, %v10802_v25  ;;  %9749 = vst.msk [vmem:[%s13402_s14 + $0x5dc] sm:$0xf] %vm9373_vm1, %v11026_v45  ;;  %v6385_v14 = vmul.f32 %v15922_v9, %v5930_v11  ;;  %v6609_v41 = vmul.f32 %v15922_v9, %v6154_v57  ;;  %v6837_v13 = vadd.f32 %v15945_v47, %v6382_v27  ;;  %v904_v25 = vld [vmem:[#allocation2 + $0x4f0] sm:$0xff] }
 0x2fb   : > { %9523 = vst.msk [vmem:[%s13402_s14 + $0x254] sm:$0xf] %vm9373_vm1, %v10800_v46  ;;  %9747 = vst.msk [vmem:[%s13402_s14 + $0x5d4] sm:$0xf] %vm9373_vm1, %v11024_v4  ;;  %v7061_v22 = vadd.f32 %v15945_v47, %v6606_v26  ;;  %v6383_v28 = vmul.f32 %v15922_v9, %v5928_v10  ;;  %v6607_v20 = vmul.f32 %v15922_v9, %v6152_v60  ;;  %v7287_v45 = vmax.f32 %v6839_v49, 0.0  ;;  %v1128_v57 = vld [vmem:[#allocation2 + $0xbf0] sm:$0xff] }
 0x2fc   : > { %v7511_v39 = vmax.f32 %v7063_v44, 0.0  ;;  %v6840_v63 = vadd.f32 %v15945_v47, %v6385_v14  ;;  %v7064_v11 = vadd.f32 %v15945_v47, %v6609_v41  ;;  %v1126_v46 = vld [vmem:[#allocation2 + $0xbe0] sm:$0xff]  ;;  %v7285_v59 = vmax.f32 %v6837_v13, 0.0  ;;  %v1129_v10 = vld [vmem:[#allocation2 + $0xbf8] sm:$0xff]  ;;  %v1127_v60 = vld [vmem:[#allocation2 + $0xbe8] sm:$0xff]  ;;  %17340 = vst [vmem:[#allocation65_spill] sm:$0xff] %v16059_v23 }
 0x2fd   : > { %v7509_v4 = vmax.f32 %v7061_v22, 0.0  ;;  %v6838_v27 = vadd.f32 %v15945_v47, %v6383_v28  ;;  %v7062_v26 = vadd.f32 %v15945_v47, %v6607_v20  ;;  %v10805_v44 = vpack.c.bf16 %v7287_v45, %v7287_v45  ;;  %v908_v41 = vld [vmem:[#allocation2 + $0x510] sm:$0xff]  ;;  %v906_v13 = vld [vmem:[#allocation2 + $0x500] sm:$0xff]  ;;  %17341 = vst [vmem:[#allocation66_spill] sm:$0xff] %v16061_v52  ;;  %v16063_v28 = vpop.f32.mrb[201].mxu0  ;;  %v1133_v45 = vld [vmem:[#allocation2 + $0xc18] sm:$0xff] }
 0x2fe   : > { %v11029_v49 = vpack.c.bf16 %v7511_v39, %v7511_v39  ;;  %v7288_v14 = vmax.f32 %v6840_v63, 0.0  ;;  %v7512_v36 = vmax.f32 %v7064_v11, 0.0  ;;  %v1130_v22 = vld [vmem:[#allocation2 + $0xc00] sm:$0xff]  ;;  %17342 = vst [vmem:[#allocation67_spill] sm:$0xff] %v16063_v28  ;;  %v10803_v20 = vpack.c.bf16 %v7285_v59, %v7285_v59  ;;  %v907_v39 = vld [vmem:[#allocation2 + $0x508] sm:$0xff]  ;;  %v16065_v63 = vpop.f32.mrb[201].mxu1 }
 0x2ff   : > { %v11027_v6 = vpack.c.bf16 %v7509_v4, %v7509_v4  ;;  %v7286_v29 = vmax.f32 %v6838_v27, 0.0  ;;  %v7510_v15 = vmax.f32 %v7062_v26, 0.0  ;;  %17343 = vst [vmem:[#allocation68_spill] sm:$0xff] %v16065_v63  ;;  %v16067_v11 = vpop.f32.mrb[202].mxu0  ;;  %9528 = vst.msk [vmem:[%s13402_s14 + $0x268] sm:$0xf] %vm9373_vm1, %v10805_v44  ;;  %v5033_v59 = vadd.f32 %v15463_v24, %v904_v25 }
 0x300   : > { %9752 = vst.msk [vmem:[%s13402_s14 + $0x5e8] sm:$0xf] %vm9373_vm1, %v11029_v49  ;;  %v10806_v52 = vpack.c.bf16 %v7288_v14, %v7288_v14  ;;  %v11030_v23 = vpack.c.bf16 %v7512_v36, %v7512_v36  ;;  %v5257_v4 = vadd.f32 %v15478_v37, %v1128_v57  ;;  %v1131_v27 = vld [vmem:[#allocation2 + $0xc08] sm:$0xff]  ;;  %v912_v26 = vld [vmem:[#allocation2 + $0x530] sm:$0xff]  ;;  %v16075_v43 = vpop.f32.mrb[202].mxu1  ;;  %v16077_v63 = vpop.f32.mrb[203].mxu0  ;;  %v5031_v36 = vadd.f32 %v15480_v5, %v902_v30 }
 0x301   : > { %v1136_v28 = vld [vmem:[#allocation2 + $0xc30] sm:$0xff]  ;;  %9526 = vst.msk [vmem:[%s13402_s14 + $0x260] sm:$0xf] %vm9373_vm1, %v10803_v20  ;;  %9750 = vst.msk [vmem:[%s13402_s14 + $0x5e0] sm:$0xf] %vm9373_vm1, %v11027_v6  ;;  %v10804_v44 = vpack.c.bf16 %v7286_v29, %v7286_v29  ;;  %v11028_v49 = vpack.c.bf16 %v7510_v15, %v7510_v15  ;;  %v5255_v24 = vadd.f32 %v15490_v35, %v1126_v46  ;;  %v910_v37 = vld [vmem:[#allocation2 + $0x520] sm:$0xff] }
 0x302   : > { %v1134_v25 = vld [vmem:[#allocation2 + $0xc20] sm:$0xff]  ;;  %v913_v57 = vld [vmem:[#allocation2 + $0x538] sm:$0xff]  ;;  %v16085_v14 = vpop.f32.mrb[203].mxu1  ;;  %9529 = vst.msk [vmem:[%s13402_s14 + $0x26c] sm:$0xf] %vm9373_vm1, %v10806_v52  ;;  %v5034_v15 = vadd.f32 %v15492_v12, %v905_v0  ;;  %v5258_v5 = vadd.f32 %v15505_v21, %v1129_v10  ;;  %v5032_v35 = vadd.f32 %v15507_v53, %v903_v61  ;;  %v5256_v29 = vadd.f32 %v15515_v50, %v1127_v60  ;;  %v911_v30 = vld [vmem:[#allocation2 + $0x528] sm:$0xff] }
 0x303   : > { %9753 = vst.msk [vmem:[%s13402_s14 + $0x5ec] sm:$0xf] %vm9373_vm1, %v11030_v23  ;;  %v1137_v6 = vld [vmem:[#allocation2 + $0xc38] sm:$0xff]  ;;  %v1135_v46 = vld [vmem:[#allocation2 + $0xc28] sm:$0xff]  ;;  %9527 = vst.msk [vmem:[%s13402_s14 + $0x264] sm:$0xf] %vm9373_vm1, %v10804_v44  ;;  %v5037_v52 = vadd.f32 %v15521_v62, %v908_v41  ;;  %v5261_v12 = vadd.f32 %v15529_v16, %v1132_v18  ;;  %v5035_v21 = vadd.f32 %v15531_v19, %v906_v13 }
 0x304   : > { %5482 = vst.msk [vmem:[#allocation2 + $0x4f0] sm:$0xff] %vm297_vm0, %v5033_v59  ;;  %5706 = vst.msk [vmem:[#allocation2 + $0xbf0] sm:$0xff] %vm297_vm0, %v5257_v4  ;;  %v5259_v53 = vadd.f32 %v15539_v7, %v1130_v22  ;;  %v916_v50 = vld [vmem:[#allocation2 + $0x550] sm:$0xff]  ;;  %v914_v61 = vld [vmem:[#allocation2 + $0x540] sm:$0xff]  ;;  %v5038_v0 = vadd.f32 %v15541_v1, %v909_v31  ;;  %v5262_v62 = vadd.f32 %v15551_v55, %v1133_v45  ;;  %v16123_v44 = vpop.f32.mrb[204].mxu0 }
 0x305   : > { %9751 = vst.msk [vmem:[%s13402_s14 + $0x5e4] sm:$0xf] %vm9373_vm1, %v11028_v49  ;;  %v1140_v23 = vld [vmem:[#allocation2 + $0xc50] sm:$0xff]  ;;  %v17344_v16 = vld [vmem:[#allocation10_spill] sm:$0xff]  ;;  %v917_v60 = vld [vmem:[#allocation2 + $0x558] sm:$0xff] }
 0x306   : > { %5480 = vst.msk [vmem:[#allocation2 + $0x4e0] sm:$0xff] %vm297_vm0, %v5031_v36  ;;  %5704 = vst.msk [vmem:[#allocation2 + $0xbe0] sm:$0xff] %vm297_vm0, %v5255_v24  ;;  %v5036_v18 = vadd.f32 %v17344_v16, %v907_v39  ;;  %v17345_v19 = vld [vmem:[#allocation6_spill] sm:$0xff]  ;;  %v1141_v41 = vld [vmem:[#allocation2 + $0xc58] sm:$0xff] }
 0x307   : > { %5483 = vst.msk [vmem:[#allocation2 + $0x4f8] sm:$0xff] %vm297_vm0, %v5034_v15  ;;  %5707 = vst.msk [vmem:[#allocation2 + $0xbf8] sm:$0xff] %vm297_vm0, %v5258_v5  ;;  %v5260_v10 = vadd.f32 %v17345_v19, %v1131_v27  ;;  %v1138_v7 = vld [vmem:[#allocation2 + $0xc40] sm:$0xff]  ;;  %v17346_v13 = vld [vmem:[#allocation7_spill] sm:$0xff] }
 0x308   : > { %5481 = vst.msk [vmem:[#allocation2 + $0x4e8] sm:$0xff] %vm297_vm0, %v5032_v35  ;;  %5705 = vst.msk [vmem:[#allocation2 + $0xbe8] sm:$0xff] %vm297_vm0, %v5256_v29  ;;  %v5041_v22 = vadd.f32 %v17346_v13, %v912_v26  ;;  %v17347_v1 = vld [vmem:[#allocation11_spill] sm:$0xff]  ;;  %v17348_v55 = vld [vmem:[#allocation12_spill] sm:$0xff] }
 0x309   : > { %5486 = vst.msk [vmem:[#allocation2 + $0x510] sm:$0xff] %vm297_vm0, %v5037_v52  ;;  %5710 = vst.msk [vmem:[#allocation2 + $0xc10] sm:$0xff] %vm297_vm0, %v5261_v12  ;;  %v5265_v31 = vadd.f32 %v17347_v1, %v1136_v28  ;;  %v5039_v20 = vadd.f32 %v17348_v55, %v910_v37  ;;  %v17349_v45 = vld [vmem:[#allocation13_spill] sm:$0xff]  ;;  %v915_v59 = vld [vmem:[#allocation2 + $0x548] sm:$0xff]  ;;  %v16133_v52 = vpop.f32.mrb[204].mxu1  ;;  %v16135_v12 = vpop.f32.mrb[205].mxu0 }
 0x30a   : > { %5484 = vst.msk [vmem:[#allocation2 + $0x500] sm:$0xff] %vm297_vm0, %v5035_v21  ;;  %5708 = vst.msk [vmem:[#allocation2 + $0xc00] sm:$0xff] %vm297_vm0, %v5259_v53  ;;  %v5263_v39 = vadd.f32 %v17349_v45, %v1134_v25  ;;  %v1139_v4 = vld [vmem:[#allocation2 + $0xc48] sm:$0xff]  ;;  %v920_v27 = vld [vmem:[#allocation2 + $0x570] sm:$0xff]  ;;  %v16145_v19 = vpop.f32.mrb[205].mxu1 }
 0x30b   : > { %5487 = vst.msk [vmem:[#allocation2 + $0x518] sm:$0xff] %vm297_vm0, %v5038_v0  ;;  %5711 = vst.msk [vmem:[#allocation2 + $0xc18] sm:$0xff] %vm297_vm0, %v5262_v62  ;;  %v17350_v26 = vld [vmem:[#allocation14_spill] sm:$0xff]  ;;  %v17351_v28 = vld [vmem:[#allocation8_spill] sm:$0xff]  ;;  %v16157_v45 = vpop.f32.mrb[206].mxu1 }
 0x30c   : > { %5485 = vst.msk [vmem:[#allocation2 + $0x508] sm:$0xff] %vm297_vm0, %v5036_v18  ;;  %5709 = vst.msk [vmem:[#allocation2 + $0xc08] sm:$0xff] %vm297_vm0, %v5260_v10  ;;  %v5042_v49 = vadd.f32 %v17350_v26, %v913_v57  ;;  %v5266_v36 = vadd.f32 %v17351_v28, %v1137_v6  ;;  %v17352_v24 = vld [vmem:[#allocation17_spill] sm:$0xff]  ;;  %v17353_v25 = vld [vmem:[#allocation15_spill] sm:$0xff]  ;;  %v16147_v10 = vpop.f32.mrb[206].mxu0 }
 0x30d   : > { %v5040_v37 = vadd.f32 %v17352_v24, %v911_v30  ;;  %v5264_v15 = vadd.f32 %v17353_v25, %v1135_v46  ;;  %v1144_v5 = vld [vmem:[#allocation2 + $0xc70] sm:$0xff]  ;;  %v918_v35 = vld [vmem:[#allocation2 + $0x560] sm:$0xff]  ;;  %5490 = vst.msk [vmem:[#allocation2 + $0x530] sm:$0xff] %vm297_vm0, %v5041_v22  ;;  %5714 = vst.msk [vmem:[#allocation2 + $0xc30] sm:$0xff] %vm297_vm0, %v5265_v31  ;;  %v16169_v25 = vpop.f32.mrb[207].mxu1 }
 0x30e   : > { %v1142_v29 = vld [vmem:[#allocation2 + $0xc60] sm:$0xff]  ;;  %5488 = vst.msk [vmem:[#allocation2 + $0x520] sm:$0xff] %vm297_vm0, %v5039_v20  ;;  %5712 = vst.msk [vmem:[#allocation2 + $0xc20] sm:$0xff] %vm297_vm0, %v5263_v39  ;;  %v17354_v57 = vld [vmem:[#allocation16_spill] sm:$0xff]  ;;  %v16159_v39 = vpop.f32.mrb[207].mxu0 }
 0x30f   : > { %v5045_v6 = vadd.f32 %v17354_v57, %v916_v50  ;;  %v17355_v30 = vld [vmem:[#allocation18_spill] sm:$0xff]  ;;  %v17356_v46 = vld [vmem:[#allocation9_spill] sm:$0xff]  ;;  %v17357_v0 = vld [vmem:[#allocation23_spill] sm:$0xff]  ;;  %5491 = vst.msk [vmem:[#allocation2 + $0x538] sm:$0xff] %vm297_vm0, %v5042_v49 }
 0x310   : > { %v5269_v21 = vadd.f32 %v17355_v30, %v1140_v23  ;;  %v5043_v53 = vadd.f32 %v17356_v46, %v914_v61  ;;  %v5267_v62 = vadd.f32 %v17357_v0, %v1138_v7  ;;  %v921_v16 = vld [vmem:[#allocation2 + $0x578] sm:$0xff]  ;;  %5715 = vst.msk [vmem:[#allocation2 + $0xc38] sm:$0xff] %vm297_vm0, %v5266_v36  ;;  %5489 = vst.msk [vmem:[#allocation2 + $0x528] sm:$0xff] %vm297_vm0, %v5040_v37  ;;  %v17358_v50 = vld [vmem:[#allocation38_spill] sm:$0xff] }
 0x311   : > { %v1145_v18 = vld [vmem:[#allocation2 + $0xc78] sm:$0xff]  ;;  %5713 = vst.msk [vmem:[#allocation2 + $0xc28] sm:$0xff] %vm297_vm0, %v5264_v15  ;;  %v5046_v23 = vadd.f32 %v17358_v50, %v917_v60  ;;  %v17359_v13 = vld [vmem:[#allocation39_spill] sm:$0xff]  ;;  %v17360_v22 = vld [vmem:[#allocation40_spill] sm:$0xff] }
 0x312   : > { %v5270_v61 = vadd.f32 %v17359_v13, %v1141_v41  ;;  %v5044_v7 = vadd.f32 %v17360_v22, %v915_v59  ;;  %v17361_v1 = vld [vmem:[#allocation41_spill] sm:$0xff]  ;;  %v919_v55 = vld [vmem:[#allocation2 + $0x568] sm:$0xff]  ;;  %v5933_v26 = vld [vmem:[#allocation2 + $0x4f0] sm:$0xff]  ;;  %5494 = vst.msk [vmem:[#allocation2 + $0x550] sm:$0xff] %vm297_vm0, %v5045_v6 }
 0x313   : > { %v5268_v31 = vadd.f32 %v17361_v1, %v1139_v4  ;;  %v1143_v20 = vld [vmem:[#allocation2 + $0xc68] sm:$0xff]  ;;  %v6157_v49 = vld [vmem:[#allocation2 + $0xbf0] sm:$0xff]  ;;  %5718 = vst.msk [vmem:[#allocation2 + $0xc50] sm:$0xff] %vm297_vm0, %v5269_v21  ;;  %5492 = vst.msk [vmem:[#allocation2 + $0x540] sm:$0xff] %vm297_vm0, %v5043_v53  ;;  %v6388_v15 = vmul.f32 %v15922_v9, %v5933_v26 }
 0x314   : > { %5716 = vst.msk [vmem:[#allocation2 + $0xc40] sm:$0xff] %vm297_vm0, %v5267_v62  ;;  %v17362_v60 = vld [vmem:[#allocation42_spill] sm:$0xff]  ;;  %v17363_v59 = vld [vmem:[#allocation43_spill] sm:$0xff]  ;;  %v17365_v24 = vld [vmem:[#allocation52_spill] sm:$0xff]  ;;  %v6612_v57 = vmul.f32 %v15922_v9, %v6157_v49  ;;  %v16199_v49 = vpop.f32.mrb[208].mxu0 }
 0x315   : > { %v5049_v41 = vadd.f32 %v17362_v60, %v920_v27  ;;  %v5273_v4 = vadd.f32 %v17363_v59, %v1144_v5  ;;  %v17364_v28 = vld [vmem:[#allocation51_spill] sm:$0xff]  ;;  %v5271_v37 = vadd.f32 %v17365_v24, %v1142_v29  ;;  %v5931_v6 = vld [vmem:[#allocation2 + $0x4e0] sm:$0xff]  ;;  %5495 = vst.msk [vmem:[#allocation2 + $0x558] sm:$0xff] %vm297_vm0, %v5046_v23  ;;  %5719 = vst.msk [vmem:[#allocation2 + $0xc58] sm:$0xff] %vm297_vm0, %v5270_v61 }
 0x316   : > { %v5047_v36 = vadd.f32 %v17364_v28, %v918_v35  ;;  %v6155_v30 = vld [vmem:[#allocation2 + $0xbe0] sm:$0xff]  ;;  %5493 = vst.msk [vmem:[#allocation2 + $0x548] sm:$0xff] %vm297_vm0, %v5044_v7  ;;  %5717 = vst.msk [vmem:[#allocation2 + $0xc48] sm:$0xff] %vm297_vm0, %v5268_v31  ;;  %v17366_v27 = vld [vmem:[#allocation53_spill] sm:$0xff]  ;;  %v6386_v21 = vmul.f32 %v15922_v9, %v5931_v6  ;;  %v7067_v61 = vadd.f32 %v15945_v47, %v6612_v57  ;;  %v16203_v28 = vpop.f32.mrb[208].mxu1 }
 0x317   : > { %v5050_v5 = vadd.f32 %v17366_v27, %v921_v16  ;;  %v17367_v35 = vld [vmem:[#allocation54_spill] sm:$0xff]  ;;  %v6610_v46 = vmul.f32 %v15922_v9, %v6155_v30  ;;  %v5934_v53 = vld [vmem:[#allocation2 + $0x4f8] sm:$0xff]  ;;  %v5932_v62 = vld [vmem:[#allocation2 + $0x4e8] sm:$0xff]  ;;  %5498 = vst.msk [vmem:[#allocation2 + $0x570] sm:$0xff] %vm297_vm0, %v5049_v41  ;;  %v16207_v30 = vpop.f32.mrb[209].mxu0 }
 0x318   : > { %v5274_v29 = vadd.f32 %v17367_v35, %v1145_v18  ;;  %v6158_v0 = vld [vmem:[#allocation2 + $0xbf8] sm:$0xff]  ;;  %5722 = vst.msk [vmem:[#allocation2 + $0xc70] sm:$0xff] %vm297_vm0, %v5273_v4  ;;  %5496 = vst.msk [vmem:[#allocation2 + $0x560] sm:$0xff] %vm297_vm0, %v5047_v36  ;;  %v17368_v50 = vld [vmem:[#allocation55_spill] sm:$0xff]  ;;  %v6843_v18 = vadd.f32 %v15945_v47, %v6388_v15  ;;  %v6389_v22 = vmul.f32 %v15922_v9, %v5934_v53  ;;  %v7515_v41 = vmax.f32 %v7067_v61, 0.0  ;;  %v16209_v53 = vpop.f32.mrb[209].mxu1 }
 0x319   : > { %5720 = vst.msk [vmem:[#allocation2 + $0xc60] sm:$0xff] %vm297_vm0, %v5271_v37  ;;  %v5048_v23 = vadd.f32 %v17368_v50, %v919_v55  ;;  %v17369_v16 = vld [vmem:[#allocation56_spill] sm:$0xff]  ;;  %v6613_v7 = vmul.f32 %v15922_v9, %v6158_v0  ;;  %v6156_v1 = vld [vmem:[#allocation2 + $0xbe8] sm:$0xff]  ;;  %5499 = vst.msk [vmem:[#allocation2 + $0x578] sm:$0xff] %vm297_vm0, %v5050_v5  ;;  %v6841_v31 = vadd.f32 %v15945_v47, %v6386_v21 }
 0x31a   : > { %v5272_v13 = vadd.f32 %v17369_v16, %v1143_v20  ;;  %5723 = vst.msk [vmem:[#allocation2 + $0xc78] sm:$0xff] %vm297_vm0, %v5274_v29  ;;  %v7065_v26 = vadd.f32 %v15945_v47, %v6610_v46  ;;  %v6387_v55 = vmul.f32 %v15922_v9, %v5932_v62  ;;  %v6611_v20 = vmul.f32 %v15922_v9, %v6156_v1  ;;  %v5937_v57 = vld [vmem:[#allocation2 + $0x510] sm:$0xff]  ;;  %v5935_v21 = vld [vmem:[#allocation2 + $0x500] sm:$0xff]  ;;  %v5938_v16 = vld [vmem:[#allocation2 + $0x518] sm:$0xff] }
 0x31b   : > { %5497 = vst.msk [vmem:[#allocation2 + $0x568] sm:$0xff] %vm297_vm0, %v5048_v23  ;;  %v7291_v60 = vmax.f32 %v6843_v18, 0.0  ;;  %v6844_v59 = vadd.f32 %v15945_v47, %v6389_v22  ;;  %v7068_v4 = vadd.f32 %v15945_v47, %v6613_v7  ;;  %v7289_v36 = vmax.f32 %v6841_v31, 0.0  ;;  %v6161_v6 = vld [vmem:[#allocation2 + $0xc10] sm:$0xff]  ;;  %17370 = vst [vmem:[#allocation10_spill] sm:$0xff] %v16207_v30  ;;  %v6159_v46 = vld [vmem:[#allocation2 + $0xc00] sm:$0xff] }
 0x31c   : > { %5721 = vst.msk [vmem:[#allocation2 + $0xc68] sm:$0xff] %vm297_vm0, %v5272_v13  ;;  %v7513_v24 = vmax.f32 %v7065_v26, 0.0  ;;  %v6842_v37 = vadd.f32 %v15945_v47, %v6387_v55  ;;  %v7066_v15 = vadd.f32 %v15945_v47, %v6611_v20  ;;  %v11033_v5 = vpack.c.bf16 %v7515_v41, %v7515_v41  ;;  %17371 = vst [vmem:[#allocation6_spill] sm:$0xff] %v16209_v53  ;;  %v6162_v13 = vld [vmem:[#allocation2 + $0xc18] sm:$0xff]  ;;  %v16211_v18 = vpop.f32.mrb[210].mxu0  ;;  %v5936_v31 = vld [vmem:[#allocation2 + $0x508] sm:$0xff] }
 0x31d   : > { %v10809_v27 = vpack.c.bf16 %v7291_v60, %v7291_v60  ;;  %v7292_v35 = vmax.f32 %v6844_v59, 0.0  ;;  %v7516_v29 = vmax.f32 %v7068_v4, 0.0  ;;  %v10807_v0 = vpack.c.bf16 %v7289_v36, %v7289_v36  ;;  %17372 = vst [vmem:[#allocation7_spill] sm:$0xff] %v16211_v18  ;;  %v6160_v26 = vld [vmem:[#allocation2 + $0xc08] sm:$0xff]  ;;  %v16219_v55 = vpop.f32.mrb[210].mxu1  ;;  %v16221_v20 = vpop.f32.mrb[211].mxu0 }
 0x31e   : > { %v11031_v62 = vpack.c.bf16 %v7513_v24, %v7513_v24  ;;  %v7290_v50 = vmax.f32 %v6842_v37, 0.0  ;;  %v7514_v23 = vmax.f32 %v7066_v15, 0.0  ;;  %9756 = vst.msk [vmem:[%s13402_s14 + $0x5f8] sm:$0xf] %vm9373_vm1, %v11033_v5  ;;  %v6392_v7 = vmul.f32 %v15922_v9, %v5937_v57  ;;  %17373 = vst [vmem:[#allocation11_spill] sm:$0xff] %v16219_v55  ;;  %v16229_v36 = vpop.f32.mrb[211].mxu1 }
 0x31f   : > { %9532 = vst.msk [vmem:[%s13402_s14 + $0x278] sm:$0xf] %vm9373_vm1, %v10809_v27  ;;  %v10810_v61 = vpack.c.bf16 %v7292_v35, %v7292_v35  ;;  %v11034_v22 = vpack.c.bf16 %v7516_v29, %v7516_v29  ;;  %v6616_v1 = vmul.f32 %v15922_v9, %v6161_v6  ;;  %17374 = vst [vmem:[#allocation12_spill] sm:$0xff] %v16221_v20  ;;  %v16247_v29 = vpop.f32.mrb[212].mxu0  ;;  %v929_v20 = vld [vmem:[#allocation2 + $0x5b8] sm:$0xff]  ;;  %v927_v18 = vld [vmem:[#allocation2 + $0x5a8] sm:$0xff] }
 0x320   : > { %9530 = vst.msk [vmem:[%s13402_s14 + $0x270] sm:$0xf] %vm9373_vm1, %v10807_v0  ;;  %9754 = vst.msk [vmem:[%s13402_s14 + $0x5f0] sm:$0xf] %vm9373_vm1, %v11031_v62  ;;  %v10808_v60 = vpack.c.bf16 %v7290_v50, %v7290_v50  ;;  %v11032_v41 = vpack.c.bf16 %v7514_v23, %v7514_v23  ;;  %v6390_v59 = vmul.f32 %v15922_v9, %v5935_v21  ;;  %v16251_v50 = vpop.f32.mrb[212].mxu1  ;;  %v1153_v55 = vld [vmem:[#allocation2 + $0xcb8] sm:$0xff] }
 0x321   : > { %v6614_v4 = vmul.f32 %v15922_v9, %v6159_v46  ;;  %17375 = vst [vmem:[#allocation13_spill] sm:$0xff] %v16229_v36  ;;  %9533 = vst.msk [vmem:[%s13402_s14 + $0x27c] sm:$0xf] %vm9373_vm1, %v10810_v61  ;;  %v6847_v24 = vadd.f32 %v15945_v47, %v6392_v7  ;;  %v7071_v37 = vadd.f32 %v15945_v47, %v6616_v1  ;;  %v6165_v7 = vld [vmem:[#allocation2 + $0xc30] sm:$0xff]  ;;  %v16255_v1 = vpop.f32.mrb[213].mxu0  ;;  %v1150_v36 = vld [vmem:[#allocation2 + $0xca0] sm:$0xff] }
 0x322   : > { %9757 = vst.msk [vmem:[%s13402_s14 + $0x5fc] sm:$0xf] %vm9373_vm1, %v11034_v22  ;;  %v6393_v15 = vmul.f32 %v15922_v9, %v5938_v16  ;;  %v6617_v57 = vmul.f32 %v15922_v9, %v6162_v13  ;;  %9531 = vst.msk [vmem:[%s13402_s14 + $0x274] sm:$0xf] %vm9373_vm1, %v10808_v60  ;;  %v6845_v6 = vadd.f32 %v15945_v47, %v6390_v59  ;;  %v5941_v22 = vld [vmem:[#allocation2 + $0x530] sm:$0xff]  ;;  %v1151_v53 = vld [vmem:[#allocation2 + $0xca8] sm:$0xff] }
 0x323   : > { %9755 = vst.msk [vmem:[%s13402_s14 + $0x5f4] sm:$0xf] %vm9373_vm1, %v11032_v41  ;;  %v7069_v27 = vadd.f32 %v15945_v47, %v6614_v4  ;;  %v6391_v5 = vmul.f32 %v15922_v9, %v5936_v31  ;;  %v6615_v35 = vmul.f32 %v15922_v9, %v6160_v26  ;;  %17376 = vst [vmem:[#allocation14_spill] sm:$0xff] %v16247_v29  ;;  %v7295_v21 = vmax.f32 %v6847_v24, 0.0  ;;  %v16257_v31 = vpop.f32.mrb[213].mxu1  ;;  %v5939_v4 = vld [vmem:[#allocation2 + $0x520] sm:$0xff] }
 0x324   : > { %v7519_v46 = vmax.f32 %v7071_v37, 0.0  ;;  %v6848_v0 = vadd.f32 %v15945_v47, %v6393_v15  ;;  %v7072_v62 = vadd.f32 %v15945_v47, %v6617_v57  ;;  %17377 = vst [vmem:[#allocation8_spill] sm:$0xff] %v16251_v50  ;;  %v7293_v23 = vmax.f32 %v6845_v6, 0.0  ;;  %17378 = vst [vmem:[#allocation17_spill] sm:$0xff] %v16255_v1  ;;  %v6163_v24 = vld [vmem:[#allocation2 + $0xc20] sm:$0xff]  ;;  %v16259_v37 = vpop.f32.mrb[214].mxu0 }
 0x325   : > { %v7517_v16 = vmax.f32 %v7069_v27, 0.0  ;;  %v6846_v13 = vadd.f32 %v15945_v47, %v6391_v5  ;;  %v7070_v61 = vadd.f32 %v15945_v47, %v6615_v35  ;;  %17379 = vst [vmem:[#allocation15_spill] sm:$0xff] %v16257_v31  ;;  %v10813_v26 = vpack.c.bf16 %v7295_v21, %v7295_v21  ;;  %17380 = vst [vmem:[#allocation16_spill] sm:$0xff] %v16259_v37  ;;  %v16261_v15 = vpop.f32.mrb[214].mxu1  ;;  %v5942_v35 = vld [vmem:[#allocation2 + $0x538] sm:$0xff]  ;;  %v16263_v21 = vpop.f32.mrb[215].mxu0 }
 0x326   : > { %v11037_v60 = vpack.c.bf16 %v7519_v46, %v7519_v46  ;;  %v7296_v41 = vmax.f32 %v6848_v0, 0.0  ;;  %v7520_v59 = vmax.f32 %v7072_v62, 0.0  ;;  %17381 = vst [vmem:[#allocation18_spill] sm:$0xff] %v16261_v15  ;;  %v10811_v57 = vpack.c.bf16 %v7293_v23, %v7293_v23  ;;  %v6166_v31 = vld [vmem:[#allocation2 + $0xc38] sm:$0xff]  ;;  %17382 = vst [vmem:[#allocation9_spill] sm:$0xff] %v16263_v21  ;;  %v16265_v46 = vpop.f32.mrb[215].mxu1 }
 0x327   : > { %v11035_v6 = vpack.c.bf16 %v7517_v16, %v7517_v16  ;;  %v7294_v27 = vmax.f32 %v6846_v13, 0.0  ;;  %v7518_v5 = vmax.f32 %v7070_v61, 0.0  ;;  %17383 = vst [vmem:[#allocation23_spill] sm:$0xff] %v16265_v46  ;;  %9536 = vst.msk [vmem:[%s13402_s14 + $0x288] sm:$0xf] %vm9373_vm1, %v10813_v26  ;;  %v6396_v23 = vmul.f32 %v15922_v9, %v5941_v22  ;;  %v5940_v13 = vld [vmem:[#allocation2 + $0x528] sm:$0xff] }
 0x328   : > { %9760 = vst.msk [vmem:[%s13402_s14 + $0x608] sm:$0xf] %vm9373_vm1, %v11037_v60  ;;  %v10814_v0 = vpack.c.bf16 %v7296_v41, %v7296_v41  ;;  %v11038_v62 = vpack.c.bf16 %v7520_v59, %v7520_v59  ;;  %v6620_v16 = vmul.f32 %v15922_v9, %v6165_v7  ;;  %v6164_v61 = vld [vmem:[#allocation2 + $0xc28] sm:$0xff]  ;;  %9534 = vst.msk [vmem:[%s13402_s14 + $0x280] sm:$0xf] %vm9373_vm1, %v10811_v57  ;;  %v5946_v37 = vld [vmem:[#allocation2 + $0x558] sm:$0xff] }
 0x329   : > { %9758 = vst.msk [vmem:[%s13402_s14 + $0x600] sm:$0xf] %vm9373_vm1, %v11035_v6  ;;  %v10812_v46 = vpack.c.bf16 %v7294_v27, %v7294_v27  ;;  %v11036_v21 = vpack.c.bf16 %v7518_v5, %v7518_v5  ;;  %v6394_v26 = vmul.f32 %v15922_v9, %v5939_v4  ;;  %v6618_v60 = vmul.f32 %v15922_v9, %v6163_v24  ;;  %v16295_v27 = vpop.f32.mrb[216].mxu0  ;;  %v1152_v50 = vld [vmem:[#allocation2 + $0xcb0] sm:$0xff]  ;;  %v926_v29 = vld [vmem:[#allocation2 + $0x5a0] sm:$0xff] }
 0x32a   : > { %9537 = vst.msk [vmem:[%s13402_s14 + $0x28c] sm:$0xf] %vm9373_vm1, %v10814_v0  ;;  %9761 = vst.msk [vmem:[%s13402_s14 + $0x60c] sm:$0xf] %vm9373_vm1, %v11038_v62  ;;  %v6851_v22 = vadd.f32 %v15945_v47, %v6396_v23  ;;  %v7075_v7 = vadd.f32 %v15945_v47, %v6620_v16  ;;  %v6397_v41 = vmul.f32 %v15922_v9, %v5942_v35  ;;  %v16299_v62 = vpop.f32.mrb[216].mxu1  ;;  %v1156_v30 = vld [vmem:[#allocation2 + $0xcd0] sm:$0xff] }
 0x32b   : > { %v6621_v59 = vmul.f32 %v15922_v9, %v6166_v31  ;;  %9535 = vst.msk [vmem:[%s13402_s14 + $0x284] sm:$0xf] %vm9373_vm1, %v10812_v46  ;;  %9759 = vst.msk [vmem:[%s13402_s14 + $0x604] sm:$0xf] %vm9373_vm1, %v11036_v21  ;;  %v6849_v4 = vadd.f32 %v15945_v47, %v6394_v26  ;;  %v7073_v24 = vadd.f32 %v15945_v47, %v6618_v60  ;;  %v16301_v46 = vpop.f32.mrb[217].mxu0  ;;  %v5945_v26 = vld [vmem:[#allocation2 + $0x550] sm:$0xff] }
 0x32c   : > { %v6395_v57 = vmul.f32 %v15922_v9, %v5940_v13  ;;  %v6619_v6 = vmul.f32 %v15922_v9, %v6164_v61  ;;  %17384 = vst [vmem:[#allocation38_spill] sm:$0xff] %v16295_v27  ;;  %v7299_v5 = vmax.f32 %v6851_v22, 0.0  ;;  %v7523_v0 = vmax.f32 %v7075_v7, 0.0  ;;  %17385 = vst [vmem:[#allocation39_spill] sm:$0xff] %v16299_v62  ;;  %v6169_v61 = vld [vmem:[#allocation2 + $0xc50] sm:$0xff]  ;;  %v16305_v60 = vpop.f32.mrb[217].mxu1 }
 0x32d   : > { %v6852_v35 = vadd.f32 %v15945_v47, %v6397_v41  ;;  %v7076_v31 = vadd.f32 %v15945_v47, %v6621_v59  ;;  %17386 = vst [vmem:[#allocation40_spill] sm:$0xff] %v16301_v46  ;;  %v7297_v21 = vmax.f32 %v6849_v4, 0.0  ;;  %v7521_v23 = vmax.f32 %v7073_v24, 0.0  ;;  %17387 = vst [vmem:[#allocation41_spill] sm:$0xff] %v16305_v60  ;;  %v16307_v22 = vpop.f32.mrb[218].mxu0  ;;  %v5943_v27 = vld [vmem:[#allocation2 + $0x540] sm:$0xff] }
 0x32e   : > { %v6850_v16 = vadd.f32 %v15945_v47, %v6395_v57  ;;  %v7074_v13 = vadd.f32 %v15945_v47, %v6619_v6  ;;  %17388 = vst [vmem:[#allocation42_spill] sm:$0xff] %v16307_v22  ;;  %v10817_v7 = vpack.c.bf16 %v7299_v5, %v7299_v5  ;;  %v11041_v41 = vpack.c.bf16 %v7523_v0, %v7523_v0  ;;  %v6167_v46 = vld [vmem:[#allocation2 + $0xc40] sm:$0xff]  ;;  %v16309_v4 = vpop.f32.mrb[218].mxu1  ;;  %v16311_v24 = vpop.f32.mrb[219].mxu0  ;;  %v6170_v22 = vld [vmem:[#allocation2 + $0xc58] sm:$0xff] }
 0x32f   : > { %v7300_v59 = vmax.f32 %v6852_v35, 0.0  ;;  %v7524_v62 = vmax.f32 %v7076_v31, 0.0  ;;  %17389 = vst [vmem:[#allocation43_spill] sm:$0xff] %v16309_v4  ;;  %17390 = vst [vmem:[#allocation51_spill] sm:$0xff] %v16311_v24  ;;  %v10815_v57 = vpack.c.bf16 %v7297_v21, %v7297_v21  ;;  %v11039_v6 = vpack.c.bf16 %v7521_v23, %v7521_v23  ;;  %v16313_v5 = vpop.f32.mrb[219].mxu1  ;;  %v5944_v23 = vld [vmem:[#allocation2 + $0x548] sm:$0xff] }
 0x330   : > { %v7298_v15 = vmax.f32 %v6850_v16, 0.0  ;;  %v7522_v60 = vmax.f32 %v7074_v13, 0.0  ;;  %17391 = vst [vmem:[#allocation52_spill] sm:$0xff] %v16313_v5  ;;  %9540 = vst.msk [vmem:[%s13402_s14 + $0x298] sm:$0xf] %vm9373_vm1, %v10817_v7  ;;  %v6400_v31 = vmul.f32 %v15922_v9, %v5945_v26  ;;  %v6624_v21 = vmul.f32 %v15922_v9, %v6169_v61  ;;  %v6168_v16 = vld [vmem:[#allocation2 + $0xc48] sm:$0xff] }
 0x331   : > { %9764 = vst.msk [vmem:[%s13402_s14 + $0x618] sm:$0xf] %vm9373_vm1, %v11041_v41  ;;  %v10818_v0 = vpack.c.bf16 %v7300_v59, %v7300_v59  ;;  %v11042_v35 = vpack.c.bf16 %v7524_v62, %v7524_v62  ;;  %9538 = vst.msk [vmem:[%s13402_s14 + $0x290] sm:$0xf] %vm9373_vm1, %v10815_v57  ;;  %v6398_v7 = vmul.f32 %v15922_v9, %v5943_v27  ;;  %v16343_v57 = vpop.f32.mrb[220].mxu0  ;;  %v923_v4 = vld [vmem:[#allocation2 + $0x588] sm:$0xff] }
 0x332   : > { %9762 = vst.msk [vmem:[%s13402_s14 + $0x610] sm:$0xf] %vm9373_vm1, %v11039_v6  ;;  %v10816_v13 = vpack.c.bf16 %v7298_v15, %v7298_v15  ;;  %v11040_v5 = vpack.c.bf16 %v7522_v60, %v7522_v60  ;;  %v6622_v41 = vmul.f32 %v15922_v9, %v6167_v46  ;;  %v6855_v62 = vadd.f32 %v15945_v47, %v6400_v31  ;;  %v16349_v31 = vpop.f32.mrb[221].mxu0 }
 0x333   : > { %9541 = vst.msk [vmem:[%s13402_s14 + $0x29c] sm:$0xf] %vm9373_vm1, %v10818_v0  ;;  %9765 = vst.msk [vmem:[%s13402_s14 + $0x61c] sm:$0xf] %vm9373_vm1, %v11042_v35  ;;  %v7079_v26 = vadd.f32 %v15945_v47, %v6624_v21  ;;  %v6401_v61 = vmul.f32 %v15922_v9, %v5946_v37  ;;  %v6625_v59 = vmul.f32 %v15922_v9, %v6170_v22  ;;  %v16347_v35 = vpop.f32.mrb[220].mxu1 }
 0x334   : > { %9539 = vst.msk [vmem:[%s13402_s14 + $0x294] sm:$0xf] %vm9373_vm1, %v10816_v13  ;;  %9763 = vst.msk [vmem:[%s13402_s14 + $0x614] sm:$0xf] %vm9373_vm1, %v11040_v5  ;;  %v6853_v15 = vadd.f32 %v15945_v47, %v6398_v7  ;;  %v7077_v27 = vadd.f32 %v15945_v47, %v6622_v41  ;;  %v6399_v46 = vmul.f32 %v15922_v9, %v5944_v23  ;;  %v7303_v6 = vmax.f32 %v6855_v62, 0.0  ;;  %v5949_v7 = vld [vmem:[#allocation2 + $0x570] sm:$0xff] }
 0x335   : > { %v6623_v60 = vmul.f32 %v15922_v9, %v6168_v16  ;;  %17392 = vst [vmem:[#allocation53_spill] sm:$0xff] %v16343_v57  ;;  %v7527_v0 = vmax.f32 %v7079_v26, 0.0  ;;  %v6856_v37 = vadd.f32 %v15945_v47, %v6401_v61  ;;  %v7080_v22 = vadd.f32 %v15945_v47, %v6625_v59  ;;  %17393 = vst [vmem:[#allocation54_spill] sm:$0xff] %v16347_v35  ;;  %v6173_v9 = vld [vmem:[#allocation2 + $0xc70] sm:$0xff]  ;;  %v16353_v16 = vpop.f32.mrb[221].mxu1  ;;  %v16355_v41 = vpop.f32.mrb[222].mxu0 }
 0x336   : > { %17394 = vst [vmem:[#allocation55_spill] sm:$0xff] %v16349_v31  ;;  %v7301_v5 = vmax.f32 %v6853_v15, 0.0  ;;  %v7525_v21 = vmax.f32 %v7077_v27, 0.0  ;;  %v6854_v13 = vadd.f32 %v15945_v47, %v6399_v46  ;;  %17395 = vst [vmem:[#allocation56_spill] sm:$0xff] %v16353_v16  ;;  %v10821_v62 = vpack.c.bf16 %v7303_v6, %v7303_v6  ;;  %v5947_v35 = vld [vmem:[#allocation2 + $0x560] sm:$0xff]  ;;  %v16357_v15 = vpop.f32.mrb[222].mxu1 }
 0x337   : > { %v7078_v23 = vadd.f32 %v15945_v47, %v6623_v60  ;;  %17396 = vst [vmem:[#allocation69_spill] sm:$0xff] %v16355_v41  ;;  %v11045_v26 = vpack.c.bf16 %v7527_v0, %v7527_v0  ;;  %v7304_v61 = vmax.f32 %v6856_v37, 0.0  ;;  %v7528_v59 = vmax.f32 %v7080_v22, 0.0  ;;  %v6171_v31 = vld [vmem:[#allocation2 + $0xc60] sm:$0xff]  ;;  %17397 = vst [vmem:[#allocation70_spill] sm:$0xff] %v16357_v15  ;;  %v16359_v27 = vpop.f32.mrb[223].mxu0 }
 0x338   : > { %17398 = vst [vmem:[#allocation71_spill] sm:$0xff] %v16359_v27  ;;  %v10819_v46 = vpack.c.bf16 %v7301_v5, %v7301_v5  ;;  %v11043_v47 = vpack.c.bf16 %v7525_v21, %v7525_v21  ;;  %v7302_v60 = vmax.f32 %v6854_v13, 0.0  ;;  %v5950_v57 = vld [vmem:[#allocation2 + $0x578] sm:$0xff]  ;;  %v16361_v24 = vpop.f32.mrb[223].mxu1  ;;  %9544 = vst.msk [vmem:[%s13402_s14 + $0x2a8] sm:$0xf] %vm9373_vm1, %v10821_v62 }
 0x339   : > { %v7526_v16 = vmax.f32 %v7078_v23, 0.0  ;;  %v6174_v41 = vld [vmem:[#allocation2 + $0xc78] sm:$0xff]  ;;  %17399 = vst [vmem:[#allocation72_spill] sm:$0xff] %v16361_v24  ;;  %9768 = vst.msk [vmem:[%s13402_s14 + $0x628] sm:$0xf] %vm9373_vm1, %v11045_v26  ;;  %v10822_v6 = vpack.c.bf16 %v7304_v61, %v7304_v61  ;;  %v11046_v0 = vpack.c.bf16 %v7528_v59, %v7528_v59  ;;  %v5948_v21 = vld [vmem:[#allocation2 + $0x568] sm:$0xff] }
 0x33a   : > { %v16370_v37 = vld [vmem:[%s17066_s2] ss:$0 sm:$0xff]  ;;  %v6172_v13 = vld [vmem:[#allocation2 + $0xc68] sm:$0xff]  ;;  %9542 = vst.msk [vmem:[%s13402_s14 + $0x2a0] sm:$0xf] %vm9373_vm1, %v10819_v46  ;;  %v10820_v23 = vpack.c.bf16 %v7302_v60, %v7302_v60  ;;  %v925_v15 = vld [vmem:[#allocation2 + $0x598] sm:$0xff] }
 0x33b   : > { %v6404_v22 = vmul.f32 %v16370_v37, %v5949_v7  ;;  %v6628_v5 = vmul.f32 %v16370_v37, %v6173_v9  ;;  %9766 = vst.msk [vmem:[%s13402_s14 + $0x620] sm:$0xf] %vm9373_vm1, %v11043_v47  ;;  %v11044_v62 = vpack.c.bf16 %v7526_v16, %v7526_v16  ;;  %v6402_v26 = vmul.f32 %v16370_v37, %v5947_v35  ;;  %v16387_v7 = vld [vmem:[%s17067_s3] ss:$0 sm:$0xff] }
 0x33c   : > { %v6626_v61 = vmul.f32 %v16370_v37, %v6171_v31  ;;  %9545 = vst.msk [vmem:[%s13402_s14 + $0x2ac] sm:$0xf] %vm9373_vm1, %v10822_v6  ;;  %9769 = vst.msk [vmem:[%s13402_s14 + $0x62c] sm:$0xf] %vm9373_vm1, %v11046_v0  ;;  %v6405_v46 = vmul.f32 %v16370_v37, %v5950_v57  ;;  %v6629_v16 = vmul.f32 %v16370_v37, %v6174_v41  ;;  %v924_v6 = vld [vmem:[#allocation2 + $0x590] sm:$0xff]  ;;  %v922_v24 = vld [vmem:[#allocation2 + $0x580] sm:$0xff] }
 0x33d   : > { %v6859_v9 = vadd.f32 %v16387_v7, %v6404_v22  ;;  %v7083_v59 = vadd.f32 %v16387_v7, %v6628_v5  ;;  %9543 = vst.msk [vmem:[%s13402_s14 + $0x2a4] sm:$0xf] %vm9373_vm1, %v10820_v23  ;;  %9767 = vst.msk [vmem:[%s13402_s14 + $0x624] sm:$0xf] %vm9373_vm1, %v11044_v62  ;;  %v6857_v35 = vadd.f32 %v16387_v7, %v6402_v26  ;;  %v1148_v41 = vld [vmem:[#allocation2 + $0xc90] sm:$0xff]  ;;  %v1146_v23 = vld [vmem:[#allocation2 + $0xc80] sm:$0xff] }
 0x33e   : > { %v7081_v31 = vadd.f32 %v16387_v7, %v6626_v61  ;;  %v6403_v47 = vmul.f32 %v16370_v37, %v5948_v21  ;;  %v6627_v60 = vmul.f32 %v16370_v37, %v6172_v13  ;;  %v6860_v5 = vadd.f32 %v16387_v7, %v6405_v46  ;;  %v1149_v21 = vld [vmem:[#allocation2 + $0xc98] sm:$0xff]  ;;  %v1147_v13 = vld [vmem:[#allocation2 + $0xc88] sm:$0xff] }
 0x33f   : > { %v7307_v0 = vmax.f32 %v6859_v9, 0.0  ;;  %v7531_v22 = vmax.f32 %v7083_v59, 0.0  ;;  %v7084_v57 = vadd.f32 %v16387_v7, %v6629_v16  ;;  %v7305_v27 = vmax.f32 %v6857_v35, 0.0  ;;  %v928_v16 = vld [vmem:[#allocation2 + $0x5b0] sm:$0xff] }
 0x340   : > { %v7529_v62 = vmax.f32 %v7081_v31, 0.0  ;;  %v6858_v26 = vadd.f32 %v16387_v7, %v6403_v47  ;;  %v7082_v61 = vadd.f32 %v16387_v7, %v6627_v60  ;;  %v7308_v46 = vmax.f32 %v6860_v5, 0.0 }
 0x341   : > { %v10825_v9 = vpack.c.bf16 %v7307_v0, %v7307_v0  ;;  %v11049_v59 = vpack.c.bf16 %v7531_v22, %v7531_v22  ;;  %v7532_v1 = vmax.f32 %v7084_v57, 0.0  ;;  %v10823_v35 = vpack.c.bf16 %v7305_v27, %v7305_v27  ;;  %v17400_v57 = vld [vmem:[#allocation57_spill] sm:$0xff] }
 0x342   : > { %v11047_v31 = vpack.c.bf16 %v7529_v62, %v7529_v62  ;;  %v7306_v47 = vmax.f32 %v6858_v26, 0.0  ;;  %v7530_v60 = vmax.f32 %v7082_v61, 0.0  ;;  %v10826_v0 = vpack.c.bf16 %v7308_v46, %v7308_v46  ;;  %v932_v62 = vld [vmem:[#allocation2 + $0x5d0] sm:$0xff]  ;;  %v1154_v46 = vld [vmem:[#allocation2 + $0xcc0] sm:$0xff] }
 0x343   : > { %9548 = vst.msk [vmem:[%s13402_s14 + $0x2b8] sm:$0xf] %vm9373_vm1, %v10825_v9  ;;  %9772 = vst.msk [vmem:[%s13402_s14 + $0x638] sm:$0xf] %vm9373_vm1, %v11049_v59  ;;  %v11050_v22 = vpack.c.bf16 %v7532_v1, %v7532_v1  ;;  %v5053_v5 = vadd.f32 %v15713_v38, %v924_v6  ;;  %v5277_v27 = vadd.f32 %v17400_v57, %v1148_v41  ;;  %v930_v1 = vld [vmem:[#allocation2 + $0x5c0] sm:$0xff]  ;;  %v933_v38 = vld [vmem:[#allocation2 + $0x5d8] sm:$0xff] }
 0x344   : > { %9546 = vst.msk [vmem:[%s13402_s14 + $0x2b0] sm:$0xf] %vm9373_vm1, %v10823_v35  ;;  %9770 = vst.msk [vmem:[%s13402_s14 + $0x630] sm:$0xf] %vm9373_vm1, %v11047_v31  ;;  %v10824_v26 = vpack.c.bf16 %v7306_v47, %v7306_v47  ;;  %v11048_v61 = vpack.c.bf16 %v7530_v60, %v7530_v60  ;;  %v5051_v9 = vadd.f32 %v15723_v17, %v922_v24  ;;  %v1157_v24 = vld [vmem:[#allocation2 + $0xcd8] sm:$0xff]  ;;  %v1155_v35 = vld [vmem:[#allocation2 + $0xcc8] sm:$0xff] }
 0x345   : > { %v5275_v59 = vadd.f32 %v15731_v40, %v1146_v23  ;;  %9549 = vst.msk [vmem:[%s13402_s14 + $0x2bc] sm:$0xf] %vm9373_vm1, %v10826_v0  ;;  %9773 = vst.msk [vmem:[%s13402_s14 + $0x63c] sm:$0xf] %vm9373_vm1, %v11050_v22  ;;  %v5054_v6 = vadd.f32 %v15733_v2, %v925_v15  ;;  %v5278_v41 = vadd.f32 %v15745_v3, %v1149_v21  ;;  %v931_v23 = vld [vmem:[#allocation2 + $0x5c8] sm:$0xff]  ;;  %v934_v15 = vld [vmem:[#allocation2 + $0x5e0] sm:$0xff] }
 0x346   : > { %5502 = vst.msk [vmem:[#allocation2 + $0x590] sm:$0xff] %vm297_vm0, %v5053_v5  ;;  %5726 = vst.msk [vmem:[#allocation2 + $0xc90] sm:$0xff] %vm297_vm0, %v5277_v27  ;;  %v5052_v17 = vadd.f32 %v15747_v33, %v923_v4  ;;  %v5276_v40 = vadd.f32 %v15759_v48, %v1147_v13  ;;  %v5057_v31 = vadd.f32 %v15793_v32, %v928_v16  ;;  %v936_v48 = vld [vmem:[#allocation2 + $0x5f0] sm:$0xff]  ;;  %v17406_v0 = vld [vmem:[#allocation29_spill] sm:$0xff] }
 0x347   : > { %9547 = vst.msk [vmem:[%s13402_s14 + $0x2b4] sm:$0xf] %vm9373_vm1, %v10824_v26  ;;  %9771 = vst.msk [vmem:[%s13402_s14 + $0x634] sm:$0xf] %vm9373_vm1, %v11048_v61  ;;  %v5281_v2 = vadd.f32 %v15803_v51, %v1152_v50  ;;  %v5055_v3 = vadd.f32 %v15805_v34, %v926_v29  ;;  %v5279_v33 = vadd.f32 %v15815_v56, %v1150_v36  ;;  %v1160_v4 = vld [vmem:[#allocation2 + $0xcf0] sm:$0xff]  ;;  %v1158_v56 = vld [vmem:[#allocation2 + $0xce0] sm:$0xff] }
 0x348   : > { %5500 = vst.msk [vmem:[#allocation2 + $0x580] sm:$0xff] %vm297_vm0, %v5051_v9  ;;  %5724 = vst.msk [vmem:[#allocation2 + $0xc80] sm:$0xff] %vm297_vm0, %v5275_v59  ;;  %v5058_v21 = vadd.f32 %v15817_v58, %v929_v20  ;;  %v5282_v32 = vadd.f32 %v15827_v54, %v1153_v55  ;;  %v5056_v51 = vadd.f32 %v15829_v42, %v927_v18  ;;  %v937_v36 = vld [vmem:[#allocation2 + $0x5f8] sm:$0xff]  ;;  %v17401_v50 = vld [vmem:[#allocation24_spill] sm:$0xff] }
 0x349   : > { %5503 = vst.msk [vmem:[#allocation2 + $0x598] sm:$0xff] %vm297_vm0, %v5054_v6  ;;  %5727 = vst.msk [vmem:[#allocation2 + $0xc98] sm:$0xff] %vm297_vm0, %v5278_v41  ;;  %v5280_v34 = vadd.f32 %v15839_v8, %v1151_v53  ;;  %v1161_v29 = vld [vmem:[#allocation2 + $0xcf8] sm:$0xff]  ;;  %v5061_v13 = vadd.f32 %v17401_v50, %v932_v62  ;;  %v17403_v54 = vld [vmem:[#allocation26_spill] sm:$0xff]  ;;  %v5286_v22 = vadd.f32 %v17406_v0, %v1157_v24 }
 0x34a   : > { %5501 = vst.msk [vmem:[#allocation2 + $0x588] sm:$0xff] %vm297_vm0, %v5052_v17  ;;  %5725 = vst.msk [vmem:[#allocation2 + $0xc88] sm:$0xff] %vm297_vm0, %v5276_v40  ;;  %v17402_v58 = vld [vmem:[#allocation25_spill] sm:$0xff]  ;;  %v5059_v55 = vadd.f32 %v17403_v54, %v930_v1  ;;  %v17404_v42 = vld [vmem:[#allocation27_spill] sm:$0xff] }
 0x34b   : > { %5506 = vst.msk [vmem:[#allocation2 + $0x5b0] sm:$0xff] %vm297_vm0, %v5057_v31  ;;  %5730 = vst.msk [vmem:[#allocation2 + $0xcb0] sm:$0xff] %vm297_vm0, %v5281_v2  ;;  %v5285_v20 = vadd.f32 %v17402_v58, %v1156_v30  ;;  %v5283_v18 = vadd.f32 %v17404_v42, %v1154_v46  ;;  %v935_v8 = vld [vmem:[#allocation2 + $0x5e8] sm:$0xff]  ;;  %v940_v16 = vld [vmem:[#allocation2 + $0x610] sm:$0xff] }
 0x34c   : > { %5504 = vst.msk [vmem:[#allocation2 + $0x5a0] sm:$0xff] %vm297_vm0, %v5055_v3  ;;  %5728 = vst.msk [vmem:[#allocation2 + $0xca0] sm:$0xff] %vm297_vm0, %v5279_v33  ;;  %v1159_v53 = vld [vmem:[#allocation2 + $0xce8] sm:$0xff]  ;;  %v17405_v47 = vld [vmem:[#allocation28_spill] sm:$0xff] }
 0x34d   : > { %5507 = vst.msk [vmem:[#allocation2 + $0x5b8] sm:$0xff] %vm297_vm0, %v5058_v21  ;;  %5731 = vst.msk [vmem:[#allocation2 + $0xcb8] sm:$0xff] %vm297_vm0, %v5282_v32  ;;  %v5062_v60 = vadd.f32 %v17405_v47, %v933_v38  ;;  %v17407_v30 = vld [vmem:[#allocation30_spill] sm:$0xff]  ;;  %v17408_v57 = vld [vmem:[#allocation31_spill] sm:$0xff] }
 0x34e   : > { %5505 = vst.msk [vmem:[#allocation2 + $0x5a8] sm:$0xff] %vm297_vm0, %v5056_v51  ;;  %5729 = vst.msk [vmem:[#allocation2 + $0xca8] sm:$0xff] %vm297_vm0, %v5280_v34  ;;  %v5060_v5 = vadd.f32 %v17407_v30, %v931_v23  ;;  %v5284_v27 = vadd.f32 %v17408_v57, %v1155_v35  ;;  %v1164_v62 = vld [vmem:[#allocation2 + $0xd10] sm:$0xff]  ;;  %v938_v26 = vld [vmem:[#allocation2 + $0x600] sm:$0xff] }
 0x34f   : > { %v1162_v61 = vld [vmem:[#allocation2 + $0xd00] sm:$0xff]  ;;  %5510 = vst.msk [vmem:[#allocation2 + $0x5d0] sm:$0xff] %vm297_vm0, %v5061_v13  ;;  %5734 = vst.msk [vmem:[#allocation2 + $0xcd0] sm:$0xff] %vm297_vm0, %v5285_v20  ;;  %v17409_v9 = vld [vmem:[#allocation32_spill] sm:$0xff] }
 0x350   : > { %5508 = vst.msk [vmem:[#allocation2 + $0x5c0] sm:$0xff] %vm297_vm0, %v5059_v55  ;;  %5732 = vst.msk [vmem:[#allocation2 + $0xcc0] sm:$0xff] %vm297_vm0, %v5283_v18  ;;  %v5065_v59 = vadd.f32 %v17409_v9, %v936_v48  ;;  %v17410_v1 = vld [vmem:[#allocation33_spill] sm:$0xff]  ;;  %v17411_v38 = vld [vmem:[#allocation34_spill] sm:$0xff] }
 0x351   : > { %v5289_v46 = vadd.f32 %v17410_v1, %v1160_v4  ;;  %v5063_v6 = vadd.f32 %v17411_v38, %v934_v15  ;;  %v17412_v41 = vld [vmem:[#allocation35_spill] sm:$0xff]  ;;  %v941_v40 = vld [vmem:[#allocation2 + $0x618] sm:$0xff]  ;;  %5511 = vst.msk [vmem:[#allocation2 + $0x5d8] sm:$0xff] %vm297_vm0, %v5062_v60  ;;  %5735 = vst.msk [vmem:[#allocation2 + $0xcd8] sm:$0xff] %vm297_vm0, %v5286_v22 }
 0x352   : > { %v5287_v17 = vadd.f32 %v17412_v41, %v1158_v56  ;;  %v1165_v24 = vld [vmem:[#allocation2 + $0xd18] sm:$0xff]  ;;  %5509 = vst.msk [vmem:[#allocation2 + $0x5c8] sm:$0xff] %vm297_vm0, %v5060_v5  ;;  %5733 = vst.msk [vmem:[#allocation2 + $0xcc8] sm:$0xff] %vm297_vm0, %v5284_v27  ;;  %v17413_v23 = vld [vmem:[#allocation36_spill] sm:$0xff] }
 0x353   : > { %v5066_v35 = vadd.f32 %v17413_v23, %v937_v36  ;;  %v17414_v31 = vld [vmem:[#allocation37_spill] sm:$0xff]  ;;  %v17415_v3 = vld [vmem:[#allocation44_spill] sm:$0xff]  ;;  %v939_v15 = vld [vmem:[#allocation2 + $0x608] sm:$0xff]  ;;  %5514 = vst.msk [vmem:[#allocation2 + $0x5f0] sm:$0xff] %vm297_vm0, %v5065_v59 }
 0x354   : > { %v5290_v2 = vadd.f32 %v17414_v31, %v1161_v29  ;;  %v5064_v33 = vadd.f32 %v17415_v3, %v935_v8  ;;  %v17416_v48 = vld [vmem:[#allocation45_spill] sm:$0xff]  ;;  %v1163_v21 = vld [vmem:[#allocation2 + $0xd08] sm:$0xff]  ;;  %v5953_v32 = vld [vmem:[#allocation2 + $0x590] sm:$0xff]  ;;  %5738 = vst.msk [vmem:[#allocation2 + $0xcf0] sm:$0xff] %vm297_vm0, %v5289_v46 }
 0x355   : > { %v5288_v4 = vadd.f32 %v17416_v48, %v1159_v53  ;;  %v6177_v51 = vld [vmem:[#allocation2 + $0xc90] sm:$0xff]  ;;  %5512 = vst.msk [vmem:[#allocation2 + $0x5e0] sm:$0xff] %vm297_vm0, %v5063_v6  ;;  %5736 = vst.msk [vmem:[#allocation2 + $0xce0] sm:$0xff] %vm297_vm0, %v5287_v17  ;;  %v17417_v34 = vld [vmem:[#allocation46_spill] sm:$0xff]  ;;  %v6408_v54 = vmul.f32 %v16370_v37, %v5953_v32 }
 0x356   : > { %v5069_v56 = vadd.f32 %v17417_v34, %v940_v16  ;;  %v17418_v36 = vld [vmem:[#allocation47_spill] sm:$0xff]  ;;  %v17419_v50 = vld [vmem:[#allocation48_spill] sm:$0xff]  ;;  %v17420_v58 = vld [vmem:[#allocation49_spill] sm:$0xff]  ;;  %v6632_v55 = vmul.f32 %v16370_v37, %v6177_v51  ;;  %5515 = vst.msk [vmem:[#allocation2 + $0x5f8] sm:$0xff] %vm297_vm0, %v5066_v35 }
 0x357   : > { %v5293_v29 = vadd.f32 %v17418_v36, %v1164_v62  ;;  %v5067_v13 = vadd.f32 %v17419_v50, %v938_v26  ;;  %v5291_v20 = vadd.f32 %v17420_v58, %v1162_v61  ;;  %v5951_v42 = vld [vmem:[#allocation2 + $0x580] sm:$0xff]  ;;  %5739 = vst.msk [vmem:[#allocation2 + $0xcf8] sm:$0xff] %vm297_vm0, %v5290_v2  ;;  %5513 = vst.msk [vmem:[#allocation2 + $0x5e8] sm:$0xff] %vm297_vm0, %v5064_v33  ;;  %v17422_v16 = vld [vmem:[#allocation19_spill] sm:$0xff] }
 0x358   : > { %v6175_v18 = vld [vmem:[#allocation2 + $0xc80] sm:$0xff]  ;;  %5737 = vst.msk [vmem:[#allocation2 + $0xce8] sm:$0xff] %vm297_vm0, %v5288_v4  ;;  %v5294_v47 = vadd.f32 %v17422_v16, %v1165_v24  ;;  %v6406_v60 = vmul.f32 %v16370_v37, %v5951_v42  ;;  %v5954_v22 = vld [vmem:[#allocation2 + $0x598] sm:$0xff]  ;;  %v5952_v5 = vld [vmem:[#allocation2 + $0x588] sm:$0xff]  ;;  %v6863_v61 = vadd.f32 %v16387_v7, %v6408_v54  ;;  %v7087_v9 = vadd.f32 %v16387_v7, %v6632_v55 }
 0x359   : > { %v17421_v8 = vld [vmem:[#allocation50_spill] sm:$0xff]  ;;  %v6630_v0 = vmul.f32 %v16370_v37, %v6175_v18  ;;  %v6178_v30 = vld [vmem:[#allocation2 + $0xc98] sm:$0xff]  ;;  %5518 = vst.msk [vmem:[#allocation2 + $0x610] sm:$0xff] %vm297_vm0, %v5069_v56  ;;  %5742 = vst.msk [vmem:[#allocation2 + $0xd10] sm:$0xff] %vm297_vm0, %v5293_v29  ;;  %v6409_v59 = vmul.f32 %v16370_v37, %v5954_v22  ;;  %v6407_v41 = vmul.f32 %v16370_v37, %v5952_v5 }
 0x35a   : > { %v5070_v53 = vadd.f32 %v17421_v8, %v941_v40  ;;  %5516 = vst.msk [vmem:[#allocation2 + $0x600] sm:$0xff] %vm297_vm0, %v5067_v13  ;;  %5740 = vst.msk [vmem:[#allocation2 + $0xd00] sm:$0xff] %vm297_vm0, %v5291_v20  ;;  %v17423_v57 = vld [vmem:[#allocation20_spill] sm:$0xff]  ;;  %v17424_v62 = vld [vmem:[#allocation21_spill] sm:$0xff]  ;;  %v6633_v1 = vmul.f32 %v16370_v37, %v6178_v30  ;;  %v6861_v38 = vadd.f32 %v16387_v7, %v6406_v60  ;;  %v7311_v40 = vmax.f32 %v6863_v61, 0.0 }
 0x35b   : > { %v5068_v27 = vadd.f32 %v17423_v57, %v939_v15  ;;  %v5292_v26 = vadd.f32 %v17424_v62, %v1163_v21  ;;  %v6176_v46 = vld [vmem:[#allocation2 + $0xc88] sm:$0xff]  ;;  %5743 = vst.msk [vmem:[#allocation2 + $0xd18] sm:$0xff] %vm297_vm0, %v5294_v47  ;;  %v7085_v6 = vadd.f32 %v16387_v7, %v6630_v0  ;;  %v7535_v24 = vmax.f32 %v7087_v9, 0.0  ;;  %v5957_v48 = vld [vmem:[#allocation2 + $0x5b0] sm:$0xff]  ;;  %v5955_v34 = vld [vmem:[#allocation2 + $0x5a0] sm:$0xff] }
 0x35c   : > { %5519 = vst.msk [vmem:[#allocation2 + $0x618] sm:$0xff] %vm297_vm0, %v5070_v53  ;;  %v6631_v17 = vmul.f32 %v16370_v37, %v6176_v46  ;;  %v6864_v23 = vadd.f32 %v16387_v7, %v6409_v59  ;;  %v7088_v35 = vadd.f32 %v16387_v7, %v6633_v1  ;;  %v7309_v31 = vmax.f32 %v6861_v38, 0.0  ;;  %v6181_v4 = vld [vmem:[#allocation2 + $0xcb0] sm:$0xff]  ;;  %v6179_v56 = vld [vmem:[#allocation2 + $0xca0] sm:$0xff]  ;;  %v5958_v58 = vld [vmem:[#allocation2 + $0x5b8] sm:$0xff] }
 0x35d   : > { %5517 = vst.msk [vmem:[#allocation2 + $0x608] sm:$0xff] %vm297_vm0, %v5068_v27  ;;  %5741 = vst.msk [vmem:[#allocation2 + $0xd08] sm:$0xff] %vm297_vm0, %v5292_v26  ;;  %v7533_v2 = vmax.f32 %v7085_v6, 0.0  ;;  %v6862_v3 = vadd.f32 %v16387_v7, %v6407_v41  ;;  %v10829_v15 = vpack.c.bf16 %v7311_v40, %v7311_v40  ;;  %v11053_v21 = vpack.c.bf16 %v7535_v24, %v7535_v24  ;;  %v6182_v20 = vld [vmem:[#allocation2 + $0xcb8] sm:$0xff]  ;;  %v5956_v8 = vld [vmem:[#allocation2 + $0x5a8] sm:$0xff] }
 0x35e   : > { %v7086_v33 = vadd.f32 %v16387_v7, %v6631_v17  ;;  %v7312_v32 = vmax.f32 %v6864_v23, 0.0  ;;  %v7536_v51 = vmax.f32 %v7088_v35, 0.0  ;;  %v10827_v36 = vpack.c.bf16 %v7309_v31, %v7309_v31  ;;  %v6180_v53 = vld [vmem:[#allocation2 + $0xca8] sm:$0xff]  ;;  %v5961_v40 = vld [vmem:[#allocation2 + $0x5d0] sm:$0xff] }
 0x35f   : > { %v11051_v29 = vpack.c.bf16 %v7533_v2, %v7533_v2  ;;  %v7310_v50 = vmax.f32 %v6862_v3, 0.0  ;;  %9552 = vst.msk [vmem:[%s13402_s14 + $0x2c8] sm:$0xf] %vm9373_vm1, %v10829_v15  ;;  %9776 = vst.msk [vmem:[%s13402_s14 + $0x648] sm:$0xf] %vm9373_vm1, %v11053_v21  ;;  %v6412_v42 = vmul.f32 %v16370_v37, %v5957_v48  ;;  %v6636_v18 = vmul.f32 %v16370_v37, %v6181_v4  ;;  %v6185_v24 = vld [vmem:[#allocation2 + $0xcd0] sm:$0xff] }
 0x360   : > { %v7534_v13 = vmax.f32 %v7086_v33, 0.0  ;;  %v10830_v54 = vpack.c.bf16 %v7312_v32, %v7312_v32  ;;  %v11054_v55 = vpack.c.bf16 %v7536_v51, %v7536_v51  ;;  %9550 = vst.msk [vmem:[%s13402_s14 + $0x2c0] sm:$0xf] %vm9373_vm1, %v10827_v36  ;;  %v6410_v60 = vmul.f32 %v16370_v37, %v5955_v34  ;;  %v5959_v3 = vld [vmem:[#allocation2 + $0x5c0] sm:$0xff]  ;;  %v5962_v32 = vld [vmem:[#allocation2 + $0x5d8] sm:$0xff] }
 0x361   : > { %9774 = vst.msk [vmem:[%s13402_s14 + $0x640] sm:$0xf] %vm9373_vm1, %v11051_v29  ;;  %v10828_v16 = vpack.c.bf16 %v7310_v50, %v7310_v50  ;;  %v6634_v0 = vmul.f32 %v16370_v37, %v6179_v56  ;;  %v6867_v22 = vadd.f32 %v16387_v7, %v6412_v42  ;;  %v7091_v30 = vadd.f32 %v16387_v7, %v6636_v18  ;;  %v6183_v33 = vld [vmem:[#allocation2 + $0xcc0] sm:$0xff]  ;;  %v6186_v51 = vld [vmem:[#allocation2 + $0xcd8] sm:$0xff]  ;;  %v5960_v50 = vld [vmem:[#allocation2 + $0x5c8] sm:$0xff] }
 0x362   : > { %v11052_v47 = vpack.c.bf16 %v7534_v13, %v7534_v13  ;;  %9553 = vst.msk [vmem:[%s13402_s14 + $0x2cc] sm:$0xf] %vm9373_vm1, %v10830_v54  ;;  %9777 = vst.msk [vmem:[%s13402_s14 + $0x64c] sm:$0xf] %vm9373_vm1, %v11054_v55  ;;  %v6413_v5 = vmul.f32 %v16370_v37, %v5958_v58  ;;  %v6637_v57 = vmul.f32 %v16370_v37, %v6182_v20  ;;  %v6184_v13 = vld [vmem:[#allocation2 + $0xcc8] sm:$0xff] }
 0x363   : > { %9551 = vst.msk [vmem:[%s13402_s14 + $0x2c4] sm:$0xf] %vm9373_vm1, %v10828_v16  ;;  %v6865_v27 = vadd.f32 %v16387_v7, %v6410_v60  ;;  %v7089_v62 = vadd.f32 %v16387_v7, %v6634_v0  ;;  %v6411_v26 = vmul.f32 %v16370_v37, %v5956_v8  ;;  %v6635_v61 = vmul.f32 %v16370_v37, %v6180_v53 }
 0x364   : > { %9775 = vst.msk [vmem:[%s13402_s14 + $0x644] sm:$0xf] %vm9373_vm1, %v11052_v47  ;;  %v7315_v9 = vmax.f32 %v6867_v22, 0.0  ;;  %v7539_v59 = vmax.f32 %v7091_v30, 0.0  ;;  %v6868_v1 = vadd.f32 %v16387_v7, %v6413_v5  ;;  %v7092_v46 = vadd.f32 %v16387_v7, %v6637_v57 }
 0x365   : > { %v7313_v38 = vmax.f32 %v6865_v27, 0.0  ;;  %v7537_v6 = vmax.f32 %v7089_v62, 0.0  ;;  %v6866_v41 = vadd.f32 %v16387_v7, %v6411_v26  ;;  %v7090_v17 = vadd.f32 %v16387_v7, %v6635_v61 }
 0x366   : > { %v10833_v23 = vpack.c.bf16 %v7315_v9, %v7315_v9  ;;  %v11057_v35 = vpack.c.bf16 %v7539_v59, %v7539_v59  ;;  %v7316_v31 = vmax.f32 %v6868_v1, 0.0  ;;  %v7540_v2 = vmax.f32 %v7092_v46, 0.0  ;;  %v5965_v9 = vld [vmem:[#allocation2 + $0x5f0] sm:$0xff] }
 0x367   : > { %v10831_v48 = vpack.c.bf16 %v7313_v38, %v7313_v38  ;;  %v11055_v4 = vpack.c.bf16 %v7537_v6, %v7537_v6  ;;  %v7314_v15 = vmax.f32 %v6866_v41, 0.0  ;;  %v7538_v21 = vmax.f32 %v7090_v17, 0.0  ;;  %v6189_v59 = vld [vmem:[#allocation2 + $0xcf0] sm:$0xff]  ;;  %v5963_v41 = vld [vmem:[#allocation2 + $0x5e0] sm:$0xff] }
 0x368   : > { %9556 = vst.msk [vmem:[%s13402_s14 + $0x2d8] sm:$0xf] %vm9373_vm1, %v10833_v23  ;;  %9780 = vst.msk [vmem:[%s13402_s14 + $0x658] sm:$0xf] %vm9373_vm1, %v11057_v35  ;;  %v10834_v34 = vpack.c.bf16 %v7316_v31, %v7316_v31  ;;  %v11058_v56 = vpack.c.bf16 %v7540_v2, %v7540_v2  ;;  %v6416_v36 = vmul.f32 %v16370_v37, %v5961_v40  ;;  %v6187_v17 = vld [vmem:[#allocation2 + $0xce0] sm:$0xff]  ;;  %v5966_v31 = vld [vmem:[#allocation2 + $0x5f8] sm:$0xff] }
 0x369   : > { %v6640_v29 = vmul.f32 %v16370_v37, %v6185_v24  ;;  %9554 = vst.msk [vmem:[%s13402_s14 + $0x2d0] sm:$0xf] %vm9373_vm1, %v10831_v48  ;;  %9778 = vst.msk [vmem:[%s13402_s14 + $0x650] sm:$0xf] %vm9373_vm1, %v11055_v4  ;;  %v10832_v58 = vpack.c.bf16 %v7314_v15, %v7314_v15  ;;  %v11056_v20 = vpack.c.bf16 %v7538_v21, %v7538_v21  ;;  %v6190_v2 = vld [vmem:[#allocation2 + $0xcf8] sm:$0xff]  ;;  %v5964_v15 = vld [vmem:[#allocation2 + $0x5e8] sm:$0xff] }
 0x36a   : > { %v6414_v54 = vmul.f32 %v16370_v37, %v5959_v3  ;;  %v6638_v55 = vmul.f32 %v16370_v37, %v6183_v33  ;;  %9557 = vst.msk [vmem:[%s13402_s14 + $0x2dc] sm:$0xf] %vm9373_vm1, %v10834_v34  ;;  %9781 = vst.msk [vmem:[%s13402_s14 + $0x65c] sm:$0xf] %vm9373_vm1, %v11058_v56  ;;  %v6871_v42 = vadd.f32 %v16387_v7, %v6416_v36  ;;  %v6188_v21 = vld [vmem:[#allocation2 + $0xce8] sm:$0xff] }
 0x36b   : > { %v7095_v18 = vadd.f32 %v16387_v7, %v6640_v29  ;;  %v6417_v8 = vmul.f32 %v16370_v37, %v5962_v32  ;;  %v6641_v53 = vmul.f32 %v16370_v37, %v6186_v51  ;;  %9555 = vst.msk [vmem:[%s13402_s14 + $0x2d4] sm:$0xf] %vm9373_vm1, %v10832_v58  ;;  %9779 = vst.msk [vmem:[%s13402_s14 + $0x654] sm:$0xf] %vm9373_vm1, %v11056_v20 }
 0x36c   : > { %v6869_v16 = vadd.f32 %v16387_v7, %v6414_v54  ;;  %v7093_v47 = vadd.f32 %v16387_v7, %v6638_v55  ;;  %v6415_v60 = vmul.f32 %v16370_v37, %v5960_v50  ;;  %v6639_v0 = vmul.f32 %v16370_v37, %v6184_v13 }
 0x36d   : > { %v7319_v22 = vmax.f32 %v6871_v42, 0.0  ;;  %v7543_v30 = vmax.f32 %v7095_v18, 0.0  ;;  %v6872_v5 = vadd.f32 %v16387_v7, %v6417_v8  ;;  %v7096_v57 = vadd.f32 %v16387_v7, %v6641_v53 }
 0x36e   : > { %v7317_v27 = vmax.f32 %v6869_v16, 0.0  ;;  %v7541_v62 = vmax.f32 %v7093_v47, 0.0  ;;  %v6870_v26 = vadd.f32 %v16387_v7, %v6415_v60  ;;  %v7094_v61 = vadd.f32 %v16387_v7, %v6639_v0 }
 0x36f   : > { %v10837_v1 = vpack.c.bf16 %v7319_v22, %v7319_v22  ;;  %v11061_v46 = vpack.c.bf16 %v7543_v30, %v7543_v30  ;;  %v7320_v38 = vmax.f32 %v6872_v5, 0.0  ;;  %v7544_v6 = vmax.f32 %v7096_v57, 0.0  ;;  %v5969_v22 = vld [vmem:[#allocation2 + $0x610] sm:$0xff] }
 0x370   : > { %v10835_v40 = vpack.c.bf16 %v7317_v27, %v7317_v27  ;;  %v11059_v24 = vpack.c.bf16 %v7541_v62, %v7541_v62  ;;  %v7318_v23 = vmax.f32 %v6870_v26, 0.0  ;;  %v7542_v35 = vmax.f32 %v7094_v61, 0.0  ;;  %v6193_v30 = vld [vmem:[#allocation2 + $0xd10] sm:$0xff]  ;;  %v5967_v26 = vld [vmem:[#allocation2 + $0x600] sm:$0xff] }
 0x371   : > { %9560 = vst.msk [vmem:[%s13402_s14 + $0x2e8] sm:$0xf] %vm9373_vm1, %v10837_v1  ;;  %9784 = vst.msk [vmem:[%s13402_s14 + $0x668] sm:$0xf] %vm9373_vm1, %v11061_v46  ;;  %v10838_v3 = vpack.c.bf16 %v7320_v38, %v7320_v38  ;;  %v11062_v33 = vpack.c.bf16 %v7544_v6, %v7544_v6  ;;  %v6420_v48 = vmul.f32 %v16370_v37, %v5965_v9  ;;  %v6191_v61 = vld [vmem:[#allocation2 + $0xd00] sm:$0xff]  ;;  %v5970_v38 = vld [vmem:[#allocation2 + $0x618] sm:$0xff] }
 0x372   : > { %v6644_v4 = vmul.f32 %v16370_v37, %v6189_v59  ;;  %9558 = vst.msk [vmem:[%s13402_s14 + $0x2e0] sm:$0xf] %vm9373_vm1, %v10835_v40  ;;  %9782 = vst.msk [vmem:[%s13402_s14 + $0x660] sm:$0xf] %vm9373_vm1, %v11059_v24  ;;  %v10836_v32 = vpack.c.bf16 %v7318_v23, %v7318_v23  ;;  %v11060_v51 = vpack.c.bf16 %v7542_v35, %v7542_v35  ;;  %v6194_v6 = vld [vmem:[#allocation2 + $0xd18] sm:$0xff]  ;;  %v5968_v23 = vld [vmem:[#allocation2 + $0x608] sm:$0xff] }
 0x373   : > { %v6418_v34 = vmul.f32 %v16370_v37, %v5963_v41  ;;  %v6642_v56 = vmul.f32 %v16370_v37, %v6187_v17  ;;  %9561 = vst.msk [vmem:[%s13402_s14 + $0x2ec] sm:$0xf] %vm9373_vm1, %v10838_v3  ;;  %9785 = vst.msk [vmem:[%s13402_s14 + $0x66c] sm:$0xf] %vm9373_vm1, %v11062_v33  ;;  %v6875_v36 = vadd.f32 %v16387_v7, %v6420_v48  ;;  %v6192_v35 = vld [vmem:[#allocation2 + $0xd08] sm:$0xff] }
 0x374   : > { %v7099_v29 = vadd.f32 %v16387_v7, %v6644_v4  ;;  %v6421_v50 = vmul.f32 %v16370_v37, %v5966_v31  ;;  %v6645_v13 = vmul.f32 %v16370_v37, %v6190_v2  ;;  %9559 = vst.msk [vmem:[%s13402_s14 + $0x2e4] sm:$0xf] %vm9373_vm1, %v10836_v32  ;;  %9783 = vst.msk [vmem:[%s13402_s14 + $0x664] sm:$0xf] %vm9373_vm1, %v11060_v51 }
 0x375   : > { %v6873_v58 = vadd.f32 %v16387_v7, %v6418_v34  ;;  %v7097_v20 = vadd.f32 %v16387_v7, %v6642_v56  ;;  %v6419_v54 = vmul.f32 %v16370_v37, %v5964_v15  ;;  %v6643_v55 = vmul.f32 %v16370_v37, %v6188_v21 }
 0x376   : > { %v7323_v42 = vmax.f32 %v6875_v36, 0.0  ;;  %v7547_v18 = vmax.f32 %v7099_v29, 0.0  ;;  %v6876_v8 = vadd.f32 %v16387_v7, %v6421_v50  ;;  %v7100_v53 = vadd.f32 %v16387_v7, %v6645_v13  ;;  %v944_v36 = vld [vmem:[#allocation2 + $0x630] sm:$0xff] }
 0x377   : > { %v7321_v16 = vmax.f32 %v6873_v58, 0.0  ;;  %v7545_v47 = vmax.f32 %v7097_v20, 0.0  ;;  %v6874_v60 = vadd.f32 %v16387_v7, %v6419_v54  ;;  %v7098_v0 = vadd.f32 %v16387_v7, %v6643_v55  ;;  %v1168_v20 = vld [vmem:[#allocation2 + $0xd30] sm:$0xff]  ;;  %v942_v54 = vld [vmem:[#allocation2 + $0x620] sm:$0xff] }
 0x378   : > { %v10841_v5 = vpack.c.bf16 %v7323_v42, %v7323_v42  ;;  %v11065_v57 = vpack.c.bf16 %v7547_v18, %v7547_v18  ;;  %v7324_v27 = vmax.f32 %v6876_v8, 0.0  ;;  %v7548_v62 = vmax.f32 %v7100_v53, 0.0  ;;  %v1166_v55 = vld [vmem:[#allocation2 + $0xd20] sm:$0xff] }
 0x379   : > { %v10839_v9 = vpack.c.bf16 %v7321_v16, %v7321_v16  ;;  %v11063_v59 = vpack.c.bf16 %v7545_v47, %v7545_v47  ;;  %v7322_v1 = vmax.f32 %v6874_v60, 0.0  ;;  %v7546_v46 = vmax.f32 %v7098_v0, 0.0  ;;  %v945_v16 = vld [vmem:[#allocation2 + $0x638] sm:$0xff]  ;;  %v943_v60 = vld [vmem:[#allocation2 + $0x628] sm:$0xff] }
 0x37a   : > { %9564 = vst.msk [vmem:[%s13402_s14 + $0x2f8] sm:$0xf] %vm9373_vm1, %v10841_v5  ;;  %9788 = vst.msk [vmem:[%s13402_s14 + $0x678] sm:$0xf] %vm9373_vm1, %v11065_v57  ;;  %v10842_v41 = vpack.c.bf16 %v7324_v27, %v7324_v27  ;;  %v11066_v17 = vpack.c.bf16 %v7548_v62, %v7548_v62  ;;  %v6424_v40 = vmul.f32 %v16370_v37, %v5969_v22  ;;  %v1169_v47 = vld [vmem:[#allocation2 + $0xd38] sm:$0xff]  ;;  %v948_v57 = vld [vmem:[#allocation2 + $0x650] sm:$0xff] }
 0x37b   : > { %v6648_v24 = vmul.f32 %v16370_v37, %v6193_v30  ;;  %9562 = vst.msk [vmem:[%s13402_s14 + $0x2f0] sm:$0xf] %vm9373_vm1, %v10839_v9  ;;  %9786 = vst.msk [vmem:[%s13402_s14 + $0x670] sm:$0xf] %vm9373_vm1, %v11063_v59  ;;  %v10840_v31 = vpack.c.bf16 %v7322_v1, %v7322_v1  ;;  %v11064_v2 = vpack.c.bf16 %v7546_v46, %v7546_v46  ;;  %v1172_v27 = vld [vmem:[#allocation2 + $0xd50] sm:$0xff]  ;;  %v946_v62 = vld [vmem:[#allocation2 + $0x640] sm:$0xff] }
 0x37c   : > { %v6422_v3 = vmul.f32 %v16370_v37, %v5967_v26  ;;  %v6646_v33 = vmul.f32 %v16370_v37, %v6191_v61  ;;  %9565 = vst.msk [vmem:[%s13402_s14 + $0x2fc] sm:$0xf] %vm9373_vm1, %v10842_v41  ;;  %9789 = vst.msk [vmem:[%s13402_s14 + $0x67c] sm:$0xf] %vm9373_vm1, %v11066_v17  ;;  %v6879_v48 = vadd.f32 %v16387_v7, %v6424_v40  ;;  %v1170_v26 = vld [vmem:[#allocation2 + $0xd40] sm:$0xff]  ;;  %v949_v1 = vld [vmem:[#allocation2 + $0x658] sm:$0xff] }
 0x37d   : > { %v7103_v4 = vadd.f32 %v16387_v7, %v6648_v24  ;;  %v6425_v15 = vmul.f32 %v16370_v37, %v5970_v38  ;;  %v6649_v21 = vmul.f32 %v16370_v37, %v6194_v6  ;;  %9563 = vst.msk [vmem:[%s13402_s14 + $0x2f4] sm:$0xf] %vm9373_vm1, %v10840_v31  ;;  %9787 = vst.msk [vmem:[%s13402_s14 + $0x674] sm:$0xf] %vm9373_vm1, %v11064_v2  ;;  %v1173_v46 = vld [vmem:[#allocation2 + $0xd58] sm:$0xff]  ;;  %v947_v38 = vld [vmem:[#allocation2 + $0x648] sm:$0xff] }
 0x37e   : > { %v6877_v32 = vadd.f32 %v16387_v7, %v6422_v3  ;;  %v7101_v51 = vadd.f32 %v16387_v7, %v6646_v33  ;;  %v6423_v34 = vmul.f32 %v16370_v37, %v5968_v23  ;;  %v6647_v56 = vmul.f32 %v16370_v37, %v6192_v35  ;;  %v1167_v37 = vld [vmem:[#allocation2 + $0xd28] sm:$0xff]  ;;  %v17425_v17 = vld [vmem:[#allocation22_spill] sm:$0xff]  ;;  %v952_v31 = vld [vmem:[#allocation2 + $0x670] sm:$0xff] }
 0x37f   : > { %v7327_v29 = vmax.f32 %v6879_v48, 0.0  ;;  %v7551_v50 = vmax.f32 %v7103_v4, 0.0  ;;  %v6880_v13 = vadd.f32 %v16387_v7, %v6425_v15  ;;  %v7104_v58 = vadd.f32 %v16387_v7, %v6649_v21  ;;  %v17426_v24 = vld [vmem:[#allocation58_spill] sm:$0xff]  ;;  %v1171_v35 = vld [vmem:[#allocation2 + $0xd48] sm:$0xff]  ;;  %v1176_v2 = vld [vmem:[#allocation2 + $0xd70] sm:$0xff] }
 0x380   : > { %v7325_v42 = vmax.f32 %v6877_v32, 0.0  ;;  %v7549_v18 = vmax.f32 %v7101_v51, 0.0  ;;  %v6878_v8 = vadd.f32 %v16387_v7, %v6423_v34  ;;  %v7102_v53 = vadd.f32 %v16387_v7, %v6647_v56  ;;  %v17427_v48 = vld [vmem:[#allocation59_spill] sm:$0xff]  ;;  %v17428_v15 = vld [vmem:[#allocation60_spill] sm:$0xff]  ;;  %v950_v32 = vld [vmem:[#allocation2 + $0x660] sm:$0xff] }
 0x381   : > { %v10845_v0 = vpack.c.bf16 %v7327_v29, %v7327_v29  ;;  %v11069_v22 = vpack.c.bf16 %v7551_v50, %v7551_v50  ;;  %v7328_v30 = vmax.f32 %v6880_v13, 0.0  ;;  %v7552_v5 = vmax.f32 %v7104_v58, 0.0  ;;  %v1174_v51 = vld [vmem:[#allocation2 + $0xd60] sm:$0xff]  ;;  %v953_v34 = vld [vmem:[#allocation2 + $0x678] sm:$0xff]  ;;  %v17431_v13 = vld [vmem:[#allocation63_spill] sm:$0xff] }
 0x382   : > { %v10843_v61 = vpack.c.bf16 %v7325_v42, %v7325_v42  ;;  %v11067_v9 = vpack.c.bf16 %v7549_v18, %v7549_v18  ;;  %v7326_v59 = vmax.f32 %v6878_v8, 0.0  ;;  %v7550_v7 = vmax.f32 %v7102_v53, 0.0  ;;  %v17429_v56 = vld [vmem:[#allocation61_spill] sm:$0xff]  ;;  %v17430_v29 = vld [vmem:[#allocation62_spill] sm:$0xff]  ;;  %v951_v42 = vld [vmem:[#allocation2 + $0x668] sm:$0xff] }
 0x383   : > { %9568 = vst.msk [vmem:[%s13402_s14 + $0x308] sm:$0xf] %vm9373_vm1, %v10845_v0  ;;  %9792 = vst.msk [vmem:[%s13402_s14 + $0x688] sm:$0xf] %vm9373_vm1, %v11069_v22  ;;  %v10846_v6 = vpack.c.bf16 %v7328_v30, %v7328_v30  ;;  %v11070_v41 = vpack.c.bf16 %v7552_v5, %v7552_v5  ;;  %v5073_v40 = vadd.f32 %v17425_v17, %v944_v36  ;;  %v1175_v18 = vld [vmem:[#allocation2 + $0xd68] sm:$0xff]  ;;  %v17433_v8 = vld [vmem:[#allocation65_spill] sm:$0xff] }
 0x384   : > { %v5297_v23 = vadd.f32 %v17426_v24, %v1168_v20  ;;  %9566 = vst.msk [vmem:[%s13402_s14 + $0x300] sm:$0xf] %vm9373_vm1, %v10843_v61  ;;  %9790 = vst.msk [vmem:[%s13402_s14 + $0x680] sm:$0xf] %vm9373_vm1, %v11067_v9  ;;  %v10844_v3 = vpack.c.bf16 %v7326_v59, %v7326_v59  ;;  %v11068_v33 = vpack.c.bf16 %v7550_v7, %v7550_v7  ;;  %v17432_v20 = vld [vmem:[#allocation64_spill] sm:$0xff]  ;;  %v954_v61 = vld [vmem:[#allocation2 + $0x680] sm:$0xff] }
 0x385   : > { %v5071_v4 = vadd.f32 %v17427_v48, %v942_v54  ;;  %v5295_v21 = vadd.f32 %v17428_v15, %v1166_v55  ;;  %9569 = vst.msk [vmem:[%s13402_s14 + $0x30c] sm:$0xf] %vm9373_vm1, %v10846_v6  ;;  %9793 = vst.msk [vmem:[%s13402_s14 + $0x68c] sm:$0xf] %vm9373_vm1, %v11070_v41  ;;  %v5074_v36 = vadd.f32 %v17429_v56, %v945_v16  ;;  %v1177_v55 = vld [vmem:[#allocation2 + $0xd78] sm:$0xff]  ;;  %v17434_v16 = vld [vmem:[#allocation66_spill] sm:$0xff] }
 0x386   : > { %5522 = vst.msk [vmem:[#allocation2 + $0x630] sm:$0xff] %vm297_vm0, %v5073_v40  ;;  %5746 = vst.msk [vmem:[#allocation2 + $0xd30] sm:$0xff] %vm297_vm0, %v5297_v23  ;;  %v5298_v50 = vadd.f32 %v17430_v29, %v1169_v47  ;;  %v5072_v58 = vadd.f32 %v17431_v13, %v943_v60  ;;  %v5296_v54 = vadd.f32 %v17432_v20, %v1167_v37  ;;  %v17435_v47 = vld [vmem:[#allocation67_spill] sm:$0xff]  ;;  %v17436_v60 = vld [vmem:[#allocation68_spill] sm:$0xff] }
 0x387   : > { %9567 = vst.msk [vmem:[%s13402_s14 + $0x304] sm:$0xf] %vm9373_vm1, %v10844_v3  ;;  %9791 = vst.msk [vmem:[%s13402_s14 + $0x684] sm:$0xf] %vm9373_vm1, %v11068_v33  ;;  %v5077_v53 = vadd.f32 %v17433_v8, %v948_v57  ;;  %v5301_v0 = vadd.f32 %v17434_v16, %v1172_v27  ;;  %v5075_v22 = vadd.f32 %v17435_v47, %v946_v62  ;;  %v956_v37 = vld [vmem:[#allocation2 + $0x690] sm:$0xff]  ;;  %v957_v59 = vld [vmem:[#allocation2 + $0x698] sm:$0xff] }
 0x388   : > { %5520 = vst.msk [vmem:[#allocation2 + $0x620] sm:$0xff] %vm297_vm0, %v5071_v4  ;;  %5744 = vst.msk [vmem:[#allocation2 + $0xd20] sm:$0xff] %vm297_vm0, %v5295_v21  ;;  %v5299_v30 = vadd.f32 %v17436_v60, %v1170_v26  ;;  %v1180_v5 = vld [vmem:[#allocation2 + $0xd90] sm:$0xff]  ;;  %v5078_v9 = vadd.f32 %v16067_v11, %v949_v1  ;;  %v5302_v57 = vadd.f32 %v16075_v43, %v1173_v46  ;;  %v1178_v26 = vld [vmem:[#allocation2 + $0xd80] sm:$0xff] }
 0x389   : > { %5523 = vst.msk [vmem:[#allocation2 + $0x638] sm:$0xff] %vm297_vm0, %v5074_v36  ;;  %5747 = vst.msk [vmem:[#allocation2 + $0xd38] sm:$0xff] %vm297_vm0, %v5298_v50  ;;  %v5076_v27 = vadd.f32 %v16077_v63, %v947_v38  ;;  %v5300_v62 = vadd.f32 %v16085_v14, %v1171_v35  ;;  %v1181_v7 = vld [vmem:[#allocation2 + $0xd98] sm:$0xff]  ;;  %v5081_v6 = vadd.f32 %v16123_v44, %v952_v31  ;;  %v955_v14 = vld [vmem:[#allocation2 + $0x688] sm:$0xff] }
 0x38a   : > { %5521 = vst.msk [vmem:[#allocation2 + $0x628] sm:$0xff] %vm297_vm0, %v5072_v58  ;;  %5745 = vst.msk [vmem:[#allocation2 + $0xd28] sm:$0xff] %vm297_vm0, %v5296_v54  ;;  %v5305_v11 = vadd.f32 %v16133_v52, %v1176_v2  ;;  %v5079_v43 = vadd.f32 %v16135_v12, %v950_v32  ;;  %v5303_v63 = vadd.f32 %v16145_v19, %v1174_v51  ;;  %v1179_v1 = vld [vmem:[#allocation2 + $0xd88] sm:$0xff]  ;;  %v960_v46 = vld [vmem:[#allocation2 + $0x6b0] sm:$0xff] }
 0x38b   : > { %5526 = vst.msk [vmem:[#allocation2 + $0x650] sm:$0xff] %vm297_vm0, %v5077_v53  ;;  %5750 = vst.msk [vmem:[#allocation2 + $0xd50] sm:$0xff] %vm297_vm0, %v5301_v0  ;;  %v5082_v38 = vadd.f32 %v16147_v10, %v953_v34  ;;  %v5306_v44 = vadd.f32 %v16157_v45, %v1177_v55  ;;  %v5080_v52 = vadd.f32 %v16159_v39, %v951_v42  ;;  %v1184_v19 = vld [vmem:[#allocation2 + $0xdb0] sm:$0xff]  ;;  %v958_v41 = vld [vmem:[#allocation2 + $0x6a0] sm:$0xff] }
 0x38c   : > { %5524 = vst.msk [vmem:[#allocation2 + $0x640] sm:$0xff] %vm297_vm0, %v5075_v22  ;;  %5748 = vst.msk [vmem:[#allocation2 + $0xd40] sm:$0xff] %vm297_vm0, %v5299_v30  ;;  %v5304_v12 = vadd.f32 %v16169_v25, %v1175_v18  ;;  %v1182_v17 = vld [vmem:[#allocation2 + $0xda0] sm:$0xff]  ;;  %v5085_v40 = vadd.f32 %v16199_v49, %v956_v37  ;;  %v5309_v10 = vadd.f32 %v16203_v28, %v1180_v5  ;;  %v961_v25 = vld [vmem:[#allocation2 + $0x6b8] sm:$0xff] }
 0x38d   : > { %5527 = vst.msk [vmem:[#allocation2 + $0x658] sm:$0xff] %vm297_vm0, %v5078_v9  ;;  %5751 = vst.msk [vmem:[#allocation2 + $0xd58] sm:$0xff] %vm297_vm0, %v5302_v57  ;;  %v17437_v45 = vld [vmem:[#allocation10_spill] sm:$0xff]  ;;  %v1185_v35 = vld [vmem:[#allocation2 + $0xdb8] sm:$0xff] }
 0x38e   : > { %5525 = vst.msk [vmem:[#allocation2 + $0x648] sm:$0xff] %vm297_vm0, %v5076_v27  ;;  %5749 = vst.msk [vmem:[#allocation2 + $0xd48] sm:$0xff] %vm297_vm0, %v5300_v62  ;;  %v5083_v24 = vadd.f32 %v17437_v45, %v954_v61  ;;  %v17438_v39 = vld [vmem:[#allocation6_spill] sm:$0xff]  ;;  %v17439_v31 = vld [vmem:[#allocation7_spill] sm:$0xff] }
 0x38f   : > { %5530 = vst.msk [vmem:[#allocation2 + $0x670] sm:$0xff] %vm297_vm0, %v5081_v6  ;;  %5754 = vst.msk [vmem:[#allocation2 + $0xd70] sm:$0xff] %vm297_vm0, %v5305_v11  ;;  %v5307_v23 = vadd.f32 %v17438_v39, %v1178_v26  ;;  %v5086_v2 = vadd.f32 %v17439_v31, %v957_v59  ;;  %v17440_v3 = vld [vmem:[#allocation11_spill] sm:$0xff]  ;;  %v17441_v33 = vld [vmem:[#allocation12_spill] sm:$0xff] }
 0x390   : > { %5528 = vst.msk [vmem:[#allocation2 + $0x660] sm:$0xff] %vm297_vm0, %v5079_v43  ;;  %5752 = vst.msk [vmem:[#allocation2 + $0xd60] sm:$0xff] %vm297_vm0, %v5303_v63  ;;  %v5310_v49 = vadd.f32 %v17440_v3, %v1181_v7  ;;  %v5084_v28 = vadd.f32 %v17441_v33, %v955_v14  ;;  %v17442_v48 = vld [vmem:[#allocation13_spill] sm:$0xff]  ;;  %v959_v15 = vld [vmem:[#allocation2 + $0x6a8] sm:$0xff] }
 0x391   : > { %5531 = vst.msk [vmem:[#allocation2 + $0x678] sm:$0xff] %vm297_vm0, %v5082_v38  ;;  %5755 = vst.msk [vmem:[#allocation2 + $0xd78] sm:$0xff] %vm297_vm0, %v5306_v44  ;;  %v5308_v4 = vadd.f32 %v17442_v48, %v1179_v1  ;;  %v1183_v21 = vld [vmem:[#allocation2 + $0xda8] sm:$0xff]  ;;  %v5973_v32 = vld [vmem:[#allocation2 + $0x630] sm:$0xff] }
 0x392   : > { %5529 = vst.msk [vmem:[#allocation2 + $0x668] sm:$0xff] %vm297_vm0, %v5080_v52  ;;  %5753 = vst.msk [vmem:[#allocation2 + $0xd68] sm:$0xff] %vm297_vm0, %v5304_v12  ;;  %v6197_v51 = vld [vmem:[#allocation2 + $0xd30] sm:$0xff]  ;;  %v17443_v34 = vld [vmem:[#allocation14_spill] sm:$0xff] }
 0x393   : > { %5534 = vst.msk [vmem:[#allocation2 + $0x690] sm:$0xff] %vm297_vm0, %v5085_v40  ;;  %5758 = vst.msk [vmem:[#allocation2 + $0xd90] sm:$0xff] %vm297_vm0, %v5309_v10  ;;  %v5089_v56 = vadd.f32 %v17443_v34, %v960_v46  ;;  %v17444_v36 = vld [vmem:[#allocation8_spill] sm:$0xff]  ;;  %v17445_v50 = vld [vmem:[#allocation17_spill] sm:$0xff] }
 0x394   : > { %5532 = vst.msk [vmem:[#allocation2 + $0x680] sm:$0xff] %vm297_vm0, %v5083_v24  ;;  %5756 = vst.msk [vmem:[#allocation2 + $0xd80] sm:$0xff] %vm297_vm0, %v5307_v23  ;;  %v5313_v29 = vadd.f32 %v17444_v36, %v1184_v19  ;;  %v5087_v13 = vadd.f32 %v17445_v50, %v958_v41  ;;  %v17446_v58 = vld [vmem:[#allocation15_spill] sm:$0xff]  ;;  %v16728_v54 = vld [vmem:[%s17066_s2] ss:$0 sm:$0xff] }
 0x395   : > { %v5311_v20 = vadd.f32 %v17446_v58, %v1182_v17  ;;  %v6428_v55 = vmul.f32 %v16728_v54, %v5973_v32  ;;  %v6652_v42 = vmul.f32 %v16728_v54, %v6197_v51  ;;  %v5971_v18 = vld [vmem:[#allocation2 + $0x620] sm:$0xff]  ;;  %5535 = vst.msk [vmem:[#allocation2 + $0x698] sm:$0xff] %vm297_vm0, %v5086_v2  ;;  %5759 = vst.msk [vmem:[#allocation2 + $0xd98] sm:$0xff] %vm297_vm0, %v5310_v49  ;;  %v17447_v53 = vld [vmem:[#allocation16_spill] sm:$0xff] }
 0x396   : > { %v6195_v8 = vld [vmem:[#allocation2 + $0xd20] sm:$0xff]  ;;  %5533 = vst.msk [vmem:[#allocation2 + $0x688] sm:$0xff] %vm297_vm0, %v5084_v28  ;;  %5757 = vst.msk [vmem:[#allocation2 + $0xd88] sm:$0xff] %vm297_vm0, %v5308_v4  ;;  %v5090_v16 = vadd.f32 %v17447_v53, %v961_v25  ;;  %v6426_v22 = vmul.f32 %v16728_v54, %v5971_v18  ;;  %v5974_v30 = vld [vmem:[#allocation2 + $0x638] sm:$0xff] }
 0x397   : > { %v17448_v0 = vld [vmem:[#allocation18_spill] sm:$0xff]  ;;  %v6650_v60 = vmul.f32 %v16728_v54, %v6195_v8  ;;  %v6198_v37 = vld [vmem:[#allocation2 + $0xd38] sm:$0xff]  ;;  %v5972_v5 = vld [vmem:[#allocation2 + $0x628] sm:$0xff]  ;;  %5538 = vst.msk [vmem:[#allocation2 + $0x6b0] sm:$0xff] %vm297_vm0, %v5089_v56  ;;  %v6429_v7 = vmul.f32 %v16728_v54, %v5974_v30 }
 0x398   : > { %v5314_v47 = vadd.f32 %v17448_v0, %v1185_v35  ;;  %5762 = vst.msk [vmem:[#allocation2 + $0xdb0] sm:$0xff] %vm297_vm0, %v5313_v29  ;;  %5536 = vst.msk [vmem:[#allocation2 + $0x6a0] sm:$0xff] %vm297_vm0, %v5087_v13  ;;  %v17449_v61 = vld [vmem:[#allocation9_spill] sm:$0xff]  ;;  %v17450_v57 = vld [vmem:[#allocation23_spill] sm:$0xff]  ;;  %v6653_v6 = vmul.f32 %v16728_v54, %v6198_v37  ;;  %v6427_v14 = vmul.f32 %v16728_v54, %v5972_v5 }
 0x399   : > { %5760 = vst.msk [vmem:[#allocation2 + $0xda0] sm:$0xff] %vm297_vm0, %v5311_v20  ;;  %v5088_v9 = vadd.f32 %v17449_v61, %v959_v15  ;;  %v5312_v27 = vadd.f32 %v17450_v57, %v1183_v21  ;;  %v16749_v62 = vld [vmem:[%s17067_s3] ss:$0 sm:$0xff]  ;;  %v6196_v11 = vld [vmem:[#allocation2 + $0xd28] sm:$0xff]  ;;  %5539 = vst.msk [vmem:[#allocation2 + $0x6b8] sm:$0xff] %vm297_vm0, %v5090_v16 }
 0x39a   : > { %v6883_v26 = vadd.f32 %v16749_v62, %v6428_v55  ;;  %v7107_v59 = vadd.f32 %v16749_v62, %v6652_v42  ;;  %5763 = vst.msk [vmem:[#allocation2 + $0xdb8] sm:$0xff] %vm297_vm0, %v5314_v47  ;;  %v6881_v43 = vadd.f32 %v16749_v62, %v6426_v22  ;;  %v7105_v63 = vadd.f32 %v16749_v62, %v6650_v60  ;;  %v5977_v40 = vld [vmem:[#allocation2 + $0x650] sm:$0xff]  ;;  %v5975_v25 = vld [vmem:[#allocation2 + $0x640] sm:$0xff]  ;;  %v5978_v33 = vld [vmem:[#allocation2 + $0x658] sm:$0xff] }
 0x39b   : > { %v6651_v1 = vmul.f32 %v16728_v54, %v6196_v11  ;;  %5537 = vst.msk [vmem:[#allocation2 + $0x6a8] sm:$0xff] %vm297_vm0, %v5088_v9  ;;  %5761 = vst.msk [vmem:[#allocation2 + $0xda8] sm:$0xff] %vm297_vm0, %v5312_v27  ;;  %v6884_v44 = vadd.f32 %v16749_v62, %v6429_v7  ;;  %v7108_v52 = vadd.f32 %v16749_v62, %v6653_v6  ;;  %v6201_v10 = vld [vmem:[#allocation2 + $0xd50] sm:$0xff]  ;;  %v6199_v35 = vld [vmem:[#allocation2 + $0xd40] sm:$0xff] }
 0x39c   : > { %v7331_v46 = vmax.f32 %v6883_v26, 0.0  ;;  %v7555_v38 = vmax.f32 %v7107_v59, 0.0  ;;  %v7329_v12 = vmax.f32 %v6881_v43, 0.0  ;;  %v7553_v19 = vmax.f32 %v7105_v63, 0.0  ;;  %v6202_v28 = vld [vmem:[#allocation2 + $0xd58] sm:$0xff]  ;;  %v5976_v32 = vld [vmem:[#allocation2 + $0x648] sm:$0xff] }
 0x39d   : > { %v6882_v41 = vadd.f32 %v16749_v62, %v6427_v14  ;;  %v7106_v17 = vadd.f32 %v16749_v62, %v6651_v1  ;;  %v7332_v39 = vmax.f32 %v6884_v44, 0.0  ;;  %v7556_v23 = vmax.f32 %v7108_v52, 0.0  ;;  %v6200_v51 = vld [vmem:[#allocation2 + $0xd48] sm:$0xff]  ;;  %v5981_v5 = vld [vmem:[#allocation2 + $0x670] sm:$0xff]  ;;  %v5979_v59 = vld [vmem:[#allocation2 + $0x660] sm:$0xff] }
 0x39e   : > { %v10849_v45 = vpack.c.bf16 %v7331_v46, %v7331_v46  ;;  %v11073_v24 = vpack.c.bf16 %v7555_v38, %v7555_v38  ;;  %v10847_v31 = vpack.c.bf16 %v7329_v12, %v7329_v12  ;;  %v11071_v2 = vpack.c.bf16 %v7553_v19, %v7553_v19  ;;  %v6205_v61 = vld [vmem:[#allocation2 + $0xd70] sm:$0xff]  ;;  %v6203_v7 = vld [vmem:[#allocation2 + $0xd60] sm:$0xff]  ;;  %v5982_v14 = vld [vmem:[#allocation2 + $0x678] sm:$0xff] }
 0x39f   : > { %v7330_v3 = vmax.f32 %v6882_v41, 0.0  ;;  %v7554_v49 = vmax.f32 %v7106_v17, 0.0  ;;  %v10850_v48 = vpack.c.bf16 %v7332_v39, %v7332_v39  ;;  %v11074_v4 = vpack.c.bf16 %v7556_v23, %v7556_v23  ;;  %v6206_v1 = vld [vmem:[#allocation2 + $0xd78] sm:$0xff]  ;;  %v5980_v12 = vld [vmem:[#allocation2 + $0x668] sm:$0xff] }
 0x3a0   : > { %9572 = vst.msk [vmem:[%s13402_s14 + $0x318] sm:$0xf] %vm9373_vm1, %v10849_v45  ;;  %9796 = vst.msk [vmem:[%s13402_s14 + $0x698] sm:$0xf] %vm9373_vm1, %v11073_v24  ;;  %v6432_v15 = vmul.f32 %v16728_v54, %v5977_v40  ;;  %v6656_v21 = vmul.f32 %v16728_v54, %v6201_v10  ;;  %v6430_v36 = vmul.f32 %v16728_v54, %v5975_v25  ;;  %v6204_v19 = vld [vmem:[#allocation2 + $0xd68] sm:$0xff] }
 0x3a1   : > { %9570 = vst.msk [vmem:[%s13402_s14 + $0x310] sm:$0xf] %vm9373_vm1, %v10847_v31  ;;  %9794 = vst.msk [vmem:[%s13402_s14 + $0x690] sm:$0xf] %vm9373_vm1, %v11071_v2  ;;  %v10848_v34 = vpack.c.bf16 %v7330_v3, %v7330_v3  ;;  %v11072_v56 = vpack.c.bf16 %v7554_v49, %v7554_v49  ;;  %v6654_v29 = vmul.f32 %v16728_v54, %v6199_v35 }
 0x3a2   : > { %9573 = vst.msk [vmem:[%s13402_s14 + $0x31c] sm:$0xf] %vm9373_vm1, %v10850_v48  ;;  %9797 = vst.msk [vmem:[%s13402_s14 + $0x69c] sm:$0xf] %vm9373_vm1, %v11074_v4  ;;  %v6887_v50 = vadd.f32 %v16749_v62, %v6432_v15  ;;  %v7111_v13 = vadd.f32 %v16749_v62, %v6656_v21  ;;  %v6433_v58 = vmul.f32 %v16728_v54, %v5978_v33 }
 0x3a3   : > { %v6657_v20 = vmul.f32 %v16728_v54, %v6202_v28  ;;  %9571 = vst.msk [vmem:[%s13402_s14 + $0x314] sm:$0xf] %vm9373_vm1, %v10848_v34  ;;  %9795 = vst.msk [vmem:[%s13402_s14 + $0x694] sm:$0xf] %vm9373_vm1, %v11072_v56  ;;  %v6885_v55 = vadd.f32 %v16749_v62, %v6430_v36  ;;  %v7109_v42 = vadd.f32 %v16749_v62, %v6654_v29 }
 0x3a4   : > { %v6431_v18 = vmul.f32 %v16728_v54, %v5976_v32  ;;  %v6655_v8 = vmul.f32 %v16728_v54, %v6200_v51  ;;  %v7335_v53 = vmax.f32 %v6887_v50, 0.0  ;;  %v7559_v16 = vmax.f32 %v7111_v13, 0.0  ;;  %v5985_v32 = vld [vmem:[#allocation2 + $0x690] sm:$0xff]  ;;  %v5983_v50 = vld [vmem:[#allocation2 + $0x680] sm:$0xff] }
 0x3a5   : > { %v6888_v0 = vadd.f32 %v16749_v62, %v6433_v58  ;;  %v7112_v47 = vadd.f32 %v16749_v62, %v6657_v20  ;;  %v7333_v22 = vmax.f32 %v6885_v55, 0.0  ;;  %v7557_v60 = vmax.f32 %v7109_v42, 0.0  ;;  %v6209_v51 = vld [vmem:[#allocation2 + $0xd90] sm:$0xff]  ;;  %v6207_v13 = vld [vmem:[#allocation2 + $0xd80] sm:$0xff] }
 0x3a6   : > { %v6886_v30 = vadd.f32 %v16749_v62, %v6431_v18  ;;  %v7110_v37 = vadd.f32 %v16749_v62, %v6655_v8  ;;  %v10853_v9 = vpack.c.bf16 %v7335_v53, %v7335_v53  ;;  %v11077_v57 = vpack.c.bf16 %v7559_v16, %v7559_v16  ;;  %v5986_v18 = vld [vmem:[#allocation2 + $0x698] sm:$0xff] }
 0x3a7   : > { %v7336_v27 = vmax.f32 %v6888_v0, 0.0  ;;  %v7560_v26 = vmax.f32 %v7112_v47, 0.0  ;;  %v10851_v6 = vpack.c.bf16 %v7333_v22, %v7333_v22  ;;  %v11075_v11 = vpack.c.bf16 %v7557_v60, %v7557_v60  ;;  %v6210_v8 = vld [vmem:[#allocation2 + $0xd98] sm:$0xff]  ;;  %v5984_v22 = vld [vmem:[#allocation2 + $0x688] sm:$0xff] }
 0x3a8   : > { %v7334_v43 = vmax.f32 %v6886_v30, 0.0  ;;  %v7558_v63 = vmax.f32 %v7110_v37, 0.0  ;;  %9576 = vst.msk [vmem:[%s13402_s14 + $0x328] sm:$0xf] %vm9373_vm1, %v10853_v9  ;;  %9800 = vst.msk [vmem:[%s13402_s14 + $0x6a8] sm:$0xf] %vm9373_vm1, %v11077_v57  ;;  %v6436_v44 = vmul.f32 %v16728_v54, %v5981_v5  ;;  %v6660_v52 = vmul.f32 %v16728_v54, %v6205_v61 }
 0x3a9   : > { %v10854_v46 = vpack.c.bf16 %v7336_v27, %v7336_v27  ;;  %v11078_v38 = vpack.c.bf16 %v7560_v26, %v7560_v26  ;;  %9574 = vst.msk [vmem:[%s13402_s14 + $0x320] sm:$0xf] %vm9373_vm1, %v10851_v6  ;;  %9798 = vst.msk [vmem:[%s13402_s14 + $0x6a0] sm:$0xf] %vm9373_vm1, %v11075_v11  ;;  %v6434_v40 = vmul.f32 %v16728_v54, %v5979_v59  ;;  %v6208_v60 = vld [vmem:[#allocation2 + $0xd88] sm:$0xff] }
 0x3aa   : > { %v10852_v41 = vpack.c.bf16 %v7334_v43, %v7334_v43  ;;  %v11076_v17 = vpack.c.bf16 %v7558_v63, %v7558_v63  ;;  %v6658_v10 = vmul.f32 %v16728_v54, %v6203_v7  ;;  %v6891_v45 = vadd.f32 %v16749_v62, %v6436_v44 }
 0x3ab   : > { %9577 = vst.msk [vmem:[%s13402_s14 + $0x32c] sm:$0xf] %vm9373_vm1, %v10854_v46  ;;  %9801 = vst.msk [vmem:[%s13402_s14 + $0x6ac] sm:$0xf] %vm9373_vm1, %v11078_v38  ;;  %v7115_v24 = vadd.f32 %v16749_v62, %v6660_v52  ;;  %v6437_v39 = vmul.f32 %v16728_v54, %v5982_v14  ;;  %v6661_v23 = vmul.f32 %v16728_v54, %v6206_v1 }
 0x3ac   : > { %9575 = vst.msk [vmem:[%s13402_s14 + $0x324] sm:$0xf] %vm9373_vm1, %v10852_v41  ;;  %9799 = vst.msk [vmem:[%s13402_s14 + $0x6a4] sm:$0xf] %vm9373_vm1, %v11076_v17  ;;  %v6889_v25 = vadd.f32 %v16749_v62, %v6434_v40  ;;  %v7113_v35 = vadd.f32 %v16749_v62, %v6658_v10  ;;  %v6435_v31 = vmul.f32 %v16728_v54, %v5980_v12  ;;  %v7339_v3 = vmax.f32 %v6891_v45, 0.0  ;;  %v5989_v12 = vld [vmem:[#allocation2 + $0x6b0] sm:$0xff] }
 0x3ad   : > { %v6659_v2 = vmul.f32 %v16728_v54, %v6204_v19  ;;  %v7563_v49 = vmax.f32 %v7115_v24, 0.0  ;;  %v6892_v33 = vadd.f32 %v16749_v62, %v6437_v39  ;;  %v7116_v28 = vadd.f32 %v16749_v62, %v6661_v23  ;;  %v6213_v19 = vld [vmem:[#allocation2 + $0xdb0] sm:$0xff]  ;;  %v5987_v45 = vld [vmem:[#allocation2 + $0x6a0] sm:$0xff] }
 0x3ae   : > { %v7337_v48 = vmax.f32 %v6889_v25, 0.0  ;;  %v7561_v4 = vmax.f32 %v7113_v35, 0.0  ;;  %v6890_v15 = vadd.f32 %v16749_v62, %v6435_v31  ;;  %v10857_v34 = vpack.c.bf16 %v7339_v3, %v7339_v3  ;;  %v6211_v24 = vld [vmem:[#allocation2 + $0xda0] sm:$0xff]  ;;  %v5990_v31 = vld [vmem:[#allocation2 + $0x6b8] sm:$0xff] }
 0x3af   : > { %v7114_v21 = vadd.f32 %v16749_v62, %v6659_v2  ;;  %v11081_v56 = vpack.c.bf16 %v7563_v49, %v7563_v49  ;;  %v7340_v36 = vmax.f32 %v6892_v33, 0.0  ;;  %v7564_v29 = vmax.f32 %v7116_v28, 0.0  ;;  %v6214_v2 = vld [vmem:[#allocation2 + $0xdb8] sm:$0xff] }
 0x3b0   : > { %v10855_v58 = vpack.c.bf16 %v7337_v48, %v7337_v48  ;;  %v11079_v20 = vpack.c.bf16 %v7561_v4, %v7561_v4  ;;  %v7338_v55 = vmax.f32 %v6890_v15, 0.0  ;;  %9580 = vst.msk [vmem:[%s13402_s14 + $0x338] sm:$0xf] %vm9373_vm1, %v10857_v34  ;;  %v6440_v0 = vmul.f32 %v16728_v54, %v5985_v32  ;;  %v5988_v48 = vld [vmem:[#allocation2 + $0x6a8] sm:$0xff] }
 0x3b1   : > { %v7562_v42 = vmax.f32 %v7114_v21, 0.0  ;;  %9804 = vst.msk [vmem:[%s13402_s14 + $0x6b8] sm:$0xf] %vm9373_vm1, %v11081_v56  ;;  %v10858_v53 = vpack.c.bf16 %v7340_v36, %v7340_v36  ;;  %v11082_v16 = vpack.c.bf16 %v7564_v29, %v7564_v29  ;;  %v6664_v47 = vmul.f32 %v16728_v54, %v6209_v51  ;;  %v6212_v4 = vld [vmem:[#allocation2 + $0xda8] sm:$0xff] }
 0x3b2   : > { %9578 = vst.msk [vmem:[%s13402_s14 + $0x330] sm:$0xf] %vm9373_vm1, %v10855_v58  ;;  %9802 = vst.msk [vmem:[%s13402_s14 + $0x6b0] sm:$0xf] %vm9373_vm1, %v11079_v20  ;;  %v10856_v30 = vpack.c.bf16 %v7338_v55, %v7338_v55  ;;  %v6438_v5 = vmul.f32 %v16728_v54, %v5983_v50  ;;  %v6662_v61 = vmul.f32 %v16728_v54, %v6207_v13 }
 0x3b3   : > { %v11080_v37 = vpack.c.bf16 %v7562_v42, %v7562_v42  ;;  %9581 = vst.msk [vmem:[%s13402_s14 + $0x33c] sm:$0xf] %vm9373_vm1, %v10858_v53  ;;  %9805 = vst.msk [vmem:[%s13402_s14 + $0x6bc] sm:$0xf] %vm9373_vm1, %v11082_v16  ;;  %v6895_v9 = vadd.f32 %v16749_v62, %v6440_v0  ;;  %v7119_v57 = vadd.f32 %v16749_v62, %v6664_v47  ;;  %v964_v53 = vld [vmem:[#allocation2 + $0x6d0] sm:$0xff] }
 0x3b4   : > { %v6441_v27 = vmul.f32 %v16728_v54, %v5986_v18  ;;  %v6665_v26 = vmul.f32 %v16728_v54, %v6210_v8  ;;  %9579 = vst.msk [vmem:[%s13402_s14 + $0x334] sm:$0xf] %vm9373_vm1, %v10856_v30  ;;  %v6893_v59 = vadd.f32 %v16749_v62, %v6438_v5  ;;  %v7117_v7 = vadd.f32 %v16749_v62, %v6662_v61  ;;  %v962_v30 = vld [vmem:[#allocation2 + $0x6c0] sm:$0xff] }
 0x3b5   : > { %9803 = vst.msk [vmem:[%s13402_s14 + $0x6b4] sm:$0xf] %vm9373_vm1, %v11080_v37  ;;  %v6439_v6 = vmul.f32 %v16728_v54, %v5984_v22  ;;  %v6663_v11 = vmul.f32 %v16728_v54, %v6208_v60  ;;  %v7343_v43 = vmax.f32 %v6895_v9, 0.0  ;;  %v7567_v63 = vmax.f32 %v7119_v57, 0.0  ;;  %v1188_v60 = vld [vmem:[#allocation2 + $0xdd0] sm:$0xff]  ;;  %v1186_v37 = vld [vmem:[#allocation2 + $0xdc0] sm:$0xff] }
 0x3b6   : > { %v6896_v14 = vadd.f32 %v16749_v62, %v6441_v27  ;;  %v7120_v1 = vadd.f32 %v16749_v62, %v6665_v26  ;;  %v7341_v46 = vmax.f32 %v6893_v59, 0.0  ;;  %v7565_v38 = vmax.f32 %v7117_v7, 0.0  ;;  %v965_v27 = vld [vmem:[#allocation2 + $0x6d8] sm:$0xff]  ;;  %v963_v59 = vld [vmem:[#allocation2 + $0x6c8] sm:$0xff] }
 0x3b7   : > { %v6894_v44 = vadd.f32 %v16749_v62, %v6439_v6  ;;  %v7118_v52 = vadd.f32 %v16749_v62, %v6663_v11  ;;  %v10861_v41 = vpack.c.bf16 %v7343_v43, %v7343_v43  ;;  %v11085_v17 = vpack.c.bf16 %v7567_v63, %v7567_v63  ;;  %v1189_v26 = vld [vmem:[#allocation2 + $0xdd8] sm:$0xff]  ;;  %v1187_v63 = vld [vmem:[#allocation2 + $0xdc8] sm:$0xff] }
 0x3b8   : > { %v7344_v40 = vmax.f32 %v6896_v14, 0.0  ;;  %v7568_v10 = vmax.f32 %v7120_v1, 0.0  ;;  %v10859_v39 = vpack.c.bf16 %v7341_v46, %v7341_v46  ;;  %v11083_v23 = vpack.c.bf16 %v7565_v38, %v7565_v38  ;;  %v968_v14 = vld [vmem:[#allocation2 + $0x6f0] sm:$0xff] }
 0x3b9   : > { %v7342_v25 = vmax.f32 %v6894_v44, 0.0  ;;  %v7566_v35 = vmax.f32 %v7118_v52, 0.0  ;;  %9584 = vst.msk [vmem:[%s13402_s14 + $0x348] sm:$0xf] %vm9373_vm1, %v10861_v41  ;;  %9808 = vst.msk [vmem:[%s13402_s14 + $0x6c8] sm:$0xf] %vm9373_vm1, %v11085_v17  ;;  %v6444_v33 = vmul.f32 %v16728_v54, %v5989_v12  ;;  %v6668_v28 = vmul.f32 %v16728_v54, %v6213_v19 }
 0x3ba   : > { %v10862_v3 = vpack.c.bf16 %v7344_v40, %v7344_v40  ;;  %v11086_v49 = vpack.c.bf16 %v7568_v10, %v7568_v10  ;;  %9582 = vst.msk [vmem:[%s13402_s14 + $0x340] sm:$0xf] %vm9373_vm1, %v10859_v39  ;;  %9806 = vst.msk [vmem:[%s13402_s14 + $0x6c0] sm:$0xf] %vm9373_vm1, %v11083_v23  ;;  %v6442_v32 = vmul.f32 %v16728_v54, %v5987_v45  ;;  %v1192_v1 = vld [vmem:[#allocation2 + $0xdf0] sm:$0xff]  ;;  %v17451_v44 = vld [vmem:[#allocation38_spill] sm:$0xff] }
 0x3bb   : > { %v10860_v15 = vpack.c.bf16 %v7342_v25, %v7342_v25  ;;  %v11084_v21 = vpack.c.bf16 %v7566_v35, %v7566_v35  ;;  %v6666_v51 = vmul.f32 %v16728_v54, %v6211_v24  ;;  %v6899_v34 = vadd.f32 %v16749_v62, %v6444_v33  ;;  %v17452_v12 = vld [vmem:[#allocation39_spill] sm:$0xff]  ;;  %v966_v41 = vld [vmem:[#allocation2 + $0x6e0] sm:$0xff]  ;;  %v969_v40 = vld [vmem:[#allocation2 + $0x6f8] sm:$0xff] }
 0x3bc   : > { %9585 = vst.msk [vmem:[%s13402_s14 + $0x34c] sm:$0xf] %vm9373_vm1, %v10862_v3  ;;  %9809 = vst.msk [vmem:[%s13402_s14 + $0x6cc] sm:$0xf] %vm9373_vm1, %v11086_v49  ;;  %v7123_v56 = vadd.f32 %v16749_v62, %v6668_v28  ;;  %v6445_v36 = vmul.f32 %v16728_v54, %v5990_v31  ;;  %v6669_v29 = vmul.f32 %v16728_v54, %v6214_v2  ;;  %v1190_v17 = vld [vmem:[#allocation2 + $0xde0] sm:$0xff]  ;;  %v17453_v24 = vld [vmem:[#allocation40_spill] sm:$0xff] }
 0x3bd   : > { %9583 = vst.msk [vmem:[%s13402_s14 + $0x344] sm:$0xf] %vm9373_vm1, %v10860_v15  ;;  %9807 = vst.msk [vmem:[%s13402_s14 + $0x6c4] sm:$0xf] %vm9373_vm1, %v11084_v21  ;;  %v6897_v50 = vadd.f32 %v16749_v62, %v6442_v32  ;;  %v7121_v13 = vadd.f32 %v16749_v62, %v6666_v51  ;;  %v6443_v58 = vmul.f32 %v16728_v54, %v5988_v48  ;;  %v7347_v55 = vmax.f32 %v6899_v34, 0.0  ;;  %v17454_v23 = vld [vmem:[#allocation41_spill] sm:$0xff] }
 0x3be   : > { %v6667_v20 = vmul.f32 %v16728_v54, %v6212_v4  ;;  %v7571_v42 = vmax.f32 %v7123_v56, 0.0  ;;  %v6900_v18 = vadd.f32 %v16749_v62, %v6445_v36  ;;  %v7124_v8 = vadd.f32 %v16749_v62, %v6669_v29  ;;  %v1193_v35 = vld [vmem:[#allocation2 + $0xdf8] sm:$0xff]  ;;  %v967_v31 = vld [vmem:[#allocation2 + $0x6e8] sm:$0xff]  ;;  %v17455_v3 = vld [vmem:[#allocation42_spill] sm:$0xff] }
 0x3bf   : > { %v7345_v16 = vmax.f32 %v6897_v50, 0.0  ;;  %v7569_v0 = vmax.f32 %v7121_v13, 0.0  ;;  %v6898_v47 = vadd.f32 %v16749_v62, %v6443_v58  ;;  %v10865_v5 = vpack.c.bf16 %v7347_v55, %v7347_v55  ;;  %v1191_v2 = vld [vmem:[#allocation2 + $0xde8] sm:$0xff]  ;;  %v17458_v15 = vld [vmem:[#allocation52_spill] sm:$0xff]  ;;  %v17459_v32 = vld [vmem:[#allocation53_spill] sm:$0xff] }
 0x3c0   : > { %v7122_v22 = vadd.f32 %v16749_v62, %v6667_v20  ;;  %v11089_v61 = vpack.c.bf16 %v7571_v42, %v7571_v42  ;;  %v7348_v9 = vmax.f32 %v6900_v18, 0.0  ;;  %v7572_v57 = vmax.f32 %v7124_v8, 0.0  ;;  %v17456_v33 = vld [vmem:[#allocation43_spill] sm:$0xff]  ;;  %v17460_v34 = vld [vmem:[#allocation54_spill] sm:$0xff]  ;;  %v17462_v50 = vld [vmem:[#allocation56_spill] sm:$0xff] }
 0x3c1   : > { %v10863_v7 = vpack.c.bf16 %v7345_v16, %v7345_v16  ;;  %v11087_v6 = vpack.c.bf16 %v7569_v0, %v7569_v0  ;;  %v7346_v11 = vmax.f32 %v6898_v47, 0.0  ;;  %9588 = vst.msk [vmem:[%s13402_s14 + $0x358] sm:$0xf] %vm9373_vm1, %v10865_v5  ;;  %v5093_v52 = vadd.f32 %v17451_v44, %v964_v53  ;;  %v17457_v48 = vld [vmem:[#allocation51_spill] sm:$0xff]  ;;  %v17463_v58 = vld [vmem:[#allocation69_spill] sm:$0xff]  ;;  %v17464_v55 = vld [vmem:[#allocation70_spill] sm:$0xff] }
 0x3c2   : > { %v7570_v43 = vmax.f32 %v7122_v22, 0.0  ;;  %9812 = vst.msk [vmem:[%s13402_s14 + $0x6d8] sm:$0xf] %vm9373_vm1, %v11089_v61  ;;  %v10866_v46 = vpack.c.bf16 %v7348_v9, %v7348_v9  ;;  %v11090_v38 = vpack.c.bf16 %v7572_v57, %v7572_v57  ;;  %v5317_v19 = vadd.f32 %v17452_v12, %v1188_v60  ;;  %v17461_v36 = vld [vmem:[#allocation55_spill] sm:$0xff]  ;;  %v17466_v53 = vld [vmem:[#allocation72_spill] sm:$0xff] }
 0x3c3   : > { %9586 = vst.msk [vmem:[%s13402_s14 + $0x350] sm:$0xf] %vm9373_vm1, %v10863_v7  ;;  %9810 = vst.msk [vmem:[%s13402_s14 + $0x6d0] sm:$0xf] %vm9373_vm1, %v11087_v6  ;;  %v10864_v10 = vpack.c.bf16 %v7346_v11, %v7346_v11  ;;  %v5091_v39 = vadd.f32 %v17453_v24, %v962_v30  ;;  %v5315_v25 = vadd.f32 %v17454_v23, %v1186_v37  ;;  %v17465_v18 = vld [vmem:[#allocation71_spill] sm:$0xff] }
 0x3c4   : > { %v11088_v45 = vpack.c.bf16 %v7570_v43, %v7570_v43  ;;  %9589 = vst.msk [vmem:[%s13402_s14 + $0x35c] sm:$0xf] %vm9373_vm1, %v10866_v46  ;;  %9813 = vst.msk [vmem:[%s13402_s14 + $0x6dc] sm:$0xf] %vm9373_vm1, %v11090_v38  ;;  %v5094_v49 = vadd.f32 %v17455_v3, %v965_v27  ;;  %v5318_v28 = vadd.f32 %v17456_v33, %v1189_v26 }
 0x3c5   : > { %5542 = vst.msk [vmem:[#allocation2 + $0x6d0] sm:$0xff] %vm297_vm0, %v5093_v52  ;;  %5766 = vst.msk [vmem:[#allocation2 + $0xdd0] sm:$0xff] %vm297_vm0, %v5317_v19  ;;  %v5092_v4 = vadd.f32 %v17457_v48, %v963_v59  ;;  %v5316_v21 = vadd.f32 %v17458_v15, %v1187_v63  ;;  %v5097_v51 = vadd.f32 %v17459_v32, %v968_v14 }
 0x3c6   : > { %9587 = vst.msk [vmem:[%s13402_s14 + $0x354] sm:$0xf] %vm9373_vm1, %v10864_v10  ;;  %9811 = vst.msk [vmem:[%s13402_s14 + $0x6d4] sm:$0xf] %vm9373_vm1, %v11088_v45  ;;  %v5321_v56 = vadd.f32 %v17460_v34, %v1192_v1  ;;  %v5095_v29 = vadd.f32 %v17461_v36, %v966_v41  ;;  %v5319_v13 = vadd.f32 %v17462_v50, %v1190_v17 }
 0x3c7   : > { %5540 = vst.msk [vmem:[#allocation2 + $0x6c0] sm:$0xff] %vm297_vm0, %v5091_v39  ;;  %5764 = vst.msk [vmem:[#allocation2 + $0xdc0] sm:$0xff] %vm297_vm0, %v5315_v25  ;;  %v5098_v20 = vadd.f32 %v17463_v58, %v969_v40  ;;  %v5322_v42 = vadd.f32 %v17464_v55, %v1193_v35  ;;  %v5096_v8 = vadd.f32 %v17465_v18, %v967_v31 }
 0x3c8   : > { %5543 = vst.msk [vmem:[#allocation2 + $0x6d8] sm:$0xff] %vm297_vm0, %v5094_v49  ;;  %5767 = vst.msk [vmem:[#allocation2 + $0xdd8] sm:$0xff] %vm297_vm0, %v5318_v28  ;;  %v5320_v16 = vadd.f32 %v17466_v53, %v1191_v2 }
 0x3c9   : > { %5541 = vst.msk [vmem:[#allocation2 + $0x6c8] sm:$0xff] %vm297_vm0, %v5092_v4  ;;  %5765 = vst.msk [vmem:[#allocation2 + $0xdc8] sm:$0xff] %vm297_vm0, %v5316_v21 }
 0x3ca   : > { %5546 = vst.msk [vmem:[#allocation2 + $0x6f0] sm:$0xff] %vm297_vm0, %v5097_v51  ;;  %5770 = vst.msk [vmem:[#allocation2 + $0xdf0] sm:$0xff] %vm297_vm0, %v5321_v56 }
 0x3cb   : > { %5544 = vst.msk [vmem:[#allocation2 + $0x6e0] sm:$0xff] %vm297_vm0, %v5095_v29  ;;  %5768 = vst.msk [vmem:[#allocation2 + $0xde0] sm:$0xff] %vm297_vm0, %v5319_v13 }
 0x3cc   : > { %5547 = vst.msk [vmem:[#allocation2 + $0x6f8] sm:$0xff] %vm297_vm0, %v5098_v20  ;;  %5771 = vst.msk [vmem:[#allocation2 + $0xdf8] sm:$0xff] %vm297_vm0, %v5322_v42  ;;  %v5993_v0 = vld [vmem:[#allocation2 + $0x6d0] sm:$0xff] }
 0x3cd   : > { %5545 = vst.msk [vmem:[#allocation2 + $0x6e8] sm:$0xff] %vm297_vm0, %v5096_v8  ;;  %5769 = vst.msk [vmem:[#allocation2 + $0xde8] sm:$0xff] %vm297_vm0, %v5320_v16  ;;  %v6217_v47 = vld [vmem:[#allocation2 + $0xdd0] sm:$0xff]  ;;  %v6448_v22 = vmul.f32 %v16728_v54, %v5993_v0 }
 0x3ce   : > { %v6672_v60 = vmul.f32 %v16728_v54, %v6217_v47  ;;  %v5991_v30 = vld [vmem:[#allocation2 + $0x6c0] sm:$0xff] }
 0x3cf   : > { %v6215_v37 = vld [vmem:[#allocation2 + $0xdc0] sm:$0xff]  ;;  %v6446_v5 = vmul.f32 %v16728_v54, %v5991_v30  ;;  %v5994_v9 = vld [vmem:[#allocation2 + $0x6d8] sm:$0xff]  ;;  %v6903_v26 = vadd.f32 %v16749_v62, %v6448_v22 }
 0x3d0   : > { %v6670_v61 = vmul.f32 %v16728_v54, %v6215_v37  ;;  %v6218_v57 = vld [vmem:[#allocation2 + $0xdd8] sm:$0xff]  ;;  %v5992_v27 = vld [vmem:[#allocation2 + $0x6c8] sm:$0xff]  ;;  %v7127_v59 = vadd.f32 %v16749_v62, %v6672_v60  ;;  %v6449_v7 = vmul.f32 %v16728_v54, %v5994_v9 }
 0x3d1   : > { %v6673_v6 = vmul.f32 %v16728_v54, %v6218_v57  ;;  %v6216_v11 = vld [vmem:[#allocation2 + $0xdc8] sm:$0xff]  ;;  %v6901_v43 = vadd.f32 %v16749_v62, %v6446_v5  ;;  %v6447_v14 = vmul.f32 %v16728_v54, %v5992_v27  ;;  %v7351_v46 = vmax.f32 %v6903_v26, 0.0  ;;  %v5997_v40 = vld [vmem:[#allocation2 + $0x6f0] sm:$0xff] }
 0x3d2   : > { %v7125_v63 = vadd.f32 %v16749_v62, %v6670_v61  ;;  %v6671_v1 = vmul.f32 %v16728_v54, %v6216_v11  ;;  %v7575_v38 = vmax.f32 %v7127_v59, 0.0  ;;  %v6904_v44 = vadd.f32 %v16749_v62, %v6449_v7  ;;  %v6221_v10 = vld [vmem:[#allocation2 + $0xdf0] sm:$0xff]  ;;  %v5995_v25 = vld [vmem:[#allocation2 + $0x6e0] sm:$0xff] }
 0x3d3   : > { %v7128_v52 = vadd.f32 %v16749_v62, %v6673_v6  ;;  %v7349_v12 = vmax.f32 %v6901_v43, 0.0  ;;  %v6902_v41 = vadd.f32 %v16749_v62, %v6447_v14  ;;  %v10869_v45 = vpack.c.bf16 %v7351_v46, %v7351_v46  ;;  %v6219_v35 = vld [vmem:[#allocation2 + $0xde0] sm:$0xff]  ;;  %v5998_v33 = vld [vmem:[#allocation2 + $0x6f8] sm:$0xff] }
 0x3d4   : > { %v7573_v19 = vmax.f32 %v7125_v63, 0.0  ;;  %v7126_v17 = vadd.f32 %v16749_v62, %v6671_v1  ;;  %v11093_v24 = vpack.c.bf16 %v7575_v38, %v7575_v38  ;;  %v7352_v39 = vmax.f32 %v6904_v44, 0.0  ;;  %v6222_v28 = vld [vmem:[#allocation2 + $0xdf8] sm:$0xff]  ;;  %v5996_v32 = vld [vmem:[#allocation2 + $0x6e8] sm:$0xff] }
 0x3d5   : > { %v7576_v23 = vmax.f32 %v7128_v52, 0.0  ;;  %v10867_v31 = vpack.c.bf16 %v7349_v12, %v7349_v12  ;;  %v7350_v3 = vmax.f32 %v6902_v41, 0.0  ;;  %9592 = vst.msk [vmem:[%s13402_s14 + $0x368] sm:$0xf] %vm9373_vm1, %v10869_v45  ;;  %v6452_v15 = vmul.f32 %v16728_v54, %v5997_v40  ;;  %v6220_v51 = vld [vmem:[#allocation2 + $0xde8] sm:$0xff] }
 0x3d6   : > { %v11091_v2 = vpack.c.bf16 %v7573_v19, %v7573_v19  ;;  %v7574_v49 = vmax.f32 %v7126_v17, 0.0  ;;  %9816 = vst.msk [vmem:[%s13402_s14 + $0x6e8] sm:$0xf] %vm9373_vm1, %v11093_v24  ;;  %v10870_v48 = vpack.c.bf16 %v7352_v39, %v7352_v39  ;;  %v6676_v21 = vmul.f32 %v16728_v54, %v6221_v10 }
 0x3d7   : > { %v11094_v4 = vpack.c.bf16 %v7576_v23, %v7576_v23  ;;  %9590 = vst.msk [vmem:[%s13402_s14 + $0x360] sm:$0xf] %vm9373_vm1, %v10867_v31  ;;  %v10868_v34 = vpack.c.bf16 %v7350_v3, %v7350_v3  ;;  %v6450_v36 = vmul.f32 %v16728_v54, %v5995_v25  ;;  %v6674_v29 = vmul.f32 %v16728_v54, %v6219_v35 }
 0x3d8   : > { %9814 = vst.msk [vmem:[%s13402_s14 + $0x6e0] sm:$0xf] %vm9373_vm1, %v11091_v2  ;;  %v11092_v56 = vpack.c.bf16 %v7574_v49, %v7574_v49  ;;  %9593 = vst.msk [vmem:[%s13402_s14 + $0x36c] sm:$0xf] %vm9373_vm1, %v10870_v48  ;;  %v6907_v50 = vadd.f32 %v16749_v62, %v6452_v15  ;;  %v7131_v13 = vadd.f32 %v16749_v62, %v6676_v21 }
 0x3d9   : > { %9817 = vst.msk [vmem:[%s13402_s14 + $0x6ec] sm:$0xf] %vm9373_vm1, %v11094_v4  ;;  %v6453_v58 = vmul.f32 %v16728_v54, %v5998_v33  ;;  %v6677_v20 = vmul.f32 %v16728_v54, %v6222_v28  ;;  %9591 = vst.msk [vmem:[%s13402_s14 + $0x364] sm:$0xf] %vm9373_vm1, %v10868_v34  ;;  %v6905_v55 = vadd.f32 %v16749_v62, %v6450_v36 }
 0x3da   : > { %9815 = vst.msk [vmem:[%s13402_s14 + $0x6e4] sm:$0xf] %vm9373_vm1, %v11092_v56  ;;  %v7129_v42 = vadd.f32 %v16749_v62, %v6674_v29  ;;  %v6451_v18 = vmul.f32 %v16728_v54, %v5996_v32  ;;  %v6675_v8 = vmul.f32 %v16728_v54, %v6220_v51  ;;  %v7355_v53 = vmax.f32 %v6907_v50, 0.0 }
 0x3db   : > { %v7579_v16 = vmax.f32 %v7131_v13, 0.0  ;;  %v6908_v0 = vadd.f32 %v16749_v62, %v6453_v58  ;;  %v7132_v47 = vadd.f32 %v16749_v62, %v6677_v20  ;;  %v7353_v22 = vmax.f32 %v6905_v55, 0.0 }
 0x3dc   : > { %v7577_v60 = vmax.f32 %v7129_v42, 0.0  ;;  %v6906_v30 = vadd.f32 %v16749_v62, %v6451_v18  ;;  %v7130_v37 = vadd.f32 %v16749_v62, %v6675_v8  ;;  %v10873_v5 = vpack.c.bf16 %v7355_v53, %v7355_v53 }
 0x3dd   : > { %v11097_v54 = vpack.c.bf16 %v7579_v16, %v7579_v16  ;;  %v7356_v61 = vmax.f32 %v6908_v0, 0.0  ;;  %v7580_v9 = vmax.f32 %v7132_v47, 0.0  ;;  %v10871_v57 = vpack.c.bf16 %v7353_v22, %v7353_v22 }
 0x3de   : > { %v11095_v27 = vpack.c.bf16 %v7577_v60, %v7577_v60  ;;  %v7354_v26 = vmax.f32 %v6906_v30, 0.0  ;;  %v7578_v59 = vmax.f32 %v7130_v37, 0.0  ;;  %9596 = vst.msk [vmem:[%s13402_s14 + $0x378] sm:$0xf] %vm9373_vm1, %v10873_v5 }
 0x3df   : > { %9820 = vst.msk [vmem:[%s13402_s14 + $0x6f8] sm:$0xf] %vm9373_vm1, %v11097_v54  ;;  %v10874_v62 = vpack.c.bf16 %v7356_v61, %v7356_v61  ;;  %v11098_v7 = vpack.c.bf16 %v7580_v9, %v7580_v9  ;;  %9594 = vst.msk [vmem:[%s13402_s14 + $0x370] sm:$0xf] %vm9373_vm1, %v10871_v57 }
 0x3e0   : > { %9818 = vst.msk [vmem:[%s13402_s14 + $0x6f0] sm:$0xf] %vm9373_vm1, %v11095_v27  ;;  %v10872_v6 = vpack.c.bf16 %v7354_v26, %v7354_v26  ;;  %v11096_v11 = vpack.c.bf16 %v7578_v59, %v7578_v59 }
 0x3e1   : > { %9597 = vst.msk [vmem:[%s13402_s14 + $0x37c] sm:$0xf] %vm9373_vm1, %v10874_v62  ;;  %9821 = vst.msk [vmem:[%s13402_s14 + $0x6fc] sm:$0xf] %vm9373_vm1, %v11098_v7 }
 0x3e2   : > { %9595 = vst.msk [vmem:[%s13402_s14 + $0x374] sm:$0xf] %vm9373_vm1, %v10872_v6  ;;  %9819 = vst.msk [vmem:[%s13402_s14 + $0x6f4] sm:$0xf] %vm9373_vm1, %v11096_v11 }
 0x3e3   : > { %12132 = shalt.err (!%p12129_p5)
}
 0x3e4   : > { %s12133_s12 = scalar_lea.hbm %s17000_s7, 28672  ;;  %s12137_s22 = scalar_lea.hbm %s17068_s4, 401408 }
 0x3e5   : > { %p12134_p6 = scmp.ne.s32.totalorder %s17000_s7, %s12133_s12  ;;  %p12138_p10 = scmp.lt.u32.totalorder %s17000_s7, %s17068_s4 }
 0x3e6   : > { %p12139_p11 = scmp.lt.u32.totalorder %s12137_s22, %s12133_s12  ;;  %p12141_p13 = scmp.lt.u32.totalorder %s12133_s12, %s17000_s7 }
 0x3e7   : > { %p12135_p7 = pnand %p12134_p6, %p12268_p4 }
 0x3e8   : > { %p12140_p12 = por %p12139_p11, %p12138_p10 }
 0x3e9   : > { %p12136_p9 = pneg %p12135_p7 }
 0x3ea   : > { %p12142_p0 = por %p12141_p13, %p12140_p12 }
 0x3ec   : > { %p12143_p1 = pnand %p12142_p0, %p12136_p9 }
 0x3ee   : > { %12146 = shalt.err (!%p12143_p1)
}
 0x3ef   : > { %s12201_s29 = smov 64   ;;  %s12202_s30 = smov 4  }
 0x3f0   : > { %11813 = dma.vmem_to_hbm [thread:$0]  (%p12268_p4), %s17002_s5, 28672, %s17000_s7, %s17018_s8, %s12201_s29, %s12201_s29, %s12202_s30  }
 0x3f1 PF: > { %p11819_p2 = scmp.ge.s32.totalorder %s12197_s20, 2  ;;  %s9852_s18 = sand.u32 1, %s12177_s15  }
 0x3f2   : > { %s9853_s6 = scalar_lea.sflag [#allocation4], %s9852_s18 }
 0x3f3   : > { %p11816_p3 = pnand %p11819_p2, %p12275_p8 }
 0x3f5   : > { %12172 = dma.done.wait (!%p11816_p3), %s9853_s6, 28672  }
 0x3f6   : > { %12174 = vsyncadd (!%p11816_p3), %s9853_s6, 4294938624  ;;  %s17_s20 = sadd.s32 1, %s12197_s20   ;;  %s17467_s15 = smov %s12181_s16 }
 0x3f7   : > { %p14_p5 = scmp.ge.s32.totalorder %s17_s20, 16   ;;  %s17468_s16 = smov %s12185_s17 }
 0x3f8   : > { %s17469_s17 = smov %s12281_s28  ;;  %s17470_s18 = smov %s12193_s19 }
 0x3f9   : > { %s17471_s19 = smov %s17473_s23  ;;  %16 = sbr.rel (!%p14_p5) target bundleno = 4 (0x4), region = 88 }
 0x400   :  { %9858 = vsyncpa [#allocation4], 1 }
 0x401   :  { %9860 = vsyncpa [#allocation4 + $0x1], 1 }

</bundles_post_ra>
